<compile_context>
chip_gen: v6e
topology: v6e:2x2x1
jax: 0.10.0
libtpu: 0.0.40
codegen_flags: <defaults>
</compile_context>

<pallas_src>
import functools

import jax
import jax.numpy as jnp
from jax.experimental import pallas as pl
from jax.experimental.pallas import tpu as pltpu

EPS = 1e-5


def _round_up(x, m):
    return (x + m - 1) // m * m


def _pad_lanes(c):
    # v6e/v7x MXUs are 2x256x256 for bf16: pad to 256 once the real channel count
    # exceeds a single 128-lane group; v5e's 4x128x128 already matches 128.
    return 128 if c <= 128 else _round_up(c, 256)


def _compiler_params(vmem_estimate_bytes):
    return pltpu.CompilerParams(
        dimension_semantics=("parallel",),                        # one grid step per image
        vmem_limit_bytes=int(min(64 << 20, max(32 << 20, 2 * vmem_estimate_bytes))),
    )


# --------------------------------------------------------------------------- #
# Pallas kernels
# --------------------------------------------------------------------------- #
def conv3x3_relu_stats_kernel(x_ref, w_ref, b_ref, y_ref, ps_ref, pq_ref, *, H, W):
    """Direct 3x3 conv (input already spatially zero-padded) + bias + ReLU + stats.

    x_ref : (1, H+2, W+2, Cin) bf16    w_ref : (9, Cin, Cout) bf16 (tap-major)
    b_ref : (1, Cout) f32
    y_ref : (1, H, W, Cout) bf16       ps/pq : (1, 1, Cout) f32 (this image's sum / sumsq)
    """
    cout = w_ref.shape[-1]
    acc = jnp.zeros((H * W, cout), jnp.float32)
    for dh in range(3):
        for dw in range(3):
            patch = x_ref[0, dh:dh + H, dw:dw + W, :].reshape(H * W, -1)
            acc = acc + jnp.dot(patch, w_ref[dh * 3 + dw],
                                preferred_element_type=jnp.float32)
    y = jnp.maximum(acc + b_ref[...], 0.0)
    ps_ref[...] = jnp.sum(y, axis=0, keepdims=True)[None]
    pq_ref[...] = jnp.sum(y * y, axis=0, keepdims=True)[None]
    y_ref[...] = y.reshape(1, H, W, cout).astype(y_ref.dtype)


def bn_conv3x3_relu_stats_kernel(y1_ref, sc_ref, sh_ref, w_ref, b_ref,
                                 y_ref, ps_ref, pq_ref, hpad_ref, *, H, W):
    """Fused: BN1-apply (+ per-image time-embedding shift) -> zero-pad in VMEM ->
    direct 3x3 conv -> bias -> ReLU -> per-image BN2 partial stats.

    y1_ref : (1, H, W, C) bf16       sc_ref : (1, C) f32     sh_ref : (1, 1, C) f32
    w_ref  : (9, C, C) bf16          b_ref  : (1, C) f32
    y_ref  : (1, H, W, C) bf16       ps/pq  : (1, 1, C) f32
    hpad_ref (scratch) : (H+2, W+2, C) bf16
    """
    cout = w_ref.shape[-1]
    h1 = y1_ref[0].astype(jnp.float32) * sc_ref[...] + sh_ref[0]        # (H, W, C) f32
    hpad_ref[...] = jnp.zeros(hpad_ref.shape, hpad_ref.dtype)           # zero halo
    hpad_ref[1:H + 1, 1:W + 1, :] = h1.astype(hpad_ref.dtype)
    acc = jnp.zeros((H * W, cout), jnp.float32)
    for dh in range(3):
        for dw in range(3):
            patch = hpad_ref[dh:dh + H, dw:dw + W, :].reshape(H * W, -1)
            acc = acc + jnp.dot(patch, w_ref[dh * 3 + dw],
                                preferred_element_type=jnp.float32)
    y = jnp.maximum(acc + b_ref[...], 0.0)
    ps_ref[...] = jnp.sum(y, axis=0, keepdims=True)[None]
    pq_ref[...] = jnp.sum(y * y, axis=0, keepdims=True)[None]
    y_ref[...] = y.reshape(1, H, W, cout).astype(y_ref.dtype)


def transform_conv4x4s2_kernel(p00_ref, p01_ref, p10_ref, p11_ref,
                               w_ref, b_ref, o_ref, *, Ho, Wo):
    """4x4 stride-2 pad-1 conv as 16 unstrided taps over the 4 stride-phases of the
    (already BN2-normalized, zero-padded) input.

    phase(p,q)[k,l,:] = hpad[2k+p, 2l+q, :], so tap (kh,kw) = (2a+p, 2b+q) reads
    phase(p,q)[i+a, j+b, :] for output pixel (i,j).
    """
    cout = w_ref.shape[-1]
    phases = (p00_ref, p01_ref, p10_ref, p11_ref)
    acc = jnp.zeros((Ho * Wo, cout), jnp.float32)
    for kh in range(4):
        for kw in range(4):
            a, p = kh // 2, kh % 2
            b, q = kw // 2, kw % 2
            ph = phases[p * 2 + q]
            patch = ph[0, a:a + Ho, b:b + Wo, :].reshape(Ho * Wo, -1)
            acc = acc + jnp.dot(patch, w_ref[kh * 4 + kw],
                                preferred_element_type=jnp.float32)
    o_ref[...] = (acc + b_ref[...]).reshape(1, Ho, Wo, cout).astype(o_ref.dtype)


# --------------------------------------------------------------------------- #
# pallas_call wrappers
# --------------------------------------------------------------------------- #
def _conv1_call(xpad, w1, b1, H, W):
    n, hp, wp, cin = xpad.shape
    cout = w1.shape[-1]
    est = 2 * (hp * wp * cin * 2 + H * W * cout * 2) + 2 * w1.size * 2 + H * W * cout * 4
    return pl.pallas_call(
        functools.partial(conv3x3_relu_stats_kernel, H=H, W=W),
        out_shape=(
            jax.ShapeDtypeStruct((n, H, W, cout), jnp.bfloat16),
            jax.ShapeDtypeStruct((n, 1, cout), jnp.float32),
            jax.ShapeDtypeStruct((n, 1, cout), jnp.float32),
        ),
        grid=(n,),
        in_specs=[
            pl.BlockSpec((1, hp, wp, cin), lambda i: (i, 0, 0, 0)),
            pl.BlockSpec(w1.shape, lambda i: (0, 0, 0)),
            pl.BlockSpec((1, cout), lambda i: (0, 0)),
        ],
        out_specs=(
            pl.BlockSpec((1, H, W, cout), lambda i: (i, 0, 0, 0)),
            pl.BlockSpec((1, 1, cout), lambda i: (i, 0, 0)),
            pl.BlockSpec((1, 1, cout), lambda i: (i, 0, 0)),
        ),
        compiler_params=_compiler_params(est),
    )(xpad, w1, b1)


def _conv2_call(y1, sc1, sh1_img, w2, b2, H, W):
    n, _, _, cpad = y1.shape
    cout = w2.shape[-1]
    est = (4 * H * W * cpad * 2 + (H + 2) * (W + 2) * cpad * 2
           + 2 * w2.size * 2 + H * W * cout * 4)
    return pl.pallas_call(
        functools.partial(bn_conv3x3_relu_stats_kernel, H=H, W=W),
        out_shape=(
            jax.ShapeDtypeStruct((n, H, W, cout), jnp.bfloat16),
            jax.ShapeDtypeStruct((n, 1, cout), jnp.float32),
            jax.ShapeDtypeStruct((n, 1, cout), jnp.float32),
        ),
        grid=(n,),
        in_specs=[
            pl.BlockSpec((1, H, W, cpad), lambda i: (i, 0, 0, 0)),
            pl.BlockSpec((1, cpad), lambda i: (0, 0)),
            pl.BlockSpec((1, 1, cpad), lambda i: (i, 0, 0)),
            pl.BlockSpec(w2.shape, lambda i: (0, 0, 0)),
            pl.BlockSpec((1, cout), lambda i: (0, 0)),
        ],
        out_specs=(
            pl.BlockSpec((1, H, W, cout), lambda i: (i, 0, 0, 0)),
            pl.BlockSpec((1, 1, cout), lambda i: (i, 0, 0)),
            pl.BlockSpec((1, 1, cout), lambda i: (i, 0, 0)),
        ),
        scratch_shapes=[pltpu.VMEM((H + 2, W + 2, cpad), jnp.bfloat16)],
        compiler_params=_compiler_params(est),
    )(y1, sc1, sh1_img, w2, b2)


def _transform_call(phases, wT, bT, Ho, Wo):
    n, hp, wp, cpad = phases[0].shape
    cout = wT.shape[-1]
    est = 4 * 2 * hp * wp * cpad * 2 + 2 * wT.size * 2 + 2 * Ho * Wo * cout * 4
    ph_spec = pl.BlockSpec((1, hp, wp, cpad), lambda i: (i, 0, 0, 0))
    return pl.pallas_call(
        functools.partial(transform_conv4x4s2_kernel, Ho=Ho, Wo=Wo),
        out_shape=jax.ShapeDtypeStruct((n, Ho, Wo, cout), jnp.float32),
        grid=(n,),
        in_specs=[ph_spec, ph_spec, ph_spec, ph_spec,
                  pl.BlockSpec(wT.shape, lambda i: (0, 0, 0)),
                  pl.BlockSpec((1, cout), lambda i: (0, 0))],
        out_specs=pl.BlockSpec((1, Ho, Wo, cout), lambda i: (i, 0, 0, 0)),
        compiler_params=_compiler_params(est),
    )(*phases, wT, bT)


# --------------------------------------------------------------------------- #
# One-time parameter prep: pad channels to lane multiple, flatten OIHW -> (taps, Ci, Co), bf16
# --------------------------------------------------------------------------- #
def prepare_params(params):
    in_ch = params["w1"].shape[1]
    out_ch = params["b1"].shape[0]
    cin_pad = _pad_lanes(in_ch)
    cpad = _pad_lanes(out_ch)

    def flat_taps(w_oihw, ci_pad, co_pad):
        o, i, kh, kw = w_oihw.shape
        w = jnp.pad(w_oihw, ((0, co_pad - o), (0, ci_pad - i), (0, 0), (0, 0)))
        w = jnp.transpose(w, (2, 3, 1, 0)).reshape(kh * kw, ci_pad, co_pad)
        return w.astype(jnp.bfloat16)

    def row(v):
        return jnp.pad(v, (0, cpad - v.shape[0])).reshape(1, -1).astype(jnp.float32)

    return {
        "w1": flat_taps(params["w1"], cin_pad, cpad), "b1": row(params["b1"]),
        "w2": flat_taps(params["w2"], cpad, cpad), "b2": row(params["b2"]),
        "wT": flat_taps(params["wT"], cpad, cpad), "bT": row(params["bT"]),
        "wt_lin": jnp.pad(params["wt_lin"], ((0, 0), (0, cpad - out_ch))).astype(jnp.float32),
        "bt_lin": row(params["bt_lin"]),
        "g1": row(params["g1"]), "be1": row(params["be1"]),
        "g2": row(params["g2"]), "be2": row(params["be2"]),
    }


def _bn_scale_shift(psum, psq, g_row, be_row, count):
    """Reduce per-image (N,1,C) partial sums to a (1,C) scale/shift (tiny, plain JAX)."""
    mean = jnp.sum(psum, axis=(0, 1)) / count
    ex2 = jnp.sum(psq, axis=(0, 1)) / count
    var = ex2 - mean * mean                       # biased variance, training-mode BN
    scale = g_row[0] * jax.lax.rsqrt(var + EPS)
    shift = be_row[0] - mean * scale
    return scale.reshape(1, -1), shift.reshape(1, -1)


# --------------------------------------------------------------------------- #
# Block forward (up=False)
# --------------------------------------------------------------------------- #
def block_forward(prep, x_nchw, t, out_ch):
    n, _, h, w = x_nchw.shape
    cpad = prep["b1"].shape[1]
    cin_pad = prep["w1"].shape[1]
    r = n * h * w

    # NCHW -> NHWC, channel pad, spatial zero-pad (conv1 halo), bf16 MXU operand.
    x = jnp.transpose(x_nchw, (0, 2, 3, 1))
    x = jnp.pad(x, ((0, 0), (1, 1), (1, 1), (0, cin_pad - x.shape[-1]))).astype(jnp.bfloat16)

    # stage 1: direct conv1 + ReLU + per-image BN1 partial stats
    y1, s1, q1 = _conv1_call(x, prep["w1"], prep["b1"], h, w)

    # tiny reductions: BN1 scale/shift; fold ReLU(time_mlp(t)) into the per-image shift
    sc1, sh1 = _bn_scale_shift(s1, q1, prep["g1"], prep["be1"], r)
    te = jax.nn.relu(t.astype(jnp.float32) @ prep["wt_lin"] + prep["bt_lin"])   # (N, Cpad)
    sh1_img = sh1[None, :, :] + te[:, None, :]                                  # (N, 1, Cpad)

    # stage 2: fused BN1-apply(+te) + direct conv2 + ReLU + BN2 partial stats
    y2, s2, q2 = _conv2_call(y1, sc1, sh1_img, prep["w2"], prep["b2"], h, w)

    # BN2 scale/shift; apply + zero-pad + stride-phase split (one small XLA fusion)
    sc2, sh2 = _bn_scale_shift(s2, q2, prep["g2"], prep["be2"], r)
    h2 = (y2.astype(jnp.float32) * sc2 + sh2).astype(jnp.bfloat16)
    hp = jnp.pad(h2, ((0, 0), (1, 1), (1, 1), (0, 0)))
    phases = [hp[:, p::2, q::2, :] for p in (0, 1) for q in (0, 1)]   # 4x (N, h/2+1, w/2+1, C)

    # stage 3: transform conv (4x4, stride 2, pad 1) as 16 unstrided phase taps
    ho, wo = h // 2, w // 2
    out = _transform_call(phases, prep["wT"], prep["bT"], ho, wo)
    out = out[..., :out_ch]
    return jnp.transpose(out, (0, 3, 1, 2))                           # NHWC -> NCHW


# --------------------------------------------------------------------------- #
# Pure-JAX reference (mirrors the bf16-operand / f32-accumulate / bf16-store pipeline)
# --------------------------------------------------------------------------- #
def ref_forward(params, x_nchw, t):
    f32 = jnp.float32
    q = lambda a: a.astype(jnp.bfloat16).astype(f32)
    x = jnp.transpose(x_nchw, (0, 2, 3, 1))
    n, h, w, _ = x.shape
    r = n * h * w

    def conv(a, w_oihw, stride, pad):
        w_hwio = jnp.transpose(w_oihw, (2, 3, 1, 0))
        return jax.lax.conv_general_dilated(
            q(a), q(w_hwio), (stride, stride), [(pad, pad), (pad, pad)],
            dimension_numbers=("NHWC", "HWIO", "NHWC"),
            preferred_element_type=f32)

    def scale_shift(y, g, be):
        mean = jnp.sum(y, axis=(0, 1, 2)) / r
        ex2 = jnp.sum(y * y, axis=(0, 1, 2)) / r
        var = ex2 - mean * mean
        sc = g * jax.lax.rsqrt(var + EPS)
        return sc, be - mean * sc

    y1 = jax.nn.relu(conv(x, params["w1"], 1, 1) + params["b1"])
    sc1, sh1 = scale_shift(y1, params["g1"], params["be1"])
    te = jax.nn.relu(t @ params["wt_lin"] + params["bt_lin"])
    h1 = q(y1) * sc1 + (sh1 + te[:, None, None, :])
    y2 = jax.nn.relu(conv(h1, params["w2"], 1, 1) + params["b2"])
    sc2, sh2 = scale_shift(y2, params["g2"], params["be2"])
    h2 = q(y2) * sc2 + sh2
    out = conv(h2, params["wT"], 2, 1) + params["bT"]
    return jnp.transpose(out, (0, 3, 1, 2))


# --------------------------------------------------------------------------- #
# Deterministic parameter init (synthetic; shapes match the PyTorch module, up=False)
# --------------------------------------------------------------------------- #
def init_params(key, in_ch, out_ch, time_emb_dim):
    ks = jax.random.split(key, 12)

    def nrm(k, shape, fan_in):
        return jax.random.normal(k, shape, jnp.float32) / jnp.sqrt(float(fan_in))

    p = {}
    p["w1"] = nrm(ks[0], (out_ch, in_ch, 3, 3), in_ch * 9)
    p["b1"] = 0.1 * jax.random.normal(ks[1], (out_ch,), jnp.float32)
    p["w2"] = nrm(ks[2], (out_ch, out_ch, 3, 3), out_ch * 9)
    p["b2"] = 0.1 * jax.random.normal(ks[3], (out_ch,), jnp.float32)
    p["wT"] = nrm(ks[4], (out_ch, out_ch, 4, 4), out_ch * 16)
    p["bT"] = 0.1 * jax.random.normal(ks[5], (out_ch,), jnp.float32)
    p["wt_lin"] = nrm(ks[6], (time_emb_dim, out_ch), time_emb_dim)
    p["bt_lin"] = 0.1 * jax.random.normal(ks[7], (out_ch,), jnp.float32)
    p["g1"] = 1.0 + 0.1 * jax.random.normal(ks[8], (out_ch,), jnp.float32)
    p["be1"] = 0.1 * jax.random.normal(ks[9], (out_ch,), jnp.float32)
    p["g2"] = 1.0 + 0.1 * jax.random.normal(ks[10], (out_ch,), jnp.float32)
    p["be2"] = 0.1 * jax.random.normal(ks[11], (out_ch,), jnp.float32)
    return p


# --------------------------------------------------------------------------- #
if __name__ == "__main__":
    in_ch, out_ch, time_emb_dim = 4, 8, 32
    N, H, W = 2, 16, 16

    key = jax.random.PRNGKey(0)
    kp, kx, kt = jax.random.split(key, 3)
    params = init_params(kp, in_ch, out_ch, time_emb_dim)
    x = jax.random.normal(kx, (N, in_ch, H, W), jnp.float32)        # PyTorch NCHW input
    t = jax.random.normal(kt, (N, time_emb_dim), jnp.float32)

    prep = prepare_params(params)                                   # one-time weight prep
    fwd = jax.jit(functools.partial(block_forward, out_ch=out_ch))

    out = jax.block_until_ready(fwd(prep, x, t))
    assert out.shape == (N, out_ch, H // 2, W // 2), out.shape

    ref = jax.block_until_ready(jax.jit(ref_forward)(params, x, t))
    if not bool(jnp.allclose(out, ref, atol=2e-3, rtol=2e-3)):
        max_err = float(jnp.max(jnp.abs(out - ref)))
        raise AssertionError(f"Pallas output mismatch vs reference, max abs err = {max_err}")

    print("KERNEL_OK")
</pallas_src>

<mosaic_0001>
module attributes {stable_mosaic.version = 11 : i64} {
  func.func @conv3x3_relu_stats_kernel(%arg0: i32, %arg1: memref<1x18x18x128xbf16, #tpu.memory_space<vmem>>, %arg2: memref<9x128x128xbf16, #tpu.memory_space<vmem>>, %arg3: memref<1x128xf32, #tpu.memory_space<vmem>>, %arg4: memref<1x16x16x128xbf16, #tpu.memory_space<vmem>>, %arg5: memref<1x1x128xf32, #tpu.memory_space<vmem>>, %arg6: memref<1x1x128xf32, #tpu.memory_space<vmem>>) attributes {dimension_semantics = [#tpu.dimension_semantics<parallel>], iteration_bounds = array<i64: 2>, scalar_prefetch = 0 : i64, scratch_operands = 0 : i64, tpu.core_type = #tpu.core_type<tc>, window_params = [{transform_indices = @transform_0, window_bounds = array<i64: 1, 18, 18, 128>}, {pipeline_mode = #tpu.pipeline_mode<synchronous>, transform_indices = @transform_1, window_bounds = array<i64: 9, 128, 128>}, {pipeline_mode = #tpu.pipeline_mode<synchronous>, transform_indices = @transform_2, window_bounds = array<i64: 1, 128>}, {transform_indices = @transform_3, window_bounds = array<i64: 1, 16, 16, 128>}, {transform_indices = @transform_4, window_bounds = array<i64: 1, 1, 128>}, {transform_indices = @transform_5, window_bounds = array<i64: 1, 1, 128>}]} {
    %cst = arith.constant 0.000000e+00 : f32
    %0 = vector.broadcast %cst : f32 to vector<256x128xf32>
    %c0 = arith.constant 0 : index
    %c0_0 = arith.constant 0 : index
    %c0_1 = arith.constant 0 : index
    %c0_2 = arith.constant 0 : index
    %1 = vector.load %arg1[%c0, %c0_0, %c0_1, %c0_2] : memref<1x18x18x128xbf16, #tpu.memory_space<vmem>>, vector<1x16x16x128xbf16>
    %2 = vector.shape_cast %1 : vector<1x16x16x128xbf16> to vector<16x16x128xbf16>
    %3 = vector.shape_cast %2 : vector<16x16x128xbf16> to vector<256x128xbf16>
    %c0_3 = arith.constant 0 : index
    %c0_4 = arith.constant 0 : index
    %c0_5 = arith.constant 0 : index
    %4 = vector.load %arg2[%c0_3, %c0_4, %c0_5] : memref<9x128x128xbf16, #tpu.memory_space<vmem>>, vector<1x128x128xbf16>
    %5 = vector.shape_cast %4 : vector<1x128x128xbf16> to vector<128x128xbf16>
    %cst_6 = arith.constant dense<0.000000e+00> : vector<256x128xf32>
    %6 = tpu.matmul %3, %5, %cst_6 {dimension_numbers = #tpu.dot_dimension_numbers<[1], [0], [0], [1], [0, 0, 1, 1], [], []>} : vector<256x128xbf16>, vector<128x128xbf16>, vector<256x128xf32> -> vector<256x128xf32>
    %7 = arith.addf %0, %6 : vector<256x128xf32>
    %c0_7 = arith.constant 0 : index
    %c0_8 = arith.constant 0 : index
    %c1 = arith.constant 1 : index
    %c0_9 = arith.constant 0 : index
    %8 = vector.load %arg1[%c0_7, %c0_8, %c1, %c0_9] : memref<1x18x18x128xbf16, #tpu.memory_space<vmem>>, vector<1x16x16x128xbf16>
    %9 = vector.shape_cast %8 : vector<1x16x16x128xbf16> to vector<16x16x128xbf16>
    %10 = vector.shape_cast %9 : vector<16x16x128xbf16> to vector<256x128xbf16>
    %c1_10 = arith.constant 1 : index
    %c0_11 = arith.constant 0 : index
    %c0_12 = arith.constant 0 : index
    %11 = vector.load %arg2[%c1_10, %c0_11, %c0_12] : memref<9x128x128xbf16, #tpu.memory_space<vmem>>, vector<1x128x128xbf16>
    %12 = vector.shape_cast %11 : vector<1x128x128xbf16> to vector<128x128xbf16>
    %cst_13 = arith.constant dense<0.000000e+00> : vector<256x128xf32>
    %13 = tpu.matmul %10, %12, %cst_13 {dimension_numbers = #tpu.dot_dimension_numbers<[1], [0], [0], [1], [0, 0, 1, 1], [], []>} : vector<256x128xbf16>, vector<128x128xbf16>, vector<256x128xf32> -> vector<256x128xf32>
    %14 = arith.addf %7, %13 : vector<256x128xf32>
    %c0_14 = arith.constant 0 : index
    %c0_15 = arith.constant 0 : index
    %c2 = arith.constant 2 : index
    %c0_16 = arith.constant 0 : index
    %15 = vector.load %arg1[%c0_14, %c0_15, %c2, %c0_16] : memref<1x18x18x128xbf16, #tpu.memory_space<vmem>>, vector<1x16x16x128xbf16>
    %16 = vector.shape_cast %15 : vector<1x16x16x128xbf16> to vector<16x16x128xbf16>
    %17 = vector.shape_cast %16 : vector<16x16x128xbf16> to vector<256x128xbf16>
    %c2_17 = arith.constant 2 : index
    %c0_18 = arith.constant 0 : index
    %c0_19 = arith.constant 0 : index
    %18 = vector.load %arg2[%c2_17, %c0_18, %c0_19] : memref<9x128x128xbf16, #tpu.memory_space<vmem>>, vector<1x128x128xbf16>
    %19 = vector.shape_cast %18 : vector<1x128x128xbf16> to vector<128x128xbf16>
    %cst_20 = arith.constant dense<0.000000e+00> : vector<256x128xf32>
    %20 = tpu.matmul %17, %19, %cst_20 {dimension_numbers = #tpu.dot_dimension_numbers<[1], [0], [0], [1], [0, 0, 1, 1], [], []>} : vector<256x128xbf16>, vector<128x128xbf16>, vector<256x128xf32> -> vector<256x128xf32>
    %21 = arith.addf %14, %20 : vector<256x128xf32>
    %c0_21 = arith.constant 0 : index
    %c1_22 = arith.constant 1 : index
    %c0_23 = arith.constant 0 : index
    %c0_24 = arith.constant 0 : index
    %22 = vector.load %arg1[%c0_21, %c1_22, %c0_23, %c0_24] : memref<1x18x18x128xbf16, #tpu.memory_space<vmem>>, vector<1x16x16x128xbf16>
    %23 = vector.shape_cast %22 : vector<1x16x16x128xbf16> to vector<16x16x128xbf16>
    %24 = vector.shape_cast %23 : vector<16x16x128xbf16> to vector<256x128xbf16>
    %c3 = arith.constant 3 : index
    %c0_25 = arith.constant 0 : index
    %c0_26 = arith.constant 0 : index
    %25 = vector.load %arg2[%c3, %c0_25, %c0_26] : memref<9x128x128xbf16, #tpu.memory_space<vmem>>, vector<1x128x128xbf16>
    %26 = vector.shape_cast %25 : vector<1x128x128xbf16> to vector<128x128xbf16>
    %cst_27 = arith.constant dense<0.000000e+00> : vector<256x128xf32>
    %27 = tpu.matmul %24, %26, %cst_27 {dimension_numbers = #tpu.dot_dimension_numbers<[1], [0], [0], [1], [0, 0, 1, 1], [], []>} : vector<256x128xbf16>, vector<128x128xbf16>, vector<256x128xf32> -> vector<256x128xf32>
    %28 = arith.addf %21, %27 : vector<256x128xf32>
    %c0_28 = arith.constant 0 : index
    %c1_29 = arith.constant 1 : index
    %c1_30 = arith.constant 1 : index
    %c0_31 = arith.constant 0 : index
    %29 = vector.load %arg1[%c0_28, %c1_29, %c1_30, %c0_31] : memref<1x18x18x128xbf16, #tpu.memory_space<vmem>>, vector<1x16x16x128xbf16>
    %30 = vector.shape_cast %29 : vector<1x16x16x128xbf16> to vector<16x16x128xbf16>
    %31 = vector.shape_cast %30 : vector<16x16x128xbf16> to vector<256x128xbf16>
    %c4 = arith.constant 4 : index
    %c0_32 = arith.constant 0 : index
    %c0_33 = arith.constant 0 : index
    %32 = vector.load %arg2[%c4, %c0_32, %c0_33] : memref<9x128x128xbf16, #tpu.memory_space<vmem>>, vector<1x128x128xbf16>
    %33 = vector.shape_cast %32 : vector<1x128x128xbf16> to vector<128x128xbf16>
    %cst_34 = arith.constant dense<0.000000e+00> : vector<256x128xf32>
    %34 = tpu.matmul %31, %33, %cst_34 {dimension_numbers = #tpu.dot_dimension_numbers<[1], [0], [0], [1], [0, 0, 1, 1], [], []>} : vector<256x128xbf16>, vector<128x128xbf16>, vector<256x128xf32> -> vector<256x128xf32>
    %35 = arith.addf %28, %34 : vector<256x128xf32>
    %c0_35 = arith.constant 0 : index
    %c1_36 = arith.constant 1 : index
    %c2_37 = arith.constant 2 : index
    %c0_38 = arith.constant 0 : index
    %36 = vector.load %arg1[%c0_35, %c1_36, %c2_37, %c0_38] : memref<1x18x18x128xbf16, #tpu.memory_space<vmem>>, vector<1x16x16x128xbf16>
    %37 = vector.shape_cast %36 : vector<1x16x16x128xbf16> to vector<16x16x128xbf16>
    %38 = vector.shape_cast %37 : vector<16x16x128xbf16> to vector<256x128xbf16>
    %c5 = arith.constant 5 : index
    %c0_39 = arith.constant 0 : index
    %c0_40 = arith.constant 0 : index
    %39 = vector.load %arg2[%c5, %c0_39, %c0_40] : memref<9x128x128xbf16, #tpu.memory_space<vmem>>, vector<1x128x128xbf16>
    %40 = vector.shape_cast %39 : vector<1x128x128xbf16> to vector<128x128xbf16>
    %cst_41 = arith.constant dense<0.000000e+00> : vector<256x128xf32>
    %41 = tpu.matmul %38, %40, %cst_41 {dimension_numbers = #tpu.dot_dimension_numbers<[1], [0], [0], [1], [0, 0, 1, 1], [], []>} : vector<256x128xbf16>, vector<128x128xbf16>, vector<256x128xf32> -> vector<256x128xf32>
    %42 = arith.addf %35, %41 : vector<256x128xf32>
    %c0_42 = arith.constant 0 : index
    %c2_43 = arith.constant 2 : index
    %c0_44 = arith.constant 0 : index
    %c0_45 = arith.constant 0 : index
    %43 = vector.load %arg1[%c0_42, %c2_43, %c0_44, %c0_45] : memref<1x18x18x128xbf16, #tpu.memory_space<vmem>>, vector<1x16x16x128xbf16>
    %44 = vector.shape_cast %43 : vector<1x16x16x128xbf16> to vector<16x16x128xbf16>
    %45 = vector.shape_cast %44 : vector<16x16x128xbf16> to vector<256x128xbf16>
    %c6 = arith.constant 6 : index
    %c0_46 = arith.constant 0 : index
    %c0_47 = arith.constant 0 : index
    %46 = vector.load %arg2[%c6, %c0_46, %c0_47] : memref<9x128x128xbf16, #tpu.memory_space<vmem>>, vector<1x128x128xbf16>
    %47 = vector.shape_cast %46 : vector<1x128x128xbf16> to vector<128x128xbf16>
    %cst_48 = arith.constant dense<0.000000e+00> : vector<256x128xf32>
    %48 = tpu.matmul %45, %47, %cst_48 {dimension_numbers = #tpu.dot_dimension_numbers<[1], [0], [0], [1], [0, 0, 1, 1], [], []>} : vector<256x128xbf16>, vector<128x128xbf16>, vector<256x128xf32> -> vector<256x128xf32>
    %49 = arith.addf %42, %48 : vector<256x128xf32>
    %c0_49 = arith.constant 0 : index
    %c2_50 = arith.constant 2 : index
    %c1_51 = arith.constant 1 : index
    %c0_52 = arith.constant 0 : index
    %50 = vector.load %arg1[%c0_49, %c2_50, %c1_51, %c0_52] : memref<1x18x18x128xbf16, #tpu.memory_space<vmem>>, vector<1x16x16x128xbf16>
    %51 = vector.shape_cast %50 : vector<1x16x16x128xbf16> to vector<16x16x128xbf16>
    %52 = vector.shape_cast %51 : vector<16x16x128xbf16> to vector<256x128xbf16>
    %c7 = arith.constant 7 : index
    %c0_53 = arith.constant 0 : index
    %c0_54 = arith.constant 0 : index
    %53 = vector.load %arg2[%c7, %c0_53, %c0_54] : memref<9x128x128xbf16, #tpu.memory_space<vmem>>, vector<1x128x128xbf16>
    %54 = vector.shape_cast %53 : vector<1x128x128xbf16> to vector<128x128xbf16>
    %cst_55 = arith.constant dense<0.000000e+00> : vector<256x128xf32>
    %55 = tpu.matmul %52, %54, %cst_55 {dimension_numbers = #tpu.dot_dimension_numbers<[1], [0], [0], [1], [0, 0, 1, 1], [], []>} : vector<256x128xbf16>, vector<128x128xbf16>, vector<256x128xf32> -> vector<256x128xf32>
    %56 = arith.addf %49, %55 : vector<256x128xf32>
    %c0_56 = arith.constant 0 : index
    %c2_57 = arith.constant 2 : index
    %c2_58 = arith.constant 2 : index
    %c0_59 = arith.constant 0 : index
    %57 = vector.load %arg1[%c0_56, %c2_57, %c2_58, %c0_59] : memref<1x18x18x128xbf16, #tpu.memory_space<vmem>>, vector<1x16x16x128xbf16>
    %58 = vector.shape_cast %57 : vector<1x16x16x128xbf16> to vector<16x16x128xbf16>
    %59 = vector.shape_cast %58 : vector<16x16x128xbf16> to vector<256x128xbf16>
    %c8 = arith.constant 8 : index
    %c0_60 = arith.constant 0 : index
    %c0_61 = arith.constant 0 : index
    %60 = vector.load %arg2[%c8, %c0_60, %c0_61] : memref<9x128x128xbf16, #tpu.memory_space<vmem>>, vector<1x128x128xbf16>
    %61 = vector.shape_cast %60 : vector<1x128x128xbf16> to vector<128x128xbf16>
    %cst_62 = arith.constant dense<0.000000e+00> : vector<256x128xf32>
    %62 = tpu.matmul %59, %61, %cst_62 {dimension_numbers = #tpu.dot_dimension_numbers<[1], [0], [0], [1], [0, 0, 1, 1], [], []>} : vector<256x128xbf16>, vector<128x128xbf16>, vector<256x128xf32> -> vector<256x128xf32>
    %63 = arith.addf %56, %62 : vector<256x128xf32>
    %c0_63 = arith.constant 0 : index
    %c0_64 = arith.constant 0 : index
    %64 = vector.load %arg3[%c0_63, %c0_64] : memref<1x128xf32, #tpu.memory_space<vmem>>, vector<1x128xf32>
    %65 = vector.broadcast %64 : vector<1x128xf32> to vector<256x128xf32>
    %66 = arith.addf %63, %65 : vector<256x128xf32>
    %cst_65 = arith.constant 0.000000e+00 : f32
    %67 = vector.broadcast %cst_65 : f32 to vector<256x128xf32>
    %68 = arith.maximumf %66, %67 : vector<256x128xf32>
    %cst_66 = arith.constant dense<0.000000e+00> : vector<128xf32>
    %69 = vector.multi_reduction <add>, %68, %cst_66 [0] : vector<256x128xf32> to vector<128xf32>
    %70 = vector.shape_cast %69 : vector<128xf32> to vector<1x128xf32>
    %71 = vector.shape_cast %70 : vector<1x128xf32> to vector<1x1x128xf32>
    %c0_67 = arith.constant 0 : index
    %c0_68 = arith.constant 0 : index
    %c0_69 = arith.constant 0 : index
    %72 = vector.load %arg5[%c0_67, %c0_68, %c0_69] : memref<1x1x128xf32, #tpu.memory_space<vmem>>, vector<1x1x128xf32>
    tpu.vector_store %arg5[%c0_67, %c0_68, %c0_69], %71 {strides = array<i32>} : memref<1x1x128xf32, #tpu.memory_space<vmem>>, vector<1x1x128xf32>,
    %73 = arith.mulf %68, %68 : vector<256x128xf32>
    %cst_70 = arith.constant dense<0.000000e+00> : vector<128xf32>
    %74 = vector.multi_reduction <add>, %73, %cst_70 [0] : vector<256x128xf32> to vector<128xf32>
    %75 = vector.shape_cast %74 : vector<128xf32> to vector<1x128xf32>
    %76 = vector.shape_cast %75 : vector<1x128xf32> to vector<1x1x128xf32>
    %c0_71 = arith.constant 0 : index
    %c0_72 = arith.constant 0 : index
    %c0_73 = arith.constant 0 : index
    %77 = vector.load %arg6[%c0_71, %c0_72, %c0_73] : memref<1x1x128xf32, #tpu.memory_space<vmem>>, vector<1x1x128xf32>
    tpu.vector_store %arg6[%c0_71, %c0_72, %c0_73], %76 {strides = array<i32>} : memref<1x1x128xf32, #tpu.memory_space<vmem>>, vector<1x1x128xf32>,
    %78 = vector.shape_cast %68 : vector<256x128xf32> to vector<1x16x16x128xf32>
    %79 = arith.truncf %78 : vector<1x16x16x128xf32> to vector<1x16x16x128xbf16>
    %c0_74 = arith.constant 0 : index
    %c0_75 = arith.constant 0 : index
    %c0_76 = arith.constant 0 : index
    %c0_77 = arith.constant 0 : index
    %80 = vector.load %arg4[%c0_74, %c0_75, %c0_76, %c0_77] : memref<1x16x16x128xbf16, #tpu.memory_space<vmem>>, vector<1x16x16x128xbf16>
    tpu.vector_store %arg4[%c0_74, %c0_75, %c0_76, %c0_77], %79 {strides = array<i32>} : memref<1x16x16x128xbf16, #tpu.memory_space<vmem>>, vector<1x16x16x128xbf16>,
    return
  }
  func.func @transform_0(%arg0: i32) -> (i32, i32, i32, i32) {
    %c0_i32 = arith.constant 0 : i32
    %c0_i32_0 = arith.constant 0 : i32
    %c0_i32_1 = arith.constant 0 : i32
    %c0_i32_2 = arith.constant 0 : i32
    return %arg0, %c0_i32, %c0_i32_0, %c0_i32_1 : i32, i32, i32, i32
  }
  func.func @transform_1(%arg0: i32) -> (i32, i32, i32) {
    %c0_i32 = arith.constant 0 : i32
    %c0_i32_0 = arith.constant 0 : i32
    %c0_i32_1 = arith.constant 0 : i32
    %c0_i32_2 = arith.constant 0 : i32
    return %c0_i32, %c0_i32_0, %c0_i32_1 : i32, i32, i32
  }
  func.func @transform_2(%arg0: i32) -> (i32, i32) {
    %c0_i32 = arith.constant 0 : i32
    %c0_i32_0 = arith.constant 0 : i32
    %c0_i32_1 = arith.constant 0 : i32
    return %c0_i32, %c0_i32_0 : i32, i32
  }
  func.func @transform_3(%arg0: i32) -> (i32, i32, i32, i32) {
    %c0_i32 = arith.constant 0 : i32
    %c0_i32_0 = arith.constant 0 : i32
    %c0_i32_1 = arith.constant 0 : i32
    %c0_i32_2 = arith.constant 0 : i32
    return %arg0, %c0_i32, %c0_i32_0, %c0_i32_1 : i32, i32, i32, i32
  }
  func.func @transform_4(%arg0: i32) -> (i32, i32, i32) {
    %c0_i32 = arith.constant 0 : i32
    %c0_i32_0 = arith.constant 0 : i32
    %c0_i32_1 = arith.constant 0 : i32
    return %arg0, %c0_i32, %c0_i32_0 : i32, i32, i32
  }
  func.func @transform_5(%arg0: i32) -> (i32, i32, i32) {
    %c0_i32 = arith.constant 0 : i32
    %c0_i32_0 = arith.constant 0 : i32
    %c0_i32_1 = arith.constant 0 : i32
    return %arg0, %c0_i32, %c0_i32_0 : i32, i32, i32
  }
}

module attributes {stable_mosaic.version = 11 : i64} {
  func.func @bn_conv3x3_relu_stats_kernel(%arg0: i32, %arg1: memref<1x16x16x128xbf16, #tpu.memory_space<vmem>>, %arg2: memref<1x128xf32, #tpu.memory_space<vmem>>, %arg3: memref<1x1x128xf32, #tpu.memory_space<vmem>>, %arg4: memref<9x128x128xbf16, #tpu.memory_space<vmem>>, %arg5: memref<1x128xf32, #tpu.memory_space<vmem>>, %arg6: memref<1x16x16x128xbf16, #tpu.memory_space<vmem>>, %arg7: memref<1x1x128xf32, #tpu.memory_space<vmem>>, %arg8: memref<1x1x128xf32, #tpu.memory_space<vmem>>, %arg9: memref<18x18x128xbf16, #tpu.memory_space<vmem>>) attributes {dimension_semantics = [#tpu.dimension_semantics<parallel>], iteration_bounds = array<i64: 2>, scalar_prefetch = 0 : i64, scratch_operands = 1 : i64, tpu.core_type = #tpu.core_type<tc>, window_params = [{transform_indices = @transform_0, window_bounds = array<i64: 1, 16, 16, 128>}, {pipeline_mode = #tpu.pipeline_mode<synchronous>, transform_indices = @transform_1, window_bounds = array<i64: 1, 128>}, {transform_indices = @transform_2, window_bounds = array<i64: 1, 1, 128>}, {pipeline_mode = #tpu.pipeline_mode<synchronous>, transform_indices = @transform_3, window_bounds = array<i64: 9, 128, 128>}, {pipeline_mode = #tpu.pipeline_mode<synchronous>, transform_indices = @transform_4, window_bounds = array<i64: 1, 128>}, {transform_indices = @transform_5, window_bounds = array<i64: 1, 16, 16, 128>}, {transform_indices = @transform_6, window_bounds = array<i64: 1, 1, 128>}, {transform_indices = @transform_7, window_bounds = array<i64: 1, 1, 128>}]} {
    %c0 = arith.constant 0 : index
    %c0_0 = arith.constant 0 : index
    %c0_1 = arith.constant 0 : index
    %c0_2 = arith.constant 0 : index
    %0 = vector.load %arg1[%c0, %c0_0, %c0_1, %c0_2] : memref<1x16x16x128xbf16, #tpu.memory_space<vmem>>, vector<1x16x16x128xbf16>
    %1 = vector.shape_cast %0 : vector<1x16x16x128xbf16> to vector<16x16x128xbf16>
    %2 = arith.extf %1 : vector<16x16x128xbf16> to vector<16x16x128xf32>
    %c0_3 = arith.constant 0 : index
    %c0_4 = arith.constant 0 : index
    %3 = vector.load %arg2[%c0_3, %c0_4] : memref<1x128xf32, #tpu.memory_space<vmem>>, vector<1x128xf32>
    %4 = vector.shape_cast %3 : vector<1x128xf32> to vector<1x1x128xf32>
    %5 = vector.broadcast %4 : vector<1x1x128xf32> to vector<16x16x128xf32>
    %6 = arith.mulf %2, %5 : vector<16x16x128xf32>
    %c0_5 = arith.constant 0 : index
    %c0_6 = arith.constant 0 : index
    %c0_7 = arith.constant 0 : index
    %7 = vector.load %arg3[%c0_5, %c0_6, %c0_7] : memref<1x1x128xf32, #tpu.memory_space<vmem>>, vector<1x1x128xf32>
    %8 = vector.shape_cast %7 : vector<1x1x128xf32> to vector<1x128xf32>
    %9 = vector.shape_cast %8 : vector<1x128xf32> to vector<1x1x128xf32>
    %10 = vector.broadcast %9 : vector<1x1x128xf32> to vector<16x16x128xf32>
    %11 = arith.addf %6, %10 : vector<16x16x128xf32>
    %cst = arith.constant 0.000000e+00 : bf16
    %12 = vector.broadcast %cst : bf16 to vector<18x18x128xbf16>
    %c0_8 = arith.constant 0 : index
    %c0_9 = arith.constant 0 : index
    %c0_10 = arith.constant 0 : index
    %13 = vector.load %arg9[%c0_8, %c0_9, %c0_10] : memref<18x18x128xbf16, #tpu.memory_space<vmem>>, vector<18x18x128xbf16>
    tpu.vector_store %arg9[%c0_8, %c0_9, %c0_10], %12 {strides = array<i32>} : memref<18x18x128xbf16, #tpu.memory_space<vmem>>, vector<18x18x128xbf16>,
    %14 = arith.truncf %11 : vector<16x16x128xf32> to vector<16x16x128xbf16>
    %c1 = arith.constant 1 : index
    %c1_11 = arith.constant 1 : index
    %c0_12 = arith.constant 0 : index
    %15 = vector.load %arg9[%c1, %c1_11, %c0_12] : memref<18x18x128xbf16, #tpu.memory_space<vmem>>, vector<16x16x128xbf16>
    tpu.vector_store %arg9[%c1, %c1_11, %c0_12], %14 {strides = array<i32>} : memref<18x18x128xbf16, #tpu.memory_space<vmem>>, vector<16x16x128xbf16>,
    %cst_13 = arith.constant 0.000000e+00 : f32
    %16 = vector.broadcast %cst_13 : f32 to vector<256x128xf32>
    %c0_14 = arith.constant 0 : index
    %c0_15 = arith.constant 0 : index
    %c0_16 = arith.constant 0 : index
    %17 = vector.load %arg9[%c0_14, %c0_15, %c0_16] : memref<18x18x128xbf16, #tpu.memory_space<vmem>>, vector<16x16x128xbf16>
    %18 = vector.shape_cast %17 : vector<16x16x128xbf16> to vector<256x128xbf16>
    %c0_17 = arith.constant 0 : index
    %c0_18 = arith.constant 0 : index
    %c0_19 = arith.constant 0 : index
    %19 = vector.load %arg4[%c0_17, %c0_18, %c0_19] : memref<9x128x128xbf16, #tpu.memory_space<vmem>>, vector<1x128x128xbf16>
    %20 = vector.shape_cast %19 : vector<1x128x128xbf16> to vector<128x128xbf16>
    %cst_20 = arith.constant dense<0.000000e+00> : vector<256x128xf32>
    %21 = tpu.matmul %18, %20, %cst_20 {dimension_numbers = #tpu.dot_dimension_numbers<[1], [0], [0], [1], [0, 0, 1, 1], [], []>} : vector<256x128xbf16>, vector<128x128xbf16>, vector<256x128xf32> -> vector<256x128xf32>
    %22 = arith.addf %16, %21 : vector<256x128xf32>
    %c0_21 = arith.constant 0 : index
    %c1_22 = arith.constant 1 : index
    %c0_23 = arith.constant 0 : index
    %23 = vector.load %arg9[%c0_21, %c1_22, %c0_23] : memref<18x18x128xbf16, #tpu.memory_space<vmem>>, vector<16x16x128xbf16>
    %24 = vector.shape_cast %23 : vector<16x16x128xbf16> to vector<256x128xbf16>
    %c1_24 = arith.constant 1 : index
    %c0_25 = arith.constant 0 : index
    %c0_26 = arith.constant 0 : index
    %25 = vector.load %arg4[%c1_24, %c0_25, %c0_26] : memref<9x128x128xbf16, #tpu.memory_space<vmem>>, vector<1x128x128xbf16>
    %26 = vector.shape_cast %25 : vector<1x128x128xbf16> to vector<128x128xbf16>
    %cst_27 = arith.constant dense<0.000000e+00> : vector<256x128xf32>
    %27 = tpu.matmul %24, %26, %cst_27 {dimension_numbers = #tpu.dot_dimension_numbers<[1], [0], [0], [1], [0, 0, 1, 1], [], []>} : vector<256x128xbf16>, vector<128x128xbf16>, vector<256x128xf32> -> vector<256x128xf32>
    %28 = arith.addf %22, %27 : vector<256x128xf32>
    %c0_28 = arith.constant 0 : index
    %c2 = arith.constant 2 : index
    %c0_29 = arith.constant 0 : index
    %29 = vector.load %arg9[%c0_28, %c2, %c0_29] : memref<18x18x128xbf16, #tpu.memory_space<vmem>>, vector<16x16x128xbf16>
    %30 = vector.shape_cast %29 : vector<16x16x128xbf16> to vector<256x128xbf16>
    %c2_30 = arith.constant 2 : index
    %c0_31 = arith.constant 0 : index
    %c0_32 = arith.constant 0 : index
    %31 = vector.load %arg4[%c2_30, %c0_31, %c0_32] : memref<9x128x128xbf16, #tpu.memory_space<vmem>>, vector<1x128x128xbf16>
    %32 = vector.shape_cast %31 : vector<1x128x128xbf16> to vector<128x128xbf16>
    %cst_33 = arith.constant dense<0.000000e+00> : vector<256x128xf32>
    %33 = tpu.matmul %30, %32, %cst_33 {dimension_numbers = #tpu.dot_dimension_numbers<[1], [0], [0], [1], [0, 0, 1, 1], [], []>} : vector<256x128xbf16>, vector<128x128xbf16>, vector<256x128xf32> -> vector<256x128xf32>
    %34 = arith.addf %28, %33 : vector<256x128xf32>
    %c1_34 = arith.constant 1 : index
    %c0_35 = arith.constant 0 : index
    %c0_36 = arith.constant 0 : index
    %35 = vector.load %arg9[%c1_34, %c0_35, %c0_36] : memref<18x18x128xbf16, #tpu.memory_space<vmem>>, vector<16x16x128xbf16>
    %36 = vector.shape_cast %35 : vector<16x16x128xbf16> to vector<256x128xbf16>
    %c3 = arith.constant 3 : index
    %c0_37 = arith.constant 0 : index
    %c0_38 = arith.constant 0 : index
    %37 = vector.load %arg4[%c3, %c0_37, %c0_38] : memref<9x128x128xbf16, #tpu.memory_space<vmem>>, vector<1x128x128xbf16>
    %38 = vector.shape_cast %37 : vector<1x128x128xbf16> to vector<128x128xbf16>
    %cst_39 = arith.constant dense<0.000000e+00> : vector<256x128xf32>
    %39 = tpu.matmul %36, %38, %cst_39 {dimension_numbers = #tpu.dot_dimension_numbers<[1], [0], [0], [1], [0, 0, 1, 1], [], []>} : vector<256x128xbf16>, vector<128x128xbf16>, vector<256x128xf32> -> vector<256x128xf32>
    %40 = arith.addf %34, %39 : vector<256x128xf32>
    %c1_40 = arith.constant 1 : index
    %c1_41 = arith.constant 1 : index
    %c0_42 = arith.constant 0 : index
    %41 = vector.load %arg9[%c1_40, %c1_41, %c0_42] : memref<18x18x128xbf16, #tpu.memory_space<vmem>>, vector<16x16x128xbf16>
    %42 = vector.shape_cast %41 : vector<16x16x128xbf16> to vector<256x128xbf16>
    %c4 = arith.constant 4 : index
    %c0_43 = arith.constant 0 : index
    %c0_44 = arith.constant 0 : index
    %43 = vector.load %arg4[%c4, %c0_43, %c0_44] : memref<9x128x128xbf16, #tpu.memory_space<vmem>>, vector<1x128x128xbf16>
    %44 = vector.shape_cast %43 : vector<1x128x128xbf16> to vector<128x128xbf16>
    %cst_45 = arith.constant dense<0.000000e+00> : vector<256x128xf32>
    %45 = tpu.matmul %42, %44, %cst_45 {dimension_numbers = #tpu.dot_dimension_numbers<[1], [0], [0], [1], [0, 0, 1, 1], [], []>} : vector<256x128xbf16>, vector<128x128xbf16>, vector<256x128xf32> -> vector<256x128xf32>
    %46 = arith.addf %40, %45 : vector<256x128xf32>
    %c1_46 = arith.constant 1 : index
    %c2_47 = arith.constant 2 : index
    %c0_48 = arith.constant 0 : index
    %47 = vector.load %arg9[%c1_46, %c2_47, %c0_48] : memref<18x18x128xbf16, #tpu.memory_space<vmem>>, vector<16x16x128xbf16>
    %48 = vector.shape_cast %47 : vector<16x16x128xbf16> to vector<256x128xbf16>
    %c5 = arith.constant 5 : index
    %c0_49 = arith.constant 0 : index
    %c0_50 = arith.constant 0 : index
    %49 = vector.load %arg4[%c5, %c0_49, %c0_50] : memref<9x128x128xbf16, #tpu.memory_space<vmem>>, vector<1x128x128xbf16>
    %50 = vector.shape_cast %49 : vector<1x128x128xbf16> to vector<128x128xbf16>
    %cst_51 = arith.constant dense<0.000000e+00> : vector<256x128xf32>
    %51 = tpu.matmul %48, %50, %cst_51 {dimension_numbers = #tpu.dot_dimension_numbers<[1], [0], [0], [1], [0, 0, 1, 1], [], []>} : vector<256x128xbf16>, vector<128x128xbf16>, vector<256x128xf32> -> vector<256x128xf32>
    %52 = arith.addf %46, %51 : vector<256x128xf32>
    %c2_52 = arith.constant 2 : index
    %c0_53 = arith.constant 0 : index
    %c0_54 = arith.constant 0 : index
    %53 = vector.load %arg9[%c2_52, %c0_53, %c0_54] : memref<18x18x128xbf16, #tpu.memory_space<vmem>>, vector<16x16x128xbf16>
    %54 = vector.shape_cast %53 : vector<16x16x128xbf16> to vector<256x128xbf16>
    %c6 = arith.constant 6 : index
    %c0_55 = arith.constant 0 : index
    %c0_56 = arith.constant 0 : index
    %55 = vector.load %arg4[%c6, %c0_55, %c0_56] : memref<9x128x128xbf16, #tpu.memory_space<vmem>>, vector<1x128x128xbf16>
    %56 = vector.shape_cast %55 : vector<1x128x128xbf16> to vector<128x128xbf16>
    %cst_57 = arith.constant dense<0.000000e+00> : vector<256x128xf32>
    %57 = tpu.matmul %54, %56, %cst_57 {dimension_numbers = #tpu.dot_dimension_numbers<[1], [0], [0], [1], [0, 0, 1, 1], [], []>} : vector<256x128xbf16>, vector<128x128xbf16>, vector<256x128xf32> -> vector<256x128xf32>
    %58 = arith.addf %52, %57 : vector<256x128xf32>
    %c2_58 = arith.constant 2 : index
    %c1_59 = arith.constant 1 : index
    %c0_60 = arith.constant 0 : index
    %59 = vector.load %arg9[%c2_58, %c1_59, %c0_60] : memref<18x18x128xbf16, #tpu.memory_space<vmem>>, vector<16x16x128xbf16>
    %60 = vector.shape_cast %59 : vector<16x16x128xbf16> to vector<256x128xbf16>
    %c7 = arith.constant 7 : index
    %c0_61 = arith.constant 0 : index
    %c0_62 = arith.constant 0 : index
    %61 = vector.load %arg4[%c7, %c0_61, %c0_62] : memref<9x128x128xbf16, #tpu.memory_space<vmem>>, vector<1x128x128xbf16>
    %62 = vector.shape_cast %61 : vector<1x128x128xbf16> to vector<128x128xbf16>
    %cst_63 = arith.constant dense<0.000000e+00> : vector<256x128xf32>
    %63 = tpu.matmul %60, %62, %cst_63 {dimension_numbers = #tpu.dot_dimension_numbers<[1], [0], [0], [1], [0, 0, 1, 1], [], []>} : vector<256x128xbf16>, vector<128x128xbf16>, vector<256x128xf32> -> vector<256x128xf32>
    %64 = arith.addf %58, %63 : vector<256x128xf32>
    %c2_64 = arith.constant 2 : index
    %c2_65 = arith.constant 2 : index
    %c0_66 = arith.constant 0 : index
    %65 = vector.load %arg9[%c2_64, %c2_65, %c0_66] : memref<18x18x128xbf16, #tpu.memory_space<vmem>>, vector<16x16x128xbf16>
    %66 = vector.shape_cast %65 : vector<16x16x128xbf16> to vector<256x128xbf16>
    %c8 = arith.constant 8 : index
    %c0_67 = arith.constant 0 : index
    %c0_68 = arith.constant 0 : index
    %67 = vector.load %arg4[%c8, %c0_67, %c0_68] : memref<9x128x128xbf16, #tpu.memory_space<vmem>>, vector<1x128x128xbf16>
    %68 = vector.shape_cast %67 : vector<1x128x128xbf16> to vector<128x128xbf16>
    %cst_69 = arith.constant dense<0.000000e+00> : vector<256x128xf32>
    %69 = tpu.matmul %66, %68, %cst_69 {dimension_numbers = #tpu.dot_dimension_numbers<[1], [0], [0], [1], [0, 0, 1, 1], [], []>} : vector<256x128xbf16>, vector<128x128xbf16>, vector<256x128xf32> -> vector<256x128xf32>
    %70 = arith.addf %64, %69 : vector<256x128xf32>
    %c0_70 = arith.constant 0 : index
    %c0_71 = arith.constant 0 : index
    %71 = vector.load %arg5[%c0_70, %c0_71] : memref<1x128xf32, #tpu.memory_space<vmem>>, vector<1x128xf32>
    %72 = vector.broadcast %71 : vector<1x128xf32> to vector<256x128xf32>
    %73 = arith.addf %70, %72 : vector<256x128xf32>
    %cst_72 = arith.constant 0.000000e+00 : f32
    %74 = vector.broadcast %cst_72 : f32 to vector<256x128xf32>
    %75 = arith.maximumf %73, %74 : vector<256x128xf32>
    %cst_73 = arith.constant dense<0.000000e+00> : vector<128xf32>
    %76 = vector.multi_reduction <add>, %75, %cst_73 [0] : vector<256x128xf32> to vector<128xf32>
    %77 = vector.shape_cast %76 : vector<128xf32> to vector<1x128xf32>
    %78 = vector.shape_cast %77 : vector<1x128xf32> to vector<1x1x128xf32>
    %c0_74 = arith.constant 0 : index
    %c0_75 = arith.constant 0 : index
    %c0_76 = arith.constant 0 : index
    %79 = vector.load %arg7[%c0_74, %c0_75, %c0_76] : memref<1x1x128xf32, #tpu.memory_space<vmem>>, vector<1x1x128xf32>
    tpu.vector_store %arg7[%c0_74, %c0_75, %c0_76], %78 {strides = array<i32>} : memref<1x1x128xf32, #tpu.memory_space<vmem>>, vector<1x1x128xf32>,
    %80 = arith.mulf %75, %75 : vector<256x128xf32>
    %cst_77 = arith.constant dense<0.000000e+00> : vector<128xf32>
    %81 = vector.multi_reduction <add>, %80, %cst_77 [0] : vector<256x128xf32> to vector<128xf32>
    %82 = vector.shape_cast %81 : vector<128xf32> to vector<1x128xf32>
    %83 = vector.shape_cast %82 : vector<1x128xf32> to vector<1x1x128xf32>
    %c0_78 = arith.constant 0 : index
    %c0_79 = arith.constant 0 : index
    %c0_80 = arith.constant 0 : index
    %84 = vector.load %arg8[%c0_78, %c0_79, %c0_80] : memref<1x1x128xf32, #tpu.memory_space<vmem>>, vector<1x1x128xf32>
    tpu.vector_store %arg8[%c0_78, %c0_79, %c0_80], %83 {strides = array<i32>} : memref<1x1x128xf32, #tpu.memory_space<vmem>>, vector<1x1x128xf32>,
    %85 = vector.shape_cast %75 : vector<256x128xf32> to vector<1x16x16x128xf32>
    %86 = arith.truncf %85 : vector<1x16x16x128xf32> to vector<1x16x16x128xbf16>
    %c0_81 = arith.constant 0 : index
    %c0_82 = arith.constant 0 : index
    %c0_83 = arith.constant 0 : index
    %c0_84 = arith.constant 0 : index
    %87 = vector.load %arg6[%c0_81, %c0_82, %c0_83, %c0_84] : memref<1x16x16x128xbf16, #tpu.memory_space<vmem>>, vector<1x16x16x128xbf16>
    tpu.vector_store %arg6[%c0_81, %c0_82, %c0_83, %c0_84], %86 {strides = array<i32>} : memref<1x16x16x128xbf16, #tpu.memory_space<vmem>>, vector<1x16x16x128xbf16>,
    return
  }
  func.func @transform_0(%arg0: i32) -> (i32, i32, i32, i32) {
    %c0_i32 = arith.constant 0 : i32
    %c0_i32_0 = arith.constant 0 : i32
    %c0_i32_1 = arith.constant 0 : i32
    %c0_i32_2 = arith.constant 0 : i32
    return %arg0, %c0_i32, %c0_i32_0, %c0_i32_1 : i32, i32, i32, i32
  }
  func.func @transform_1(%arg0: i32) -> (i32, i32) {
    %c0_i32 = arith.constant 0 : i32
    %c0_i32_0 = arith.constant 0 : i32
    %c0_i32_1 = arith.constant 0 : i32
    return %c0_i32, %c0_i32_0 : i32, i32
  }
  func.func @transform_2(%arg0: i32) -> (i32, i32, i32) {
    %c0_i32 = arith.constant 0 : i32
    %c0_i32_0 = arith.constant 0 : i32
    %c0_i32_1 = arith.constant 0 : i32
    return %arg0, %c0_i32, %c0_i32_0 : i32, i32, i32
  }
  func.func @transform_3(%arg0: i32) -> (i32, i32, i32) {
    %c0_i32 = arith.constant 0 : i32
    %c0_i32_0 = arith.constant 0 : i32
    %c0_i32_1 = arith.constant 0 : i32
    %c0_i32_2 = arith.constant 0 : i32
    return %c0_i32, %c0_i32_0, %c0_i32_1 : i32, i32, i32
  }
  func.func @transform_4(%arg0: i32) -> (i32, i32) {
    %c0_i32 = arith.constant 0 : i32
    %c0_i32_0 = arith.constant 0 : i32
    %c0_i32_1 = arith.constant 0 : i32
    return %c0_i32, %c0_i32_0 : i32, i32
  }
  func.func @transform_5(%arg0: i32) -> (i32, i32, i32, i32) {
    %c0_i32 = arith.constant 0 : i32
    %c0_i32_0 = arith.constant 0 : i32
    %c0_i32_1 = arith.constant 0 : i32
    %c0_i32_2 = arith.constant 0 : i32
    return %arg0, %c0_i32, %c0_i32_0, %c0_i32_1 : i32, i32, i32, i32
  }
  func.func @transform_6(%arg0: i32) -> (i32, i32, i32) {
    %c0_i32 = arith.constant 0 : i32
    %c0_i32_0 = arith.constant 0 : i32
    %c0_i32_1 = arith.constant 0 : i32
    return %arg0, %c0_i32, %c0_i32_0 : i32, i32, i32
  }
  func.func @transform_7(%arg0: i32) -> (i32, i32, i32) {
    %c0_i32 = arith.constant 0 : i32
    %c0_i32_0 = arith.constant 0 : i32
    %c0_i32_1 = arith.constant 0 : i32
    return %arg0, %c0_i32, %c0_i32_0 : i32, i32, i32
  }
}

module attributes {stable_mosaic.version = 11 : i64} {
  func.func @transform_conv4x4s2_kernel(%arg0: i32, %arg1: memref<1x9x9x128xbf16, #tpu.memory_space<vmem>>, %arg2: memref<1x9x9x128xbf16, #tpu.memory_space<vmem>>, %arg3: memref<1x9x9x128xbf16, #tpu.memory_space<vmem>>, %arg4: memref<1x9x9x128xbf16, #tpu.memory_space<vmem>>, %arg5: memref<16x128x128xbf16, #tpu.memory_space<vmem>>, %arg6: memref<1x128xf32, #tpu.memory_space<vmem>>, %arg7: memref<1x8x8x128xf32, #tpu.memory_space<vmem>>) attributes {dimension_semantics = [#tpu.dimension_semantics<parallel>], iteration_bounds = array<i64: 2>, scalar_prefetch = 0 : i64, scratch_operands = 0 : i64, tpu.core_type = #tpu.core_type<tc>, window_params = [{transform_indices = @transform_0, window_bounds = array<i64: 1, 9, 9, 128>}, {transform_indices = @transform_1, window_bounds = array<i64: 1, 9, 9, 128>}, {transform_indices = @transform_2, window_bounds = array<i64: 1, 9, 9, 128>}, {transform_indices = @transform_3, window_bounds = array<i64: 1, 9, 9, 128>}, {pipeline_mode = #tpu.pipeline_mode<synchronous>, transform_indices = @transform_4, window_bounds = array<i64: 16, 128, 128>}, {pipeline_mode = #tpu.pipeline_mode<synchronous>, transform_indices = @transform_5, window_bounds = array<i64: 1, 128>}, {transform_indices = @transform_6, window_bounds = array<i64: 1, 8, 8, 128>}]} {
    %cst = arith.constant 0.000000e+00 : f32
    %0 = vector.broadcast %cst : f32 to vector<64x128xf32>
    %c0 = arith.constant 0 : index
    %c0_0 = arith.constant 0 : index
    %c0_1 = arith.constant 0 : index
    %c0_2 = arith.constant 0 : index
    %1 = vector.load %arg1[%c0, %c0_0, %c0_1, %c0_2] : memref<1x9x9x128xbf16, #tpu.memory_space<vmem>>, vector<1x8x8x128xbf16>
    %2 = vector.shape_cast %1 : vector<1x8x8x128xbf16> to vector<8x8x128xbf16>
    %3 = vector.shape_cast %2 : vector<8x8x128xbf16> to vector<64x128xbf16>
    %c0_3 = arith.constant 0 : index
    %c0_4 = arith.constant 0 : index
    %c0_5 = arith.constant 0 : index
    %4 = vector.load %arg5[%c0_3, %c0_4, %c0_5] : memref<16x128x128xbf16, #tpu.memory_space<vmem>>, vector<1x128x128xbf16>
    %5 = vector.shape_cast %4 : vector<1x128x128xbf16> to vector<128x128xbf16>
    %cst_6 = arith.constant dense<0.000000e+00> : vector<64x128xf32>
    %6 = tpu.matmul %3, %5, %cst_6 {dimension_numbers = #tpu.dot_dimension_numbers<[1], [0], [0], [1], [0, 0, 1, 1], [], []>} : vector<64x128xbf16>, vector<128x128xbf16>, vector<64x128xf32> -> vector<64x128xf32>
    %7 = arith.addf %0, %6 : vector<64x128xf32>
    %c0_7 = arith.constant 0 : index
    %c0_8 = arith.constant 0 : index
    %c0_9 = arith.constant 0 : index
    %c0_10 = arith.constant 0 : index
    %8 = vector.load %arg2[%c0_7, %c0_8, %c0_9, %c0_10] : memref<1x9x9x128xbf16, #tpu.memory_space<vmem>>, vector<1x8x8x128xbf16>
    %9 = vector.shape_cast %8 : vector<1x8x8x128xbf16> to vector<8x8x128xbf16>
    %10 = vector.shape_cast %9 : vector<8x8x128xbf16> to vector<64x128xbf16>
    %c1 = arith.constant 1 : index
    %c0_11 = arith.constant 0 : index
    %c0_12 = arith.constant 0 : index
    %11 = vector.load %arg5[%c1, %c0_11, %c0_12] : memref<16x128x128xbf16, #tpu.memory_space<vmem>>, vector<1x128x128xbf16>
    %12 = vector.shape_cast %11 : vector<1x128x128xbf16> to vector<128x128xbf16>
    %cst_13 = arith.constant dense<0.000000e+00> : vector<64x128xf32>
    %13 = tpu.matmul %10, %12, %cst_13 {dimension_numbers = #tpu.dot_dimension_numbers<[1], [0], [0], [1], [0, 0, 1, 1], [], []>} : vector<64x128xbf16>, vector<128x128xbf16>, vector<64x128xf32> -> vector<64x128xf32>
    %14 = arith.addf %7, %13 : vector<64x128xf32>
    %c0_14 = arith.constant 0 : index
    %c0_15 = arith.constant 0 : index
    %c1_16 = arith.constant 1 : index
    %c0_17 = arith.constant 0 : index
    %15 = vector.load %arg1[%c0_14, %c0_15, %c1_16, %c0_17] : memref<1x9x9x128xbf16, #tpu.memory_space<vmem>>, vector<1x8x8x128xbf16>
    %16 = vector.shape_cast %15 : vector<1x8x8x128xbf16> to vector<8x8x128xbf16>
    %17 = vector.shape_cast %16 : vector<8x8x128xbf16> to vector<64x128xbf16>
    %c2 = arith.constant 2 : index
    %c0_18 = arith.constant 0 : index
    %c0_19 = arith.constant 0 : index
    %18 = vector.load %arg5[%c2, %c0_18, %c0_19] : memref<16x128x128xbf16, #tpu.memory_space<vmem>>, vector<1x128x128xbf16>
    %19 = vector.shape_cast %18 : vector<1x128x128xbf16> to vector<128x128xbf16>
    %cst_20 = arith.constant dense<0.000000e+00> : vector<64x128xf32>
    %20 = tpu.matmul %17, %19, %cst_20 {dimension_numbers = #tpu.dot_dimension_numbers<[1], [0], [0], [1], [0, 0, 1, 1], [], []>} : vector<64x128xbf16>, vector<128x128xbf16>, vector<64x128xf32> -> vector<64x128xf32>
    %21 = arith.addf %14, %20 : vector<64x128xf32>
    %c0_21 = arith.constant 0 : index
    %c0_22 = arith.constant 0 : index
    %c1_23 = arith.constant 1 : index
    %c0_24 = arith.constant 0 : index
    %22 = vector.load %arg2[%c0_21, %c0_22, %c1_23, %c0_24] : memref<1x9x9x128xbf16, #tpu.memory_space<vmem>>, vector<1x8x8x128xbf16>
    %23 = vector.shape_cast %22 : vector<1x8x8x128xbf16> to vector<8x8x128xbf16>
    %24 = vector.shape_cast %23 : vector<8x8x128xbf16> to vector<64x128xbf16>
    %c3 = arith.constant 3 : index
    %c0_25 = arith.constant 0 : index
    %c0_26 = arith.constant 0 : index
    %25 = vector.load %arg5[%c3, %c0_25, %c0_26] : memref<16x128x128xbf16, #tpu.memory_space<vmem>>, vector<1x128x128xbf16>
    %26 = vector.shape_cast %25 : vector<1x128x128xbf16> to vector<128x128xbf16>
    %cst_27 = arith.constant dense<0.000000e+00> : vector<64x128xf32>
    %27 = tpu.matmul %24, %26, %cst_27 {dimension_numbers = #tpu.dot_dimension_numbers<[1], [0], [0], [1], [0, 0, 1, 1], [], []>} : vector<64x128xbf16>, vector<128x128xbf16>, vector<64x128xf32> -> vector<64x128xf32>
    %28 = arith.addf %21, %27 : vector<64x128xf32>
    %c0_28 = arith.constant 0 : index
    %c0_29 = arith.constant 0 : index
    %c0_30 = arith.constant 0 : index
    %c0_31 = arith.constant 0 : index
    %29 = vector.load %arg3[%c0_28, %c0_29, %c0_30, %c0_31] : memref<1x9x9x128xbf16, #tpu.memory_space<vmem>>, vector<1x8x8x128xbf16>
    %30 = vector.shape_cast %29 : vector<1x8x8x128xbf16> to vector<8x8x128xbf16>
    %31 = vector.shape_cast %30 : vector<8x8x128xbf16> to vector<64x128xbf16>
    %c4 = arith.constant 4 : index
    %c0_32 = arith.constant 0 : index
    %c0_33 = arith.constant 0 : index
    %32 = vector.load %arg5[%c4, %c0_32, %c0_33] : memref<16x128x128xbf16, #tpu.memory_space<vmem>>, vector<1x128x128xbf16>
    %33 = vector.shape_cast %32 : vector<1x128x128xbf16> to vector<128x128xbf16>
    %cst_34 = arith.constant dense<0.000000e+00> : vector<64x128xf32>
    %34 = tpu.matmul %31, %33, %cst_34 {dimension_numbers = #tpu.dot_dimension_numbers<[1], [0], [0], [1], [0, 0, 1, 1], [], []>} : vector<64x128xbf16>, vector<128x128xbf16>, vector<64x128xf32> -> vector<64x128xf32>
    %35 = arith.addf %28, %34 : vector<64x128xf32>
    %c0_35 = arith.constant 0 : index
    %c0_36 = arith.constant 0 : index
    %c0_37 = arith.constant 0 : index
    %c0_38 = arith.constant 0 : index
    %36 = vector.load %arg4[%c0_35, %c0_36, %c0_37, %c0_38] : memref<1x9x9x128xbf16, #tpu.memory_space<vmem>>, vector<1x8x8x128xbf16>
    %37 = vector.shape_cast %36 : vector<1x8x8x128xbf16> to vector<8x8x128xbf16>
    %38 = vector.shape_cast %37 : vector<8x8x128xbf16> to vector<64x128xbf16>
    %c5 = arith.constant 5 : index
    %c0_39 = arith.constant 0 : index
    %c0_40 = arith.constant 0 : index
    %39 = vector.load %arg5[%c5, %c0_39, %c0_40] : memref<16x128x128xbf16, #tpu.memory_space<vmem>>, vector<1x128x128xbf16>
    %40 = vector.shape_cast %39 : vector<1x128x128xbf16> to vector<128x128xbf16>
    %cst_41 = arith.constant dense<0.000000e+00> : vector<64x128xf32>
    %41 = tpu.matmul %38, %40, %cst_41 {dimension_numbers = #tpu.dot_dimension_numbers<[1], [0], [0], [1], [0, 0, 1, 1], [], []>} : vector<64x128xbf16>, vector<128x128xbf16>, vector<64x128xf32> -> vector<64x128xf32>
    %42 = arith.addf %35, %41 : vector<64x128xf32>
    %c0_42 = arith.constant 0 : index
    %c0_43 = arith.constant 0 : index
    %c1_44 = arith.constant 1 : index
    %c0_45 = arith.constant 0 : index
    %43 = vector.load %arg3[%c0_42, %c0_43, %c1_44, %c0_45] : memref<1x9x9x128xbf16, #tpu.memory_space<vmem>>, vector<1x8x8x128xbf16>
    %44 = vector.shape_cast %43 : vector<1x8x8x128xbf16> to vector<8x8x128xbf16>
    %45 = vector.shape_cast %44 : vector<8x8x128xbf16> to vector<64x128xbf16>
    %c6 = arith.constant 6 : index
    %c0_46 = arith.constant 0 : index
    %c0_47 = arith.constant 0 : index
    %46 = vector.load %arg5[%c6, %c0_46, %c0_47] : memref<16x128x128xbf16, #tpu.memory_space<vmem>>, vector<1x128x128xbf16>
    %47 = vector.shape_cast %46 : vector<1x128x128xbf16> to vector<128x128xbf16>
    %cst_48 = arith.constant dense<0.000000e+00> : vector<64x128xf32>
    %48 = tpu.matmul %45, %47, %cst_48 {dimension_numbers = #tpu.dot_dimension_numbers<[1], [0], [0], [1], [0, 0, 1, 1], [], []>} : vector<64x128xbf16>, vector<128x128xbf16>, vector<64x128xf32> -> vector<64x128xf32>
    %49 = arith.addf %42, %48 : vector<64x128xf32>
    %c0_49 = arith.constant 0 : index
    %c0_50 = arith.constant 0 : index
    %c1_51 = arith.constant 1 : index
    %c0_52 = arith.constant 0 : index
    %50 = vector.load %arg4[%c0_49, %c0_50, %c1_51, %c0_52] : memref<1x9x9x128xbf16, #tpu.memory_space<vmem>>, vector<1x8x8x128xbf16>
    %51 = vector.shape_cast %50 : vector<1x8x8x128xbf16> to vector<8x8x128xbf16>
    %52 = vector.shape_cast %51 : vector<8x8x128xbf16> to vector<64x128xbf16>
    %c7 = arith.constant 7 : index
    %c0_53 = arith.constant 0 : index
    %c0_54 = arith.constant 0 : index
    %53 = vector.load %arg5[%c7, %c0_53, %c0_54] : memref<16x128x128xbf16, #tpu.memory_space<vmem>>, vector<1x128x128xbf16>
    %54 = vector.shape_cast %53 : vector<1x128x128xbf16> to vector<128x128xbf16>
    %cst_55 = arith.constant dense<0.000000e+00> : vector<64x128xf32>
    %55 = tpu.matmul %52, %54, %cst_55 {dimension_numbers = #tpu.dot_dimension_numbers<[1], [0], [0], [1], [0, 0, 1, 1], [], []>} : vector<64x128xbf16>, vector<128x128xbf16>, vector<64x128xf32> -> vector<64x128xf32>
    %56 = arith.addf %49, %55 : vector<64x128xf32>
    %c0_56 = arith.constant 0 : index
    %c1_57 = arith.constant 1 : index
    %c0_58 = arith.constant 0 : index
    %c0_59 = arith.constant 0 : index
    %57 = vector.load %arg1[%c0_56, %c1_57, %c0_58, %c0_59] : memref<1x9x9x128xbf16, #tpu.memory_space<vmem>>, vector<1x8x8x128xbf16>
    %58 = vector.shape_cast %57 : vector<1x8x8x128xbf16> to vector<8x8x128xbf16>
    %59 = vector.shape_cast %58 : vector<8x8x128xbf16> to vector<64x128xbf16>
    %c8 = arith.constant 8 : index
    %c0_60 = arith.constant 0 : index
    %c0_61 = arith.constant 0 : index
    %60 = vector.load %arg5[%c8, %c0_60, %c0_61] : memref<16x128x128xbf16, #tpu.memory_space<vmem>>, vector<1x128x128xbf16>
    %61 = vector.shape_cast %60 : vector<1x128x128xbf16> to vector<128x128xbf16>
    %cst_62 = arith.constant dense<0.000000e+00> : vector<64x128xf32>
    %62 = tpu.matmul %59, %61, %cst_62 {dimension_numbers = #tpu.dot_dimension_numbers<[1], [0], [0], [1], [0, 0, 1, 1], [], []>} : vector<64x128xbf16>, vector<128x128xbf16>, vector<64x128xf32> -> vector<64x128xf32>
    %63 = arith.addf %56, %62 : vector<64x128xf32>
    %c0_63 = arith.constant 0 : index
    %c1_64 = arith.constant 1 : index
    %c0_65 = arith.constant 0 : index
    %c0_66 = arith.constant 0 : index
    %64 = vector.load %arg2[%c0_63, %c1_64, %c0_65, %c0_66] : memref<1x9x9x128xbf16, #tpu.memory_space<vmem>>, vector<1x8x8x128xbf16>
    %65 = vector.shape_cast %64 : vector<1x8x8x128xbf16> to vector<8x8x128xbf16>
    %66 = vector.shape_cast %65 : vector<8x8x128xbf16> to vector<64x128xbf16>
    %c9 = arith.constant 9 : index
    %c0_67 = arith.constant 0 : index
    %c0_68 = arith.constant 0 : index
    %67 = vector.load %arg5[%c9, %c0_67, %c0_68] : memref<16x128x128xbf16, #tpu.memory_space<vmem>>, vector<1x128x128xbf16>
    %68 = vector.shape_cast %67 : vector<1x128x128xbf16> to vector<128x128xbf16>
    %cst_69 = arith.constant dense<0.000000e+00> : vector<64x128xf32>
    %69 = tpu.matmul %66, %68, %cst_69 {dimension_numbers = #tpu.dot_dimension_numbers<[1], [0], [0], [1], [0, 0, 1, 1], [], []>} : vector<64x128xbf16>, vector<128x128xbf16>, vector<64x128xf32> -> vector<64x128xf32>
    %70 = arith.addf %63, %69 : vector<64x128xf32>
    %c0_70 = arith.constant 0 : index
    %c1_71 = arith.constant 1 : index
    %c1_72 = arith.constant 1 : index
    %c0_73 = arith.constant 0 : index
    %71 = vector.load %arg1[%c0_70, %c1_71, %c1_72, %c0_73] : memref<1x9x9x128xbf16, #tpu.memory_space<vmem>>, vector<1x8x8x128xbf16>
    %72 = vector.shape_cast %71 : vector<1x8x8x128xbf16> to vector<8x8x128xbf16>
    %73 = vector.shape_cast %72 : vector<8x8x128xbf16> to vector<64x128xbf16>
    %c10 = arith.constant 10 : index
    %c0_74 = arith.constant 0 : index
    %c0_75 = arith.constant 0 : index
    %74 = vector.load %arg5[%c10, %c0_74, %c0_75] : memref<16x128x128xbf16, #tpu.memory_space<vmem>>, vector<1x128x128xbf16>
    %75 = vector.shape_cast %74 : vector<1x128x128xbf16> to vector<128x128xbf16>
    %cst_76 = arith.constant dense<0.000000e+00> : vector<64x128xf32>
    %76 = tpu.matmul %73, %75, %cst_76 {dimension_numbers = #tpu.dot_dimension_numbers<[1], [0], [0], [1], [0, 0, 1, 1], [], []>} : vector<64x128xbf16>, vector<128x128xbf16>, vector<64x128xf32> -> vector<64x128xf32>
    %77 = arith.addf %70, %76 : vector<64x128xf32>
    %c0_77 = arith.constant 0 : index
    %c1_78 = arith.constant 1 : index
    %c1_79 = arith.constant 1 : index
    %c0_80 = arith.constant 0 : index
    %78 = vector.load %arg2[%c0_77, %c1_78, %c1_79, %c0_80] : memref<1x9x9x128xbf16, #tpu.memory_space<vmem>>, vector<1x8x8x128xbf16>
    %79 = vector.shape_cast %78 : vector<1x8x8x128xbf16> to vector<8x8x128xbf16>
    %80 = vector.shape_cast %79 : vector<8x8x128xbf16> to vector<64x128xbf16>
    %c11 = arith.constant 11 : index
    %c0_81 = arith.constant 0 : index
    %c0_82 = arith.constant 0 : index
    %81 = vector.load %arg5[%c11, %c0_81, %c0_82] : memref<16x128x128xbf16, #tpu.memory_space<vmem>>, vector<1x128x128xbf16>
    %82 = vector.shape_cast %81 : vector<1x128x128xbf16> to vector<128x128xbf16>
    %cst_83 = arith.constant dense<0.000000e+00> : vector<64x128xf32>
    %83 = tpu.matmul %80, %82, %cst_83 {dimension_numbers = #tpu.dot_dimension_numbers<[1], [0], [0], [1], [0, 0, 1, 1], [], []>} : vector<64x128xbf16>, vector<128x128xbf16>, vector<64x128xf32> -> vector<64x128xf32>
    %84 = arith.addf %77, %83 : vector<64x128xf32>
    %c0_84 = arith.constant 0 : index
    %c1_85 = arith.constant 1 : index
    %c0_86 = arith.constant 0 : index
    %c0_87 = arith.constant 0 : index
    %85 = vector.load %arg3[%c0_84, %c1_85, %c0_86, %c0_87] : memref<1x9x9x128xbf16, #tpu.memory_space<vmem>>, vector<1x8x8x128xbf16>
    %86 = vector.shape_cast %85 : vector<1x8x8x128xbf16> to vector<8x8x128xbf16>
    %87 = vector.shape_cast %86 : vector<8x8x128xbf16> to vector<64x128xbf16>
    %c12 = arith.constant 12 : index
    %c0_88 = arith.constant 0 : index
    %c0_89 = arith.constant 0 : index
    %88 = vector.load %arg5[%c12, %c0_88, %c0_89] : memref<16x128x128xbf16, #tpu.memory_space<vmem>>, vector<1x128x128xbf16>
    %89 = vector.shape_cast %88 : vector<1x128x128xbf16> to vector<128x128xbf16>
    %cst_90 = arith.constant dense<0.000000e+00> : vector<64x128xf32>
    %90 = tpu.matmul %87, %89, %cst_90 {dimension_numbers = #tpu.dot_dimension_numbers<[1], [0], [0], [1], [0, 0, 1, 1], [], []>} : vector<64x128xbf16>, vector<128x128xbf16>, vector<64x128xf32> -> vector<64x128xf32>
    %91 = arith.addf %84, %90 : vector<64x128xf32>
    %c0_91 = arith.constant 0 : index
    %c1_92 = arith.constant 1 : index
    %c0_93 = arith.constant 0 : index
    %c0_94 = arith.constant 0 : index
    %92 = vector.load %arg4[%c0_91, %c1_92, %c0_93, %c0_94] : memref<1x9x9x128xbf16, #tpu.memory_space<vmem>>, vector<1x8x8x128xbf16>
    %93 = vector.shape_cast %92 : vector<1x8x8x128xbf16> to vector<8x8x128xbf16>
    %94 = vector.shape_cast %93 : vector<8x8x128xbf16> to vector<64x128xbf16>
    %c13 = arith.constant 13 : index
    %c0_95 = arith.constant 0 : index
    %c0_96 = arith.constant 0 : index
    %95 = vector.load %arg5[%c13, %c0_95, %c0_96] : memref<16x128x128xbf16, #tpu.memory_space<vmem>>, vector<1x128x128xbf16>
    %96 = vector.shape_cast %95 : vector<1x128x128xbf16> to vector<128x128xbf16>
    %cst_97 = arith.constant dense<0.000000e+00> : vector<64x128xf32>
    %97 = tpu.matmul %94, %96, %cst_97 {dimension_numbers = #tpu.dot_dimension_numbers<[1], [0], [0], [1], [0, 0, 1, 1], [], []>} : vector<64x128xbf16>, vector<128x128xbf16>, vector<64x128xf32> -> vector<64x128xf32>
    %98 = arith.addf %91, %97 : vector<64x128xf32>
    %c0_98 = arith.constant 0 : index
    %c1_99 = arith.constant 1 : index
    %c1_100 = arith.constant 1 : index
    %c0_101 = arith.constant 0 : index
    %99 = vector.load %arg3[%c0_98, %c1_99, %c1_100, %c0_101] : memref<1x9x9x128xbf16, #tpu.memory_space<vmem>>, vector<1x8x8x128xbf16>
    %100 = vector.shape_cast %99 : vector<1x8x8x128xbf16> to vector<8x8x128xbf16>
    %101 = vector.shape_cast %100 : vector<8x8x128xbf16> to vector<64x128xbf16>
    %c14 = arith.constant 14 : index
    %c0_102 = arith.constant 0 : index
    %c0_103 = arith.constant 0 : index
    %102 = vector.load %arg5[%c14, %c0_102, %c0_103] : memref<16x128x128xbf16, #tpu.memory_space<vmem>>, vector<1x128x128xbf16>
    %103 = vector.shape_cast %102 : vector<1x128x128xbf16> to vector<128x128xbf16>
    %cst_104 = arith.constant dense<0.000000e+00> : vector<64x128xf32>
    %104 = tpu.matmul %101, %103, %cst_104 {dimension_numbers = #tpu.dot_dimension_numbers<[1], [0], [0], [1], [0, 0, 1, 1], [], []>} : vector<64x128xbf16>, vector<128x128xbf16>, vector<64x128xf32> -> vector<64x128xf32>
    %105 = arith.addf %98, %104 : vector<64x128xf32>
    %c0_105 = arith.constant 0 : index
    %c1_106 = arith.constant 1 : index
    %c1_107 = arith.constant 1 : index
    %c0_108 = arith.constant 0 : index
    %106 = vector.load %arg4[%c0_105, %c1_106, %c1_107, %c0_108] : memref<1x9x9x128xbf16, #tpu.memory_space<vmem>>, vector<1x8x8x128xbf16>
    %107 = vector.shape_cast %106 : vector<1x8x8x128xbf16> to vector<8x8x128xbf16>
    %108 = vector.shape_cast %107 : vector<8x8x128xbf16> to vector<64x128xbf16>
    %c15 = arith.constant 15 : index
    %c0_109 = arith.constant 0 : index
    %c0_110 = arith.constant 0 : index
    %109 = vector.load %arg5[%c15, %c0_109, %c0_110] : memref<16x128x128xbf16, #tpu.memory_space<vmem>>, vector<1x128x128xbf16>
    %110 = vector.shape_cast %109 : vector<1x128x128xbf16> to vector<128x128xbf16>
    %cst_111 = arith.constant dense<0.000000e+00> : vector<64x128xf32>
    %111 = tpu.matmul %108, %110, %cst_111 {dimension_numbers = #tpu.dot_dimension_numbers<[1], [0], [0], [1], [0, 0, 1, 1], [], []>} : vector<64x128xbf16>, vector<128x128xbf16>, vector<64x128xf32> -> vector<64x128xf32>
    %112 = arith.addf %105, %111 : vector<64x128xf32>
    %c0_112 = arith.constant 0 : index
    %c0_113 = arith.constant 0 : index
    %113 = vector.load %arg6[%c0_112, %c0_113] : memref<1x128xf32, #tpu.memory_space<vmem>>, vector<1x128xf32>
    %114 = vector.broadcast %113 : vector<1x128xf32> to vector<64x128xf32>
    %115 = arith.addf %112, %114 : vector<64x128xf32>
    %116 = vector.shape_cast %115 : vector<64x128xf32> to vector<1x8x8x128xf32>
    %c0_114 = arith.constant 0 : index
    %c0_115 = arith.constant 0 : index
    %c0_116 = arith.constant 0 : index
    %c0_117 = arith.constant 0 : index
    %117 = vector.load %arg7[%c0_114, %c0_115, %c0_116, %c0_117] : memref<1x8x8x128xf32, #tpu.memory_space<vmem>>, vector<1x8x8x128xf32>
    tpu.vector_store %arg7[%c0_114, %c0_115, %c0_116, %c0_117], %116 {strides = array<i32>} : memref<1x8x8x128xf32, #tpu.memory_space<vmem>>, vector<1x8x8x128xf32>,
    return
  }
  func.func @transform_0(%arg0: i32) -> (i32, i32, i32, i32) {
    %c0_i32 = arith.constant 0 : i32
    %c0_i32_0 = arith.constant 0 : i32
    %c0_i32_1 = arith.constant 0 : i32
    %c0_i32_2 = arith.constant 0 : i32
    return %arg0, %c0_i32, %c0_i32_0, %c0_i32_1 : i32, i32, i32, i32
  }
  func.func @transform_1(%arg0: i32) -> (i32, i32, i32, i32) {
    %c0_i32 = arith.constant 0 : i32
    %c0_i32_0 = arith.constant 0 : i32
    %c0_i32_1 = arith.constant 0 : i32
    %c0_i32_2 = arith.constant 0 : i32
    return %arg0, %c0_i32, %c0_i32_0, %c0_i32_1 : i32, i32, i32, i32
  }
  func.func @transform_2(%arg0: i32) -> (i32, i32, i32, i32) {
    %c0_i32 = arith.constant 0 : i32
    %c0_i32_0 = arith.constant 0 : i32
    %c0_i32_1 = arith.constant 0 : i32
    %c0_i32_2 = arith.constant 0 : i32
    return %arg0, %c0_i32, %c0_i32_0, %c0_i32_1 : i32, i32, i32, i32
  }
  func.func @transform_3(%arg0: i32) -> (i32, i32, i32, i32) {
    %c0_i32 = arith.constant 0 : i32
    %c0_i32_0 = arith.constant 0 : i32
    %c0_i32_1 = arith.constant 0 : i32
    %c0_i32_2 = arith.constant 0 : i32
    return %arg0, %c0_i32, %c0_i32_0, %c0_i32_1 : i32, i32, i32, i32
  }
  func.func @transform_4(%arg0: i32) -> (i32, i32, i32) {
    %c0_i32 = arith.constant 0 : i32
    %c0_i32_0 = arith.constant 0 : i32
    %c0_i32_1 = arith.constant 0 : i32
    %c0_i32_2 = arith.constant 0 : i32
    return %c0_i32, %c0_i32_0, %c0_i32_1 : i32, i32, i32
  }
  func.func @transform_5(%arg0: i32) -> (i32, i32) {
    %c0_i32 = arith.constant 0 : i32
    %c0_i32_0 = arith.constant 0 : i32
    %c0_i32_1 = arith.constant 0 : i32
    return %c0_i32, %c0_i32_0 : i32, i32
  }
  func.func @transform_6(%arg0: i32) -> (i32, i32, i32, i32) {
    %c0_i32 = arith.constant 0 : i32
    %c0_i32_0 = arith.constant 0 : i32
    %c0_i32_1 = arith.constant 0 : i32
    %c0_i32_2 = arith.constant 0 : i32
    return %arg0, %c0_i32, %c0_i32_0, %c0_i32_1 : i32, i32, i32, i32
  }
}

</mosaic_0001>

<bundles_post_ra>
// kernel: block_forward.5
= control target key start
LH: loop header
LB: loop body
LE: loop exit
PB: predicated region body
PF: predicated region fallthrough
CT: control target
= control target key end

     0   :  { %s5364_s21 = smov 0   ;;  %s6283_s0 = inlined_call_operand.vmem [shape: bf16[2,9,9,128], index: 0, kind: input, shape index: {}]   ;;  %s6284_s1 = inlined_call_operand.vmem [shape: bf16[2,9,9,128], index: 1, kind: input, shape index: {}]   ;;  %s6285_s2 = inlined_call_operand.vmem [shape: bf16[2,9,9,128], index: 2, kind: input, shape index: {}]   ;;  %s6286_s3 = inlined_call_operand.vmem [shape: bf16[2,9,9,128], index: 3, kind: input, shape index: {}]   ;;  %s6287_s4 = inlined_call_operand.vmem [shape: bf16[16,128,128], index: 4, kind: input, shape index: {}]   ;;  %s6288_s5 = inlined_call_operand.vmem [shape: f32[1,128], index: 5, kind: input, shape index: {}]   ;;  %s6289_s6 = inlined_call_operand.vmem [shape: f32[2,8,8,128], index: 6, kind: output, shape index: {}]  }
   0x1 LB: > { %s4033_s22 = sadd.s32 4294967295, %s5327_s21   ;;  %p4037_p0 = scmp.ge.s32.totalorder %s5327_s21, 1  ;;  %s5327_s21 = sphi %s5364_s21, %s16_s21  }
   0x2   : > { %p242_p1 = scmp.lt.s32.totalorder %s5327_s21, 3 }
   0x4   : > { %p243_p2 = pnand %p4037_p0, %p242_p1 }
   0x6   : > { %246 = sbr.rel (%p243_p2) target bundleno = 495 (0x1ef), region = 44 }
   0xb   : > { %v5161_v0 = vld [vmem:[%s6287_s4 + $0x78] sm:$0xff]   ;;  %p287_p3 = scmp.lt.s32.totalorder %s4033_s22, 1  ;;  %v5163_v2 = vld [vmem:[%s6287_s4 + $0x70] sm:$0xff]   ;;  %v5165_v4 = vld [vmem:[%s6287_s4 + $0x68] sm:$0xff]   ;;  %vm652_vm0 = vsmask.f32 3328 }
   0xc   : > { %v5162_v1 = vld [vmem:[%s6287_s4 + $0x38] sm:$0xff]   ;;  %4768 = vmatprep.subr.bf16.mxu0 %v5161_v0  ;;  %v5164_v3 = vld [vmem:[%s6287_s4 + $0x30] sm:$0xff]   ;;  %v5166_v5 = vld [vmem:[%s6287_s4 + $0x28] sm:$0xff]   ;;  %vm653_vm1 = vsmask.f32 7440 }
   0xd   : > { %4792 = vmatprep.subr.bf16.mxu1 %v5162_v1  ;;  %4769 = vmatpush3.bf16.msra.mxu0 %v5161_v0  ;;  %s6321_s22 = smov (!%p287_p3, %s4033_s22), 1  ;;  %v5167_v6 = vld [vmem:[%s6287_s4 + $0x60] sm:$0xff]   ;;  %v5169_v8 = vld [vmem:[%s6287_s4 + $0x58] sm:$0xff]   ;;  %v5171_v10 = vld [vmem:[%s6287_s4 + $0x50] sm:$0xff]  }
   0xe   : > { %4793 = vmatpush3.bf16.msra.mxu1 %v5162_v1  ;;  %4770 = vmatprep.subr.bf16.mxu0 %v5163_v2  ;;  %v5168_v7 = vld [vmem:[%s6287_s4 + $0x20] sm:$0xff]   ;;  %s5399_s15 = smul.u32 72, %s6321_s22  ;;  %v5170_v9 = vld [vmem:[%s6287_s4 + $0x18] sm:$0xff]   ;;  %v5172_v11 = vld [vmem:[%s6287_s4 + $0x10] sm:$0xff]  }
   0xf   : > { %4794 = vmatprep.subr.bf16.mxu1 %v5164_v3  ;;  %v5173_v14 = vld [vmem:[%s6287_s4 + $0x48] sm:$0xff]   ;;  %v5175_v16 = vld [vmem:[%s6287_s4 + $0x40] sm:$0xff]   ;;  %v5181_v19 = vld [vmem:[%s6287_s4 + $0xb8] sm:$0xff]  }
  0x10   : > { %s5411_s24 = scalar_lea.vmem %s6284_s1, %s5399_s15  ;;  %s5420_s29 = scalar_lea.vmem %s6283_s0, %s5399_s15  ;;  %v5174_v15 = vld [vmem:[%s6287_s4 + $0x8] sm:$0xff]   ;;  %v5176_v17 = vld [vmem:[%s6287_s4] sm:$0xff]   ;;  %v5182_v20 = vld [vmem:[%s6287_s4 + $0xf8] sm:$0xff]  }
  0x11   : > { %4771 = vmatpush3.bf16.msra.mxu0 %v5163_v2  ;;  %v5177_v12 = vld [vmem:[%s5411_s24] ss:$8 sps:$4 sm:$0xff]   ;;  %v5179_v18 = vld [vmem:[%s5411_s24 + $0x10] ss:$8 sps:$4 sm:$0xff]   ;;  %v637_v33 = vld [vmem:[%s5420_s29 + $0x4] sm:$0x1]  ;;  %s5599_s18 = scalar_lea.vmem %s6285_s2, %s5399_s15  ;;  %s5605_s23 = scalar_lea.vmem %s6286_s3, %s5399_s15 }
  0x12   : > { %4795 = vmatpush3.bf16.msra.mxu1 %v5164_v3  ;;  %4772 = vmatprep.subr.bf16.mxu0 %v5165_v4  ;;  %v5178_v13 = vld [vmem:[%s5420_s29] ss:$8 sps:$4 sm:$0xff]   ;;  %v5180_v21 = vld [vmem:[%s5420_s29 + $0x10] ss:$8 sps:$4 sm:$0xff]   ;;  %v639_v35 = vld [vmem:[%s5420_s29 + $0xc] sm:$0x1] }
  0x13   : > { %4796 = vmatprep.subr.bf16.mxu1 %v5166_v5  ;;  %4784 = vmatprep.mubr.bf16.mxu0 %v5177_v12  ;;  %v5183_v22 = vld [vmem:[%s6287_s4 + $0xb0] sm:$0xff]   ;;  %v5191_v24 = vld [vmem:[%s5411_s24 + $0x20] ss:$8 sps:$4 sm:$0xff]   ;;  %v5189_v36 = vld [vmem:[%s6287_s4 + $0x98] sm:$0xff]   ;;  %v665_v39 = vshll.u32 %v637_v33, 16  ;;  %v679_v43 = vshll.u32 %v639_v35, 16 }
  0x14   : > { %4808 = vmatprep.mubr.bf16.mxu1 %v5178_v13  ;;  %v5184_v23 = vld [vmem:[%s6287_s4 + $0xf0] sm:$0xff]   ;;  %v5192_v25 = vld [vmem:[%s5420_s29 + $0x20] ss:$8 sps:$4 sm:$0xff]   ;;  %v922_v44 = vld [vmem:[%s5411_s24 + $0x4] sm:$0x1] }
  0x15   : > { %4773 = vmatpush3.bf16.msra.mxu0 %v5165_v4  ;;  %v5185_v26 = vld [vmem:[%s6287_s4 + $0xa8] sm:$0xff]   ;;  %v5187_v28 = vld [vmem:[%s6287_s4 + $0xa0] sm:$0xff]   ;;  %v5193_v29 = vld [vmem:[%s5411_s24 + $0x30] ss:$8 sps:$4 sm:$0xff]   ;;  %v667_v48 = vrot.slane %v665_v39, 5  ;;  %v681_v53 = vrot.slane %v679_v43, 5 }
  0x16   : > { %4797 = vmatpush3.bf16.msra.mxu1 %v5166_v5  ;;  %4774 = vmatprep.subr.bf16.mxu0 %v5167_v6  ;;  %v5186_v27 = vld [vmem:[%s6287_s4 + $0xe8] sm:$0xff]   ;;  %v5188_v30 = vld [vmem:[%s6287_s4 + $0xe0] sm:$0xff]   ;;  %v5194_v31 = vld [vmem:[%s5420_s29 + $0x30] ss:$8 sps:$4 sm:$0xff]   ;;  %v947_v57 = vshll.u32 %v922_v44, 16 }
  0x17   : > { %4798 = vmatprep.subr.bf16.mxu1 %v5168_v7  ;;  %v636_v32 = vld [vmem:[%s5420_s29] sm:$0xf]  ;;  %v638_v34 = vld [vmem:[%s5420_s29 + $0x8] sm:$0xf]  ;;  %v924_v50 = vld [vmem:[%s5411_s24 + $0xc] sm:$0x1] }
  0x18   : > { %v656_v37 = vshrl.u32 %v636_v32, 16  ;;  %v659_v38 = vshll.u32 %v636_v32, 16  ;;  %v670_v40 = vshrl.u32 %v638_v34, 16  ;;  %v921_v41 = vld [vmem:[%s5411_s24] sm:$0xf]  ;;  %v673_v42 = vshll.u32 %v638_v34, 16  ;;  %vm5489_vm2 = vmor %vm652_vm0, %vm653_vm1 }
  0x19   : > { %4775 = vmatpush3.bf16.msra.mxu0 %v5167_v6  ;;  %v923_v45 = vld [vmem:[%s5411_s24 + $0x8] sm:$0xf]  ;;  %v5190_v51 = vld [vmem:[%s6287_s4 + $0xd8] sm:$0xff]   ;;  %v938_v54 = vshrl.u32 %v921_v41, 16  ;;  %v941_v55 = vshll.u32 %v921_v41, 16  ;;  %v5195_v61 = vld [vmem:[%s6287_s4 + $0x90] sm:$0xff]  }
  0x1a   : > { %4799 = vmatpush3.bf16.msra.mxu1 %v5168_v7  ;;  %4776 = vmatprep.subr.bf16.mxu0 %v5169_v8  ;;  %v658_v46 = vrot.slane %v656_v37, 4  ;;  %v661_v47 = vrot.slane %v659_v38, 5  ;;  %v672_v49 = vrot.slane %v670_v40, 4  ;;  %v675_v52 = vrot.slane %v673_v42, 5  ;;  %v640_v60 = vld [vmem:[%s5420_s29 + $0x10] sm:$0xf] }
  0x1b   : > { %4800 = vmatprep.subr.bf16.mxu1 %v5170_v9  ;;  %v952_v58 = vshrl.u32 %v923_v45, 16  ;;  %v955_v59 = vshll.u32 %v923_v45, 16  ;;  %v940_v0 = vrot.slane %v938_v54, 4  ;;  %v943_v1 = vrot.slane %v941_v55, 5  ;;  %v641_v3 = vld [vmem:[%s5420_s29 + $0x14] sm:$0x1] }
  0x1c   : > { %v662_v56 = vor.u32 %v661_v47, %v658_v46  ;;  %v676_v63 = vor.u32 %v675_v52, %v672_v49  ;;  %v961_v2 = vshll.u32 %v924_v50, 16  ;;  %v949_v5 = vrot.slane %v947_v57, 5  ;;  %v643_v13 = vld [vmem:[%s5420_s29 + $0x1c] sm:$0x1]  ;;  %v5198_v32 = vld [vmem:[%s6287_s4 + $0xc8] sm:$0xff]   ;;  %v5199_v41 = vld [vmem:[%s6287_s4 + $0x80] sm:$0xff]  }
  0x1d   : > { %4777 = vmatpush3.bf16.msra.mxu0 %v5169_v8  ;;  %v954_v6 = vrot.slane %v952_v58, 4  ;;  %v957_v7 = vrot.slane %v955_v59, 5  ;;  %v642_v8 = vld [vmem:[%s5420_s29 + $0x18] sm:$0xf]  ;;  %v5200_v49 = vld [vmem:[%s6287_s4 + $0xc0] sm:$0xff]  }
  0x1e   : > { %4801 = vmatpush3.bf16.msra.mxu1 %v5170_v9  ;;  %4778 = vmatprep.subr.bf16.mxu0 %v5171_v10  ;;  %v663_v4 = vrot.slane %v662_v56, 4  ;;  %v5196_v9 = vld [vmem:[%s6287_s4 + $0xd0] sm:$0xff]   ;;  %v963_v12 = vrot.slane %v961_v2, 5  ;;  %v701_v35 = vshll.u32 %v642_v8, 16  ;;  %v5201_v58 = vld [vmem:[%s6287_s4 + $0x138] sm:$0xff]  }
  0x1f   : > { %4802 = vmatprep.subr.bf16.mxu1 %v5172_v11  ;;  %v644_v59 = vld [vmem:[%s5420_s29 + $0x20] sm:$0xf] }
  0x20   : > { %v703_v43 = vrot.slane %v701_v35, 5 }
  0x21   : > { %4779 = vmatpush3.bf16.msra.mxu0 %v5171_v10  ;;  %v677_v10 = vrot.slane %v676_v63, 4 }
  0x22   : > { %4803 = vmatpush3.bf16.msra.mxu1 %v5172_v11  ;;  %4780 = vmatprep.subr.bf16.mxu0 %v5173_v14  ;;  %v944_v11 = vor.u32 %v943_v1, %v940_v0  ;;  %v645_v0 = vld [vmem:[%s5420_s29 + $0x24] sm:$0x1]  ;;  %v712_v1 = vshrl.u32 %v644_v59, 16 }
  0x23   : > { %4804 = vmatprep.subr.bf16.mxu1 %v5174_v15 }
  0x25   : > { %4781 = vmatpush3.bf16.msra.mxu0 %v5173_v14  ;;  %v684_v14 = vshrl.u32 %v640_v60, 16 }
  0x26   : > { %4805 = vmatpush3.bf16.msra.mxu1 %v5174_v15  ;;  %4782 = vmatprep.subr.bf16.mxu0 %v5175_v16  ;;  %v668_v15 = vsel %vm5489_vm2, %v663_v4, %v667_v48  ;;  %v647_v4 = vld [vmem:[%s5420_s29 + $0x2c] sm:$0x1] }
  0x27   : > { %4806 = vmatprep.subr.bf16.mxu1 %v5176_v17 }
  0x29   : > { %4783 = vmatpush3.bf16.msra.mxu0 %v5175_v16  ;;  %v958_v16 = vor.u32 %v957_v7, %v954_v6 }
  0x2a   : > { %4807 = vmatpush3.bf16.msra.mxu1 %v5176_v17  ;;  %4816 = vmatprep.subr.bf16.mxu0 %v5181_v19  ;;  %v687_v17 = vshll.u32 %v640_v60, 16 }
  0x2b   : > { %4840 = vmatprep.subr.bf16.mxu1 %v5182_v20 }
  0x2c   : > { %4785 = vmatmul.mubr.bf16.vlgmr.msra.gmra.mxu0 %v5179_v18  ;;  %v693_v18 = vshll.u32 %v641_v3, 16  ;;  %v646_v3 = vld [vmem:[%s5420_s29 + $0x28] sm:$0xf] }
  0x2d   : > { %4809 = vmatmul.mubr.bf16.vlgmr.msra.gmra.mxu1 %v5180_v21  ;;  %4817 = vmatpush3.bf16.msra.mxu0 %v5181_v19  ;;  %v925_v19 = vld [vmem:[%s5411_s24 + $0x10] sm:$0xf]  ;;  %v682_v21 = vsel %vm5489_vm2, %v677_v10, %v681_v53  ;;  %v721_v10 = vshll.u32 %v645_v0, 16 }
  0x2e   : > { %4841 = vmatpush3.bf16.msra.mxu1 %v5182_v20  ;;  %4818 = vmatprep.subr.bf16.mxu0 %v5183_v22  ;;  %v926_v20 = vld [vmem:[%s5411_s24 + $0x14] sm:$0x1]  ;;  %v966_v39 = vshrl.u32 %v925_v19, 16  ;;  %v969_v40 = vshll.u32 %v925_v19, 16 }
  0x2f   : > { %4842 = vmatprep.subr.bf16.mxu1 %v5184_v23  ;;  %4788 = vmatprep.mubr.bf16.mxu0 %v5191_v24  ;;  %v698_v24 = vshrl.u32 %v642_v8, 16  ;;  %v975_v44 = vshll.u32 %v926_v20, 16  ;;  %v5202_v8 = vld [vmem:[%s6287_s4 + $0x178] sm:$0xff]   ;;  %v723_v19 = vrot.slane %v721_v10, 5  ;;  %v729_v20 = vshll.u32 %v646_v3, 16 }
  0x30   : > { %4812 = vmatprep.mubr.bf16.mxu1 %v5192_v25  ;;  %v927_v25 = vld [vmem:[%s5411_s24 + $0x18] sm:$0xf]  ;;  %v968_v46 = vrot.slane %v966_v39, 4  ;;  %v971_v47 = vrot.slane %v969_v40, 5 }
  0x31   : > { %4819 = vmatpush3.bf16.msra.mxu0 %v5183_v22  ;;  %v945_v22 = vrot.slane %v944_v11, 4  ;;  %v700_v34 = vrot.slane %v698_v24, 4  ;;  %v980_v48 = vshrl.u32 %v927_v25, 16  ;;  %v983_v52 = vshll.u32 %v927_v25, 16  ;;  %v648_v11 = vld [vmem:[%s5420_s29 + $0x30] sm:$0xf] }
  0x32   : > { %4843 = vmatpush3.bf16.msra.mxu1 %v5184_v23  ;;  %4820 = vmatprep.subr.bf16.mxu0 %v5185_v26  ;;  %v686_v23 = vrot.slane %v684_v14, 4  ;;  %v972_v55 = vor.u32 %v971_v47, %v968_v46  ;;  %v977_v56 = vrot.slane %v975_v44, 5  ;;  %v930_v46 = vld [vmem:[%s5411_s24 + $0x24] sm:$0x1]  ;;  %v931_v47 = vld [vmem:[%s5411_s24 + $0x28] sm:$0xf] }
  0x33   : > { %4844 = vmatprep.subr.bf16.mxu1 %v5186_v27  ;;  %v950_v33 = vsel %vm5489_vm2, %v945_v22, %v949_v5  ;;  %v704_v50 = vor.u32 %v703_v43, %v700_v34  ;;  %v982_v57 = vrot.slane %v980_v48, 4  ;;  %v715_v5 = vshll.u32 %v644_v59, 16  ;;  %v651_v22 = vld [vmem:[%s5420_s29 + $0x3c] sm:$0x1]  ;;  %v5207_v59 = vld [vmem:[%s6287_s4 + $0x120] sm:$0xff]  }
  0x34   : > { %4789 = vmatmul.mubr.bf16.gmra.mxu0 %v5193_v29  ;;  %v689_v29 = vrot.slane %v687_v17, 5  ;;  %v973_v2 = vrot.slane %v972_v55, 4  ;;  %v650_v17 = vld [vmem:[%s5420_s29 + $0x38] sm:$0xf]  ;;  %v1008_v0 = vshrl.u32 %v931_v47, 16 }
  0x35   : > { %4821 = vmatpush3.bf16.msra.mxu0 %v5185_v26  ;;  %4813 = vmatmul.mubr.bf16.gmra.mxu1 %v5194_v31  ;;  %v5197_v26 = vld [vmem:[%s6287_s4 + $0x88] sm:$0xff]   ;;  %v928_v31 = vld [vmem:[%s5411_s24 + $0x1c] sm:$0x1]  ;;  %v705_v60 = vrot.slane %v704_v50, 4  ;;  %v717_v14 = vrot.slane %v715_v5, 5  ;;  %v754_v39 = vshrl.u32 %v650_v17, 16 }
  0x36   : > { %4845 = vmatpush3.bf16.msra.mxu1 %v5186_v27  ;;  %4822 = vmatprep.subr.bf16.mxu0 %v5187_v28  ;;  %v4100_v27 = vcombine.low %v668_v15, %v682_v21  ;;  %v690_v38 = vor.u32 %v689_v29, %v686_v23  ;;  %v989_v53 = vshll.u32 %v928_v31, 16  ;;  %v726_v15 = vshrl.u32 %v646_v3, 16  ;;  %v5203_v23 = vld [vmem:[%s6287_s4 + $0x130] sm:$0xff]  }
  0x37   : > { %4846 = vmatprep.subr.bf16.mxu1 %v5188_v30  ;;  %v735_v21 = vshll.u32 %v647_v4, 16  ;;  %v731_v29 = vrot.slane %v729_v20, 5  ;;  %v757_v40 = vshll.u32 %v650_v17, 16  ;;  %v756_v50 = vrot.slane %v754_v39, 4 }
  0x38   : > { %4832 = vmatprep.mubr.bf16.mxu0 %v4100_v27  ;;  %v691_v45 = vrot.slane %v690_v38, 4  ;;  %v991_v63 = vrot.slane %v989_v53, 5  ;;  %v728_v25 = vrot.slane %v726_v15, 4  ;;  %v743_v27 = vshll.u32 %v648_v11, 16 }
  0x39   : > { %4823 = vmatpush3.bf16.msra.mxu0 %v5187_v28  ;;  %v959_v28 = vrot.slane %v958_v16, 4  ;;  %v649_v16 = vld [vmem:[%s5420_s29 + $0x34] sm:$0x1]  ;;  %v1010_v10 = vrot.slane %v1008_v0, 4  ;;  %v5228_v0 = vld [vmem:[%s6287_s4 + $0x1e8] sm:$0xff]  }
  0x3a   : > { %4847 = vmatpush3.bf16.msra.mxu1 %v5188_v30  ;;  %4824 = vmatprep.subr.bf16.mxu0 %v5189_v36  ;;  %v695_v30 = vrot.slane %v693_v18, 5  ;;  %v749_v31 = vshll.u32 %v649_v16, 16 }
  0x3b   : > { %4848 = vmatprep.subr.bf16.mxu1 %v5190_v51  ;;  %v964_v37 = vsel %vm5489_vm2, %v959_v28, %v963_v12 }
  0x3c   : > { %v4128_v42 = vcombine.low %v950_v33, %v964_v37  ;;  %v696_v54 = vsel %vm5489_vm2, %v691_v45, %v695_v30  ;;  %v737_v30 = vrot.slane %v735_v21, 5  ;;  %v5204_v33 = vld [vmem:[%s6287_s4 + $0x170] sm:$0xff]   ;;  %v732_v37 = vor.u32 %v731_v29, %v728_v25  ;;  %v5210_v29 = vld [vmem:[%s6287_s4 + $0x158] sm:$0xff]  }
  0x3d   : > { %4825 = vmatpush3.bf16.msra.mxu0 %v5189_v36  ;;  %v707_v36 = vshll.u32 %v643_v13, 16  ;;  %v978_v13 = vsel %vm5489_vm2, %v973_v2, %v977_v56  ;;  %v751_v38 = vrot.slane %v749_v31, 5  ;;  %v763_v45 = vshll.u32 %v651_v22, 16  ;;  %v932_v56 = vld [vmem:[%s5411_s24 + $0x2c] sm:$0x1]  ;;  %v5209_v22 = vld [vmem:[%s6287_s4 + $0x118] sm:$0xff]  }
  0x3e   : > { %4849 = vmatpush3.bf16.msra.mxu1 %v5190_v51  ;;  %4826 = vmatprep.subr.bf16.mxu0 %v5195_v61  ;;  %v934_v2 = vld [vmem:[%s5411_s24 + $0x34] sm:$0x1] }
  0x3f   : > { %4850 = vmatprep.subr.bf16.mxu1 %v5196_v9  ;;  %4856 = vmatprep.mubr.bf16.mxu1 %v4128_v42  ;;  %v709_v51 = vrot.slane %v707_v36, 5  ;;  %v745_v36 = vrot.slane %v743_v27, 5  ;;  %v929_v42 = vld [vmem:[%s5411_s24 + $0x20] sm:$0xf]  ;;  %v765_v55 = vrot.slane %v763_v45, 5  ;;  %v1031_v17 = vshll.u32 %v934_v2, 16 }
  0x40   : > { %v994_v48 = vshrl.u32 %v929_v42, 16  ;;  %v997_v53 = vshll.u32 %v929_v42, 16  ;;  %v5213_v45 = vld [vmem:[%s6287_s4 + $0x108] sm:$0xff]   ;;  %v5231_v2 = vld [vmem:[%s6287_s4 + $0x1a0] sm:$0xff]  }
  0x41   : > { %4827 = vmatpush3.bf16.msra.mxu0 %v5195_v61  ;;  %v985_v61 = vrot.slane %v983_v52, 5  ;;  %v710_v6 = vsel %vm5489_vm2, %v705_v60, %v709_v51  ;;  %v759_v51 = vrot.slane %v757_v40, 5  ;;  %v5206_v52 = vld [vmem:[%s6287_s4 + $0x168] sm:$0xff]   ;;  %v5212_v40 = vld [vmem:[%s6287_s4 + $0x150] sm:$0xff]  }
  0x42   : > { %4851 = vmatpush3.bf16.msra.mxu1 %v5196_v9  ;;  %4828 = vmatprep.subr.bf16.mxu0 %v5197_v26  ;;  %v714_v9 = vrot.slane %v712_v1, 4  ;;  %v4101_v12 = vcombine.low %v696_v54, %v710_v6  ;;  %v933_v1 = vld [vmem:[%s5411_s24 + $0x30] sm:$0xf]  ;;  %v1011_v6 = vshll.u32 %v931_v47, 16 }
  0x43   : > { %4852 = vmatprep.subr.bf16.mxu1 %v5198_v32  ;;  %v986_v7 = vor.u32 %v985_v61, %v982_v57  ;;  %v996_v57 = vrot.slane %v994_v48, 4  ;;  %v760_v61 = vor.u32 %v759_v51, %v756_v50  ;;  %v1022_v15 = vshrl.u32 %v933_v1, 16  ;;  %v5218_v48 = vld [vmem:[%s5605_s23] ss:$8 sps:$4 sm:$0xff]  }
  0x44   : > { %v718_v24 = vor.u32 %v717_v14, %v714_v9  ;;  %v1013_v14 = vrot.slane %v1011_v6, 5  ;;  %v1025_v16 = vshll.u32 %v933_v1, 16  ;;  %v5214_v50 = vld [vmem:[%s6287_s4 + $0x148] sm:$0xff]   ;;  %v5215_v51 = vld [vmem:[%s6287_s4 + $0x100] sm:$0xff]   ;;  %v5230_v1 = vld [vmem:[%s5605_s23 + $0x30] ss:$8 sps:$4 sm:$0xff]  }
  0x45   : > { %4829 = vmatpush3.bf16.msra.mxu0 %v5197_v26  ;;  %v987_v18 = vrot.slane %v986_v7, 4  ;;  %v740_v26 = vshrl.u32 %v648_v11, 16  ;;  %v935_v7 = vld [vmem:[%s5411_s24 + $0x38] sm:$0xf]  ;;  %v1017_v11 = vshll.u32 %v932_v56, 16  ;;  %v1024_v25 = vrot.slane %v1022_v15, 4 }
  0x46   : > { %4853 = vmatpush3.bf16.msra.mxu1 %v5198_v32  ;;  %4830 = vmatprep.subr.bf16.mxu0 %v5199_v41  ;;  %v719_v34 = vrot.slane %v718_v24, 4  ;;  %v1036_v21 = vshrl.u32 %v935_v7, 16  ;;  %v1014_v24 = vor.u32 %v1013_v14, %v1010_v10  ;;  %v5220_v56 = vld [vmem:[%s5605_s23 + $0x10] ss:$8 sps:$4 sm:$0xff]   ;;  %v1544_v6 = vld [vmem:[%s5599_s18 + $0x4] sm:$0x1] }
  0x47   : > { %4854 = vmatprep.subr.bf16.mxu1 %v5200_v49  ;;  %v992_v28 = vsel %vm5489_vm2, %v987_v18, %v991_v63  ;;  %v742_v35 = vrot.slane %v740_v26, 4  ;;  %v999_v63 = vrot.slane %v997_v53, 5  ;;  %v1019_v20 = vrot.slane %v1017_v11, 5  ;;  %v5221_v53 = vld [vmem:[%s6287_s4 + $0x1b8] sm:$0xff]  }
  0x48   : > { %v4129_v32 = vcombine.low %v978_v13, %v992_v28  ;;  %v724_v43 = vsel %vm5489_vm2, %v719_v34, %v723_v19  ;;  %v5208_v13 = vld [vmem:[%s6287_s4 + $0x160] sm:$0xff]   ;;  %v1027_v26 = vrot.slane %v1025_v16, 5  ;;  %v1038_v27 = vrot.slane %v1036_v21, 4  ;;  %v5211_v34 = vld [vmem:[%s6287_s4 + $0x110] sm:$0xff]  }
  0x49   : > { %4831 = vmatpush3.bf16.msra.mxu0 %v5199_v41  ;;  %v5205_v41 = vld [vmem:[%s6287_s4 + $0x128] sm:$0xff]   ;;  %v746_v44 = vor.u32 %v745_v36, %v742_v35  ;;  %v1000_v9 = vor.u32 %v999_v63, %v996_v57  ;;  %v1039_v28 = vshll.u32 %v935_v7, 16  ;;  %v1015_v31 = vrot.slane %v1014_v24, 4  ;;  %v5226_v63 = vld [vmem:[%s5599_s18 + $0x30] ss:$8 sps:$4 sm:$0xff]  }
  0x4a   : > { %4855 = vmatpush3.bf16.msra.mxu1 %v5200_v49  ;;  %4864 = vmatprep.subr.bf16.mxu0 %v5201_v58  ;;  %v733_v49 = vrot.slane %v732_v37, 4  ;;  %v1033_v35 = vrot.slane %v1031_v17, 5  ;;  %v5225_v57 = vld [vmem:[%s5599_s18 + $0x20] ss:$8 sps:$4 sm:$0xff]   ;;  %v1826_v17 = vld [vmem:[%s5605_s23 + $0x4] sm:$0x1] }
  0x4b   : > { %4888 = vmatprep.subr.bf16.mxu1 %v5202_v8  ;;  %v747_v54 = vrot.slane %v746_v44, 4  ;;  %v1001_v19 = vrot.slane %v1000_v9, 4  ;;  %v1041_v36 = vrot.slane %v1039_v28, 5  ;;  %v1020_v37 = vsel %vm5489_vm2, %v1015_v31, %v1019_v20  ;;  %v1545_v7 = vld [vmem:[%s5599_s18 + $0x8] sm:$0xf]  ;;  %v5235_v28 = vld [vmem:[%s6287_s4 + $0x190] sm:$0xff]  }
  0x4c   : > { %4833 = vmatmul.mubr.bf16.vlgmr.msra.gmra.mxu0 %v4101_v12  ;;  %v738_v60 = vsel %vm5489_vm2, %v733_v49, %v737_v30  ;;  %v936_v12 = vld [vmem:[%s5411_s24 + $0x3c] sm:$0x1]  ;;  %v1546_v9 = vld [vmem:[%s5599_s18 + $0xc] sm:$0x1]  ;;  %v1577_v14 = vshll.u32 %v1545_v7, 16 }
  0x4d   : > { %4865 = vmatpush3.bf16.msra.mxu0 %v5201_v58  ;;  %4857 = vmatmul.mubr.bf16.vlgmr.msra.gmra.mxu1 %v4129_v32  ;;  %v1003_v58 = vshll.u32 %v930_v46, 16  ;;  %v4102_v3 = vcombine.low %v724_v43, %v738_v60  ;;  %v752_v4 = vsel %vm5489_vm2, %v747_v54, %v751_v38  ;;  %v1028_v32 = vor.u32 %v1027_v26, %v1024_v25  ;;  %v5217_v46 = vld [vmem:[%s5599_s18] ss:$8 sps:$4 sm:$0xff]   ;;  %v5222_v54 = vld [vmem:[%s6287_s4 + $0x1f8] sm:$0xff]   ;;  %v5224_v60 = vld [vmem:[%s6287_s4 + $0x1f0] sm:$0xff]  }
  0x4e   : > { %4866 = vmatprep.subr.bf16.mxu0 %v5203_v23  ;;  %4889 = vmatpush3.bf16.msra.mxu1 %v5202_v8  ;;  %v761_v8 = vrot.slane %v760_v61, 4  ;;  %v1042_v42 = vor.u32 %v1041_v36, %v1038_v27  ;;  %v5227_v61 = vld [vmem:[%s6287_s4 + $0x1a8] sm:$0xff]   ;;  %v1583_v15 = vshll.u32 %v1546_v9, 16  ;;  %v1825_v16 = vld [vmem:[%s5605_s23] sm:$0xf] }
  0x4f   : > { %4890 = vmatprep.subr.bf16.mxu1 %v5204_v33  ;;  %v1005_v5 = vrot.slane %v1003_v58, 5  ;;  %4836 = vmatprep.mubr.bf16.mxu0 %v4102_v3  ;;  %v1029_v38 = vrot.slane %v1028_v32, 4  ;;  %v5223_v58 = vld [vmem:[%s6287_s4 + $0x1b0] sm:$0xff]   ;;  %v5232_v3 = vld [vmem:[%s6287_s4 + $0x1e0] sm:$0xff]   ;;  %v1828_v25 = vld [vmem:[%s5605_s23 + $0xc] sm:$0x1] }
  0x50   : > { %v766_v18 = vsel %vm5489_vm2, %v761_v8, %v765_v55  ;;  %v1043_v44 = vrot.slane %v1042_v42, 4  ;;  %v5219_v55 = vld [vmem:[%s5599_s18 + $0x10] ss:$8 sps:$4 sm:$0xff]   ;;  %v1585_v24 = vrot.slane %v1583_v15, 5  ;;  %v1842_v26 = vshrl.u32 %v1825_v16, 16 }
  0x51   : > { %4867 = vmatpush3.bf16.msra.mxu0 %v5203_v23  ;;  %v4103_v23 = vcombine.low %v752_v4, %v766_v18  ;;  %v1006_v30 = vsel %vm5489_vm2, %v1001_v19, %v1005_v5  ;;  %v1034_v43 = vsel %vm5489_vm2, %v1029_v38, %v1033_v35  ;;  %v5233_v4 = vld [vmem:[%s6287_s4 + $0x198] sm:$0xff]   ;;  %v1543_v5 = vld [vmem:[%s5599_s18] sm:$0xf]  ;;  %v1845_v27 = vshll.u32 %v1825_v16, 16 }
  0x52   : > { %4868 = vmatprep.subr.bf16.mxu0 %v5205_v41  ;;  %4891 = vmatpush3.bf16.msra.mxu1 %v5204_v33  ;;  %v1045_v33 = vshll.u32 %v936_v12, 16  ;;  %v5234_v8 = vld [vmem:[%s6287_s4 + $0x1d8] sm:$0xff]   ;;  %v1560_v10 = vshrl.u32 %v1543_v5, 16  ;;  %v1563_v11 = vshll.u32 %v1543_v5, 16  ;;  %v1569_v12 = vshll.u32 %v1544_v6, 16 }
  0x53   : > { %4892 = vmatprep.subr.bf16.mxu1 %v5206_v52  ;;  %v1844_v36 = vrot.slane %v1842_v26, 4  ;;  %v1865_v38 = vshll.u32 %v1828_v25, 16  ;;  %v5241_v26 = vld [vmem:[%s6287_s4 + $0x238] sm:$0xff]  }
  0x54   : > { %4837 = vmatmul.mubr.bf16.gmra.mxu0 %v4103_v23  ;;  %v1047_v39 = vrot.slane %v1045_v33, 5  ;;  %v1562_v18 = vrot.slane %v1560_v10, 4  ;;  %v1565_v19 = vrot.slane %v1563_v11, 5  ;;  %v1571_v20 = vrot.slane %v1569_v12, 5  ;;  %v1547_v33 = vld [vmem:[%s5599_s18 + $0x10] sm:$0xf] }
  0x55   : > { %4869 = vmatpush3.bf16.msra.mxu0 %v5205_v41  ;;  %v4130_v41 = vcombine.low %v1006_v30, %v1020_v37  ;;  %4880 = vmatprep.mubr.bf16.mxu0 %v5217_v46  ;;  %v1579_v23 = vrot.slane %v1577_v14, 5  ;;  %v1851_v30 = vshll.u32 %v1826_v17, 16  ;;  %v1847_v37 = vrot.slane %v1845_v27, 5 }
  0x56   : > { %4870 = vmatprep.subr.bf16.mxu0 %v5207_v59  ;;  %4893 = vmatpush3.bf16.msra.mxu1 %v5206_v52  ;;  %v1048_v47 = vsel %vm5489_vm2, %v1043_v44, %v1047_v39  ;;  %v5216_v52 = vld [vmem:[%s6287_s4 + $0x140] sm:$0xff]   ;;  %v1548_v39 = vld [vmem:[%s5599_s18 + $0x14] sm:$0x1]  ;;  %v1549_v44 = vld [vmem:[%s5599_s18 + $0x18] sm:$0xf] }
  0x57   : > { %4894 = vmatprep.subr.bf16.mxu1 %v5208_v13  ;;  %4860 = vmatprep.mubr.bf16.mxu1 %v4130_v41  ;;  %v4131_v49 = vcombine.low %v1034_v43, %v1048_v47  ;;  %v1853_v41 = vrot.slane %v1851_v30, 5  ;;  %v1848_v47 = vor.u32 %v1847_v37, %v1844_v36  ;;  %v5243_v37 = vld [vmem:[%s6287_s4 + $0x230] sm:$0xff]  }
  0x59   : > { %4871 = vmatpush3.bf16.msra.mxu0 %v5207_v59  ;;  %4861 = vmatmul.mubr.bf16.gmra.mxu1 %v4131_v49  ;;  %v5229_v59 = vld [vmem:[%s5605_s23 + $0x20] ss:$8 sps:$4 sm:$0xff]   ;;  %v1588_v49 = vshrl.u32 %v1547_v33, 16 }
  0x5a   : > { %4872 = vmatprep.subr.bf16.mxu0 %v5209_v22  ;;  %4895 = vmatpush3.bf16.msra.mxu1 %v5208_v13  ;;  %v1574_v13 = vshrl.u32 %v1545_v7, 16  ;;  %v1605_v7 = vshll.u32 %v1549_v44, 16 }
  0x5b   : > { %4896 = vmatprep.subr.bf16.mxu1 %v5210_v29  ;;  %4904 = vmatprep.mubr.bf16.mxu1 %v5218_v48  ;;  %v1867_v48 = vrot.slane %v1865_v38, 5  ;;  %v1552_v38 = vld [vmem:[%s5599_s18 + $0x24] sm:$0x1] }
  0x5c   : > { %v1576_v21 = vrot.slane %v1574_v13, 4  ;;  %v5240_v13 = vld [vmem:[%s6287_s4 + $0x1c0] sm:$0xff]   ;;  %v1607_v16 = vrot.slane %v1605_v7, 5 }
  0x5d   : > { %4873 = vmatpush3.bf16.msra.mxu0 %v5209_v22  ;;  %v1827_v22 = vld [vmem:[%s5605_s23 + $0x8] sm:$0xf] }
  0x5e   : > { %4874 = vmatprep.subr.bf16.mxu0 %v5211_v34  ;;  %4897 = vmatpush3.bf16.msra.mxu1 %v5210_v29  ;;  %v1566_v29 = vor.u32 %v1565_v19, %v1562_v18  ;;  %v1856_v31 = vshrl.u32 %v1827_v22, 16  ;;  %v1859_v32 = vshll.u32 %v1827_v22, 16  ;;  %v1580_v35 = vor.u32 %v1579_v23, %v1576_v21 }
  0x5f   : > { %4898 = vmatprep.subr.bf16.mxu1 %v5212_v40 }
  0x60   : > { %v1858_v42 = vrot.slane %v1856_v31, 4  ;;  %v1861_v43 = vrot.slane %v1859_v32, 5  ;;  %v1581_v46 = vrot.slane %v1580_v35, 4  ;;  %v1551_v35 = vld [vmem:[%s5599_s18 + $0x20] sm:$0xf] }
  0x61   : > { %4875 = vmatpush3.bf16.msra.mxu0 %v5211_v34  ;;  %v5236_v34 = vld [vmem:[%s6287_s4 + $0x1d0] sm:$0xff]  }
  0x62   : > { %4876 = vmatprep.subr.bf16.mxu0 %v5213_v45  ;;  %4899 = vmatpush3.bf16.msra.mxu1 %v5212_v40  ;;  %v1567_v40 = vrot.slane %v1566_v29, 4 }
  0x63   : > { %4900 = vmatprep.subr.bf16.mxu1 %v5214_v50 }
  0x65   : > { %4877 = vmatpush3.bf16.msra.mxu0 %v5213_v45  ;;  %v5237_v45 = vld [vmem:[%s6287_s4 + $0x188] sm:$0xff]  }
  0x66   : > { %4878 = vmatprep.subr.bf16.mxu0 %v5215_v51  ;;  %4901 = vmatpush3.bf16.msra.mxu1 %v5214_v50  ;;  %v1572_v50 = vsel %vm5489_vm2, %v1567_v40, %v1571_v20  ;;  %v1616_v40 = vshrl.u32 %v1551_v35, 16 }
  0x67   : > { %4902 = vmatprep.subr.bf16.mxu1 %v5216_v52 }
  0x69   : > { %4879 = vmatpush3.bf16.msra.mxu0 %v5215_v51  ;;  %v1862_v51 = vor.u32 %v1861_v43, %v1858_v42  ;;  %v1554_v43 = vld [vmem:[%s5599_s18 + $0x2c] sm:$0x1] }
  0x6a   : > { %4912 = vmatprep.subr.bf16.mxu0 %v5221_v53  ;;  %4903 = vmatpush3.bf16.msra.mxu1 %v5216_v52  ;;  %v1550_v52 = vld [vmem:[%s5599_s18 + $0x1c] sm:$0x1] }
  0x6b   : > { %4936 = vmatprep.subr.bf16.mxu1 %v5222_v54 }
  0x6c   : > { %4881 = vmatmul.mubr.bf16.vlgmr.msra.gmra.mxu0 %v5219_v55  ;;  %v1829_v55 = vld [vmem:[%s5605_s23 + $0x10] sm:$0xf] }
  0x6d   : > { %4913 = vmatpush3.bf16.msra.mxu0 %v5221_v53  ;;  %4884 = vmatprep.mubr.bf16.mxu0 %v5225_v57  ;;  %v1591_v53 = vshll.u32 %v1547_v33, 16  ;;  %v1586_v57 = vsel %vm5489_vm2, %v1581_v46, %v1585_v24  ;;  %v1870_v11 = vshrl.u32 %v1829_v55, 16  ;;  %v1873_v12 = vshll.u32 %v1829_v55, 16  ;;  %v1555_v46 = vld [vmem:[%s5599_s18 + $0x30] sm:$0xf] }
  0x6e   : > { %4905 = vmatmul.mubr.bf16.vlgmr.msra.gmra.mxu1 %v5220_v56  ;;  %4914 = vmatprep.subr.bf16.mxu0 %v5223_v58  ;;  %v5238_v56 = vld [vmem:[%s6287_s4 + $0x1c8] sm:$0xff]  }
  0x6f   : > { %4937 = vmatpush3.bf16.msra.mxu1 %v5222_v54  ;;  %4908 = vmatprep.mubr.bf16.mxu1 %v5229_v59  ;;  %v1597_v54 = vshll.u32 %v1548_v39, 16  ;;  %v1590_v59 = vrot.slane %v1588_v49, 4  ;;  %v1872_v19 = vrot.slane %v1870_v11, 4  ;;  %v1875_v20 = vrot.slane %v1873_v12, 5  ;;  %v1553_v39 = vld [vmem:[%s5599_s18 + $0x28] sm:$0xf] }
  0x70   : > { %4938 = vmatprep.subr.bf16.mxu1 %v5224_v60  ;;  %v1618_v49 = vrot.slane %v1616_v40, 4 }
  0x71   : > { %4915 = vmatpush3.bf16.msra.mxu0 %v5223_v58  ;;  %v1849_v58 = vrot.slane %v1848_v47, 4  ;;  %v1599_v15 = vrot.slane %v1597_v54, 5  ;;  %v1876_v27 = vor.u32 %v1875_v20, %v1872_v19 }
  0x72   : > { %4916 = vmatprep.subr.bf16.mxu0 %v5227_v61 }
  0x73   : > { %4939 = vmatpush3.bf16.msra.mxu1 %v5224_v60  ;;  %v1602_v60 = vshrl.u32 %v1549_v44, 16  ;;  %v1854_v5 = vsel %vm5489_vm2, %v1849_v58, %v1853_v41  ;;  %v1877_v36 = vrot.slane %v1876_v27, 4  ;;  %v1619_v44 = vshll.u32 %v1551_v35, 16  ;;  %v5244_v58 = vld [vmem:[%s6287_s4 + $0x270] sm:$0xff]  }
  0x74   : > { %4885 = vmatmul.mubr.bf16.gmra.mxu0 %v5226_v63  ;;  %4940 = vmatprep.subr.bf16.mxu1 %v5228_v0  ;;  %v4212_v63 = vcombine.low %v1572_v50, %v1586_v57  ;;  %v1630_v50 = vshrl.u32 %v1553_v39, 16  ;;  %v1558_v57 = vld [vmem:[%s5599_s18 + $0x3c] sm:$0x1] }
  0x75   : > { %4917 = vmatpush3.bf16.msra.mxu0 %v5227_v61  ;;  %v1830_v61 = vld [vmem:[%s5605_s23 + $0x14] sm:$0x1]  ;;  %v1604_v6 = vrot.slane %v1602_v60, 4  ;;  %v1621_v54 = vrot.slane %v1619_v44, 5  ;;  %v1639_v60 = vshll.u32 %v1554_v43, 16 }
  0x76   : > { %4909 = vmatmul.mubr.bf16.gmra.mxu1 %v5230_v1  ;;  %4918 = vmatprep.subr.bf16.mxu0 %v5231_v2  ;;  %v1593_v1 = vrot.slane %v1591_v53, 5  ;;  %v1879_v17 = vshll.u32 %v1830_v61, 16  ;;  %v1644_v61 = vshrl.u32 %v1555_v46, 16  ;;  %v1840_v44 = vld [vmem:[%s5605_s23 + $0x3c] sm:$0x1] }
  0x77   : > { %4941 = vmatpush3.bf16.msra.mxu1 %v5228_v0  ;;  %v1863_v0 = vrot.slane %v1862_v51, 4  ;;  %4928 = vmatprep.mubr.bf16.mxu0 %v4212_v63  ;;  %v1608_v22 = vor.u32 %v1607_v16, %v1604_v6  ;;  %v1556_v51 = vld [vmem:[%s5599_s18 + $0x34] sm:$0x1]  ;;  %v1647_v63 = vshll.u32 %v1555_v46, 16  ;;  %v1667_v16 = vshll.u32 %v1558_v57, 16 }
  0x78   : > { %4942 = vmatprep.subr.bf16.mxu1 %v5232_v3  ;;  %v1594_v10 = vor.u32 %v1593_v1, %v1590_v59  ;;  %v1632_v59 = vrot.slane %v1630_v50, 4  ;;  %v1622_v1 = vor.u32 %v1621_v54, %v1618_v49  ;;  %v1646_v6 = vrot.slane %v1644_v61, 4  ;;  %v5249_v50 = vld [vmem:[%s6287_s4 + $0x218] sm:$0xff]  }
  0x79   : > { %4919 = vmatpush3.bf16.msra.mxu0 %v5231_v2  ;;  %v1831_v2 = vld [vmem:[%s5605_s23 + $0x18] sm:$0xf]  ;;  %v1868_v9 = vsel %vm5489_vm2, %v1863_v0, %v1867_v48  ;;  %v1609_v31 = vrot.slane %v1608_v22, 4  ;;  %v1649_v7 = vrot.slane %v1647_v63, 5 }
  0x7a   : > { %4920 = vmatprep.subr.bf16.mxu0 %v5233_v4  ;;  %v4240_v14 = vcombine.low %v1854_v5, %v1868_v9  ;;  %v1595_v18 = vrot.slane %v1594_v10, 4  ;;  %v1884_v21 = vshrl.u32 %v1831_v2, 16  ;;  %v1887_v24 = vshll.u32 %v1831_v2, 16 }
  0x7b   : > { %4943 = vmatpush3.bf16.msra.mxu1 %v5232_v3  ;;  %v1832_v3 = vld [vmem:[%s5605_s23 + $0x1c] sm:$0x1]  ;;  %v1641_v5 = vrot.slane %v1639_v60, 5  ;;  %v1623_v9 = vrot.slane %v1622_v1, 4  ;;  %v5251_v60 = vld [vmem:[%s6287_s4 + $0x210] sm:$0xff]  }
  0x7c   : > { %4944 = vmatprep.subr.bf16.mxu1 %v5234_v8  ;;  %4952 = vmatprep.mubr.bf16.mxu1 %v4240_v14  ;;  %v1893_v25 = vshll.u32 %v1832_v3, 16  ;;  %v1886_v29 = vrot.slane %v1884_v21, 4  ;;  %v1600_v30 = vsel %vm5489_vm2, %v1595_v18, %v1599_v15  ;;  %v1889_v32 = vrot.slane %v1887_v24, 5  ;;  %v1835_v18 = vld [vmem:[%s5605_s23 + $0x28] sm:$0xf] }
  0x7d   : > { %4921 = vmatpush3.bf16.msra.mxu0 %v5233_v4  ;;  %v5239_v4 = vld [vmem:[%s6287_s4 + $0x180] sm:$0xff]   ;;  %v1653_v3 = vshll.u32 %v1556_v51, 16  ;;  %v1650_v14 = vor.u32 %v1649_v7, %v1646_v6 }
  0x7e   : > { %4922 = vmatprep.subr.bf16.mxu0 %v5235_v28  ;;  %v1895_v33 = vrot.slane %v1893_v25, 5  ;;  %v1890_v42 = vor.u32 %v1889_v32, %v1886_v29  ;;  %v5246_v25 = vld [vmem:[%s6287_s4 + $0x268] sm:$0xff]   ;;  %v1837_v32 = vld [vmem:[%s5605_s23 + $0x30] sm:$0xf] }
  0x7f   : > { %4945 = vmatpush3.bf16.msra.mxu1 %v5234_v8  ;;  %v1611_v8 = vshll.u32 %v1550_v52, 16  ;;  %v1557_v52 = vld [vmem:[%s5599_s18 + $0x38] sm:$0xf]  ;;  %v1655_v11 = vrot.slane %v1653_v3, 5  ;;  %v1929_v49 = vshll.u32 %v1837_v32, 16 }
  0x80   : > { %4946 = vmatprep.subr.bf16.mxu1 %v5236_v34  ;;  %v1891_v53 = vrot.slane %v1890_v42, 4  ;;  %v1658_v12 = vshrl.u32 %v1557_v52, 16  ;;  %v1661_v15 = vshll.u32 %v1557_v52, 16  ;;  %v1915_v42 = vshll.u32 %v1835_v18, 16 }
  0x81   : > { %4923 = vmatpush3.bf16.msra.mxu0 %v5235_v28  ;;  %v1613_v23 = vrot.slane %v1611_v8, 5  ;;  %v1881_v28 = vrot.slane %v1879_v17, 5  ;;  %v5245_v8 = vld [vmem:[%s6287_s4 + $0x228] sm:$0xff]   ;;  %v1834_v17 = vld [vmem:[%s5605_s23 + $0x24] sm:$0x1] }
  0x82   : > { %4924 = vmatprep.subr.bf16.mxu0 %v5237_v45  ;;  %v1896_v0 = vsel %vm5489_vm2, %v1891_v53, %v1895_v33  ;;  %v1660_v21 = vrot.slane %v1658_v12, 4  ;;  %v1663_v24 = vrot.slane %v1661_v15, 5  ;;  %v5247_v33 = vld [vmem:[%s6287_s4 + $0x220] sm:$0xff]   ;;  %v1917_v52 = vrot.slane %v1915_v42, 5  ;;  %v5253_v12 = vld [vmem:[%s6287_s4 + $0x208] sm:$0xff]  }
  0x83   : > { %4947 = vmatpush3.bf16.msra.mxu1 %v5236_v34  ;;  %v5242_v34 = vld [vmem:[%s6287_s4 + $0x278] sm:$0xff]   ;;  %v1614_v41 = vsel %vm5489_vm2, %v1609_v31, %v1613_v23  ;;  %v1882_v48 = vsel %vm5489_vm2, %v1877_v36, %v1881_v28  ;;  %v1651_v23 = vrot.slane %v1650_v14, 4  ;;  %v1912_v31 = vshrl.u32 %v1835_v18, 16  ;;  %v5254_v18 = vld [vmem:[%s6287_s4 + $0x248] sm:$0xff]   ;;  %v4326_v42 = vld [vmem:[%s5420_s29 + $0x10] sm:$0xf] }
  0x84   : > { %4948 = vmatprep.subr.bf16.mxu1 %v5238_v56  ;;  %v4213_v47 = vcombine.low %v1600_v30, %v1614_v41  ;;  %v1907_v30 = vshll.u32 %v1834_v17, 16  ;;  %v1664_v35 = vor.u32 %v1663_v24, %v1660_v21  ;;  %v1669_v36 = vrot.slane %v1667_v16, 5  ;;  %v5255_v21 = vld [vmem:[%s6287_s4 + $0x200] sm:$0xff]   ;;  %v5261_v24 = vld [vmem:[%s6287_s4 + $0x2b8] sm:$0xff]  }
  0x85   : > { %4925 = vmatpush3.bf16.msra.mxu0 %v5237_v45  ;;  %v1625_v45 = vshll.u32 %v1552_v38, 16  ;;  %v1838_v38 = vld [vmem:[%s5605_s23 + $0x34] sm:$0x1]  ;;  %v1656_v40 = vsel %vm5489_vm2, %v1651_v23, %v1655_v11  ;;  %v1914_v41 = vrot.slane %v1912_v31, 4  ;;  %v5258_v23 = vld [vmem:[%s5411_s24 + $0x8] ss:$8 sps:$4 sm:$0xff]  }
  0x86   : > { %4926 = vmatprep.subr.bf16.mxu0 %v5239_v4  ;;  %v1665_v46 = vrot.slane %v1664_v35, 4  ;;  %v1909_v51 = vrot.slane %v1907_v30, 5  ;;  %v1935_v53 = vshll.u32 %v1838_v38, 16  ;;  %v5252_v11 = vld [vmem:[%s6287_s4 + $0x250] sm:$0xff]   ;;  %v5260_v30 = vld [vmem:[%s5411_s24 + $0x18] ss:$8 sps:$4 sm:$0xff]  }
  0x87   : > { %4949 = vmatpush3.bf16.msra.mxu1 %v5238_v56  ;;  %v1627_v55 = vrot.slane %v1625_v45, 5  ;;  %v1633_v56 = vshll.u32 %v1553_v39, 16  ;;  %v1839_v39 = vld [vmem:[%s5605_s23 + $0x38] sm:$0xf]  ;;  %v5248_v45 = vld [vmem:[%s6287_s4 + $0x260] sm:$0xff]   ;;  %v1918_v63 = vor.u32 %v1917_v52, %v1914_v41  ;;  %v5264_v31 = vld [vmem:[%s6287_s4 + $0x2f0] sm:$0xff]  }
  0x88   : > { %4950 = vmatprep.subr.bf16.mxu1 %v5240_v13  ;;  %v1940_v54 = vshrl.u32 %v1839_v39, 16  ;;  %v1943_v3 = vshll.u32 %v1839_v39, 16  ;;  %v5271_v35 = vld [vmem:[%s6287_s4 + $0x2a0] sm:$0xff]   ;;  %v5273_v39 = vld [vmem:[%s6287_s4 + $0x298] sm:$0xff]   ;;  %v4325_v41 = vld [vmem:[%s5420_s29 + $0xc] sm:$0x1] }
  0x89   : > { %4927 = vmatpush3.bf16.msra.mxu0 %v5239_v4  ;;  %v1635_v2 = vrot.slane %v1633_v56, 5  ;;  %v4241_v4 = vcombine.low %v1882_v48, %v1896_v0  ;;  %v1628_v19 = vsel %vm5489_vm2, %v1623_v9, %v1627_v55  ;;  %v1926_v48 = vshrl.u32 %v1837_v32, 16  ;;  %v5267_v32 = vld [vmem:[%s6287_s4 + $0x2a8] sm:$0xff]   ;;  %v5272_v38 = vld [vmem:[%s6287_s4 + $0x2e0] sm:$0xff]  }
  0x8a   : > { %4960 = vmatprep.subr.bf16.mxu0 %v5241_v26  ;;  %v1670_v55 = vsel %vm5489_vm2, %v1665_v46, %v1669_v36  ;;  %v1942_v1 = vrot.slane %v1940_v54, 4  ;;  %v1919_v6 = vrot.slane %v1918_v63, 4  ;;  %v1945_v9 = vrot.slane %v1943_v3, 5  ;;  %v5268_v36 = vld [vmem:[%s6287_s4 + $0x2e8] sm:$0xff]  }
  0x8b   : > { %4951 = vmatpush3.bf16.msra.mxu1 %v5240_v13  ;;  %v1636_v10 = vor.u32 %v1635_v2, %v1632_v59  ;;  %v1833_v13 = vld [vmem:[%s5605_s23 + $0x20] sm:$0xf]  ;;  %v1928_v57 = vrot.slane %v1926_v48, 4  ;;  %v5250_v59 = vld [vmem:[%s6287_s4 + $0x258] sm:$0xff]   ;;  %v4215_v61 = vcombine.low %v1656_v40, %v1670_v55  ;;  %v4324_v40 = vld [vmem:[%s5420_s29 + $0x8] sm:$0xf] }
  0x8c   : > { %4929 = vmatmul.mubr.bf16.vlgmr.msra.gmra.mxu0 %v4213_v47  ;;  %4984 = vmatprep.subr.bf16.mxu1 %v5242_v34  ;;  %v1898_v22 = vshrl.u32 %v1833_v13, 16  ;;  %v1901_v27 = vshll.u32 %v1833_v13, 16  ;;  %v1946_v15 = vor.u32 %v1945_v9, %v1942_v1  ;;  %v2469_v46 = vshll.u32 %v4324_v40, 16  ;;  %v4368_v52 = vld [vmem:[%s5411_s24 + $0x8] sm:$0xf] }
  0x8d   : > { %4961 = vmatpush3.bf16.msra.mxu0 %v5241_v26  ;;  %v1637_v20 = vrot.slane %v1636_v10, 4  ;;  %v1836_v26 = vld [vmem:[%s5605_s23 + $0x2c] sm:$0x1]  ;;  %v2480_v48 = vshrl.u32 %v4326_v42, 16  ;;  %v2748_v63 = vshrl.u32 %v4368_v52, 16 }
  0x8e   : > { %4962 = vmatprep.subr.bf16.mxu0 %v5243_v37  ;;  %4953 = vmatmul.mubr.bf16.vlgmr.msra.gmra.mxu1 %v4241_v4  ;;  %v1900_v29 = vrot.slane %v1898_v22, 4  ;;  %v1921_v43 = vshll.u32 %v1836_v26, 16  ;;  %v1949_v4 = vshll.u32 %v1840_v44, 16  ;;  %v1947_v17 = vrot.slane %v1946_v15, 4  ;;  %v5259_v26 = vld [vmem:[%s5420_s29 + $0x18] ss:$8 sps:$4 sm:$0xff]  }
  0x8f   : > { %4985 = vmatpush3.bf16.msra.mxu1 %v5242_v34  ;;  %v1642_v28 = vsel %vm5489_vm2, %v1637_v20, %v1641_v5  ;;  %v4327_v44 = vld [vmem:[%s5420_s29 + $0x14] sm:$0x1]  ;;  %v2471_v55 = vrot.slane %v2469_v46, 5 }
  0x90   : > { %4986 = vmatprep.subr.bf16.mxu1 %v5244_v58  ;;  %v4214_v34 = vcombine.low %v1628_v19, %v1642_v28  ;;  %v1923_v0 = vrot.slane %v1921_v43, 5  ;;  %v1951_v10 = vrot.slane %v1949_v4, 5  ;;  %v5257_v19 = vld [vmem:[%s5420_s29 + $0x8] ss:$8 sps:$4 sm:$0xff]  }
  0x91   : > { %4963 = vmatpush3.bf16.msra.mxu0 %v5243_v37  ;;  %v1903_v37 = vrot.slane %v1901_v27, 5  ;;  %v5265_v27 = vld [vmem:[%s5420_s29 + $0x28] ss:$8 sps:$4 sm:$0xff]  }
  0x92   : > { %4964 = vmatprep.subr.bf16.mxu0 %v5245_v8  ;;  %4932 = vmatprep.mubr.bf16.mxu0 %v4214_v34  ;;  %v1924_v13 = vsel %vm5489_vm2, %v1919_v6, %v1923_v0  ;;  %v1952_v20 = vsel %vm5489_vm2, %v1947_v17, %v1951_v10  ;;  %v5263_v28 = vld [vmem:[%s6287_s4 + $0x2b0] sm:$0xff]   ;;  %v5266_v34 = vld [vmem:[%s5420_s29 + $0x38] ss:$8 sps:$4 sm:$0xff]   ;;  %v2751_v0 = vshll.u32 %v4368_v52, 16  ;;  %v5277_v6 = vld [vmem:[%s6287_s4 + $0x288] sm:$0xff]  }
  0x93   : > { %4987 = vmatpush3.bf16.msra.mxu1 %v5244_v58  ;;  %v1904_v47 = vor.u32 %v1903_v37, %v1900_v29  ;;  %v1931_v58 = vrot.slane %v1929_v49, 5  ;;  %v5262_v29 = vld [vmem:[%s6287_s4 + $0x2f8] sm:$0xff]   ;;  %v5275_v43 = vld [vmem:[%s6287_s4 + $0x290] sm:$0xff]  }
  0x94   : > { %4988 = vmatprep.subr.bf16.mxu1 %v5246_v25  ;;  %4933 = vmatmul.mubr.bf16.gmra.mxu0 %v4215_v61  ;;  %v5270_v37 = vld [vmem:[%s5411_s24 + $0x38] ss:$8 sps:$4 sm:$0xff]   ;;  %v4371_v61 = vld [vmem:[%s5411_s24 + $0x14] sm:$0x1]  ;;  %v2753_v9 = vrot.slane %v2751_v0, 5 }
  0x95   : > { %4965 = vmatpush3.bf16.msra.mxu0 %v5245_v8  ;;  %v1905_v56 = vrot.slane %v1904_v47, 4  ;;  %v1932_v2 = vor.u32 %v1931_v58, %v1928_v57  ;;  %v1937_v8 = vrot.slane %v1935_v53, 5  ;;  %4976 = vmatprep.mubr.bf16.mxu0 %v5257_v19  ;;  %v2475_v47 = vshll.u32 %v4325_v41, 16  ;;  %v5274_v49 = vld [vmem:[%s6287_s4 + $0x2d8] sm:$0xff]   ;;  %v4369_v53 = vld [vmem:[%s5411_s24 + $0xc] sm:$0x1] }
  0x96   : > { %4966 = vmatprep.subr.bf16.mxu0 %v5247_v33  ;;  %v2482_v57 = vrot.slane %v2480_v48, 4  ;;  %v4370_v58 = vld [vmem:[%s5411_s24 + $0x10] sm:$0xf]  ;;  %v2771_v10 = vshll.u32 %v4371_v61, 16  ;;  %v5281_v52 = vld [vmem:[%s6287_s4 + $0x338] sm:$0xff]  }
  0x97   : > { %4989 = vmatpush3.bf16.msra.mxu1 %v5246_v25  ;;  %v1910_v5 = vsel %vm5489_vm2, %v1905_v56, %v1909_v51  ;;  %v1933_v7 = vrot.slane %v1932_v2, 4  ;;  %v5256_v25 = vld [vmem:[%s6287_s4 + $0x240] sm:$0xff]   ;;  %v2489_v51 = vshll.u32 %v4327_v44, 16  ;;  %v2477_v56 = vrot.slane %v2475_v47, 5  ;;  %v5276_v17 = vld [vmem:[%s6287_s4 + $0x2d0] sm:$0xff]  }
  0x98   : > { %4990 = vmatprep.subr.bf16.mxu1 %v5248_v45  ;;  %v4242_v14 = vcombine.low %v1910_v5, %v1924_v13  ;;  %v2757_v2 = vshll.u32 %v4369_v53, 16  ;;  %v2762_v3 = vshrl.u32 %v4370_v58, 16  ;;  %v2765_v4 = vshll.u32 %v4370_v58, 16  ;;  %v4328_v5 = vld [vmem:[%s5420_s29 + $0x18] sm:$0xf] }
  0x99   : > { %4967 = vmatpush3.bf16.msra.mxu0 %v5247_v33  ;;  %v1938_v16 = vsel %vm5489_vm2, %v1933_v7, %v1937_v8  ;;  %v5269_v33 = vld [vmem:[%s5411_s24 + $0x28] ss:$8 sps:$4 sm:$0xff]   ;;  %v2750_v8 = vrot.slane %v2748_v63, 4 }
  0x9a   : > { %4968 = vmatprep.subr.bf16.mxu0 %v5249_v50  ;;  %4956 = vmatprep.mubr.bf16.mxu1 %v4242_v14  ;;  %v4243_v22 = vcombine.low %v1938_v16, %v1952_v20  ;;  %v2759_v13 = vrot.slane %v2757_v2, 5  ;;  %v2764_v14 = vrot.slane %v2762_v3, 4  ;;  %v2767_v15 = vrot.slane %v2765_v4, 5  ;;  %v4330_v16 = vld [vmem:[%s5420_s29 + $0x20] sm:$0xf] }
  0x9b   : > { %4991 = vmatpush3.bf16.msra.mxu1 %v5248_v45  ;;  %v2466_v45 = vshrl.u32 %v4324_v40, 16  ;;  %v2754_v19 = vor.u32 %v2753_v9, %v2750_v8  ;;  %v2773_v20 = vrot.slane %v2771_v10, 5  ;;  %v5283_v9 = vld [vmem:[%s6287_s4 + $0x330] sm:$0xff]   ;;  %v4333_v10 = vld [vmem:[%s5420_s29 + $0x2c] sm:$0x1] }
  0x9c   : > { %4992 = vmatprep.subr.bf16.mxu1 %v5250_v59  ;;  %4957 = vmatmul.mubr.bf16.gmra.mxu1 %v4243_v22 }
  0x9d   : > { %4969 = vmatpush3.bf16.msra.mxu0 %v5249_v50  ;;  %5000 = vmatprep.mubr.bf16.mxu1 %v5258_v23  ;;  %v2483_v50 = vshll.u32 %v4326_v42, 16  ;;  %v2468_v54 = vrot.slane %v2466_v45, 4  ;;  %v2768_v23 = vor.u32 %v2767_v15, %v2764_v14  ;;  %v2511_v42 = vshll.u32 %v4330_v16, 16  ;;  %v4335_v15 = vld [vmem:[%s5420_s29 + $0x34] sm:$0x1] }
  0x9e   : > { %4970 = vmatprep.subr.bf16.mxu0 %v5251_v60 }
  0x9f   : > { %4993 = vmatpush3.bf16.msra.mxu1 %v5250_v59  ;;  %v2485_v59 = vrot.slane %v2483_v50, 5  ;;  %v2472_v1 = vor.u32 %v2471_v55, %v2468_v54  ;;  %v2513_v50 = vrot.slane %v2511_v42, 5 }
  0xa0   : > { %4994 = vmatprep.subr.bf16.mxu1 %v5252_v11 }
  0xa1   : > { %4971 = vmatpush3.bf16.msra.mxu0 %v5251_v60  ;;  %v2491_v60 = vrot.slane %v2489_v51, 5  ;;  %v2486_v7 = vor.u32 %v2485_v59, %v2482_v57  ;;  %v5280_v57 = vld [vmem:[%s6287_s4 + $0x2c0] sm:$0xff]  }
  0xa2   : > { %4972 = vmatprep.subr.bf16.mxu0 %v5253_v12 }
  0xa3   : > { %4995 = vmatpush3.bf16.msra.mxu1 %v5252_v11  ;;  %v4329_v11 = vld [vmem:[%s5420_s29 + $0x1c] sm:$0x1] }
  0xa4   : > { %4996 = vmatprep.subr.bf16.mxu1 %v5254_v18 }
  0xa5   : > { %4973 = vmatpush3.bf16.msra.mxu0 %v5253_v12  ;;  %v2473_v12 = vrot.slane %v2472_v1, 4 }
  0xa6   : > { %4974 = vmatprep.subr.bf16.mxu0 %v5255_v21 }
  0xa7   : > { %4997 = vmatpush3.bf16.msra.mxu1 %v5254_v18  ;;  %v2487_v18 = vrot.slane %v2486_v7, 4  ;;  %v2478_v22 = vsel %vm5489_vm2, %v2473_v12, %v2477_v56  ;;  %v4332_v7 = vld [vmem:[%s5420_s29 + $0x28] sm:$0xf] }
  0xa8   : > { %4998 = vmatprep.subr.bf16.mxu1 %v5256_v25  ;;  %v2522_v12 = vshrl.u32 %v4332_v7, 16 }
  0xa9   : > { %4975 = vmatpush3.bf16.msra.mxu0 %v5255_v21  ;;  %v2494_v21 = vshrl.u32 %v4328_v5, 16 }
  0xaa   : > { %5008 = vmatprep.subr.bf16.mxu0 %v5261_v24 }
  0xab   : > { %4999 = vmatpush3.bf16.msra.mxu1 %v5256_v25  ;;  %v2497_v25 = vshll.u32 %v4328_v5, 16 }
  0xac   : > { %4977 = vmatmul.mubr.bf16.vlgmr.msra.gmra.mxu0 %v5259_v26  ;;  %5032 = vmatprep.subr.bf16.mxu1 %v5262_v29  ;;  %v2503_v26 = vshll.u32 %v4329_v11, 16  ;;  %v4334_v11 = vld [vmem:[%s5420_s29 + $0x30] sm:$0xf] }
  0xad   : > { %5009 = vmatpush3.bf16.msra.mxu0 %v5261_v24  ;;  %4980 = vmatprep.mubr.bf16.mxu0 %v5265_v27  ;;  %v4331_v24 = vld [vmem:[%s5420_s29 + $0x24] sm:$0x1]  ;;  %v4372_v27 = vld [vmem:[%s5411_s24 + $0x18] sm:$0xf] }
  0xae   : > { %5010 = vmatprep.subr.bf16.mxu0 %v5263_v28  ;;  %5001 = vmatmul.mubr.bf16.vlgmr.msra.gmra.mxu1 %v5260_v30  ;;  %v2755_v30 = vrot.slane %v2754_v19, 4  ;;  %v2776_v46 = vshrl.u32 %v4372_v27, 16  ;;  %v2779_v47 = vshll.u32 %v4372_v27, 16 }
  0xaf   : > { %5033 = vmatpush3.bf16.msra.mxu1 %v5262_v29  ;;  %5004 = vmatprep.mubr.bf16.mxu1 %v5269_v33  ;;  %v2492_v29 = vsel %vm5489_vm2, %v2487_v18, %v2491_v60  ;;  %v4373_v33 = vld [vmem:[%s5411_s24 + $0x1c] sm:$0x1]  ;;  %v4336_v18 = vld [vmem:[%s5420_s29 + $0x38] sm:$0xf] }
  0xb0   : > { %5034 = vmatprep.subr.bf16.mxu1 %v5264_v31  ;;  %v2760_v40 = vsel %vm5489_vm2, %v2755_v30, %v2759_v13  ;;  %v2785_v51 = vshll.u32 %v4373_v33, 16  ;;  %v2778_v54 = vrot.slane %v2776_v46, 4  ;;  %v2781_v55 = vrot.slane %v2779_v47, 5  ;;  %v5284_v30 = vld [vmem:[%s6287_s4 + $0x370] sm:$0xff]  }
  0xb1   : > { %5011 = vmatpush3.bf16.msra.mxu0 %v5263_v28  ;;  %v5279_v28 = vld [vmem:[%s6287_s4 + $0x280] sm:$0xff]   ;;  %v2550_v33 = vshrl.u32 %v4336_v18, 16 }
  0xb2   : > { %5012 = vmatprep.subr.bf16.mxu0 %v5267_v32  ;;  %v2782_v63 = vor.u32 %v2781_v55, %v2778_v54  ;;  %v2787_v0 = vrot.slane %v2785_v51, 5 }
  0xb3   : > { %5035 = vmatpush3.bf16.msra.mxu1 %v5264_v31  ;;  %v2496_v31 = vrot.slane %v2494_v21, 4  ;;  %v2524_v21 = vrot.slane %v2522_v12, 4 }
  0xb4   : > { %4981 = vmatmul.mubr.bf16.gmra.mxu0 %v5266_v34  ;;  %5036 = vmatprep.subr.bf16.mxu1 %v5268_v36  ;;  %v4356_v34 = vcombine.low %v2478_v22, %v2492_v29  ;;  %v2783_v8 = vrot.slane %v2782_v63, 4  ;;  %v2536_v22 = vshrl.u32 %v4334_v11, 16  ;;  %v4339_v29 = vld [vmem:[%s5420_s29 + $0x44] sm:$0x1] }
  0xb5   : > { %5013 = vmatpush3.bf16.msra.mxu0 %v5267_v32  ;;  %v2508_v32 = vshrl.u32 %v4330_v16, 16  ;;  %v2525_v16 = vshll.u32 %v4332_v7, 16  ;;  %v2573_v51 = vshll.u32 %v4339_v29, 16 }
  0xb6   : > { %5014 = vmatprep.subr.bf16.mxu0 %v5271_v35  ;;  %5005 = vmatmul.mubr.bf16.gmra.mxu1 %v5270_v37  ;;  %v4374_v37 = vld [vmem:[%s5411_s24 + $0x20] sm:$0xf] }
  0xb7   : > { %5037 = vmatpush3.bf16.msra.mxu1 %v5268_v36  ;;  %v2499_v36 = vrot.slane %v2497_v25, 5  ;;  %v2510_v41 = vrot.slane %v2508_v32, 4  ;;  %5024 = vmatprep.mubr.bf16.mxu0 %v4356_v34  ;;  %v2790_v56 = vshrl.u32 %v4374_v37, 16  ;;  %v2793_v60 = vshll.u32 %v4374_v37, 16 }
  0xb8   : > { %5038 = vmatprep.subr.bf16.mxu1 %v5272_v38  ;;  %v2545_v32 = vshll.u32 %v4335_v15, 16  ;;  %v2553_v34 = vshll.u32 %v4336_v18, 16 }
  0xb9   : > { %5015 = vmatpush3.bf16.msra.mxu0 %v5271_v35  ;;  %v2769_v35 = vrot.slane %v2768_v23, 4  ;;  %v2500_v45 = vor.u32 %v2499_v36, %v2496_v31  ;;  %v2514_v58 = vor.u32 %v2513_v50, %v2510_v41  ;;  %v2792_v1 = vrot.slane %v2790_v56, 4  ;;  %v4337_v23 = vld [vmem:[%s5420_s29 + $0x3c] sm:$0x1] }
  0xba   : > { %5016 = vmatprep.subr.bf16.mxu0 %v5273_v39  ;;  %v2795_v4 = vrot.slane %v2793_v60, 5  ;;  %v2538_v31 = vrot.slane %v2536_v22, 4  ;;  %v2552_v41 = vrot.slane %v2550_v33, 4  ;;  %v2555_v42 = vrot.slane %v2553_v34, 5  ;;  %v5286_v60 = vld [vmem:[%s6287_s4 + $0x368] sm:$0xff]   ;;  %v5289_v22 = vld [vmem:[%s6287_s4 + $0x318] sm:$0xff]  }
  0xbb   : > { %5039 = vmatpush3.bf16.msra.mxu1 %v5272_v38  ;;  %v4375_v38 = vld [vmem:[%s5411_s24 + $0x24] sm:$0x1]  ;;  %v2774_v44 = vsel %vm5489_vm2, %v2769_v35, %v2773_v20  ;;  %v2501_v53 = vrot.slane %v2500_v45, 4  ;;  %v2515_v3 = vrot.slane %v2514_v58, 4  ;;  %v2788_v20 = vsel %vm5489_vm2, %v2783_v8, %v2787_v0 }
  0xbc   : > { %5040 = vmatprep.subr.bf16.mxu1 %v5274_v49  ;;  %v4400_v48 = vcombine.low %v2760_v40, %v2774_v44  ;;  %v2799_v61 = vshll.u32 %v4375_v38, 16  ;;  %v2796_v14 = vor.u32 %v2795_v4, %v2792_v1  ;;  %v2559_v38 = vshll.u32 %v4337_v23, 16  ;;  %v4380_v4 = vld [vmem:[%s5411_s24 + $0x38] sm:$0xf] }
  0xbd   : > { %5017 = vmatpush3.bf16.msra.mxu0 %v5273_v39  ;;  %v5278_v39 = vld [vmem:[%s6287_s4 + $0x2c8] sm:$0xff]   ;;  %v2547_v40 = vrot.slane %v2545_v32, 5  ;;  %v2575_v8 = vrot.slane %v2573_v51, 5  ;;  %v5291_v32 = vld [vmem:[%s6287_s4 + $0x310] sm:$0xff]  }
  0xbe   : > { %5018 = vmatprep.subr.bf16.mxu0 %v5275_v43  ;;  %5048 = vmatprep.mubr.bf16.mxu1 %v4400_v48  ;;  %v2801_v5 = vrot.slane %v2799_v61, 5  ;;  %v2797_v25 = vrot.slane %v2796_v14, 4  ;;  %v2561_v46 = vrot.slane %v2559_v38, 5  ;;  %v4376_v48 = vld [vmem:[%s5411_s24 + $0x28] sm:$0xf] }
  0xbf   : > { %5041 = vmatpush3.bf16.msra.mxu1 %v5274_v49  ;;  %v2505_v49 = vrot.slane %v2503_v26, 5  ;;  %v2527_v26 = vrot.slane %v2525_v16, 5  ;;  %v4379_v61 = vld [vmem:[%s5411_s24 + $0x34] sm:$0x1]  ;;  %v2807_v63 = vshll.u32 %v4376_v48, 16 }
  0xc0   : > { %5042 = vmatprep.subr.bf16.mxu1 %v5276_v17  ;;  %v2802_v35 = vsel %vm5489_vm2, %v2797_v25, %v2801_v5  ;;  %v5287_v5 = vld [vmem:[%s6287_s4 + $0x320] sm:$0xff]   ;;  %v2827_v15 = vshll.u32 %v4379_v61, 16 }
  0xc1   : > { %5019 = vmatpush3.bf16.msra.mxu0 %v5275_v43  ;;  %v2517_v43 = vshll.u32 %v4331_v24, 16  ;;  %v2506_v2 = vsel %vm5489_vm2, %v2501_v53, %v2505_v49  ;;  %v4338_v24 = vld [vmem:[%s5420_s29 + $0x40] sm:$0xf]  ;;  %v2528_v36 = vor.u32 %v2527_v26, %v2524_v21  ;;  %v2556_v49 = vor.u32 %v2555_v42, %v2552_v41  ;;  %v4378_v53 = vld [vmem:[%s5411_s24 + $0x30] sm:$0xf] }
  0xc2   : > { %5020 = vmatprep.subr.bf16.mxu0 %v5277_v6  ;;  %v2564_v47 = vshrl.u32 %v4338_v24, 16  ;;  %v2567_v50 = vshll.u32 %v4338_v24, 16  ;;  %v2821_v14 = vshll.u32 %v4378_v53, 16  ;;  %v4383_v16 = vld [vmem:[%s5411_s24 + $0x44] sm:$0x1]  ;;  %v2835_v21 = vshll.u32 %v4380_v4, 16 }
  0xc3   : > { %5043 = vmatpush3.bf16.msra.mxu1 %v5276_v17  ;;  %v2519_v59 = vrot.slane %v2517_v43, 5  ;;  %v2531_v17 = vshll.u32 %v4333_v10, 16  ;;  %v5285_v43 = vld [vmem:[%s6287_s4 + $0x328] sm:$0xff]   ;;  %v2529_v44 = vrot.slane %v2528_v36, 4  ;;  %v2557_v58 = vrot.slane %v2556_v49, 4 }
  0xc4   : > { %5044 = vmatprep.subr.bf16.mxu1 %v5278_v39  ;;  %v2566_v56 = vrot.slane %v2564_v47, 4  ;;  %v4381_v10 = vld [vmem:[%s5411_s24 + $0x3c] sm:$0x1]  ;;  %v2823_v24 = vrot.slane %v2821_v14, 5  ;;  %v5293_v47 = vld [vmem:[%s6287_s4 + $0x308] sm:$0xff]  }
  0xc5   : > { %5021 = vmatpush3.bf16.msra.mxu0 %v5277_v6  ;;  %v5282_v6 = vld [vmem:[%s6287_s4 + $0x378] sm:$0xff]   ;;  %v2520_v13 = vsel %vm5489_vm2, %v2515_v3, %v2519_v59  ;;  %v2533_v27 = vrot.slane %v2531_v17, 5  ;;  %v2569_v59 = vrot.slane %v2567_v50, 5  ;;  %v2818_v3 = vshrl.u32 %v4378_v53, 16  ;;  %v5288_v17 = vld [vmem:[%s6287_s4 + $0x360] sm:$0xff]   ;;  %v5294_v53 = vld [vmem:[%s6287_s4 + $0x348] sm:$0xff]  }
  0xc6   : > { %5022 = vmatprep.subr.bf16.mxu0 %v5279_v28  ;;  %v4357_v19 = vcombine.low %v2506_v2, %v2520_v13  ;;  %v2562_v12 = vsel %vm5489_vm2, %v2557_v58, %v2561_v46  ;;  %v2841_v25 = vshll.u32 %v4381_v10, 16  ;;  %v5292_v46 = vld [vmem:[%s6287_s4 + $0x350] sm:$0xff]   ;;  %v5299_v61 = vld [vmem:[%s5599_s18 + $0x18] ss:$8 sps:$4 sm:$0xff]  }
  0xc7   : > { %5045 = vmatpush3.bf16.msra.mxu1 %v5278_v39  ;;  %v4401_v39 = vcombine.low %v2788_v20, %v2802_v35  ;;  %v2534_v54 = vsel %vm5489_vm2, %v2529_v44, %v2533_v27  ;;  %v2570_v7 = vor.u32 %v2569_v59, %v2566_v56  ;;  %v2820_v13 = vrot.slane %v2818_v3, 4  ;;  %v5295_v56 = vld [vmem:[%s6287_s4 + $0x300] sm:$0xff]   ;;  %v5298_v58 = vld [vmem:[%s5605_s23 + $0x8] ss:$8 sps:$4 sm:$0xff]   ;;  %v5301_v59 = vld [vmem:[%s6287_s4 + $0x3b8] sm:$0xff]  }
  0xc8   : > { %5046 = vmatprep.subr.bf16.mxu1 %v5280_v57  ;;  %v2832_v20 = vshrl.u32 %v4380_v4, 16  ;;  %v2829_v35 = vrot.slane %v2827_v15, 5  ;;  %v5302_v3 = vld [vmem:[%s6287_s4 + $0x3f8] sm:$0xff]  }
  0xc9   : > { %5023 = vmatpush3.bf16.msra.mxu0 %v5279_v28  ;;  %v2539_v28 = vshll.u32 %v4334_v11, 16  ;;  %v4382_v11 = vld [vmem:[%s5411_s24 + $0x40] sm:$0xf]  ;;  %v2571_v18 = vrot.slane %v2570_v7, 4  ;;  %v2824_v34 = vor.u32 %v2823_v24, %v2820_v13  ;;  %v5309_v13 = vld [vmem:[%s5605_s23 + $0x28] ss:$8 sps:$4 sm:$0xff]  }
  0xca   : > { %5056 = vmatprep.subr.bf16.mxu0 %v5281_v52  ;;  %v2846_v26 = vshrl.u32 %v4382_v11, 16  ;;  %v2834_v29 = vrot.slane %v2832_v20, 4  ;;  %v2849_v38 = vshll.u32 %v4382_v11, 16  ;;  %v5307_v11 = vld [vmem:[%s6287_s4 + $0x3a8] sm:$0xff]  }
  0xcb   : > { %5047 = vmatpush3.bf16.msra.mxu1 %v5280_v57  ;;  %v2541_v37 = vrot.slane %v2539_v28, 5  ;;  %v2804_v57 = vshrl.u32 %v4376_v48, 16  ;;  %v2576_v27 = vsel %vm5489_vm2, %v2571_v18, %v2575_v8  ;;  %v2825_v41 = vrot.slane %v2824_v34, 4  ;;  %v5304_v8 = vld [vmem:[%s6287_s4 + $0x3f0] sm:$0xff]  }
  0xcc   : > { %5025 = vmatmul.mubr.bf16.vlgmr.msra.gmra.mxu0 %v4357_v19  ;;  %5080 = vmatprep.subr.bf16.mxu1 %v5282_v6  ;;  %v4359_v33 = vcombine.low %v2562_v12, %v2576_v27  ;;  %v2848_v36 = vrot.slane %v2846_v26, 4  ;;  %v2851_v44 = vrot.slane %v2849_v38, 5  ;;  %v5312_v26 = vld [vmem:[%s6287_s4 + $0x3e0] sm:$0xff]   ;;  %v4486_v34 = vld [vmem:[%s5599_s18 + $0x10] sm:$0xf] }
  0xcd   : > { %5057 = vmatpush3.bf16.msra.mxu0 %v5281_v52  ;;  %v2542_v45 = vor.u32 %v2541_v37, %v2538_v31  ;;  %v4377_v52 = vld [vmem:[%s5411_s24 + $0x2c] sm:$0x1]  ;;  %v2806_v1 = vrot.slane %v2804_v57, 4  ;;  %v5290_v31 = vld [vmem:[%s6287_s4 + $0x358] sm:$0xff]   ;;  %v2830_v48 = vsel %vm5489_vm2, %v2825_v41, %v2829_v35 }
  0xce   : > { %5058 = vmatprep.subr.bf16.mxu0 %v5283_v9  ;;  %5049 = vmatmul.mubr.bf16.vlgmr.msra.gmra.mxu1 %v4401_v39  ;;  %v2813_v2 = vshll.u32 %v4377_v52, 16  ;;  %v2855_v39 = vshll.u32 %v4383_v16, 16  ;;  %v2852_v50 = vor.u32 %v2851_v44, %v2848_v36  ;;  %v5306_v16 = vld [vmem:[%s5599_s18 + $0x38] ss:$8 sps:$4 sm:$0xff]   ;;  %v3389_v44 = vshll.u32 %v4486_v34, 16 }
  0xcf   : > { %5081 = vmatpush3.bf16.msra.mxu1 %v5282_v6  ;;  %v2543_v55 = vrot.slane %v2542_v45, 4  ;;  %v5314_v41 = vld [vmem:[%s6287_s4 + $0x3d8] sm:$0xff]  }
  0xd0   : > { %5082 = vmatprep.subr.bf16.mxu1 %v5284_v30  ;;  %v2815_v23 = vrot.slane %v2813_v2, 5  ;;  %v2857_v45 = vrot.slane %v2855_v39, 5  ;;  %v2853_v52 = vrot.slane %v2852_v50, 4 }
  0xd1   : > { %5059 = vmatpush3.bf16.msra.mxu0 %v5283_v9  ;;  %v2548_v0 = vsel %vm5489_vm2, %v2543_v55, %v2547_v40  ;;  %v2809_v9 = vrot.slane %v2807_v63, 5  ;;  %v5305_v63 = vld [vmem:[%s5599_s18 + $0x28] ss:$8 sps:$4 sm:$0xff]  }
  0xd2   : > { %5060 = vmatprep.subr.bf16.mxu0 %v5285_v43  ;;  %v4358_v6 = vcombine.low %v2534_v54, %v2548_v0  ;;  %v5297_v54 = vld [vmem:[%s5599_s18 + $0x8] ss:$8 sps:$4 sm:$0xff]   ;;  %v2858_v55 = vsel %vm5489_vm2, %v2853_v52, %v2857_v45  ;;  %v4529_v52 = vld [vmem:[%s5605_s23 + $0xc] sm:$0x1] }
  0xd3   : > { %5083 = vmatpush3.bf16.msra.mxu1 %v5284_v30  ;;  %v2810_v19 = vor.u32 %v2809_v9, %v2806_v1  ;;  %v2837_v30 = vrot.slane %v2835_v21, 5  ;;  %v5303_v1 = vld [vmem:[%s6287_s4 + $0x3b0] sm:$0xff]   ;;  %v5308_v21 = vld [vmem:[%s6287_s4 + $0x3e8] sm:$0xff]  }
  0xd4   : > { %5028 = vmatprep.mubr.bf16.mxu0 %v4358_v6  ;;  %5084 = vmatprep.subr.bf16.mxu1 %v5286_v60  ;;  %v5300_v6 = vld [vmem:[%s5605_s23 + $0x18] ss:$8 sps:$4 sm:$0xff]  }
  0xd5   : > { %5061 = vmatpush3.bf16.msra.mxu0 %v5285_v43  ;;  %v2811_v28 = vrot.slane %v2810_v19, 4  ;;  %v2838_v37 = vor.u32 %v2837_v30, %v2834_v29  ;;  %v2843_v43 = vrot.slane %v2841_v25, 5  ;;  %v5311_v19 = vld [vmem:[%s6287_s4 + $0x3a0] sm:$0xff]  }
  0xd6   : > { %5062 = vmatprep.subr.bf16.mxu0 %v5287_v5  ;;  %5029 = vmatmul.mubr.bf16.gmra.mxu0 %v4359_v33  ;;  %v4485_v33 = vld [vmem:[%s5599_s18 + $0xc] sm:$0x1] }
  0xd7   : > { %5085 = vmatpush3.bf16.msra.mxu1 %v5286_v60  ;;  %v2816_v40 = vsel %vm5489_vm2, %v2811_v28, %v2815_v23  ;;  %v2839_v42 = vrot.slane %v2838_v37, 4  ;;  %5072 = vmatprep.mubr.bf16.mxu0 %v5297_v54  ;;  %v5296_v60 = vld [vmem:[%s6287_s4 + $0x340] sm:$0xff]   ;;  %v5313_v28 = vld [vmem:[%s6287_s4 + $0x398] sm:$0xff]   ;;  %v4487_v37 = vld [vmem:[%s5599_s18 + $0x14] sm:$0x1]  ;;  %v3391_v54 = vrot.slane %v3389_v44, 5 }
  0xd8   : > { %5086 = vmatprep.subr.bf16.mxu1 %v5288_v17  ;;  %v4402_v49 = vcombine.low %v2816_v40, %v2830_v48  ;;  %v5310_v23 = vld [vmem:[%s5605_s23 + $0x38] ss:$8 sps:$4 sm:$0xff]   ;;  %v3381_v40 = vshll.u32 %v4485_v33, 16  ;;  %v3395_v45 = vshll.u32 %v4487_v37, 16 }
  0xd9   : > { %5063 = vmatpush3.bf16.msra.mxu0 %v5287_v5  ;;  %v2844_v51 = vsel %vm5489_vm2, %v2839_v42, %v2843_v43  ;;  %v3386_v43 = vshrl.u32 %v4486_v34, 16  ;;  %v5319_v33 = vld [vmem:[%s6287_s4 + $0x380] sm:$0xff]  }
  0xda   : > { %5064 = vmatprep.subr.bf16.mxu0 %v5289_v22  ;;  %5052 = vmatprep.mubr.bf16.mxu1 %v4402_v49  ;;  %v4403_v57 = vcombine.low %v2844_v51, %v2858_v55  ;;  %v3383_v51 = vrot.slane %v3381_v40, 5  ;;  %v3397_v55 = vrot.slane %v3395_v45, 5  ;;  %v5318_v40 = vld [vmem:[%s6287_s4 + $0x3c8] sm:$0xff]  }
  0xdb   : > { %5087 = vmatpush3.bf16.msra.mxu1 %v5288_v17 }
  0xdc   : > { %5088 = vmatprep.subr.bf16.mxu1 %v5290_v31  ;;  %5053 = vmatmul.mubr.bf16.gmra.mxu1 %v4403_v57 }
  0xdd   : > { %5065 = vmatpush3.bf16.msra.mxu0 %v5289_v22  ;;  %5096 = vmatprep.mubr.bf16.mxu1 %v5298_v58 }
  0xde   : > { %5066 = vmatprep.subr.bf16.mxu0 %v5291_v32 }
  0xdf   : > { %5089 = vmatpush3.bf16.msra.mxu1 %v5290_v31 }
  0xe0   : > { %5090 = vmatprep.subr.bf16.mxu1 %v5292_v46 }
  0xe1   : > { %5067 = vmatpush3.bf16.msra.mxu0 %v5291_v32  ;;  %v4484_v32 = vld [vmem:[%s5599_s18 + $0x8] sm:$0xf] }
  0xe2   : > { %5068 = vmatprep.subr.bf16.mxu0 %v5293_v47  ;;  %v3372_v38 = vshrl.u32 %v4484_v32, 16  ;;  %v3375_v39 = vshll.u32 %v4484_v32, 16  ;;  %v4532_v32 = vld [vmem:[%s5605_s23 + $0x18] sm:$0xf] }
  0xe3   : > { %5091 = vmatpush3.bf16.msra.mxu1 %v5292_v46  ;;  %v4528_v46 = vld [vmem:[%s5605_s23 + $0x8] sm:$0xf] }
  0xe4   : > { %5092 = vmatprep.subr.bf16.mxu1 %v5294_v53  ;;  %v3374_v49 = vrot.slane %v3372_v38, 4  ;;  %v3377_v50 = vrot.slane %v3375_v39, 5  ;;  %v3654_v57 = vshrl.u32 %v4528_v46, 16  ;;  %v4533_v39 = vld [vmem:[%s5605_s23 + $0x1c] sm:$0x1] }
  0xe5   : > { %5069 = vmatpush3.bf16.msra.mxu0 %v5293_v47  ;;  %v5315_v47 = vld [vmem:[%s6287_s4 + $0x390] sm:$0xff]  }
  0xe6   : > { %5070 = vmatprep.subr.bf16.mxu0 %v5295_v56  ;;  %v3378_v58 = vor.u32 %v3377_v50, %v3374_v49  ;;  %v4535_v49 = vld [vmem:[%s5605_s23 + $0x24] sm:$0x1]  ;;  %v3682_v50 = vshrl.u32 %v4532_v32, 16 }
  0xe7   : > { %5093 = vmatpush3.bf16.msra.mxu1 %v5294_v53  ;;  %v3388_v53 = vrot.slane %v3386_v43, 4 }
  0xe8   : > { %5094 = vmatprep.subr.bf16.mxu1 %v5296_v60 }
  0xe9   : > { %5071 = vmatpush3.bf16.msra.mxu0 %v5295_v56  ;;  %v4530_v56 = vld [vmem:[%s5605_s23 + $0x10] sm:$0xf] }
  0xea   : > { %5104 = vmatprep.subr.bf16.mxu0 %v5301_v59 }
  0xeb   : > { %5095 = vmatpush3.bf16.msra.mxu1 %v5296_v60  ;;  %v3657_v60 = vshll.u32 %v4528_v46, 16 }
  0xec   : > { %v4786_v0 = vpop.f32.mrf.mxu0  ;;  %5073 = vmatmul.mubr.bf16.vlgmr.msra.gmra.mxu0 %v5299_v61  ;;  %5128 = vmatprep.subr.bf16.mxu1 %v5302_v3  ;;  %v3663_v61 = vshll.u32 %v4529_v52, 16 }
  0xed   : > { %v4810_v2 = vpop.f32.mrf.mxu1  ;;  %5105 = vmatpush3.bf16.msra.mxu0 %v5301_v59  ;;  %5076 = vmatprep.mubr.bf16.mxu0 %v5305_v63  ;;  %v4531_v59 = vld [vmem:[%s5605_s23 + $0x14] sm:$0x1]  ;;  %v3668_v63 = vshrl.u32 %v4530_v56, 16 }
  0xee   : > { %v5972_v4 = vadd.f32 %v4810_v2, %v4786_v0  ;;  %v468_v5 = vpop.f32.mrf.mxu0  ;;  %5106 = vmatprep.subr.bf16.mxu0 %v5303_v1  ;;  %5097 = vmatmul.mubr.bf16.vlgmr.msra.gmra.mxu1 %v5300_v6  ;;  %v5316_v0 = vld [vmem:[%s6287_s4 + $0x3d0] sm:$0xff]   ;;  %v3392_v2 = vor.u32 %v3391_v54, %v3388_v53  ;;  %v3677_v6 = vshll.u32 %v4531_v59, 16  ;;  %v3684_v59 = vrot.slane %v3682_v50, 4 }
  0xef   : > { %v605_v7 = vpop.f32.mrf.mxu1  ;;  %5129 = vmatpush3.bf16.msra.mxu1 %v5302_v3  ;;  %5100 = vmatprep.mubr.bf16.mxu1 %v5309_v13  ;;  %v3656_v3 = vrot.slane %v3654_v57, 4  ;;  %v4489_v13 = vld [vmem:[%s5599_s18 + $0x1c] sm:$0x1] }
  0xf0   : > { %v5978_v9 = vadd.f32 %v605_v7, %v468_v5  ;;  %v4787_v10 = vpop.f32.mrf.mxu0  ;;  %5130 = vmatprep.subr.bf16.mxu1 %v5304_v8  ;;  %v3671_v5 = vshll.u32 %v4530_v56, 16  ;;  %v4488_v7 = vld [vmem:[%s5599_s18 + $0x18] sm:$0xf]  ;;  %v4492_v56 = vld [vmem:[%s5599_s18 + $0x28] sm:$0xf] }
  0xf1   : > { %v4811_v12 = vpop.f32.mrf.mxu1  ;;  %5107 = vmatpush3.bf16.msra.mxu0 %v5303_v1  ;;  %v5317_v1 = vld [vmem:[%s6287_s4 + $0x388] sm:$0xff]  }
  0xf2   : > { %v5984_v14 = vadd.f32 %v4811_v12, %v4787_v10  ;;  %v471_v15 = vpop.f32.mrf.mxu0  ;;  %5108 = vmatprep.subr.bf16.mxu0 %v5307_v11  ;;  %v3659_v10 = vrot.slane %v3657_v60, 5  ;;  %v3670_v12 = vrot.slane %v3668_v63, 4 }
  0xf3   : > { %v608_v17 = vpop.f32.mrf.mxu1  ;;  %5131 = vmatpush3.bf16.msra.mxu1 %v5304_v8  ;;  %v3379_v8 = vrot.slane %v3378_v58, 4 }
  0xf4   : > { %v5987_v18 = vadd.f32 %v608_v17, %v471_v15  ;;  %v4790_v20 = vpop.f32.mrf.mxu0  ;;  %5077 = vmatmul.mubr.bf16.gmra.mxu0 %v5306_v16  ;;  %5132 = vmatprep.subr.bf16.mxu1 %v5308_v21  ;;  %v3393_v15 = vrot.slane %v3392_v2, 4  ;;  %v3673_v16 = vrot.slane %v3671_v5, 5  ;;  %v3679_v17 = vrot.slane %v3677_v6, 5  ;;  %v4493_v5 = vld [vmem:[%s5599_s18 + $0x2c] sm:$0x1] }
  0xf5   : > { %v4814_v22 = vpop.f32.mrf.mxu1  ;;  %5109 = vmatpush3.bf16.msra.mxu0 %v5307_v11  ;;  %v3665_v11 = vrot.slane %v3663_v61, 5  ;;  %v5320_v61 = vld [vmem:[%s6287_s4 + $0x3c0] sm:$0xff]  }
  0xf6   : > { %v5996_v24 = vadd.f32 %v4814_v22, %v4790_v20  ;;  %v484_v25 = vpop.f32.mrf.mxu0  ;;  %5110 = vmatprep.subr.bf16.mxu0 %v5311_v19  ;;  %5101 = vmatmul.mubr.bf16.gmra.mxu1 %v5310_v23  ;;  %v3400_v20 = vshrl.u32 %v4488_v7, 16  ;;  %v3660_v22 = vor.u32 %v3659_v10, %v3656_v3  ;;  %v4491_v23 = vld [vmem:[%s5599_s18 + $0x24] sm:$0x1] }
  0xf7   : > { %v621_v27 = vpop.f32.mrf.mxu1  ;;  %5133 = vmatpush3.bf16.msra.mxu1 %v5308_v21  ;;  %v3384_v21 = vsel %vm5489_vm2, %v3379_v8, %v3383_v51  ;;  %v3423_v44 = vshll.u32 %v4491_v23, 16  ;;  %v3685_v51 = vshll.u32 %v4532_v32, 16  ;;  %v3428_v8 = vshrl.u32 %v4492_v56, 16 }
  0xf8   : > { %v6004_v29 = vadd.f32 %v621_v27, %v484_v25  ;;  %v4791_v30 = vpop.f32.mrf.mxu0  ;;  %5134 = vmatprep.subr.bf16.mxu1 %v5312_v26  ;;  %v3403_v25 = vshll.u32 %v4488_v7, 16  ;;  %v3398_v27 = vsel %vm5489_vm2, %v3393_v15, %v3397_v55  ;;  %v3691_v55 = vshll.u32 %v4533_v39, 16 }
  0xf9   : > { %v4815_v31 = vpop.f32.mrf.mxu1  ;;  %5111 = vmatpush3.bf16.msra.mxu0 %v5311_v19  ;;  %v4490_v19 = vld [vmem:[%s5599_s18 + $0x20] sm:$0xf]  ;;  %v4516_v34 = vcombine.low %v3384_v21, %v3398_v27  ;;  %v3425_v54 = vrot.slane %v3423_v44, 5  ;;  %v3687_v60 = vrot.slane %v3685_v51, 5  ;;  %v3705_v7 = vshll.u32 %v4535_v49, 16 }
  0xfa   : > { %v6009_v35 = vadd.f32 %v4815_v31, %v4791_v30  ;;  %v487_v36 = vpop.f32.mrf.mxu0  ;;  %5112 = vmatprep.subr.bf16.mxu0 %v5313_v28  ;;  %v3402_v30 = vrot.slane %v3400_v20, 4  ;;  %v3414_v31 = vshrl.u32 %v4490_v19, 16  ;;  %v3405_v37 = vrot.slane %v3403_v25, 5  ;;  %v4538_v51 = vld [vmem:[%s5605_s23 + $0x30] sm:$0xf] }
  0xfb   : > { %v624_v42 = vpop.f32.mrf.mxu1  ;;  %5135 = vmatpush3.bf16.msra.mxu1 %v5312_v26  ;;  %v3409_v26 = vshll.u32 %v4489_v13, 16  ;;  %v3417_v43 = vshll.u32 %v4490_v19, 16  ;;  %5120 = vmatprep.mubr.bf16.mxu0 %v4516_v34  ;;  %v3688_v6 = vor.u32 %v3687_v60, %v3684_v59  ;;  %v4494_v13 = vld [vmem:[%s5599_s18 + $0x30] sm:$0xf]  ;;  %v3431_v15 = vshll.u32 %v4492_v56, 16 }
  0xfc   : > { %v6019_v48 = vadd.f32 %v624_v42, %v487_v36  ;;  %5136 = vmatprep.subr.bf16.mxu1 %v5314_v41  ;;  %v3661_v36 = vrot.slane %v3660_v22, 4  ;;  %v3406_v46 = vor.u32 %v3405_v37, %v3402_v30  ;;  %v3707_v19 = vrot.slane %v3705_v7, 5  ;;  %v4496_v59 = vld [vmem:[%s5599_s18 + $0x38] sm:$0xf] }
  0xfd   : > { %5113 = vmatpush3.bf16.msra.mxu0 %v5313_v28  ;;  %v3674_v28 = vor.u32 %v3673_v16, %v3670_v12  ;;  %v3411_v38 = vrot.slane %v3409_v26, 5  ;;  %v3419_v53 = vrot.slane %v3417_v43, 5  ;;  %v3430_v20 = vrot.slane %v3428_v8, 4  ;;  %v4495_v26 = vld [vmem:[%s5599_s18 + $0x34] sm:$0x1] }
  0xfe   : > { %5114 = vmatprep.subr.bf16.mxu0 %v5315_v47  ;;  %v3666_v45 = vsel %vm5489_vm2, %v3661_v36, %v3665_v11  ;;  %v3407_v58 = vrot.slane %v3406_v46, 4  ;;  %v3437_v21 = vshll.u32 %v4493_v5, 16  ;;  %v3433_v27 = vrot.slane %v3431_v15, 5 }
  0xff   : > { %5137 = vmatpush3.bf16.msra.mxu1 %v5314_v41  ;;  %v3675_v42 = vrot.slane %v3674_v28, 4  ;;  %v3416_v41 = vrot.slane %v3414_v31, 4  ;;  %v4536_v28 = vld [vmem:[%s5605_s23 + $0x28] sm:$0xf]  ;;  %v3442_v36 = vshrl.u32 %v4494_v13, 16  ;;  %v3445_v43 = vshll.u32 %v4494_v13, 16 }
 0x100   : > { %5138 = vmatprep.subr.bf16.mxu1 %v5316_v0  ;;  %v3439_v34 = vrot.slane %v3437_v21, 5  ;;  %v3434_v39 = vor.u32 %v3433_v27, %v3430_v20  ;;  %v3451_v44 = vshll.u32 %v4495_v26, 16  ;;  %v3710_v46 = vshrl.u32 %v4536_v28, 16  ;;  %v4499_v26 = vld [vmem:[%s5599_s18 + $0x44] sm:$0x1] }
 0x101   : > { %5115 = vmatpush3.bf16.msra.mxu0 %v5315_v47  ;;  %v4534_v47 = vld [vmem:[%s5605_s23 + $0x20] sm:$0xf]  ;;  %v3680_v52 = vsel %vm5489_vm2, %v3675_v42, %v3679_v17  ;;  %v3420_v63 = vor.u32 %v3419_v53, %v3416_v41  ;;  %v3689_v17 = vrot.slane %v3688_v6, 4  ;;  %v3444_v41 = vrot.slane %v3442_v36, 4  ;;  %v4497_v6 = vld [vmem:[%s5599_s18 + $0x3c] sm:$0x1] }
 0x102   : > { %5116 = vmatprep.subr.bf16.mxu0 %v5317_v1  ;;  %v4560_v57 = vcombine.low %v3666_v45, %v3680_v52  ;;  %v3696_v2 = vshrl.u32 %v4534_v47, 16  ;;  %v3699_v3 = vshll.u32 %v4534_v47, 16  ;;  %v4537_v45 = vld [vmem:[%s5605_s23 + $0x2c] sm:$0x1]  ;;  %v4539_v52 = vld [vmem:[%s5605_s23 + $0x34] sm:$0x1] }
 0x103   : > { %5139 = vmatpush3.bf16.msra.mxu1 %v5316_v0  ;;  %v3412_v0 = vsel %vm5489_vm2, %v3407_v58, %v3411_v38  ;;  %v3421_v10 = vrot.slane %v3420_v63, 4  ;;  %v3447_v56 = vrot.slane %v3445_v43, 5  ;;  %v3712_v58 = vrot.slane %v3710_v46, 4 }
 0x104   : > { %5140 = vmatprep.subr.bf16.mxu1 %v5318_v40  ;;  %5144 = vmatprep.mubr.bf16.mxu1 %v4560_v57  ;;  %v3698_v11 = vrot.slane %v3696_v2, 4  ;;  %v3701_v12 = vrot.slane %v3699_v3, 5  ;;  %v3453_v57 = vrot.slane %v3451_v44, 5  ;;  %v3719_v3 = vshll.u32 %v4537_v45, 16  ;;  %v4542_v45 = vld [vmem:[%s5605_s23 + $0x40] sm:$0xf] }
 0x105   : > { %5117 = vmatpush3.bf16.msra.mxu0 %v5317_v1  ;;  %v3693_v1 = vrot.slane %v3691_v55, 5  ;;  %v3426_v23 = vsel %vm5489_vm2, %v3421_v10, %v3425_v54  ;;  %v3448_v2 = vor.u32 %v3447_v56, %v3444_v41  ;;  %v3724_v5 = vshrl.u32 %v4538_v51, 16 }
 0x106   : > { %5118 = vmatprep.subr.bf16.mxu0 %v5319_v33  ;;  %v3702_v25 = vor.u32 %v3701_v12, %v3698_v11  ;;  %v4517_v31 = vcombine.low %v3412_v0, %v3426_v23  ;;  %v3727_v0 = vshll.u32 %v4538_v51, 16  ;;  %v3733_v10 = vshll.u32 %v4539_v52, 16  ;;  %v4498_v11 = vld [vmem:[%s5599_s18 + $0x40] sm:$0xf]  ;;  %s4575_s18 = sshll.u32 %s6321_s22, 6 }
 0x107   : > { %5141 = vmatpush3.bf16.msra.mxu1 %v5318_v40  ;;  %v3694_v32 = vsel %vm5489_vm2, %v3689_v17, %v3693_v1  ;;  %v3456_v12 = vshrl.u32 %v4496_v59, 16  ;;  %v3721_v13 = vrot.slane %v3719_v3, 5  ;;  %v3726_v15 = vrot.slane %v3724_v5, 4  ;;  %s6239_s15 = scalar_lea.vmem %s6289_s6, %s4575_s18 }
 0x108   : > { %5142 = vmatprep.subr.bf16.mxu1 %v5320_v61  ;;  %v3703_v38 = vrot.slane %v3702_v25, 4  ;;  %v3459_v21 = vshll.u32 %v4496_v59, 16  ;;  %v3465_v27 = vshll.u32 %v4497_v6, 16  ;;  %v3479_v44 = vshll.u32 %v4499_v26, 16 }
 0x109   : > { %5119 = vmatpush3.bf16.msra.mxu0 %v5319_v33  ;;  %v3458_v20 = vrot.slane %v3456_v12, 4  ;;  %v3752_v59 = vshrl.u32 %v4542_v45, 16 }
 0x10a   : > { %v3708_v47 = vsel %vm5489_vm2, %v3703_v38, %v3707_v19  ;;  %v3735_v19 = vrot.slane %v3733_v10, 5  ;;  %v3467_v38 = vrot.slane %v3465_v27, 5 }
 0x10b   : > { %5143 = vmatpush3.bf16.msra.mxu1 %v5320_v61  ;;  %v4561_v53 = vcombine.low %v3694_v32, %v3708_v47 }
 0x10c   : > { %v4834_v16 = vpop.f32.mrf.mxu0  ;;  %5121 = vmatmul.mubr.bf16.vlgmr.msra.gmra.mxu0 %v4517_v31 }
 0x10d   : > { %v915_v22 = vadd.f32 %v4834_v16, %v5972_v4  ;;  %v4858_v30 = vpop.f32.mrf.mxu1  ;;  %v3729_v16 = vrot.slane %v3727_v0, 5  ;;  %v3754_v0 = vrot.slane %v3752_v59, 4 }
 0x10e   : > { %v882_v33 = vpop.f32.mrf.mxu0  ;;  %5145 = vmatmul.mubr.bf16.vlgmr.msra.gmra.mxu1 %v4561_v53 }
 0x10f   : > { %v6067_v37 = vadd.f32 %v4858_v30, %v915_v22  ;;  %v913_v4 = vadd.f32 %v882_v33, %v5978_v9  ;;  %v1164_v40 = vpop.f32.mrf.mxu1  ;;  %v3435_v9 = vrot.slane %v3434_v39, 4  ;;  %v3730_v23 = vor.u32 %v3729_v16, %v3726_v15  ;;  %v4540_v30 = vld [vmem:[%s5605_s23 + $0x38] sm:$0xf] }
 0x110   : > { %v4835_v42 = vpop.f32.mrf.mxu0  ;;  %v3473_v39 = vshll.u32 %v4498_v11, 16  ;;  %v3738_v46 = vshrl.u32 %v4540_v30, 16 }
 0x111   : > { %v6073_v49 = vadd.f32 %v1164_v40, %v913_v4  ;;  %v916_v50 = vadd.f32 %v4835_v42, %v5984_v14  ;;  %v4859_v54 = vpop.f32.mrf.mxu1  ;;  %v3440_v63 = vsel %vm5489_vm2, %v3435_v9, %v3439_v34  ;;  %v3713_v14 = vshll.u32 %v4536_v28, 16  ;;  %v4541_v40 = vld [vmem:[%s5605_s23 + $0x3c] sm:$0x1] }
 0x112   : > { %v885_v55 = vpop.f32.mrf.mxu0  ;;  %v3470_v28 = vshrl.u32 %v4498_v11, 16  ;;  %v3461_v34 = vrot.slane %v3459_v21, 5  ;;  %v3731_v36 = vrot.slane %v3730_v23, 4  ;;  %v3741_v9 = vshll.u32 %v4540_v30, 16 }
 0x113   : > { %v6079_v60 = vadd.f32 %v4859_v54, %v916_v50  ;;  %v914_v61 = vadd.f32 %v885_v55, %v5987_v18  ;;  %v1167_v1 = vpop.f32.mrf.mxu1  ;;  %v3715_v8 = vrot.slane %v3713_v14, 5  ;;  %v3449_v18 = vrot.slane %v3448_v2, 4  ;;  %v4543_v50 = vld [vmem:[%s5605_s23 + $0x44] sm:$0x1] }
 0x114   : > { %v4838_v25 = vpop.f32.mrf.mxu0  ;;  %v3472_v4 = vrot.slane %v3470_v28, 4  ;;  %v3462_v43 = vor.u32 %v3461_v34, %v3458_v20  ;;  %v3736_v47 = vsel %vm5489_vm2, %v3731_v36, %v3735_v19  ;;  %v3740_v54 = vrot.slane %v3738_v46, 4 }
 0x115   : > { %v6085_v7 = vadd.f32 %v1167_v1, %v914_v61  ;;  %v3716_v17 = vor.u32 %v3715_v8, %v3712_v58  ;;  %v3454_v22 = vsel %vm5489_vm2, %v3449_v18, %v3453_v57  ;;  %v919_v33 = vadd.f32 %v4838_v25, %v5996_v24 }
 0x116   : > { %v4518_v31 = vcombine.low %v3440_v63, %v3454_v22  ;;  %v898_v42 = vpop.f32.mrf.mxu0  ;;  %v3475_v24 = vrot.slane %v3473_v39, 5  ;;  %v3463_v53 = vrot.slane %v3462_v43, 4  ;;  %v3747_v55 = vshll.u32 %v4541_v40, 16 }
 0x117   : > { %v3717_v32 = vrot.slane %v3716_v17, 4  ;;  %v3481_v57 = vrot.slane %v3479_v44, 5  ;;  %v3743_v58 = vrot.slane %v3741_v9, 5  ;;  %v3755_v14 = vshll.u32 %v4542_v45, 16 }
 0x118   : > { %5124 = vmatprep.mubr.bf16.mxu0 %v4518_v31  ;;  %v4839_v51 = vpop.f32.mrf.mxu0  ;;  %v3476_v56 = vor.u32 %v3475_v24, %v3472_v4  ;;  %v3468_v63 = vsel %vm5489_vm2, %v3463_v53, %v3467_v38  ;;  %v3761_v1 = vshll.u32 %v4543_v50, 16  ;;  %v917_v2 = vadd.f32 %v898_v42, %v6004_v29 }
 0x119   : > { %v3722_v41 = vsel %vm5489_vm2, %v3717_v32, %v3721_v13  ;;  %v3744_v5 = vor.u32 %v3743_v58, %v3740_v54  ;;  %v920_v6 = vadd.f32 %v4839_v51, %v6009_v35  ;;  %v3749_v8 = vrot.slane %v3747_v55, 5  ;;  %v4862_v13 = vpop.f32.mrf.mxu1 }
 0x11a   : > { %v4562_v52 = vcombine.low %v3722_v41, %v3736_v47  ;;  %v901_v61 = vpop.f32.mrf.mxu0  ;;  %v3477_v3 = vrot.slane %v3476_v56, 4  ;;  %v3757_v10 = vrot.slane %v3755_v14, 5  ;;  %v3763_v17 = vrot.slane %v3761_v1, 5 }
 0x11b   : > { %v918_v11 = vadd.f32 %v901_v61, %v6019_v48  ;;  %v3745_v18 = vrot.slane %v3744_v5, 4  ;;  %v1201_v19 = vadd.f32 %v4862_v13, %v919_v33  ;;  %v1180_v20 = vpop.f32.mrf.mxu1 }
 0x11c   : > { %5148 = vmatprep.mubr.bf16.mxu1 %v4562_v52  ;;  %v3482_v12 = vsel %vm5489_vm2, %v3477_v3, %v3481_v57  ;;  %v3758_v16 = vor.u32 %v3757_v10, %v3754_v0  ;;  %v1199_v35 = vadd.f32 %v1180_v20, %v917_v2 }
 0x11d   : > { %v4519_v15 = vcombine.low %v3468_v63, %v3482_v12  ;;  %v3750_v29 = vsel %vm5489_vm2, %v3745_v18, %v3749_v8  ;;  %v4863_v22 = vpop.f32.mrf.mxu1 }
 0x11e   : > { %v3759_v21 = vrot.slane %v3758_v16, 4  ;;  %v1202_v23 = vadd.f32 %v4863_v22, %v920_v6 }
 0x11f   : > { %5125 = vmatmul.mubr.bf16.gmra.mxu0 %v4519_v15  ;;  %v1183_v26 = vpop.f32.mrf.mxu1 }
 0x120   : > { %v3764_v48 = vsel %vm5489_vm2, %v3759_v21, %v3763_v17  ;;  %v1200_v27 = vadd.f32 %v1183_v26, %v918_v11 }
 0x121   : > { %v4563_v25 = vcombine.low %v3750_v29, %v3764_v48 }
 0x123   : > { %5149 = vmatmul.mubr.bf16.gmra.mxu1 %v4563_v25 }
 0x12c   : > { %v6111_v28 = vpop.f32.mrf.mxu0 }
 0x12e   : > { %v6113_v30 = vpop.f32.mrf.mxu1  ;;  %v6115_v31 = vpop.f32.mrf.mxu0 }
 0x130   : > { %v6117_v32 = vpop.f32.mrf.mxu1  ;;  %v6119_v33 = vpop.f32.mrf.mxu0 }
 0x132   : > { %v6121_v34 = vpop.f32.mrf.mxu1  ;;  %v6123_v36 = vpop.f32.mrf.mxu0 }
 0x134   : > { %v6125_v62 = vpop.f32.mrf.mxu1  ;;  %v4886_v38 = vpop.f32.mrf.mxu0 }
 0x135   : > { %v1371_v4 = vadd.f32 %v4886_v38, %v1201_v19 }
 0x136   : > { %v1350_v39 = vpop.f32.mrf.mxu0  ;;  %v4910_v40 = vpop.f32.mrf.mxu1 }
 0x137   : > { %v1369_v42 = vadd.f32 %v1350_v39, %v1199_v35  ;;  %v6127_v41 = vadd.f32 %v4910_v40, %v1371_v4 }
 0x138   : > { %v4887_v43 = vpop.f32.mrf.mxu0  ;;  %v1520_v44 = vpop.f32.mrf.mxu1 }
 0x139   : > { %v1372_v45 = vadd.f32 %v4887_v43, %v1202_v23  ;;  %v6129_v46 = vadd.f32 %v1520_v44, %v1369_v42 }
 0x13a   : > { %v1353_v47 = vpop.f32.mrf.mxu0  ;;  %v4911_v24 = vpop.f32.mrf.mxu1 }
 0x13b   : > { %v1370_v50 = vadd.f32 %v1353_v47, %v1200_v27  ;;  %v6131_v9 = vadd.f32 %v4911_v24, %v1372_v45 }
 0x13c   : > { %v1523_v51 = vpop.f32.mrf.mxu1 }
 0x13d   : > { %v6133_v52 = vadd.f32 %v1523_v51, %v1370_v50 }
 0x14c   : > { %v4930_v53 = vpop.f32.mrf.mxu0 }
 0x14e   : > { %v1786_v54 = vpop.f32.mrf.mxu0  ;;  %v4954_v56 = vpop.f32.mrf.mxu1 }
 0x150   : > { %v4931_v55 = vpop.f32.mrf.mxu0  ;;  %v2068_v58 = vpop.f32.mrf.mxu1 }
 0x152   : > { %v6135_v57 = vpop.f32.mrf.mxu0  ;;  %v6139_v61 = vpop.f32.mrf.mxu1 }
 0x154   : > { %v6137_v59 = vpop.f32.mrf.mxu0  ;;  %v6143_v14 = vpop.f32.mrf.mxu1 }
 0x156   : > { %v6141_v63 = vpop.f32.mrf.mxu0 }
 0x158   : > { %v6145_v1 = vpop.f32.mrf.mxu0 }
 0x15a   : > { %v6149_v3 = vpop.f32.mrf.mxu0 }
 0x15c   : > { %v6147_v2 = vpop.f32.mrf.mxu1 }
 0x15e   : > { %v6151_v5 = vpop.f32.mrf.mxu1 }
 0x160   : > { %v6153_v6 = vpop.f32.mrf.mxu1 }
 0x162   : > { %v6155_v10 = vpop.f32.mrf.mxu1 }
 0x16c   : > { %v4978_v0 = vpop.f32.mrf.mxu0 }
 0x16e   : > { %v2239_v8 = vpop.f32.mrf.mxu0  ;;  %v5002_v12 = vpop.f32.mrf.mxu1 }
 0x170   : > { %v4979_v11 = vpop.f32.mrf.mxu0  ;;  %v2410_v13 = vpop.f32.mrf.mxu1 }
 0x172   : > { %v2242_v18 = vpop.f32.mrf.mxu0  ;;  %v5003_v16 = vpop.f32.mrf.mxu1 }
 0x174   : > { %v6157_v15 = vpop.f32.mrf.mxu0  ;;  %v2413_v19 = vpop.f32.mrf.mxu1 }
 0x176   : > { %v6159_v17 = vpop.f32.mrf.mxu0  ;;  %v6161_v20 = vpop.f32.mrf.mxu1 }
 0x177   : > { %6292 = vst [vmem:[#allocation2_spill] sm:$0xff] %v6161_v20 }
 0x178   : > { %v6163_v29 = vpop.f32.mrf.mxu0  ;;  %v6165_v21 = vpop.f32.mrf.mxu1 }
 0x179   : > { %6293 = vst [vmem:[#allocation3_spill] sm:$0xff] %v6163_v29  ;;  %6294 = vst [vmem:[#allocation4_spill] sm:$0xff] %v6165_v21 }
 0x17a   : > { %v6167_v35 = vpop.f32.mrf.mxu0  ;;  %v6169_v48 = vpop.f32.mrf.mxu1 }
 0x17b   : > { %6295 = vst [vmem:[#allocation5_spill] sm:$0xff] %v6167_v35  ;;  %6296 = vst [vmem:[#allocation6_spill] sm:$0xff] %v6169_v48  ;;  %v1365_v48 = vadd.f32 %v6115_v31, %v6073_v49 }
 0x17c   : > { %v6171_v25 = vpop.f32.mrf.mxu1 }
 0x17d   : > { %6297 = vst [vmem:[#allocation7_spill] sm:$0xff] %v6171_v25  ;;  %v1367_v25 = vadd.f32 %v6111_v28, %v6067_v37 }
 0x18c   : > { %v5026_v22 = vpop.f32.mrf.mxu0 }
 0x18e   : > { %v2692_v23 = vpop.f32.mrf.mxu0  ;;  %v5050_v26 = vpop.f32.mrf.mxu1 }
 0x190   : > { %v5027_v27 = vpop.f32.mrf.mxu0  ;;  %v2974_v38 = vpop.f32.mrf.mxu1 }
 0x192   : > { %v2695_v4 = vpop.f32.mrf.mxu0  ;;  %v5051_v39 = vpop.f32.mrf.mxu1 }
 0x194   : > { %v2977_v42 = vpop.f32.mrf.mxu1 }
 0x196   : > { %v6173_v40 = vpop.f32.mrf.mxu0 }
 0x197   : > { %6298 = vst [vmem:[#allocation8_spill] sm:$0xff] %v6173_v40 }
 0x198   : > { %v6175_v43 = vpop.f32.mrf.mxu0 }
 0x199   : > { %6299 = vst [vmem:[#allocation9_spill] sm:$0xff] %v6175_v43 }
 0x19a   : > { %v6179_v45 = vpop.f32.mrf.mxu0 }
 0x19b   : > { %6301 = vst [vmem:[#allocation11_spill] sm:$0xff] %v6179_v45  ;;  %v1368_v45 = vadd.f32 %v6119_v33, %v6079_v60 }
 0x19c   : > { %v6177_v44 = vpop.f32.mrf.mxu1  ;;  %v6183_v24 = vpop.f32.mrf.mxu0 }
 0x19d   : > { %6300 = vst [vmem:[#allocation10_spill] sm:$0xff] %v6177_v44  ;;  %6303 = vst [vmem:[#allocation13_spill] sm:$0xff] %v6183_v24  ;;  %v1537_v44 = vadd.f32 %v6113_v30, %v1367_v25  ;;  %v1535_v24 = vadd.f32 %v6117_v32, %v1365_v48  ;;  %v1538_v37 = vadd.f32 %v6121_v34, %v1368_v45 }
 0x19e   : > { %v6181_v47 = vpop.f32.mrf.mxu1 }
 0x19f   : > { %6302 = vst [vmem:[#allocation12_spill] sm:$0xff] %v6181_v47  ;;  %v1819_v21 = vadd.f32 %v4930_v53, %v1537_v44  ;;  %v1817_v28 = vadd.f32 %v1786_v54, %v1535_v24  ;;  %v1820_v29 = vadd.f32 %v4931_v55, %v1538_v37 }
 0x1a0   : > { %v6185_v50 = vpop.f32.mrf.mxu1 }
 0x1a1   : > { %6304 = vst [vmem:[#allocation14_spill] sm:$0xff] %v6185_v50  ;;  %v1366_v50 = vadd.f32 %v6123_v36, %v6085_v7  ;;  %v2099_v25 = vadd.f32 %v2068_v58, %v1817_v28  ;;  %v2102_v32 = vadd.f32 %v6139_v61, %v1820_v29 }
 0x1a2   : > { %v6191_v40 = vpop.f32.mrf.mxu1 }
 0x1a3   : > { %6305 = vst [vmem:[#allocation15_spill] sm:$0xff] %v6191_v40  ;;  %v1536_v31 = vadd.f32 %v6125_v62, %v1366_v50  ;;  %v2101_v40 = vadd.f32 %v4954_v56, %v1819_v21  ;;  %v2270_v48 = vadd.f32 %v2239_v8, %v2099_v25  ;;  %v2273_v53 = vadd.f32 %v4979_v11, %v2102_v32 }
 0x1a5   : > { %v1818_v60 = vadd.f32 %v6135_v57, %v1536_v31  ;;  %v2272_v33 = vadd.f32 %v4978_v0, %v2101_v40  ;;  %v2441_v44 = vadd.f32 %v2410_v13, %v2270_v48  ;;  %v2444_v57 = vadd.f32 %v5003_v16, %v2273_v53 }
 0x1a6   : > { %v1823_v16 = vadd.f32 %v6137_v59, %v6127_v41 }
 0x1a7   : > { %v2100_v36 = vadd.f32 %v6143_v14, %v1818_v60  ;;  %v2443_v34 = vadd.f32 %v5002_v12, %v2272_v33  ;;  %v2723_v0 = vadd.f32 %v2692_v23, %v2441_v44  ;;  %v2726_v61 = vadd.f32 %v5027_v27, %v2444_v57  ;;  %v6307_v33 = vld [vmem:[#allocation3_spill] sm:$0xff] }
 0x1a8   : > { %v1821_v27 = vadd.f32 %v6141_v63, %v6129_v46  ;;  %v2105_v37 = vadd.f32 %v6147_v2, %v1823_v16  ;;  %v6232_v63 = vld [vmem:[%s6288_s5] ss:$0 sm:$0xff]  ;;  %v6315_v16 = vld [vmem:[#allocation11_spill] sm:$0xff] }
 0x1a9   : > { %v2271_v62 = vadd.f32 %v2242_v18, %v2100_v36  ;;  %v2725_v56 = vadd.f32 %v5026_v22, %v2443_v34  ;;  %v3005_v14 = vadd.f32 %v2974_v38, %v2723_v0  ;;  %v3008_v45 = vadd.f32 %v5051_v39, %v2726_v61  ;;  %v6308_v34 = vld [vmem:[#allocation5_spill] sm:$0xff]  ;;  %v6311_v0 = vld [vmem:[#allocation6_spill] sm:$0xff] }
 0x1aa   : > { %v1824_v39 = vadd.f32 %v6145_v1, %v6131_v9  ;;  %v2103_v59 = vadd.f32 %v6151_v5, %v1821_v27  ;;  %v2276_v9 = vadd.f32 %v6157_v15, %v2105_v37  ;;  %v6317_v27 = vld [vmem:[#allocation13_spill] sm:$0xff] }
 0x1ab   : > { %v2442_v21 = vadd.f32 %v2413_v19, %v2271_v62  ;;  %v3007_v40 = vadd.f32 %v5050_v26, %v2725_v56  ;;  %v6310_v62 = vld [vmem:[#allocation8_spill] sm:$0xff] }
 0x1ac   : > { %v5074_v51 = vpop.f32.mrf.mxu0  ;;  %v2274_v5 = vadd.f32 %v6159_v17, %v2103_v59 }
 0x1ad   : > { %v2724_v12 = vadd.f32 %v2695_v4, %v2442_v21  ;;  %v3178_v11 = vadd.f32 %v5074_v51, %v3007_v40  ;;  %v6312_v40 = vld [vmem:[#allocation9_spill] sm:$0xff] }
 0x1ae   : > { %v3145_v43 = vpop.f32.mrf.mxu0  ;;  %v5098_v47 = vpop.f32.mrf.mxu1 }
 0x1af   : > { %v3176_v13 = vadd.f32 %v3145_v43, %v3005_v14  ;;  %v3006_v19 = vadd.f32 %v2977_v42, %v2724_v12  ;;  %v3349_v23 = vadd.f32 %v5098_v47, %v3178_v11  ;;  %v6313_v12 = vld [vmem:[#allocation7_spill] sm:$0xff] }
 0x1b0   : > { %v5075_v35 = vpop.f32.mrf.mxu0  ;;  %v3316_v49 = vpop.f32.mrf.mxu1 }
 0x1b1   : > { %v3179_v26 = vadd.f32 %v5075_v35, %v3008_v45  ;;  %v3347_v38 = vadd.f32 %v3316_v49, %v3176_v13  ;;  %v1822_v35 = vadd.f32 %v6149_v3, %v6133_v52  ;;  %v6314_v45 = vld [vmem:[#allocation10_spill] sm:$0xff] }
 0x1b2   : > { %v3148_v30 = vpop.f32.mrf.mxu0  ;;  %v5099_v20 = vpop.f32.mrf.mxu1 }
 0x1b3   : > { %v3177_v4 = vadd.f32 %v3148_v30, %v3006_v19  ;;  %v3350_v28 = vadd.f32 %v5099_v20, %v3179_v26  ;;  %v2106_v20 = vadd.f32 %v6153_v6, %v1824_v39  ;;  %v2104_v30 = vadd.f32 %v6155_v10, %v1822_v35  ;;  %v6306_v6 = vld [vmem:[#allocation2_spill] sm:$0xff] }
 0x1b4   : > { %v6203_v7 = vpop.f32.mrf.mxu0  ;;  %v3319_v54 = vpop.f32.mrf.mxu1  ;;  %v2447_v60 = vadd.f32 %v6306_v6, %v2276_v9 }
 0x1b5   : > { %v3348_v1 = vadd.f32 %v3319_v54, %v3177_v4  ;;  %v2277_v32 = vadd.f32 %v6307_v33, %v2106_v20  ;;  %v2275_v53 = vadd.f32 %v6308_v34, %v2104_v30  ;;  %v6309_v54 = vld [vmem:[#allocation4_spill] sm:$0xff]  ;;  %v6318_v4 = vld [vmem:[#allocation14_spill] sm:$0xff] }
 0x1b6   : > { %v6206_v55 = vpop.f32.mrf.mxu0  ;;  %v6208_v58 = vpop.f32.mrf.mxu1  ;;  %v2445_v44 = vadd.f32 %v6309_v54, %v2274_v5  ;;  %v2729_v56 = vadd.f32 %v6310_v62, %v2447_v60 }
 0x1b7   : > { %v2448_v21 = vadd.f32 %v6311_v0, %v2277_v32  ;;  %v2446_v11 = vadd.f32 %v6313_v12, %v2275_v53 }
 0x1b8   : > { %v6210_v8 = vpop.f32.mrf.mxu0  ;;  %v6212_v29 = vpop.f32.mrf.mxu1  ;;  %v2727_v61 = vadd.f32 %v6312_v40, %v2445_v44  ;;  %v3011_v13 = vadd.f32 %v6314_v45, %v2729_v56 }
 0x1b9   : > { %v2730_v19 = vadd.f32 %v6315_v16, %v2448_v21 }
 0x1ba   : > { %v6214_v18 = vpop.f32.mrf.mxu0  ;;  %v6216_v22 = vpop.f32.mrf.mxu1 }
 0x1bc   : > { %v3335_v43 = vpop.f32.mrf.mxu1 }
 0x1cc   : > { %v5122_v24 = vpop.f32.mrf.mxu0 }
 0x1cd   : > { %v3631_v50 = vadd.f32 %v5122_v24, %v3349_v23  ;;  %v6316_v23 = vld [vmem:[#allocation12_spill] sm:$0xff]  ;;  %v2728_v24 = vadd.f32 %v6317_v27, %v2446_v11 }
 0x1ce   : > { %v3598_v51 = vpop.f32.mrf.mxu0  ;;  %v5146_v46 = vpop.f32.mrf.mxu1  ;;  %v3009_v26 = vadd.f32 %v6316_v23, %v2727_v61 }
 0x1cf   : > { %v3629_v41 = vadd.f32 %v3598_v51, %v3347_v38  ;;  %v3913_v47 = vadd.f32 %v5146_v46, %v3631_v50  ;;  %v3182_v38 = vadd.f32 %v6203_v7, %v3011_v13  ;;  %v3012_v50 = vadd.f32 %v6318_v4, %v2730_v19  ;;  %v6319_v51 = vld [vmem:[#allocation15_spill] sm:$0xff] }
 0x1d0   : > { %v5123_v42 = vpop.f32.mrf.mxu0  ;;  %v3880_v52 = vpop.f32.mrf.mxu1  ;;  %v3180_v39 = vadd.f32 %v6206_v55, %v3009_v26  ;;  %v3010_v37 = vadd.f32 %v6319_v51, %v2728_v24 }
 0x1d1   : > { %v3632_v2 = vadd.f32 %v5123_v42, %v3350_v28  ;;  %v3928_v49 = vadd.f32 %v6232_v63, %v3913_v47  ;;  %v3911_v31 = vadd.f32 %v3880_v52, %v3629_v41  ;;  %v3353_v28 = vadd.f32 %v6208_v58, %v3182_v38 }
 0x1d2   : > { %v3601_v3 = vpop.f32.mrf.mxu0  ;;  %v5147_v25 = vpop.f32.mrf.mxu1  ;;  %v3183_v41 = vadd.f32 %v6210_v8, %v3012_v50  ;;  %v3351_v35 = vadd.f32 %v6212_v29, %v3180_v39  ;;  %v3181_v46 = vadd.f32 %v6214_v18, %v3010_v37 }
 0x1d3   : > { %v3630_v15 = vadd.f32 %v3601_v3, %v3348_v1  ;;  %3936 = vst [vmem:[%s6239_s15 + $0x10] sm:$0xff] %v3928_v49  ;;  %v3926_v48 = vadd.f32 %v6232_v63, %v3911_v31  ;;  %v3914_v36 = vadd.f32 %v5147_v25, %v3632_v2 }
 0x1d4   : > { %v3883_v17 = vpop.f32.mrf.mxu1  ;;  %v3354_v7 = vadd.f32 %v6216_v22, %v3183_v41  ;;  %v3352_v2 = vadd.f32 %v3335_v43, %v3181_v46 }
 0x1d5   : > { %3934 = vst [vmem:[%s6239_s15] sm:$0xff] %v3926_v48  ;;  %v3929_v10 = vadd.f32 %v6232_v63, %v3914_v36  ;;  %v3912_v57 = vadd.f32 %v3883_v17, %v3630_v15 }
 0x1d7   : > { %3937 = vst [vmem:[%s6239_s15 + $0x18] sm:$0xff] %v3929_v10  ;;  %v3927_v14 = vadd.f32 %v6232_v63, %v3912_v57 }
 0x1d9   : > { %3935 = vst [vmem:[%s6239_s15 + $0x8] sm:$0xff] %v3927_v14 }
 0x1df   : > { %v5126_v59 = vpop.f32.mrf.mxu0 }
 0x1e0   : > { %v3635_v42 = vadd.f32 %v5126_v59, %v3353_v28 }
 0x1e1   : > { %v3614_v9 = vpop.f32.mrf.mxu0 }
 0x1e2   : > { %v3633_v1 = vadd.f32 %v3614_v9, %v3351_v35 }
 0x1e3   : > { %v5127_v47 = vpop.f32.mrf.mxu0  ;;  %v5150_v55 = vpop.f32.mrf.mxu1 }
 0x1e4   : > { %v3917_v20 = vadd.f32 %v5150_v55, %v3635_v42  ;;  %v3636_v58 = vadd.f32 %v5127_v47, %v3354_v7 }
 0x1e5   : > { %v3617_v8 = vpop.f32.mrf.mxu0  ;;  %v3896_v52 = vpop.f32.mrf.mxu1 }
 0x1e6   : > { %v3932_v29 = vadd.f32 %v6232_v63, %v3917_v20  ;;  %v3915_v3 = vadd.f32 %v3896_v52, %v3633_v1  ;;  %v3634_v18 = vadd.f32 %v3617_v8, %v3352_v2 }
 0x1e7   : > { %v5151_v5 = vpop.f32.mrf.mxu1 }
 0x1e8   : > { %3940 = vst [vmem:[%s6239_s15 + $0x30] sm:$0xff] %v3932_v29  ;;  %v3930_v49 = vadd.f32 %v6232_v63, %v3915_v3  ;;  %v3918_v22 = vadd.f32 %v5151_v5, %v3636_v58 }
 0x1e9   : > { %v3899_v31 = vpop.f32.mrf.mxu1 }
 0x1ea   : > { %3938 = vst [vmem:[%s6239_s15 + $0x20] sm:$0xff] %v3930_v49  ;;  %v3933_v15 = vadd.f32 %v6232_v63, %v3918_v22  ;;  %v3916_v43 = vadd.f32 %v3899_v31, %v3634_v18 }
 0x1ec   : > { %3941 = vst [vmem:[%s6239_s15 + $0x38] sm:$0xff] %v3933_v15  ;;  %v3931_v30 = vadd.f32 %v6232_v63, %v3916_v43 }
 0x1ee   : > { %3939 = vst [vmem:[%s6239_s15 + $0x28] sm:$0xff] %v3931_v30 }
 0x1ef PF: > { %s16_s21 = sadd.s32 1, %s5327_s21  }
 0x1f0   : > { %p13_p4 = scmp.ge.s32.totalorder %s16_s21, 4  }
 0x1f2   :  { %15 = sbr.rel (!%p13_p4) target bundleno = 1 (0x1), region = 102 }

// kernel: block_forward.3
= control target key start
LH: loop header
LB: loop body
LE: loop exit
PB: predicated region body
PF: predicated region fallthrough
CT: control target
= control target key end

     0   :  { %s7091_s18 = smov 0   ;;  %s9784_s0 = inlined_call_operand.vmem [shape: bf16[2,18,18,128], index: 0, kind: input, shape index: {}]   ;;  %s9785_s1 = inlined_call_operand.vmem [shape: bf16[9,128,128], index: 1, kind: input, shape index: {}]   ;;  %s9786_s2 = inlined_call_operand.vmem [shape: f32[1,128], index: 2, kind: input, shape index: {}]   ;;  %s9787_s3 = inlined_call_operand.vmem [shape: bf16[2,16,16,128], index: 3, kind: output, shape index: {0}]   ;;  %s9788_s4 = inlined_call_operand.vmem [shape: f32[2,1,128], index: 4, kind: output, shape index: {1}]   ;;  %s9789_s5 = inlined_call_operand.vmem [shape: f32[2,1,128], index: 5, kind: output, shape index: {2}]  }
   0x1 LB: > { %s5496_s19 = sadd.s32 4294967295, %s7059_s18   ;;  %p5500_p0 = scmp.ge.s32.totalorder %s7059_s18, 1  ;;  %s7059_s18 = sphi %s7091_s18, %s16_s18  }
   0x2   : > { %p192_p1 = scmp.lt.s32.totalorder %s7059_s18, 3 }
   0x4   : > { %p193_p2 = pnand %p5500_p0, %p192_p1 }
   0x6   : > { %196 = sbr.rel (%p193_p2) target bundleno = 577 (0x241), region = 32 }
   0xb   : > { %v6924_v0 = vld [vmem:[%s9785_s1 + $0x78] sm:$0xff]   ;;  %p226_p3 = scmp.lt.s32.totalorder %s5496_s19, 1  ;;  %v6925_v1 = vld [vmem:[%s9785_s1 + $0x70] sm:$0xff]   ;;  %v6926_v2 = vld [vmem:[%s9785_s1 + $0x68] sm:$0xff]   ;;  %vm307_vm0 = vsmask.f32 3328 }
   0xc   : > { %6467 = vmatprep.subr.bf16.mxu0 %v6924_v0  ;;  %6899 = vmatprep.subr.bf16.mxu1 %v6924_v0  ;;  %v6927_v3 = vld [vmem:[%s9785_s1 + $0x60] sm:$0xff]   ;;  %vm308_vm1 = vsmask.f32 7440  ;;  %v6928_v17 = vld [vmem:[%s9785_s1 + $0x58] sm:$0xff]   ;;  %v6929_v33 = vld [vmem:[%s9785_s1 + $0x50] sm:$0xff]   ;;  %vm1337_vm3 = vcmask 1042432  }
   0xd   : > { %s9980_s19 = smov (!%p226_p3, %s5496_s19), 1  ;;  %6468 = vmatpush3.bf16.msra.mxu0 %v6924_v0  ;;  %6907 = vmatpush3.bf16.msra.mxu1 %v6924_v0  ;;  %vm7145_vm2 = vmor %vm307_vm0, %vm308_vm1  ;;  %v6930_v58 = vld [vmem:[%s9785_s1 + $0x48] sm:$0xff]   ;;  %vm1338_vm4 = vcmask 1046532  }
   0xe   : > { %6469 = vmatprep.subr.bf16.mxu0 %v6925_v1  ;;  %6900 = vmatprep.subr.bf16.mxu1 %v6925_v1  ;;  %s6915_s26 = smul.u32 216, %s9980_s19  ;;  %vm7456_vm5 = vmor %vm1337_vm3, %vm1338_vm4  ;;  %s6123_s12 = sshll.u32 %s9980_s19, 7 }
   0xf   : > { %s9671_s15 = scalar_lea.vmem %s9787_s3, %s6123_s12  ;;  %s238_s20 = scalar_lea.vmem %s9788_s4, %s9980_s19 }
  0x10   : > { %s7114_s29 = scalar_lea.vmem %s9784_s0, %s6915_s26  ;;  %s241_s23 = scalar_lea.vmem %s9789_s5, %s9980_s19 }
  0x11   : > { %6470 = vmatpush3.bf16.msra.mxu0 %v6925_v1  ;;  %6908 = vmatpush3.bf16.msra.mxu1 %v6925_v1  ;;  %v7120_v4 = vld [vmem:[%s7114_s29] sm:$0xf]  ;;  %v7123_v5 = vld [vmem:[%s7114_s29 + $0x4] sm:$0xf]  ;;  %v7126_v6 = vld [vmem:[%s7114_s29 + $0x8] sm:$0x1] }
  0x12   : > { %6471 = vmatprep.subr.bf16.mxu0 %v6926_v2  ;;  %6901 = vmatprep.subr.bf16.mxu1 %v6926_v2  ;;  %v311_v7 = vshrl.u32 %v7120_v4, 16  ;;  %v314_v8 = vshll.u32 %v7120_v4, 16  ;;  %v320_v9 = vshll.u32 %v7123_v5, 16  ;;  %v324_v10 = vshrl.u32 %v7123_v5, 16  ;;  %v259_v12 = vld [vmem:[%s7114_s29 + $0x60] sm:$0xf] }
  0x13   : > { %v330_v11 = vshll.u32 %v7126_v6, 16  ;;  %v260_v15 = vld [vmem:[%s7114_s29 + $0x64] sm:$0xf]  ;;  %v299_v16 = vld [vmem:[%s7114_s29 + $0x68] sm:$0x1]  ;;  %v503_v21 = vshrl.u32 %v259_v12, 16 }
  0x14   : > { %v313_v13 = vrot.slane %v311_v7, 4  ;;  %v316_v14 = vrot.slane %v314_v8, 5  ;;  %v322_v18 = vrot.slane %v320_v9, 5  ;;  %v326_v19 = vrot.slane %v324_v10, 4  ;;  %v7141_v26 = vld [vmem:[%s7114_s29 + $0xc] sm:$0xf] }
  0x15   : > { %6472 = vmatpush3.bf16.msra.mxu0 %v6926_v2  ;;  %6909 = vmatpush3.bf16.msra.mxu1 %v6926_v2  ;;  %v506_v23 = vshll.u32 %v259_v12, 16  ;;  %v512_v24 = vshll.u32 %v260_v15, 16  ;;  %v516_v25 = vshrl.u32 %v260_v15, 16  ;;  %v332_v29 = vrot.slane %v330_v11, 5  ;;  %v7150_v32 = vld [vmem:[%s7114_s29 + $0x10] sm:$0xf] }
  0x16   : > { %6473 = vmatprep.subr.bf16.mxu0 %v6927_v3  ;;  %6902 = vmatprep.subr.bf16.mxu1 %v6927_v3  ;;  %v317_v22 = vor.u32 %v316_v14, %v313_v13  ;;  %v327_v28 = vor.u32 %v326_v19, %v322_v18  ;;  %v505_v30 = vrot.slane %v503_v21, 4  ;;  %v522_v31 = vshll.u32 %v299_v16, 16  ;;  %v7156_v40 = vld [vmem:[%s7114_s29 + $0x14] sm:$0x1]  ;;  %v261_v47 = vld [vmem:[%s7114_s29 + $0x6c] sm:$0xf] }
  0x17   : > { %v508_v35 = vrot.slane %v506_v23, 5  ;;  %v514_v36 = vrot.slane %v512_v24, 5  ;;  %v518_v37 = vrot.slane %v516_v25, 4  ;;  %v335_v41 = vshrl.u32 %v7141_v26, 16  ;;  %v262_v52 = vld [vmem:[%s7114_s29 + $0x70] sm:$0xf] }
  0x18   : > { %v318_v34 = vrot.slane %v317_v22, 4  ;;  %v328_v38 = vrot.slane %v327_v28, 4  ;;  %v524_v39 = vrot.slane %v522_v31, 5  ;;  %v338_v42 = vshll.u32 %v7141_v26, 16  ;;  %v300_v57 = vld [vmem:[%s7114_s29 + $0x74] sm:$0x1] }
  0x19   : > { %6474 = vmatpush3.bf16.msra.mxu0 %v6927_v3  ;;  %6910 = vmatpush3.bf16.msra.mxu1 %v6927_v3  ;;  %v509_v44 = vor.u32 %v508_v35, %v505_v30  ;;  %v519_v45 = vor.u32 %v518_v37, %v514_v36  ;;  %v344_v46 = vshll.u32 %v7150_v32, 16  ;;  %v337_v49 = vrot.slane %v335_v41, 4  ;;  %v7179_v14 = vld [vmem:[%s7114_s29 + $0x18] sm:$0xf]  ;;  %v6931_v15 = vld [vmem:[%s9785_s1 + $0x40] sm:$0xff]  }
  0x1a   : > { %6475 = vmatprep.subr.bf16.mxu0 %v6928_v17  ;;  %6903 = vmatprep.subr.bf16.mxu1 %v6928_v17  ;;  %v323_v43 = vsel %vm7145_vm2, %v318_v34, %v322_v18  ;;  %v333_v48 = vsel %vm7145_vm2, %v328_v38, %v332_v29  ;;  %v340_v50 = vrot.slane %v338_v42, 5  ;;  %v348_v51 = vshrl.u32 %v7150_v32, 16  ;;  %v7187_v19 = vld [vmem:[%s7114_s29 + $0x1c] sm:$0xf]  ;;  %v7192_v25 = vld [vmem:[%s7114_s29 + $0x20] sm:$0x1] }
  0x1b   : > { %v5520_v53 = vcombine.low %v323_v43, %v333_v48  ;;  %v510_v54 = vrot.slane %v509_v44, 4  ;;  %v520_v55 = vrot.slane %v519_v45, 4  ;;  %v346_v56 = vrot.slane %v344_v46, 5  ;;  %v263_v34 = vld [vmem:[%s7114_s29 + $0x78] sm:$0xf] }
  0x1c   : > { %v341_v59 = vor.u32 %v340_v50, %v337_v49  ;;  %v350_v60 = vrot.slane %v348_v51, 4  ;;  %v354_v61 = vshll.u32 %v7156_v40, 16  ;;  %v527_v1 = vshrl.u32 %v261_v47, 16  ;;  %v6932_v41 = vld [vmem:[%s9785_s1 + $0x38] sm:$0xff]   ;;  %v301_v49 = vld [vmem:[%s7114_s29 + $0x80] sm:$0x1] }
  0x1d   : > { %6476 = vmatpush3.bf16.msra.mxu0 %v6928_v17  ;;  %6911 = vmatpush3.bf16.msra.mxu1 %v6928_v17  ;;  %v515_v63 = vsel %vm7145_vm2, %v510_v54, %v514_v36  ;;  %v525_v0 = vsel %vm7145_vm2, %v520_v55, %v524_v39  ;;  %v530_v2 = vshll.u32 %v261_v47, 16  ;;  %v536_v12 = vshll.u32 %v262_v52, 16  ;;  %v7201_v39 = vld [vmem:[%s7114_s29 + $0x7c] sm:$0xf] }
  0x1e   : > { %6477 = vmatprep.subr.bf16.mxu0 %v6929_v33  ;;  %6904 = vmatprep.subr.bf16.mxu1 %v6929_v33  ;;  %v5528_v3 = vcombine.low %v515_v63, %v525_v0  ;;  %v342_v7 = vrot.slane %v341_v59, 4  ;;  %v351_v8 = vor.u32 %v350_v60, %v346_v56  ;;  %v356_v9 = vrot.slane %v354_v61, 5  ;;  %v6933_v42 = vld [vmem:[%s9785_s1 + $0xb8] sm:$0xff]   ;;  %v6935_v59 = vld [vmem:[%s9785_s1 + $0xb0] sm:$0xff]   ;;  %v7228_v0 = vld [vmem:[%s7114_s29 + $0x28] sm:$0xf] }
  0x1f   : > { %6483 = vmatprep.mubr.bf16.mxu0 %v5520_v53  ;;  %v529_v10 = vrot.slane %v527_v1, 4  ;;  %v532_v11 = vrot.slane %v530_v2, 5  ;;  %v540_v13 = vshrl.u32 %v262_v52, 16  ;;  %v546_v18 = vshll.u32 %v300_v57, 16  ;;  %v6934_v52 = vld [vmem:[%s9785_s1 + $0x30] sm:$0xff]  }
  0x20   : > { %v347_v16 = vsel %vm7145_vm2, %v342_v7, %v346_v56  ;;  %v352_v17 = vrot.slane %v351_v8, 4  ;;  %6499 = vmatprep.mubr.bf16.mxu1 %v5528_v3  ;;  %v538_v23 = vrot.slane %v536_v12, 5  ;;  %v359_v28 = vshrl.u32 %v7179_v14, 16  ;;  %v7219_v57 = vld [vmem:[%s7114_s29 + $0x24] sm:$0xf] }
  0x21   : > { %6478 = vmatpush3.bf16.msra.mxu0 %v6929_v33  ;;  %6912 = vmatpush3.bf16.msra.mxu1 %v6929_v33  ;;  %v533_v22 = vor.u32 %v532_v11, %v529_v10  ;;  %v542_v24 = vrot.slane %v540_v13, 4  ;;  %v548_v30 = vrot.slane %v546_v18, 5  ;;  %v362_v31 = vshll.u32 %v7179_v14, 16  ;;  %v7231_v8 = vld [vmem:[%s7114_s29 + $0x2c] sm:$0x1] }
  0x22   : > { %6479 = vmatprep.subr.bf16.mxu0 %v6930_v58  ;;  %6905 = vmatprep.subr.bf16.mxu1 %v6930_v58  ;;  %v357_v29 = vsel %vm7145_vm2, %v352_v17, %v356_v9  ;;  %v368_v33 = vshll.u32 %v7187_v19, 16  ;;  %v361_v38 = vrot.slane %v359_v28, 4  ;;  %v372_v45 = vshrl.u32 %v7187_v19, 16  ;;  %v7235_v13 = vld [vmem:[%s7114_s29 + $0x84] sm:$0xf] }
  0x23   : > { %v5521_v35 = vcombine.low %v347_v16, %v357_v29  ;;  %v534_v36 = vrot.slane %v533_v22, 4  ;;  %v543_v37 = vor.u32 %v542_v24, %v538_v23  ;;  %v364_v43 = vrot.slane %v362_v31, 5  ;;  %v7242_v22 = vld [vmem:[%s7114_s29 + $0x88] sm:$0xf] }
  0x24   : > { %v370_v44 = vrot.slane %v368_v33, 5  ;;  %v378_v46 = vshll.u32 %v7192_v25, 16  ;;  %v551_v50 = vshrl.u32 %v263_v34, 16  ;;  %v554_v51 = vshll.u32 %v263_v34, 16 }
  0x25   : > { %6480 = vmatpush3.bf16.msra.mxu0 %v6930_v58  ;;  %6913 = vmatpush3.bf16.msra.mxu1 %v6930_v58  ;;  %v539_v47 = vsel %vm7145_vm2, %v534_v36, %v538_v23  ;;  %v544_v48 = vrot.slane %v543_v37, 4  ;;  %v365_v53 = vor.u32 %v364_v43, %v361_v38  ;;  %v374_v54 = vrot.slane %v372_v45, 4  ;;  %v7251_v36 = vld [vmem:[%s7114_s29 + $0x8c] sm:$0x1] }
  0x26   : > { %6481 = vmatprep.subr.bf16.mxu0 %v6931_v15  ;;  %6906 = vmatprep.subr.bf16.mxu1 %v6931_v15  ;;  %v380_v55 = vrot.slane %v378_v46, 5  ;;  %v560_v56 = vshll.u32 %v7201_v39, 16  ;;  %v553_v60 = vrot.slane %v551_v50, 4  ;;  %v556_v61 = vrot.slane %v554_v51, 5  ;;  %v6937_v37 = vld [vmem:[%s9785_s1 + $0xa8] sm:$0xff]  }
  0x27   : > { %v549_v58 = vsel %vm7145_vm2, %v544_v48, %v548_v30  ;;  %v564_v63 = vshrl.u32 %v7201_v39, 16  ;;  %v366_v2 = vrot.slane %v365_v53, 4  ;;  %v375_v3 = vor.u32 %v374_v54, %v370_v44  ;;  %v6936_v30 = vld [vmem:[%s9785_s1 + $0x28] sm:$0xff]   ;;  %v7266_v53 = vld [vmem:[%s7114_s29 + $0x30] sm:$0xf] }
  0x28   : > { %v5529_v1 = vcombine.low %v539_v47, %v549_v58  ;;  %v562_v7 = vrot.slane %v560_v56, 5  ;;  %v557_v9 = vor.u32 %v556_v61, %v553_v60  ;;  %v570_v11 = vshll.u32 %v301_v49, 16  ;;  %v7275_v60 = vld [vmem:[%s7114_s29 + $0x34] sm:$0xf] }
  0x29   : > { %6482 = vmatpush3.bf16.msra.mxu0 %v6931_v15  ;;  %6914 = vmatpush3.bf16.msra.mxu1 %v6931_v15  ;;  %v566_v10 = vrot.slane %v564_v63, 4  ;;  %v383_v12 = vshrl.u32 %v7219_v57, 16  ;;  %v371_v15 = vsel %vm7145_vm2, %v366_v2, %v370_v44  ;;  %v376_v16 = vrot.slane %v375_v3, 4 }
  0x2a   : > { %6515 = vmatprep.subr.bf16.mxu1 %v6932_v41  ;;  %6563 = vmatprep.subr.bf16.mxu0 %v6933_v42  ;;  %v386_v17 = vshll.u32 %v7219_v57, 16  ;;  %v392_v18 = vshll.u32 %v7228_v0, 16  ;;  %v558_v23 = vrot.slane %v557_v9, 4  ;;  %v572_v28 = vrot.slane %v570_v11, 5 }
  0x2b   : > { %v567_v24 = vor.u32 %v566_v10, %v562_v7  ;;  %v385_v29 = vrot.slane %v383_v12, 4  ;;  %v381_v31 = vsel %vm7145_vm2, %v376_v16, %v380_v55  ;;  %v402_v43 = vshll.u32 %v7231_v8, 16  ;;  %v7283_v16 = vld [vmem:[%s7114_s29 + $0x38] sm:$0x1] }
  0x2c   : > { %6484 = vmatmul.mubr.bf16.vlgmr.msra.gmra.mxu0 %v5521_v35  ;;  %6500 = vmatmul.mubr.bf16.vlgmr.msra.gmra.mxu1 %v5529_v1  ;;  %v388_v33 = vrot.slane %v386_v17, 5  ;;  %v394_v34 = vrot.slane %v392_v18, 5  ;;  %v396_v35 = vshrl.u32 %v7228_v0, 16  ;;  %v5522_v38 = vcombine.low %v371_v15, %v381_v31  ;;  %v7287_v18 = vld [vmem:[%s7114_s29 + $0x90] sm:$0xf] }
  0x2d   : > { %6516 = vmatpush3.bf16.msra.mxu1 %v6932_v41  ;;  %6564 = vmatpush3.bf16.msra.mxu0 %v6933_v42  ;;  %v563_v41 = vsel %vm7145_vm2, %v558_v23, %v562_v7  ;;  %v568_v42 = vrot.slane %v567_v24, 4  ;;  %v575_v46 = vshrl.u32 %v7235_v13, 16  ;;  %v578_v47 = vshll.u32 %v7235_v13, 16  ;;  %v7293_v31 = vld [vmem:[%s7114_s29 + $0x94] sm:$0xf] }
  0x2e   : > { %6517 = vmatprep.subr.bf16.mxu1 %v6934_v52  ;;  %6565 = vmatprep.subr.bf16.mxu0 %v6935_v59  ;;  %v389_v44 = vor.u32 %v388_v33, %v385_v29  ;;  %v398_v45 = vrot.slane %v396_v35, 4  ;;  %v404_v49 = vrot.slane %v402_v43, 5  ;;  %v584_v50 = vshll.u32 %v7242_v22, 16 }
  0x2f   : > { %v573_v48 = vsel %vm7145_vm2, %v568_v42, %v572_v28  ;;  %v588_v51 = vshrl.u32 %v7242_v22, 16  ;;  %6487 = vmatprep.mubr.bf16.mxu0 %v5522_v38  ;;  %v577_v58 = vrot.slane %v575_v46, 4  ;;  %v580_v61 = vrot.slane %v578_v47, 5  ;;  %v6941_v38 = vld [vmem:[%s9785_s1 + $0x98] sm:$0xff]   ;;  %v6942_v46 = vld [vmem:[%s9785_s1 + $0x10] sm:$0xff]  }
  0x30   : > { %v5530_v54 = vcombine.low %v563_v41, %v573_v48  ;;  %v390_v55 = vrot.slane %v389_v44, 4  ;;  %v399_v56 = vor.u32 %v398_v45, %v394_v34  ;;  %v586_v63 = vrot.slane %v584_v50, 5  ;;  %v7303_v44 = vld [vmem:[%s7114_s29 + $0x98] sm:$0x1] }
  0x31   : > { %6518 = vmatpush3.bf16.msra.mxu1 %v6934_v52  ;;  %6566 = vmatpush3.bf16.msra.mxu0 %v6935_v59  ;;  %v6938_v52 = vld [vmem:[%s9785_s1 + $0x20] sm:$0xff]   ;;  %v590_v1 = vrot.slane %v588_v51, 4  ;;  %v594_v2 = vshll.u32 %v7251_v36, 16  ;;  %v407_v9 = vshrl.u32 %v7266_v53, 16  ;;  %v410_v10 = vshll.u32 %v7266_v53, 16 }
  0x32   : > { %6519 = vmatprep.subr.bf16.mxu1 %v6936_v30  ;;  %v6939_v59 = vld [vmem:[%s9785_s1 + $0xa0] sm:$0xff]   ;;  %6567 = vmatprep.subr.bf16.mxu0 %v6937_v37  ;;  %v395_v3 = vsel %vm7145_vm2, %v390_v55, %v394_v34  ;;  %v400_v7 = vrot.slane %v399_v56, 4  ;;  %v581_v11 = vor.u32 %v580_v61, %v577_v58  ;;  %v416_v17 = vshll.u32 %v7275_v60, 16  ;;  %v7316_v51 = vld [vmem:[%s7114_s29 + $0x3c] sm:$0xf]  ;;  %v6943_v55 = vld [vmem:[%s9785_s1 + $0x90] sm:$0xff]  }
  0x33   : > { %6503 = vmatprep.mubr.bf16.mxu1 %v5530_v54  ;;  %v591_v12 = vor.u32 %v590_v1, %v586_v63  ;;  %v596_v15 = vrot.slane %v594_v2, 5  ;;  %v409_v24 = vrot.slane %v407_v9, 4  ;;  %v412_v28 = vrot.slane %v410_v10, 5  ;;  %v7319_v54 = vld [vmem:[%s7114_s29 + $0x40] sm:$0xf] }
  0x34   : > { %v405_v23 = vsel %vm7145_vm2, %v400_v7, %v404_v49  ;;  %v420_v29 = vshrl.u32 %v7275_v60, 16  ;;  %v582_v34 = vrot.slane %v581_v11, 4  ;;  %v426_v43 = vshll.u32 %v7283_v16, 16  ;;  %v7326_v7 = vld [vmem:[%s7114_s29 + $0x44] sm:$0x1] }
  0x35   : > { %6520 = vmatpush3.bf16.msra.mxu1 %v6936_v30  ;;  %6568 = vmatpush3.bf16.msra.mxu0 %v6937_v37  ;;  %v6940_v30 = vld [vmem:[%s9785_s1 + $0x18] sm:$0xff]   ;;  %v5523_v33 = vcombine.low %v395_v3, %v405_v23  ;;  %v592_v35 = vrot.slane %v591_v12, 4  ;;  %v418_v37 = vrot.slane %v416_v17, 5  ;;  %v413_v41 = vor.u32 %v412_v28, %v409_v24  ;;  %v7338_v28 = vld [vmem:[%s7114_s29 + $0xa0] sm:$0xf] }
  0x36   : > { %6521 = vmatprep.subr.bf16.mxu1 %v6938_v52  ;;  %6569 = vmatprep.subr.bf16.mxu0 %v6939_v59  ;;  %v422_v42 = vrot.slane %v420_v29, 4  ;;  %v599_v45 = vshrl.u32 %v7287_v18, 16  ;;  %v587_v47 = vsel %vm7145_vm2, %v582_v34, %v586_v63  ;;  %v602_v49 = vshll.u32 %v7287_v18, 16  ;;  %v7329_v9 = vld [vmem:[%s7114_s29 + $0x9c] sm:$0xf]  ;;  %v6944_v29 = vld [vmem:[%s9785_s1 + $0x8] sm:$0xff]  }
  0x37   : > { %6488 = vmatmul.mubr.bf16.gmra.mxu0 %v5523_v33  ;;  %v597_v48 = vsel %vm7145_vm2, %v592_v35, %v596_v15  ;;  %v608_v50 = vshll.u32 %v7293_v31, 16  ;;  %v414_v58 = vrot.slane %v413_v41, 4  ;;  %v428_v63 = vrot.slane %v426_v43, 5  ;;  %v6945_v41 = vld [vmem:[%s9785_s1 + $0x88] sm:$0xff]  }
  0x38   : > { %v5531_v56 = vcombine.low %v587_v47, %v597_v48  ;;  %v423_v61 = vor.u32 %v422_v42, %v418_v37  ;;  %v604_v1 = vrot.slane %v602_v49, 5  ;;  %v612_v3 = vshrl.u32 %v7293_v31, 16 }
  0x39   : > { %6522 = vmatpush3.bf16.msra.mxu1 %v6938_v52  ;;  %6570 = vmatpush3.bf16.msra.mxu0 %v6939_v59  ;;  %v601_v52 = vrot.slane %v599_v45, 4  ;;  %v610_v2 = vrot.slane %v608_v50, 5  ;;  %v419_v10 = vsel %vm7145_vm2, %v414_v58, %v418_v37  ;;  %v618_v11 = vshll.u32 %v7303_v44, 16 }
  0x3a   : > { %6523 = vmatprep.subr.bf16.mxu1 %v6940_v30  ;;  %6571 = vmatprep.subr.bf16.mxu0 %v6941_v38  ;;  %v424_v59 = vrot.slane %v423_v61, 4  ;;  %v431_v12 = vshrl.u32 %v7316_v51, 16  ;;  %v614_v17 = vrot.slane %v612_v3, 4  ;;  %v434_v23 = vshll.u32 %v7316_v51, 16  ;;  %v7354_v61 = vld [vmem:[%s7114_s29 + $0xa4] sm:$0x1] }
  0x3b   : > { %6504 = vmatmul.mubr.bf16.gmra.mxu1 %v5531_v56  ;;  %v605_v15 = vor.u32 %v604_v1, %v601_v52  ;;  %v440_v24 = vshll.u32 %v7319_v54, 16  ;;  %v620_v34 = vrot.slane %v618_v11, 5  ;;  %v444_v37 = vshrl.u32 %v7319_v54, 16 }
  0x3c   : > { %v429_v33 = vsel %vm7145_vm2, %v424_v59, %v428_v63  ;;  %v433_v35 = vrot.slane %v431_v12, 4  ;;  %v615_v43 = vor.u32 %v614_v17, %v610_v2  ;;  %v436_v45 = vrot.slane %v434_v23, 5  ;;  %v7359_v59 = vld [vmem:[%s7114_s29 + $0x48] sm:$0xf]  ;;  %v7368_v17 = vld [vmem:[%s7114_s29 + $0x4c] sm:$0xf] }
  0x3d   : > { %6524 = vmatpush3.bf16.msra.mxu1 %v6940_v30  ;;  %6572 = vmatpush3.bf16.msra.mxu0 %v6941_v38  ;;  %v5524_v42 = vcombine.low %v419_v10, %v429_v33  ;;  %v606_v30 = vrot.slane %v605_v15, 4  ;;  %v442_v47 = vrot.slane %v440_v24, 5  ;;  %v446_v48 = vrot.slane %v444_v37, 4 }
  0x3e   : > { %6525 = vmatprep.subr.bf16.mxu1 %v6942_v46  ;;  %6573 = vmatprep.subr.bf16.mxu0 %v6943_v55  ;;  %v450_v49 = vshll.u32 %v7326_v7, 16  ;;  %v623_v50 = vshrl.u32 %v7329_v9, 16  ;;  %v616_v56 = vrot.slane %v615_v43, 4  ;;  %v437_v58 = vor.u32 %v436_v45, %v433_v35 }
  0x3f   : > { %6491 = vmatprep.mubr.bf16.mxu0 %v5524_v42  ;;  %v611_v38 = vsel %vm7145_vm2, %v606_v30, %v610_v2  ;;  %v626_v63 = vshll.u32 %v7329_v9, 16  ;;  %v447_v52 = vor.u32 %v446_v48, %v442_v47  ;;  %v632_v10 = vshll.u32 %v7338_v28, 16  ;;  %v6946_v2 = vld [vmem:[%s9785_s1] sm:$0xff]   ;;  %v7377_v30 = vld [vmem:[%s7114_s29 + $0x50] sm:$0x1] }
  0x40   : > { %v452_v1 = vrot.slane %v450_v49, 5  ;;  %v625_v3 = vrot.slane %v623_v50, 4  ;;  %v621_v11 = vsel %vm7145_vm2, %v616_v56, %v620_v34  ;;  %v438_v12 = vrot.slane %v437_v58, 4 }
  0x41   : > { %6526 = vmatpush3.bf16.msra.mxu1 %v6942_v46  ;;  %6574 = vmatpush3.bf16.msra.mxu0 %v6943_v55  ;;  %v628_v15 = vrot.slane %v626_v63, 5  ;;  %v636_v46 = vshrl.u32 %v7338_v28, 16  ;;  %v6947_v55 = vld [vmem:[%s9785_s1 + $0x80] sm:$0xff]   ;;  %v5532_v23 = vcombine.low %v611_v38, %v621_v11  ;;  %v448_v24 = vrot.slane %v447_v52, 4  ;;  %v7385_v38 = vld [vmem:[%s7114_s29 + $0xa8] sm:$0xf] }
  0x42   : > { %6527 = vmatprep.subr.bf16.mxu1 %v6944_v29  ;;  %6575 = vmatprep.subr.bf16.mxu0 %v6945_v41  ;;  %v634_v33 = vrot.slane %v632_v10, 5  ;;  %v642_v35 = vshll.u32 %v7354_v61, 16  ;;  %v443_v34 = vsel %vm7145_vm2, %v438_v12, %v442_v47  ;;  %v455_v43 = vshrl.u32 %v7359_v59, 16  ;;  %9816 = vst [vmem:[#allocation2_spill] sm:$0xff] %v7385_v38  ;;  %v7390_v47 = vld [vmem:[%s9785_s1 + $0xf8] sm:$0xff]  }
  0x43   : > { %v629_v37 = vor.u32 %v628_v15, %v625_v3  ;;  %v638_v42 = vrot.slane %v636_v46, 4  ;;  %6507 = vmatprep.mubr.bf16.mxu1 %v5532_v23  ;;  %v453_v45 = vsel %vm7145_vm2, %v448_v24, %v452_v1  ;;  %v458_v49 = vshll.u32 %v7359_v59, 16  ;;  %v7393_v52 = vld [vmem:[%s7114_s29 + $0xac] sm:$0xf]  ;;  %v7398_v1 = vld [vmem:[%s9785_s1 + $0x138] sm:$0xff]  }
  0x44   : > { %v644_v48 = vrot.slane %v642_v35, 5  ;;  %v464_v50 = vshll.u32 %v7368_v17, 16  ;;  %v457_v63 = vrot.slane %v455_v43, 4  ;;  %v468_v10 = vshrl.u32 %v7368_v17, 16  ;;  %v7403_v12 = vld [vmem:[%s7114_s29 + $0xb0] sm:$0x1] }
  0x45   : > { %6528 = vmatpush3.bf16.msra.mxu1 %v6944_v29  ;;  %6576 = vmatpush3.bf16.msra.mxu0 %v6945_v41  ;;  %v5525_v29 = vcombine.low %v443_v34, %v453_v45  ;;  %v630_v56 = vrot.slane %v629_v37, 4  ;;  %v639_v58 = vor.u32 %v638_v42, %v634_v33  ;;  %v460_v41 = vrot.slane %v458_v49, 5  ;;  %9817 = vst [vmem:[#allocation3_spill] sm:$0xff] %v7403_v12  ;;  %v7406_v15 = vld [vmem:[%s7114_s29 + $0x54] sm:$0xf] }
  0x46   : > { %6529 = vmatprep.subr.bf16.mxu1 %v6946_v2  ;;  %6577 = vmatprep.subr.bf16.mxu0 %v6947_v55  ;;  %v466_v3 = vrot.slane %v464_v50, 5  ;;  %v474_v11 = vshll.u32 %v7377_v30, 16  ;;  %v647_v24 = vshrl.u32 %v7385_v38, 16  ;;  %v650_v35 = vshll.u32 %v7385_v38, 16  ;;  %v7413_v34 = vld [vmem:[%s7114_s29 + $0x58] sm:$0xf] }
  0x47   : > { %6492 = vmatmul.mubr.bf16.gmra.mxu0 %v5525_v29  ;;  %v635_v46 = vsel %vm7145_vm2, %v630_v56, %v634_v33  ;;  %v640_v23 = vrot.slane %v639_v58, 4  ;;  %v461_v37 = vor.u32 %v460_v41, %v457_v63  ;;  %v470_v42 = vrot.slane %v468_v10, 4 }
  0x48   : > { %v476_v43 = vrot.slane %v474_v11, 5  ;;  %v656_v45 = vshll.u32 %v7393_v52, 16  ;;  %v649_v49 = vrot.slane %v647_v24, 4  ;;  %v652_v50 = vrot.slane %v650_v35, 5 }
  0x49   : > { %6530 = vmatpush3.bf16.msra.mxu1 %v6946_v2  ;;  %6578 = vmatpush3.bf16.msra.mxu0 %v6947_v55  ;;  %v645_v33 = vsel %vm7145_vm2, %v640_v23, %v644_v48  ;;  %v660_v29 = vshrl.u32 %v7393_v52, 16  ;;  %v462_v56 = vrot.slane %v461_v37, 4  ;;  %v471_v58 = vor.u32 %v470_v42, %v466_v3  ;;  %v7422_v55 = vld [vmem:[%s7114_s29 + $0x5c] sm:$0x1]  ;;  %v7427_v48 = vld [vmem:[%s7114_s29 + $0xb4] sm:$0xf] }
  0x4a   : > { %6611 = vmatprep.subr.bf16.mxu1 %v7390_v47  ;;  %6659 = vmatprep.subr.bf16.mxu0 %v7398_v1  ;;  %v5533_v2 = vcombine.low %v635_v46, %v645_v33  ;;  %v658_v63 = vrot.slane %v656_v45, 5  ;;  %v653_v41 = vor.u32 %v652_v50, %v649_v49  ;;  %v666_v11 = vshll.u32 %v7403_v12, 16  ;;  %9818 = vst [vmem:[#allocation4_spill] sm:$0xff] %v7427_v48  ;;  %v7434_v37 = vld [vmem:[%s7114_s29 + $0xb8] sm:$0xf] }
  0x4b   : > { %v662_v10 = vrot.slane %v660_v29, 4  ;;  %v479_v21 = vshrl.u32 %v7406_v15, 16  ;;  %v467_v23 = vsel %vm7145_vm2, %v462_v56, %v466_v3  ;;  %v472_v24 = vrot.slane %v471_v58, 4  ;;  %9819 = vst [vmem:[#allocation5_spill] sm:$0xff] %v7434_v37  ;;  %v7440_v3 = vld [vmem:[%s7114_s29 + $0xbc] sm:$0x1] }
  0x4c   : > { %6508 = vmatmul.mubr.bf16.gmra.mxu1 %v5533_v2  ;;  %v482_v46 = vshll.u32 %v7406_v15, 16  ;;  %v488_v35 = vshll.u32 %v7413_v34, 16  ;;  %v654_v42 = vrot.slane %v653_v41, 4  ;;  %v668_v33 = vrot.slane %v666_v11, 5  ;;  %9820 = vst [vmem:[#allocation6_spill] sm:$0xff] %v7440_v3 }
  0x4d   : > { %v663_v45 = vor.u32 %v662_v10, %v658_v63  ;;  %v481_v49 = vrot.slane %v479_v21, 4  ;;  %v477_v50 = vsel %vm7145_vm2, %v472_v24, %v476_v43  ;;  %v492_v62 = vshrl.u32 %v7413_v34, 16  ;;  %v1289_v10 = vld [vmem:[%s7114_s29] sm:$0xe] }
  0x4e   : > { %v484_v29 = vrot.slane %v482_v46, 5  ;;  %v490_v2 = vrot.slane %v488_v35, 5  ;;  %v5526_v56 = vcombine.low %v467_v23, %v477_v50  ;;  %v659_v58 = vsel %vm7145_vm2, %v654_v42, %v658_v63 }
  0x4f   : > { %v664_v20 = vrot.slane %v663_v45, 4  ;;  %v498_v41 = vshll.u32 %v7422_v55, 16  ;;  %v494_v21 = vrot.slane %v492_v62, 4  ;;  %v671_v12 = vshrl.u32 %v7427_v48, 16 }
  0x50   : > { %v485_v11 = vor.u32 %v484_v29, %v481_v49  ;;  %v674_v43 = vshll.u32 %v7427_v48, 16  ;;  %6495 = vmatprep.mubr.bf16.mxu0 %v5526_v56  ;;  %v680_v46 = vshll.u32 %v7434_v37, 16  ;;  %v684_v63 = vshrl.u32 %v7434_v37, 16  ;;  %v1290_v49 = vld [vmem:[%s7114_s29 + $0xc] sm:$0xe] }
  0x51   : > { %v669_v24 = vsel %vm7145_vm2, %v664_v20, %v668_v33  ;;  %v500_v23 = vrot.slane %v498_v41, 5  ;;  %v495_v45 = vor.u32 %v494_v21, %v490_v2  ;;  %v673_v50 = vrot.slane %v671_v12, 4  ;;  %v1291_v20 = vld [vmem:[%s7114_s29 + $0x18] sm:$0xe] }
  0x52   : > { %v5534_v35 = vcombine.low %v659_v58, %v669_v24  ;;  %v486_v42 = vrot.slane %v485_v11, 4  ;;  %v676_v62 = vrot.slane %v674_v43, 5  ;;  %v682_v29 = vrot.slane %v680_v46, 5 }
  0x53   : > { %v686_v38 = vrot.slane %v684_v63, 4  ;;  %v690_v48 = vshll.u32 %v7440_v3, 16  ;;  %v496_v58 = vrot.slane %v495_v45, 4  ;;  %v5568_v41 = vrot.slane %v1289_v10, 9 }
  0x54   : > { %6511 = vmatprep.mubr.bf16.mxu1 %v5534_v35  ;;  %v491_v33 = vsel %vm7145_vm2, %v486_v42, %v490_v2  ;;  %v1342_v12 = vrot.slane %v7123_v5, 5  ;;  %v677_v11 = vor.u32 %v676_v62, %v673_v50  ;;  %v5569_v24 = vrot.slane %v1290_v49, 9 }
  0x55   : > { %v687_v21 = vor.u32 %v686_v38, %v682_v29  ;;  %v692_v43 = vrot.slane %v690_v48, 5  ;;  %v501_v46 = vsel %vm7145_vm2, %v496_v58, %v500_v23  ;;  %v1349_v35 = vrot.slane %v7150_v32, 5 }
  0x56   : > { %v1343_v63 = vsel %vm7456_vm5, %v5568_v41, %v1342_v12  ;;  %v1344_v3 = vrot.slane %v1342_v12, 4  ;;  %v5527_v37 = vcombine.low %v491_v33, %v501_v46  ;;  %v678_v2 = vrot.slane %v677_v11, 4  ;;  %v1293_v12 = vld [vmem:[%s7114_s29 + $0x30] sm:$0xe]  ;;  %v1295_v46 = vld [vmem:[%s7114_s29 + $0x48] sm:$0xe] }
  0x57   : > { %v688_v42 = vrot.slane %v687_v21, 4  ;;  %v5544_v10 = vcombine.low %v7120_v4, %v7123_v5  ;;  %v9823_v38 = vrot.slane %v7126_v6, 5  ;;  %v1351_v45 = vrot.slane %v1349_v35, 4 }
  0x58   : > { %v5570_v23 = vrot.slane %v1291_v20, 9  ;;  %6496 = vmatmul.mubr.bf16.gmra.mxu0 %v5527_v37  ;;  %v683_v50 = vsel %vm7145_vm2, %v678_v2, %v682_v29  ;;  %v1356_v33 = vrot.slane %v7187_v19, 5  ;;  %v1350_v4 = vsel %vm7456_vm5, %v5569_v24, %v1349_v35  ;;  %v1294_v24 = vld [vmem:[%s7114_s29 + $0x3c] sm:$0xe] }
  0x59   : > { %v1346_v48 = vsel %vm7456_vm5, %v1344_v3, %v9823_v38  ;;  %v693_v49 = vsel %vm7145_vm2, %v688_v42, %v692_v43  ;;  %v9824_v5 = vrot.slane %v7156_v40, 5  ;;  %v1359_v37 = vrot.slane %v7192_v25, 5  ;;  %v1292_v3 = vld [vmem:[%s7114_s29 + $0x24] sm:$0xe]  ;;  %v6955_v25 = vld [vmem:[%s9785_s1 + $0x130] sm:$0xff]  }
  0x5a   : > { %v5600_v62 = vcombine.low %v1343_v63, %v1346_v48  ;;  %v5535_v58 = vcombine.low %v683_v50, %v693_v49  ;;  %v1357_v29 = vsel %vm7456_vm5, %v5570_v23, %v1356_v33  ;;  %v1358_v20 = vrot.slane %v1356_v33, 4  ;;  %v6954_v23 = vld [vmem:[%s9785_s1 + $0xf0] sm:$0xff]  }
  0x5b   : > { %v1353_v6 = vsel %vm7456_vm5, %v1351_v45, %v9824_v5  ;;  %v1363_v41 = vrot.slane %v7228_v0, 5  ;;  %v5571_v21 = vrot.slane %v1292_v3, 9  ;;  %v1370_v43 = vrot.slane %v7275_v60, 5  ;;  %v7531_v3 = vld [vmem:[%s7114_s29 + $0x68] sm:$0x1] }
  0x5c   : > { %6579 = vmatprep.mubr.bf16.mxu0 %v5600_v62  ;;  %6512 = vmatmul.mubr.bf16.gmra.mxu1 %v5535_v58  ;;  %v5601_v11 = vcombine.low %v1350_v4, %v1353_v6  ;;  %v1360_v40 = vsel %vm7456_vm5, %v1358_v20, %v1359_v37  ;;  %v1366_v2 = vrot.slane %v7231_v8, 5  ;;  %v5572_v42 = vrot.slane %v1293_v12, 9  ;;  %v1296_v37 = vld [vmem:[%s7114_s29 + $0x54] sm:$0xe]  ;;  %v7555_v12 = vld [vmem:[%s7114_s29 + $0x60] sm:$0xe] }
  0x5d   : > { %6531 = vmatprep.mubr.bf16.mxu1 %v5544_v10  ;;  %v5602_v63 = vcombine.low %v1357_v29, %v1360_v40  ;;  %v1365_v35 = vrot.slane %v1363_v41, 4  ;;  %v1372_v38 = vrot.slane %v1370_v43, 4  ;;  %v1373_v10 = vrot.slane %v7283_v16, 5 }
  0x5e   : > { %v1377_v48 = vrot.slane %v7319_v54, 5  ;;  %v5546_v45 = vcombine.low %v7179_v14, %v7187_v19  ;;  %v1384_v50 = vrot.slane %v7368_v17, 5  ;;  %v5573_v49 = vrot.slane %v1294_v24, 9  ;;  %v6963_v24 = vld [vmem:[%s9785_s1 + $0x120] sm:$0xff]  }
  0x5f   : > { %v1380_v8 = vrot.slane %v7326_v7, 5  ;;  %v5574_v33 = vrot.slane %v1295_v46, 9  ;;  %v1364_v14 = vsel %vm7456_vm5, %v5571_v21, %v1363_v41  ;;  %v1367_v19 = vsel %vm7456_vm5, %v1365_v35, %v1366_v2  ;;  %v7567_v46 = vld [vmem:[%s7114_s29 + $0x78] sm:$0xe]  ;;  %v6962_v2 = vld [vmem:[%s9785_s1 + $0xe0] sm:$0xff]  }
  0x60   : > { %6580 = vmatmul.mubr.bf16.vlgmr.msra.gmra.mxu0 %v5601_v11  ;;  %v1379_v62 = vrot.slane %v1377_v48, 4  ;;  %v1386_v16 = vrot.slane %v1384_v50, 4  ;;  %v1387_v58 = vrot.slane %v7377_v30, 5  ;;  %v1371_v4 = vsel %vm7456_vm5, %v5572_v42, %v1370_v43  ;;  %v7558_v11 = vld [vmem:[%s7114_s29 + $0x6c] sm:$0xe] }
  0x61   : > { %6660 = vmatpush3.bf16.msra.mxu0 %v7398_v1  ;;  %6583 = vmatprep.mubr.bf16.mxu0 %v5602_v63  ;;  %v1374_v7 = vsel %vm7456_vm5, %v1372_v38, %v1373_v10  ;;  %v6959_v1 = vld [vmem:[%s9785_s1 + $0x128] sm:$0xff]   ;;  %v1391_v5 = vrot.slane %v7413_v34, 5  ;;  %v9825_v6 = vcombine.low %v7141_v26, %v7150_v32  ;;  %v5547_v30 = vcombine.low %v7219_v57, %v7228_v0  ;;  %v1300_v63 = vld [vmem:[%s7114_s29 + $0x84] sm:$0xe]  ;;  %v1301_v42 = vld [vmem:[%s7114_s29 + $0x90] sm:$0xe] }
  0x62   : > { %6661 = vmatprep.subr.bf16.mxu0 %v6955_v25  ;;  %v1401_v29 = vrot.slane %v7531_v3, 5  ;;  %v5603_v20 = vcombine.low %v1364_v14, %v1367_v19  ;;  %v7537_v41 = vsel %vm7456_vm5, %v5573_v49, %v1377_v48  ;;  %v7541_v26 = vsel %vm7456_vm5, %v1379_v62, %v1380_v8  ;;  %v6958_v32 = vld [vmem:[%s9785_s1 + $0xe8] sm:$0xff]   ;;  %v7586_v48 = vld [vmem:[%s7114_s29 + $0x64] sm:$0xf]  ;;  %v1302_v49 = vld [vmem:[%s7114_s29 + $0x9c] sm:$0xe] }
  0x63   : > { %v5604_v57 = vcombine.low %v1371_v4, %v1374_v7  ;;  %v7548_v0 = vsel %vm7456_vm5, %v5574_v33, %v1384_v50  ;;  %v5548_v40 = vcombine.low %v7266_v53, %v7275_v60  ;;  %v5575_v21 = vrot.slane %v1296_v37, 9  ;;  %v7608_v4 = vld [vmem:[%s7114_s29 + $0x74] sm:$0x1] }
  0x64   : > { %6532 = vmatmul.mubr.bf16.vlgmr.msra.gmra.mxu1 %v9825_v6  ;;  %v1394_v43 = vrot.slane %v7422_v55, 5  ;;  %v5549_v35 = vcombine.low %v7316_v51, %v7319_v54  ;;  %v5605_v53 = vcombine.low %v7537_v41, %v7541_v26  ;;  %v5550_v60 = vcombine.low %v7359_v59, %v7368_v17  ;;  %v7048_v54 = vld [vmem:[%s7114_s29 + $0x80] sm:$0x1] }
  0x65   : > { %6612 = vmatpush3.bf16.msra.mxu1 %v7390_v47  ;;  %6535 = vmatprep.mubr.bf16.mxu1 %v5546_v45  ;;  %v7552_v47 = vsel %vm7456_vm5, %v1386_v16, %v1387_v58  ;;  %v5551_v55 = vcombine.low %v7406_v15, %v7413_v34  ;;  %v5576_v10 = vrot.slane %v7555_v12, 9  ;;  %v1398_v45 = vrot.slane %v7586_v48, 5  ;;  %v7604_v16 = vld [vmem:[%s7114_s29 + $0x70] sm:$0xf]  ;;  %v7049_v17 = vld [vmem:[%s7114_s29 + $0x60] sm:$0xf] }
  0x66   : > { %6613 = vmatprep.subr.bf16.mxu1 %v6954_v23  ;;  %6662 = vmatpush3.bf16.msra.mxu0 %v6955_v25  ;;  %v1393_v25 = vrot.slane %v1391_v5, 4  ;;  %v5606_v38 = vcombine.low %v7548_v0, %v7552_v47  ;;  %v5577_v62 = vrot.slane %v7558_v11, 9  ;;  %v1419_v8 = vrot.slane %v7242_v22, 5  ;;  %v1303_v0 = vld [vmem:[%s7114_s29 + $0xa8] sm:$0xe]  ;;  %v7788_v15 = vld [vmem:[%s9785_s1 + $0x1b8] sm:$0xff]  }
  0x67   : > { %6663 = vmatprep.subr.bf16.mxu0 %v6959_v1  ;;  %v1422_v33 = vrot.slane %v7251_v36, 5  ;;  %v7597_v14 = vsel %vm7456_vm5, %v5575_v21, %v1391_v5  ;;  %v1405_v58 = vrot.slane %v7604_v16, 5  ;;  %v1408_v7 = vrot.slane %v7608_v4, 5  ;;  %v6966_v36 = vld [vmem:[%s9785_s1 + $0xd8] sm:$0xff]  }
  0x68   : > { %6584 = vmatmul.mubr.bf16.gmra.mxu0 %v5603_v20  ;;  %v7601_v19 = vsel %vm7456_vm5, %v1393_v25, %v1394_v43  ;;  %v5578_v5 = vrot.slane %v7567_v46, 9  ;;  %v1421_v37 = vrot.slane %v1419_v8, 4  ;;  %v5580_v41 = vrot.slane %v1301_v42, 9  ;;  %v5696_v42 = vld [vmem:[%s7114_s29 + $0xc] sm:$0xf] }
  0x69   : > { %6614 = vmatpush3.bf16.msra.mxu1 %v6954_v23  ;;  %6587 = vmatprep.mubr.bf16.mxu0 %v5604_v57  ;;  %v5579_v23 = vrot.slane %v1300_v63, 9  ;;  %v1426_v26 = vrot.slane %v7293_v31, 5  ;;  %v1429_v57 = vrot.slane %v7303_v44, 5  ;;  %v1412_v47 = vrot.slane %v7201_v39, 5 }
  0x6a   : > { %6615 = vmatprep.subr.bf16.mxu1 %v6958_v32  ;;  %6664 = vmatpush3.bf16.msra.mxu0 %v6959_v1  ;;  %v6967_v1 = vld [vmem:[%s9785_s1 + $0x118] sm:$0xff]   ;;  %v7632_v21 = vsel %vm7456_vm5, %v1421_v37, %v1422_v33  ;;  %v1433_v63 = vrot.slane %v7338_v28, 5  ;;  %v5582_v33 = vrot.slane %v1303_v0, 9  ;;  %v1440_v37 = vrot.slane %v7393_v52, 5  ;;  %v6970_v0 = vld [vmem:[%s9785_s1 + $0xd0] sm:$0xff]  }
  0x6b   : > { %6665 = vmatprep.subr.bf16.mxu0 %v6963_v24  ;;  %v7620_v6 = vsel %vm7456_vm5, %v5579_v23, %v1419_v8  ;;  %v7640_v44 = vsel %vm7456_vm5, %v5580_v41, %v1426_v26  ;;  %v1428_v43 = vrot.slane %v1426_v26, 4  ;;  %v6971_v23 = vld [vmem:[%s9785_s1 + $0x110] sm:$0xff]   ;;  %v1436_v8 = vrot.slane %v7354_v61, 5  ;;  %v9827_v61 = vld [vmem:[#allocation3_spill] sm:$0xff] }
  0x6c   : > { %6536 = vmatmul.mubr.bf16.gmra.mxu1 %v5547_v30  ;;  %v1400_v30 = vrot.slane %v1398_v45, 4  ;;  %v1435_v20 = vrot.slane %v1433_v63, 4  ;;  %v1443_v50 = vrot.slane %v9827_v61, 5  ;;  %v1399_v61 = vsel %vm7456_vm5, %v5576_v10, %v1398_v45  ;;  %v5699_v45 = vld [vmem:[%s7114_s29 + $0x18] sm:$0xf] }
  0x6d   : > { %6539 = vmatprep.mubr.bf16.mxu1 %v5548_v40  ;;  %6616 = vmatpush3.bf16.msra.mxu1 %v6958_v32  ;;  %v5581_v40 = vrot.slane %v1302_v49, 9  ;;  %v7652_v32 = vld [vmem:[%s7114_s29 + $0x10] sm:$0xf]  ;;  %v7656_v41 = vsel %vm7456_vm5, %v1428_v43, %v1429_v57  ;;  %v1442_v57 = vrot.slane %v1440_v37, 4  ;;  %v2210_v12 = vshrl.u32 %v5696_v42, 16 }
  0x6e   : > { %6617 = vmatprep.subr.bf16.mxu1 %v6962_v2  ;;  %6666 = vmatpush3.bf16.msra.mxu0 %v6963_v24  ;;  %v9826_v24 = vld [vmem:[#allocation2_spill] sm:$0xff]  ;;  %v9829_v43 = vld [vmem:[#allocation4_spill] sm:$0xff]  ;;  %v2213_v10 = vshll.u32 %v5696_v42, 16  ;;  %v1407_v51 = vrot.slane %v1405_v58, 4  ;;  %v2219_v59 = vshll.u32 %v7652_v32, 16  ;;  %v1413_v4 = vsel %vm7456_vm5, %v5578_v5, %v1412_v47 }
  0x6f   : > { %6667 = vmatprep.subr.bf16.mxu0 %v6967_v1  ;;  %v7660_v26 = vsel %vm7456_vm5, %v5581_v40, %v1433_v63  ;;  %v9828_v40 = vld [vmem:[#allocation5_spill] sm:$0xff]  ;;  %v7726_v42 = vld [vmem:[%s7114_s29 + $0x14] sm:$0x1]  ;;  %v2212_v63 = vrot.slane %v2210_v12, 4  ;;  %v9831_v5 = vld [vmem:[#allocation6_spill] sm:$0xff] }
  0x70   : > { %6588 = vmatmul.mubr.bf16.gmra.mxu0 %v5605_v53  ;;  %v2215_v49 = vrot.slane %v2213_v10, 5  ;;  %v5702_v53 = vld [vmem:[%s7114_s29 + $0x24] sm:$0xf]  ;;  %v1409_v11 = vsel %vm7456_vm5, %v1407_v51, %v1408_v7 }
  0x71   : > { %6618 = vmatpush3.bf16.msra.mxu1 %v6962_v2  ;;  %6591 = vmatprep.mubr.bf16.mxu0 %v5606_v38  ;;  %v7670_v2 = vsel %vm7456_vm5, %v5582_v33, %v1440_v37  ;;  %v5607_v38 = vcombine.low %v7597_v14, %v7601_v19  ;;  %v1402_v33 = vsel %vm7456_vm5, %v1400_v30, %v1401_v29  ;;  %v6975_v14 = vld [vmem:[%s9785_s1 + $0x108] sm:$0xff]   ;;  %v6979_v30 = vld [vmem:[%s9785_s1 + $0x100] sm:$0xff]   ;;  %v7745_v19 = vrot.slane %v2219_v59, 5 }
  0x72   : > { %6619 = vmatprep.subr.bf16.mxu1 %v6966_v36  ;;  %6668 = vmatpush3.bf16.msra.mxu0 %v6967_v1  ;;  %v7688_v37 = vsel %vm7456_vm5, %v1435_v20, %v1436_v8  ;;  %v7700_v29 = vsel %vm7456_vm5, %v1442_v57, %v1443_v50  ;;  %v6974_v50 = vld [vmem:[%s9785_s1 + $0xc8] sm:$0xff]   ;;  %v7715_v1 = vld [vmem:[%s7114_s29 + $0xb4] sm:$0xe]  ;;  %v5608_v20 = vcombine.low %v1399_v61, %v1402_v33  ;;  %v2223_v8 = vshrl.u32 %v7652_v32, 16  ;;  %v7743_v61 = vld [vmem:[%s7114_s29 + $0x1c] sm:$0xf] }
  0x73   : > { %6669 = vmatprep.subr.bf16.mxu0 %v6971_v23  ;;  %v7730_v57 = vld [vmem:[%s7114_s29 + $0x6c] sm:$0xf]  ;;  %v2234_v33 = vshrl.u32 %v5699_v45, 16  ;;  %v2243_v51 = vshll.u32 %v7743_v61, 16  ;;  %v2247_v39 = vshrl.u32 %v7743_v61, 16  ;;  %v2258_v59 = vshrl.u32 %v5702_v53, 16 }
  0x74   : > { %6540 = vmatmul.mubr.bf16.gmra.mxu1 %v5549_v35  ;;  %v1415_v35 = vrot.slane %v7048_v54, 5  ;;  %v5553_v54 = vcombine.low %v7730_v57, %v7604_v16  ;;  %v2225_v3 = vrot.slane %v2223_v8, 4  ;;  %v2261_v46 = vshll.u32 %v5702_v53, 16  ;;  %v7052_v8 = vld [vmem:[%s7114_s29 + $0x7c] sm:$0xf] }
  0x75   : > { %6543 = vmatprep.mubr.bf16.mxu1 %v5550_v60  ;;  %6620 = vmatpush3.bf16.msra.mxu1 %v6966_v36  ;;  %v5552_v60 = vcombine.low %v7049_v17, %v7586_v48  ;;  %v1414_v36 = vrot.slane %v1412_v47, 4  ;;  %v7740_v48 = vsel %vm7456_vm5, %v5577_v62, %v1405_v58  ;;  %v2237_v17 = vshll.u32 %v5699_v45, 16  ;;  %v6978_v58 = vld [vmem:[%s9785_s1 + $0xc0] sm:$0xff]   ;;  %v7770_v45 = vld [vmem:[%s7114_s29 + $0x28] sm:$0xf] }
  0x76   : > { %6621 = vmatprep.subr.bf16.mxu1 %v6970_v0  ;;  %6670 = vmatpush3.bf16.msra.mxu0 %v6971_v23  ;;  %v9799_v62 = vrot.slane %v9828_v40, 5  ;;  %v7757_v23 = vld [vmem:[%s7114_s29 + $0x20] sm:$0x1]  ;;  %v2236_v12 = vrot.slane %v2234_v33, 4  ;;  %9830 = vst [vmem:[#allocation2_spill] sm:$0xff] %v7770_v45  ;;  %v5609_v34 = vcombine.low %v7740_v48, %v1409_v11  ;;  %v2267_v53 = vshll.u32 %v7770_v45, 16 }
  0x77   : > { %6671 = vmatprep.subr.bf16.mxu0 %v6975_v14  ;;  %v2239_v10 = vrot.slane %v2237_v17, 5  ;;  %v1416_v7 = vsel %vm7456_vm5, %v1414_v36, %v1415_v35  ;;  %v2216_v35 = vor.u32 %v2215_v49, %v2212_v63  ;;  %v7783_v36 = vld [vmem:[%s9785_s1 + $0x178] sm:$0xff]   ;;  %v5705_v63 = vld [vmem:[%s7114_s29 + $0x30] sm:$0xf]  ;;  %v7804_v48 = vld [vmem:[%s7114_s29 + $0x34] sm:$0xf] }
  0x78   : > { %6592 = vmatmul.mubr.bf16.gmra.mxu0 %v5607_v38  ;;  %v2229_v38 = vshll.u32 %v7726_v42, 16  ;;  %v5610_v17 = vcombine.low %v1413_v4, %v1416_v7  ;;  %9833 = vst [vmem:[#allocation5_spill] sm:$0xff] %v7804_v48  ;;  %v7806_v11 = vrot.slane %v2243_v51, 5  ;;  %v2263_v47 = vrot.slane %v2261_v46, 5  ;;  %v7825_v46 = vld [vmem:[%s7114_s29 + $0x40] sm:$0xf] }
  0x79   : > { %6622 = vmatpush3.bf16.msra.mxu1 %v6970_v0  ;;  %6595 = vmatprep.mubr.bf16.mxu0 %v5608_v20  ;;  %v2226_v20 = vor.u32 %v2225_v3, %v7745_v19  ;;  %v2240_v49 = vor.u32 %v2239_v10, %v2236_v12  ;;  %v7051_v3 = vld [vmem:[%s7114_s29 + $0x78] sm:$0xf]  ;;  %v2249_v12 = vrot.slane %v2247_v39, 4  ;;  %v2260_v10 = vrot.slane %v2258_v59, 4  ;;  %9834 = vst [vmem:[#allocation4_spill] sm:$0xff] %v7825_v46 }
  0x7a   : > { %6623 = vmatprep.subr.bf16.mxu1 %v6974_v50  ;;  %6672 = vmatpush3.bf16.msra.mxu0 %v6975_v14  ;;  %v2253_v14 = vshll.u32 %v7757_v23, 16  ;;  %v5554_v33 = vcombine.low %v7051_v3, %v7052_v8  ;;  %v7797_v25 = vrot.slane %v2229_v38, 5  ;;  %v7809_v0 = vld [vmem:[%s7114_s29 + $0x38] sm:$0x1]  ;;  %v7811_v4 = vrot.slane %v2216_v35, 4 }
  0x7b   : > { %6673 = vmatprep.subr.bf16.mxu0 %v6979_v30  ;;  %v7813_v7 = vrot.slane %v2226_v20, 4  ;;  %v2282_v3 = vshrl.u32 %v5705_v63, 16  ;;  %v5708_v8 = vld [vmem:[%s7114_s29 + $0x3c] sm:$0xf]  ;;  %v7821_v51 = vrot.slane %v2267_v53, 5  ;;  %v2285_v39 = vshll.u32 %v5705_v63, 16 }
  0x7c   : > { %6544 = vmatmul.mubr.bf16.gmra.mxu1 %v5551_v55  ;;  %v1449_v55 = vrot.slane %v9799_v62, 4  ;;  %v7815_v38 = vrot.slane %v2253_v14, 5  ;;  %v2291_v59 = vshll.u32 %v7804_v48, 16  ;;  %v2295_v20 = vshrl.u32 %v7804_v48, 16 }
  0x7d   : > { %6547 = vmatprep.mubr.bf16.mxu1 %v5552_v60  ;;  %6624 = vmatpush3.bf16.msra.mxu1 %v6974_v50  ;;  %v7800_v60 = vld [vmem:[%s7114_s29 + $0x2c] sm:$0x1]  ;;  %v2271_v50 = vshrl.u32 %v7770_v45, 16  ;;  %v2250_v14 = vor.u32 %v2249_v12, %v7806_v11  ;;  %v2284_v53 = vrot.slane %v2282_v3, 4  ;;  %v2287_v63 = vrot.slane %v2285_v39, 5 }
  0x7e   : > { %6625 = vmatprep.subr.bf16.mxu1 %v6978_v58  ;;  %9832 = vst [vmem:[#allocation3_spill] sm:$0xff] %v7800_v60  ;;  %6674 = vmatpush3.bf16.msra.mxu0 %v6979_v30  ;;  %v7819_v30 = vrot.slane %v2240_v49, 4  ;;  %v2306_v49 = vshrl.u32 %v5708_v8, 16  ;;  %v2309_v62 = vshll.u32 %v5708_v8, 16  ;;  %v2297_v48 = vrot.slane %v2295_v20, 4 }
  0x7f   : > { %6755 = vmatprep.subr.bf16.mxu0 %v7788_v15  ;;  %v2273_v35 = vrot.slane %v2271_v50, 4  ;;  %v7835_v50 = vrot.slane %v2291_v59, 5  ;;  %v7838_v45 = vld [vmem:[%s7114_s29 + $0x44] sm:$0x1]  ;;  %v2319_v12 = vshrl.u32 %v7825_v46, 16  ;;  %v9835_v16 = vrot.slane %v9828_v40, 5 }
  0x80   : > { %6596 = vmatmul.mubr.bf16.gmra.mxu0 %v5609_v34  ;;  %v2277_v34 = vshll.u32 %v7800_v60, 16  ;;  %v9836_v57 = vrot.slane %v7715_v1, 9  ;;  %v7859_v39 = vld [vmem:[%s7114_s29 + $0x4c] sm:$0xf]  ;;  %v2308_v59 = vrot.slane %v2306_v49, 4  ;;  %v2311_v20 = vrot.slane %v2309_v62, 5 }
  0x81   : > { %6626 = vmatpush3.bf16.msra.mxu1 %v6978_v58  ;;  %6599 = vmatprep.mubr.bf16.mxu0 %v5610_v17  ;;  %v2264_v58 = vor.u32 %v2263_v47, %v2260_v10  ;;  %v2301_v17 = vshll.u32 %v7809_v0, 16  ;;  %v2315_v47 = vshll.u32 %v7825_v46, 16  ;;  %v5711_v10 = vld [vmem:[%s7114_s29 + $0x48] sm:$0xf]  ;;  %v2274_v8 = vor.u32 %v2273_v35, %v7821_v51 }
  0x82   : > { %6707 = vmatprep.subr.bf16.mxu1 %v7783_v36  ;;  %v2321_v1 = vrot.slane %v2319_v12, 4  ;;  %v7863_v46 = vrot.slane %v2250_v14, 4  ;;  %v2222_v62 = vsel %vm7145_vm2, %v7811_v4, %v7745_v19  ;;  %v2232_v35 = vsel %vm7145_vm2, %v7813_v7, %v7797_v25  ;;  %v5714_v4 = vld [vmem:[%s7114_s29 + $0x54] sm:$0xf] }
  0x83   : > { %v7861_v60 = vrot.slane %v2315_v47, 5  ;;  %v2333_v14 = vshll.u32 %v5711_v10, 16  ;;  %v2325_v49 = vshll.u32 %v7838_v45, 16  ;;  %v2343_v19 = vshrl.u32 %v7859_v39, 16 }
  0x84   : > { %6548 = vmatmul.mubr.bf16.gmra.mxu1 %v5553_v54  ;;  %v7849_v54 = vsel %vm7456_vm5, %v9836_v57, %v9835_v16  ;;  %v7865_v16 = vrot.slane %v2264_v58, 4  ;;  %v7867_v57 = vrot.slane %v2277_v34, 5  ;;  %v2339_v58 = vshll.u32 %v7859_v39, 16 }
  0x85   : > { %6551 = vmatprep.mubr.bf16.mxu1 %v5554_v33  ;;  %v9837_v33 = vrot.slane %v9831_v5, 5  ;;  %v2330_v5 = vshrl.u32 %v5711_v10, 16  ;;  %v9839_v34 = vcombine.low %v7640_v44, %v7656_v41  ;;  %v7888_v47 = vrot.slane %v2274_v8, 4  ;;  %v7894_v10 = vld [vmem:[%s7114_s29 + $0x58] sm:$0xf] }
  0x86   : > { %v7890_v12 = vrot.slane %v2301_v17, 5  ;;  %v2312_v25 = vor.u32 %v2311_v20, %v2308_v59  ;;  %v2322_v7 = vor.u32 %v2321_v1, %v7861_v60  ;;  %v9840_v44 = vcombine.low %v7235_v13, %v7242_v22  ;;  %v7900_v41 = vld [vmem:[%s7114_s29 + $0x50] sm:$0x1] }
  0x87   : > { %v7855_v3 = vsel %vm7456_vm5, %v1449_v55, %v9837_v33  ;;  %v9838_v55 = vcombine.low %v7620_v6, %v7632_v21  ;;  %v2288_v6 = vor.u32 %v2287_v63, %v2284_v53  ;;  %v2298_v21 = vor.u32 %v2297_v48, %v7835_v50 }
  0x88   : > { %v2332_v48 = vrot.slane %v2330_v5, 4  ;;  %v2335_v53 = vrot.slane %v2333_v14, 5  ;;  %v7902_v63 = vrot.slane %v2339_v58, 5  ;;  %v2345_v17 = vrot.slane %v2343_v19, 4  ;;  %v5717_v5 = vld [vmem:[%s7114_s29 + $0x60] sm:$0xf] }
  0x89   : > { %6600 = vmatmul.mubr.bf16.gmra.mxu0 %v9838_v55  ;;  %v9841_v33 = vcombine.low %v7287_v18, %v7293_v31  ;;  %v2354_v8 = vshrl.u32 %v5714_v4, 16  ;;  %v2357_v59 = vshll.u32 %v5714_v4, 16  ;;  %v7907_v20 = vrot.slane %v2288_v6, 4  ;;  %v7924_v31 = vld [vmem:[%s7114_s29 + $0x64] sm:$0xf] }
  0x8a   : > { %6603 = vmatprep.mubr.bf16.mxu0 %v9839_v34  ;;  %v7909_v1 = vrot.slane %v2298_v21, 4  ;;  %v7911_v13 = vrot.slane %v2325_v49, 5  ;;  %v2363_v22 = vshll.u32 %v7894_v10, 16  ;;  %v5615_v55 = vcombine.low %v7849_v54, %v7855_v3  ;;  %v7920_v34 = vld [vmem:[%s7114_s29 + $0x5c] sm:$0x1] }
  0x8b   : > { %v5760_v14 = vcombine.low %v2222_v62, %v2232_v35  ;;  %v7917_v58 = vrot.slane %v2312_v25, 4  ;;  %v2367_v18 = vshrl.u32 %v7894_v10, 16  ;;  %v7926_v6 = vrot.slane %v2322_v7, 4 }
  0x8c   : > { %6552 = vmatmul.mubr.bf16.gmra.mxu1 %v9840_v44  ;;  %v2349_v21 = vshll.u32 %v7900_v41, 16  ;;  %v2378_v49 = vshrl.u32 %v5717_v5, 16  ;;  %v2381_v19 = vshll.u32 %v5717_v5, 16  ;;  %v9842_v4 = vcombine.low %v7660_v26, %v7688_v37 }
  0x8d   : > { %6555 = vmatprep.mubr.bf16.mxu1 %v9841_v33  ;;  %v2336_v54 = vor.u32 %v2335_v53, %v2332_v48  ;;  %v2346_v3 = vor.u32 %v2345_v17, %v7902_v63  ;;  %v2356_v62 = vrot.slane %v2354_v8, 4  ;;  %v2359_v35 = vrot.slane %v2357_v59, 5  ;;  %v7964_v8 = vld [vmem:[%s7114_s29 + $0x70] sm:$0xf] }
  0x8e   : > { %v9843_v25 = vcombine.low %v7670_v2, %v7700_v29  ;;  %v7936_v7 = vrot.slane %v2363_v22, 5  ;;  %v2369_v44 = vrot.slane %v2367_v18, 4  ;;  %v2373_v33 = vshll.u32 %v7920_v34, 16 }
  0x8f   : > { %v2387_v26 = vshll.u32 %v7924_v31, 16  ;;  %v2246_v37 = vsel %vm7145_vm2, %v7819_v30, %v7806_v11  ;;  %v2256_v2 = vsel %vm7145_vm2, %v7863_v46, %v7815_v38  ;;  %v2380_v29 = vrot.slane %v2378_v49, 4  ;;  %v5720_v46 = vld [vmem:[%s7114_s29 + $0x6c] sm:$0xf] }
  0x90   : > { %v2383_v48 = vrot.slane %v2381_v19, 5  ;;  %v9844_v53 = vcombine.low %v7329_v9, %v7338_v28  ;;  %v2270_v17 = vsel %vm7145_vm2, %v7865_v16, %v7821_v51  ;;  %v2280_v11 = vsel %vm7145_vm2, %v7888_v47, %v7867_v57  ;;  %v7972_v16 = vld [vmem:[%s7114_s29 + $0x68] sm:$0x1] }
  0x91   : > { %6604 = vmatmul.mubr.bf16.gmra.mxu0 %v9842_v4  ;;  %v7959_v30 = vrot.slane %v2349_v21, 5  ;;  %v2391_v38 = vshrl.u32 %v7924_v31, 16  ;;  %v9845_v9 = vcombine.low %v9826_v24, %v7393_v52  ;;  %v7969_v28 = vrot.slane %v2336_v54, 4  ;;  %v6980_v52 = vld [vmem:[%s7114_s29 + $0xc] sm:$0xff]  }
  0x92   : > { %6607 = vmatprep.mubr.bf16.mxu0 %v9843_v25  ;;  %v2360_v51 = vor.u32 %v2359_v35, %v2356_v62  ;;  %v2402_v59 = vshrl.u32 %v5720_v46, 16  ;;  %v2405_v57 = vshll.u32 %v5720_v46, 16  ;;  %v7974_v47 = vrot.slane %v2346_v3, 4  ;;  %v7985_v62 = vld [vmem:[%s7114_s29 + $0x74] sm:$0x1] }
  0x93   : > { %v2370_v22 = vor.u32 %v2369_v44, %v7936_v7  ;;  %v7977_v5 = vrot.slane %v2373_v33, 5  ;;  %v2411_v18 = vshll.u32 %v7964_v8, 16  ;;  %v2384_v24 = vor.u32 %v2383_v48, %v2380_v29  ;;  %v5723_v25 = vld [vmem:[%s7114_s29 + $0x78] sm:$0xf]  ;;  %v7989_v44 = vld [vmem:[%s7114_s29 + $0x7c] sm:$0xf] }
  0x94   : > { %6556 = vmatmul.mubr.bf16.gmra.mxu1 %v9844_v53  ;;  %v7981_v21 = vrot.slane %v2387_v26, 5  ;;  %v2393_v49 = vrot.slane %v2391_v38, 4  ;;  %v2415_v19 = vshrl.u32 %v7964_v8, 16  ;;  %v5761_v4 = vcombine.low %v2246_v37, %v2256_v2  ;;  %v7996_v26 = vld [vmem:[%s7114_s29 + $0x80] sm:$0x1] }
  0x95   : > { %6559 = vmatprep.mubr.bf16.mxu1 %v9845_v9  ;;  %v5762_v54 = vcombine.low %v2270_v17, %v2280_v11  ;;  %v2404_v3 = vrot.slane %v2402_v59, 4  ;;  %v2407_v35 = vrot.slane %v2405_v57, 5  ;;  %v7991_v33 = vrot.slane %v2360_v51, 4 }
  0x96   : > { %v7993_v53 = vrot.slane %v2411_v18, 5  ;;  %v2417_v29 = vrot.slane %v2415_v19, 4  ;;  %v2426_v48 = vshrl.u32 %v5723_v25, 16  ;;  %v2397_v37 = vshll.u32 %v7972_v16, 16  ;;  %v5726_v19 = vld [vmem:[%s7114_s29 + $0x84] sm:$0xf] }
  0x97   : > { %v2429_v2 = vshll.u32 %v5723_v25, 16  ;;  %v2435_v17 = vshll.u32 %v7989_v44, 16  ;;  %v2439_v11 = vshrl.u32 %v7989_v44, 16  ;;  %v8001_v38 = vrot.slane %v2370_v22, 4  ;;  %v6984_v25 = vld [vmem:[%s7114_s29 + $0x24] sm:$0xff]  }
  0x98   : > { %v8003_v46 = vrot.slane %v2384_v24, 4  ;;  %v2428_v9 = vrot.slane %v2426_v48, 4  ;;  %v9846_v51 = vcombine.low %v9829_v43, %v9828_v40  ;;  %v2294_v22 = vsel %vm7145_vm2, %v7907_v20, %v7835_v50 }
  0x99   : > { %6608 = vmatmul.mubr.bf16.gmra.mxu0 %v5615_v55  ;;  %v2394_v55 = vor.u32 %v2393_v49, %v7981_v21  ;;  %v2431_v59 = vrot.slane %v2429_v2, 5  ;;  %v8009_v57 = vrot.slane %v2435_v17, 5  ;;  %v2441_v18 = vrot.slane %v2439_v11, 4  ;;  %v8058_v17 = vld [vmem:[%s7114_s29 + $0x8c] sm:$0x1] }
  0x9a   : > { %6675 = vmatprep.mubr.bf16.mxu0 %v5760_v14  ;;  %v2408_v14 = vor.u32 %v2407_v35, %v2404_v3  ;;  %v2418_v24 = vor.u32 %v2417_v29, %v7993_v53  ;;  %v2421_v49 = vshll.u32 %v7985_v62, 16  ;;  %v2445_v40 = vshll.u32 %v7996_v26, 16  ;;  %v8032_v3 = vld [vmem:[%s7114_s29 + $0x88] sm:$0xf]  ;;  %v6981_v35 = vld [vmem:[%s7114_s29 + $0x18] sm:$0xff]  }
  0x9b   : > { %v2304_v43 = vsel %vm7145_vm2, %v7909_v1, %v7890_v12  ;;  %v2328_v50 = vsel %vm7145_vm2, %v7926_v6, %v7911_v13  ;;  %v2432_v20 = vor.u32 %v2431_v59, %v2428_v9  ;;  %v6987_v12 = vld [vmem:[%s9785_s1 + $0x1b0] sm:$0xff]   ;;  %v8039_v1 = vrot.slane %v2397_v37, 5  ;;  %v8063_v11 = vld [vmem:[%s9785_s1 + $0x1a8] sm:$0xff]  }
  0x9c   : > { %6560 = vmatmul.mubr.bf16.gmra.mxu1 %v9846_v51  ;;  %v2453_v29 = vshll.u32 %v5726_v19, 16  ;;  %v6986_v13 = vld [vmem:[%s9785_s1 + $0x170] sm:$0xff]   ;;  %v2342_v6 = vsel %vm7145_vm2, %v7969_v28, %v7902_v63  ;;  %v2352_v48 = vsel %vm7145_vm2, %v7974_v47, %v7959_v30  ;;  %v8053_v37 = vrot.slane %v2394_v55, 4 }
  0x9d   : > { %6627 = vmatprep.mubr.bf16.mxu1 %v6980_v52  ;;  %v2318_v52 = vsel %vm7145_vm2, %v7917_v58, %v7861_v60  ;;  %v2442_v60 = vor.u32 %v2441_v18, %v8009_v57  ;;  %v2450_v58 = vshrl.u32 %v5726_v19, 16  ;;  %v8055_v2 = vrot.slane %v2408_v14, 4  ;;  %v5729_v14 = vld [vmem:[%s7114_s29 + $0x90] sm:$0xf]  ;;  %v8086_v59 = vld [vmem:[%s7114_s29 + $0x94] sm:$0xf] }
  0x9e   : > { %v8065_v63 = vrot.slane %v2418_v24, 4  ;;  %v8067_v28 = vrot.slane %v2421_v49, 5  ;;  %v2459_v30 = vshll.u32 %v8032_v3, 16  ;;  %v2463_v47 = vshrl.u32 %v8032_v3, 16  ;;  %9847 = vst [vmem:[#allocation6_spill] sm:$0xff] %v8086_v59 }
  0x9f   : > { %v2376_v55 = vsel %vm7145_vm2, %v8001_v38, %v7977_v5  ;;  %v8080_v9 = vrot.slane %v2432_v20, 4  ;;  %v8082_v51 = vrot.slane %v2445_v40, 5  ;;  %v2455_v18 = vrot.slane %v2453_v29, 5  ;;  %v6990_v5 = vld [vmem:[%s9785_s1 + $0x168] sm:$0xff]  }
  0xa0   : > { %v2477_v38 = vshll.u32 %v5729_v14, 16  ;;  %v2483_v24 = vshll.u32 %v8086_v59, 16  ;;  %v2487_v49 = vshrl.u32 %v8086_v59, 16  ;;  %v5763_v40 = vcombine.low %v2294_v22, %v2304_v43 }
  0xa1   : > { %6676 = vmatmul.mubr.bf16.vlgmr.msra.gmra.mxu0 %v5761_v4  ;;  %v2366_v4 = vsel %vm7145_vm2, %v7991_v33, %v7936_v7  ;;  %v2469_v7 = vshll.u32 %v8058_v17, 16  ;;  %v2474_v33 = vshrl.u32 %v5729_v14, 16  ;;  %v5764_v20 = vcombine.low %v2318_v52, %v2328_v50 }
  0xa2   : > { %6756 = vmatpush3.bf16.msra.mxu0 %v7788_v15  ;;  %6679 = vmatprep.mubr.bf16.mxu0 %v5762_v54  ;;  %v8088_v15 = vrot.slane %v2442_v60, 4  ;;  %v2452_v54 = vrot.slane %v2450_v58, 4  ;;  %v8097_v19 = vrot.slane %v2459_v30, 5  ;;  %v6985_v60 = vld [vmem:[%s7114_s29 + $0x30] sm:$0xff]   ;;  %v6995_v58 = vld [vmem:[%s9785_s1 + $0x1a0] sm:$0xff]   ;;  %v2479_v14 = vrot.slane %v2477_v38, 5 }
  0xa3   : > { %6757 = vmatprep.subr.bf16.mxu0 %v6987_v12  ;;  %v2476_v29 = vrot.slane %v2474_v33, 4  ;;  %v2489_v22 = vrot.slane %v2487_v49, 4  ;;  %v8105_v43 = vcombine.low %v2342_v6, %v2352_v48  ;;  %v8108_v52 = vcombine.low %v2366_v4, %v2376_v55  ;;  %v5732_v30 = vld [vmem:[%s7114_s29 + $0x9c] sm:$0xf]  ;;  %v8130_v4 = vld [vmem:[%s7114_s29 + $0xa4] sm:$0x1] }
  0xa4   : > { %6628 = vmatmul.mubr.bf16.vlgmr.msra.gmra.mxu1 %v6981_v35  ;;  %v2465_v35 = vrot.slane %v2463_v47, 4  ;;  %v2456_v48 = vor.u32 %v2455_v18, %v2452_v54  ;;  %v8127_v47 = vld [vmem:[%s7114_s29 + $0xa0] sm:$0xf]  ;;  %9850 = vst [vmem:[#allocation9_spill] sm:$0xff] %v8130_v4  ;;  %v2498_v55 = vshrl.u32 %v5732_v30, 16  ;;  %v2501_v33 = vshll.u32 %v5732_v30, 16 }
  0xa5   : > { %6708 = vmatpush3.bf16.msra.mxu1 %v7783_v36  ;;  %6631 = vmatprep.mubr.bf16.mxu1 %v6984_v25  ;;  %v8103_v36 = vrot.slane %v2483_v24, 5  ;;  %v2400_v25 = vsel %vm7145_vm2, %v8053_v37, %v8039_v1  ;;  %9849 = vst [vmem:[#allocation8_spill] sm:$0xff] %v8127_v47  ;;  %v6988_v38 = vld [vmem:[%s7114_s29 + $0x3c] sm:$0xff]   ;;  %v2507_v37 = vshll.u32 %v8127_v47, 16  ;;  %v2511_v24 = vshrl.u32 %v8127_v47, 16 }
  0xa6   : > { %6709 = vmatprep.subr.bf16.mxu1 %v6986_v13  ;;  %6758 = vmatpush3.bf16.msra.mxu0 %v6987_v12  ;;  %v8119_v12 = vld [vmem:[%s7114_s29 + $0x98] sm:$0x1]  ;;  %v2466_v1 = vor.u32 %v2465_v35, %v8097_v19  ;;  %v6994_v54 = vld [vmem:[%s9785_s1 + $0x160] sm:$0xff]   ;;  %v2480_v18 = vor.u32 %v2479_v14, %v2476_v29  ;;  %v2500_v30 = vrot.slane %v2498_v55, 4  ;;  %v2503_v49 = vrot.slane %v2501_v33, 5 }
  0xa7   : > { %6759 = vmatprep.subr.bf16.mxu0 %v8063_v11  ;;  %9848 = vst [vmem:[#allocation7_spill] sm:$0xff] %v8119_v12  ;;  %v2493_v35 = vshll.u32 %v8119_v12, 16  ;;  %v2513_v6 = vrot.slane %v2511_v24, 4  ;;  %v2517_v50 = vshll.u32 %v8130_v4, 16  ;;  %v5735_v47 = vld [vmem:[%s7114_s29 + $0xa8] sm:$0xf] }
  0xa8   : > { %v6998_v29 = vld [vmem:[%s9785_s1 + $0x158] sm:$0xff]   ;;  %v8153_v14 = vrot.slane %v2456_v48, 4  ;;  %v2522_v55 = vshrl.u32 %v5735_v47, 16  ;;  %v2525_v33 = vshll.u32 %v5735_v47, 16  ;;  %v8166_v4 = vld [vmem:[%s7114_s29 + $0xb0] sm:$0x1] }
  0xa9   : > { %6680 = vmatmul.mubr.bf16.gmra.mxu0 %v5763_v40  ;;  %6710 = vmatpush3.bf16.msra.mxu1 %v6986_v13  ;;  %v6999_v13 = vld [vmem:[%s9785_s1 + $0x198] sm:$0xff]   ;;  %v2490_v40 = vor.u32 %v2489_v22, %v8103_v36  ;;  %v8155_v22 = vrot.slane %v2469_v7, 5  ;;  %v6989_v48 = vld [vmem:[%s7114_s29 + $0x48] sm:$0xff]   ;;  %v8169_v7 = vrot.slane %v2466_v1, 4  ;;  %v8171_v12 = vrot.slane %v2480_v18, 4 }
  0xaa   : > { %6683 = vmatprep.mubr.bf16.mxu0 %v5764_v20  ;;  %6711 = vmatprep.subr.bf16.mxu1 %v6990_v5  ;;  %v8146_v20 = vrot.slane %v2507_v37, 5  ;;  %v2504_v37 = vor.u32 %v2503_v49, %v2500_v30  ;;  %v8173_v59 = vrot.slane %v2493_v35, 5  ;;  %v7002_v49 = vld [vmem:[%s9785_s1 + $0x150] sm:$0xff]   ;;  %v8190_v18 = vrot.slane %v2525_v33, 5 }
  0xab   : > { %6760 = vmatpush3.bf16.msra.mxu0 %v8063_v11  ;;  %v8158_v11 = vld [vmem:[%s7114_s29 + $0xac] sm:$0xf]  ;;  %v2541_v35 = vshll.u32 %v8166_v4, 16 }
  0xac   : > { %6632 = vmatmul.mubr.bf16.gmra.mxu1 %v6985_v60  ;;  %6761 = vmatprep.subr.bf16.mxu0 %v6995_v58  ;;  %9851 = vst [vmem:[#allocation10_spill] sm:$0xff] %v8158_v11  ;;  %v2424_v60 = vsel %vm7145_vm2, %v8065_v63, %v8067_v28  ;;  %v2514_v24 = vor.u32 %v2513_v6, %v8146_v20  ;;  %v2531_v47 = vshll.u32 %v8158_v11, 16  ;;  %v6992_v63 = vld [vmem:[%s7114_s29 + $0x54] sm:$0xff]   ;;  %v8180_v28 = vrot.slane %v2490_v40, 4 }
  0xad   : > { %6635 = vmatprep.mubr.bf16.mxu1 %v6988_v38  ;;  %6712 = vmatpush3.bf16.msra.mxu1 %v6990_v5  ;;  %v7003_v5 = vld [vmem:[%s9785_s1 + $0x190] sm:$0xff]   ;;  %v8182_v6 = vrot.slane %v2517_v50, 5  ;;  %v8184_v38 = vrot.slane %v2522_v55, 4  ;;  %v2535_v1 = vshrl.u32 %v8158_v11, 16  ;;  %v8199_v40 = vrot.slane %v2504_v37, 4 }
  0xae   : > { %6713 = vmatprep.subr.bf16.mxu1 %v6994_v54  ;;  %v8201_v30 = vrot.slane %v2514_v24, 4  ;;  %v5738_v55 = vld [vmem:[%s7114_s29 + $0xb4] sm:$0xf]  ;;  %v8205_v11 = vld [vmem:[%s7114_s29 + $0xb8] sm:$0xf]  ;;  %v7006_v24 = vld [vmem:[%s9785_s1 + $0x148] sm:$0xff]  }
  0xaf   : > { %6762 = vmatpush3.bf16.msra.mxu0 %v6995_v58  ;;  %v9852_v58 = vsel %vm7145_vm2, %v8003_v46, %v7981_v21  ;;  %9853 = vst [vmem:[#allocation11_spill] sm:$0xff] %v8205_v11  ;;  %v2438_v21 = vsel %vm7145_vm2, %v8080_v9, %v8009_v57  ;;  %v8217_v46 = vrot.slane %v2531_v47, 5  ;;  %v5741_v37 = vld [vmem:[%s7114_s29 + $0xc0] sm:$0xf]  ;;  %v2448_v57 = vsel %vm7145_vm2, %v8088_v15, %v8082_v51  ;;  %v8244_v47 = vld [vmem:[%s7114_s29 + $0xc4] sm:$0xf] }
  0xb0   : > { %6763 = vmatprep.subr.bf16.mxu0 %v6999_v13  ;;  %v5767_v50 = vcombine.low %v9852_v58, %v2400_v25  ;;  %v2546_v25 = vshrl.u32 %v5738_v55, 16  ;;  %v2462_v9 = vsel %vm7145_vm2, %v8153_v14, %v8097_v19  ;;  %9856 = vst [vmem:[#allocation13_spill] sm:$0xff] %v8244_v47  ;;  %v8247_v51 = vld [vmem:[%s7114_s29 + $0xc8] sm:$0x1]  ;;  %v2579_v58 = vshll.u32 %v8244_v47, 16 }
  0xb1   : > { %6684 = vmatmul.mubr.bf16.gmra.mxu0 %v8105_v43  ;;  %6714 = vmatpush3.bf16.msra.mxu1 %v6994_v54  ;;  %v9854_v43 = vsel %vm7145_vm2, %v8055_v2, %v7993_v53  ;;  %v2537_v54 = vrot.slane %v2535_v1, 4  ;;  %v2549_v53 = vshll.u32 %v5738_v55, 16  ;;  %v2555_v2 = vshll.u32 %v8205_v11, 16 }
  0xb2   : > { %6687 = vmatprep.mubr.bf16.mxu0 %v8108_v52  ;;  %v5768_v33 = vcombine.low %v9854_v43, %v2424_v60  ;;  %6715 = vmatprep.subr.bf16.mxu1 %v6998_v29  ;;  %v7007_v52 = vld [vmem:[%s9785_s1 + $0x188] sm:$0xff]   ;;  %v2559_v60 = vshrl.u32 %v8205_v11, 16  ;;  %v2548_v15 = vrot.slane %v2546_v25, 4  ;;  %v9857_v55 = vrot.slane %v7652_v32, 5 }
  0xb3   : > { %6764 = vmatpush3.bf16.msra.mxu0 %v6999_v13  ;;  %v2472_v13 = vsel %vm7145_vm2, %v8169_v7, %v8155_v22  ;;  %v2551_v19 = vrot.slane %v2549_v53, 5  ;;  %v8249_v14 = vrot.slane %v2555_v2, 5  ;;  %v2570_v22 = vshrl.u32 %v5741_v37, 16  ;;  %v6993_v2 = vld [vmem:[%s7114_s29 + $0x60] sm:$0xff]  }
  0xb4   : > { %6636 = vmatmul.mubr.bf16.gmra.mxu1 %v6989_v48  ;;  %6765 = vmatprep.subr.bf16.mxu0 %v7003_v5  ;;  %v8241_v48 = vld [vmem:[%s7114_s29 + $0xbc] sm:$0x1]  ;;  %v2561_v1 = vrot.slane %v2559_v60, 4  ;;  %v2573_v7 = vshll.u32 %v5741_v37, 16  ;;  %v8254_v43 = vrot.slane %v9857_v55, 4  ;;  %v8259_v25 = vrot.slane %v2541_v35, 5 }
  0xb5   : > { %9855 = vst [vmem:[#allocation12_spill] sm:$0xff] %v8241_v48  ;;  %6639 = vmatprep.mubr.bf16.mxu1 %v6992_v63  ;;  %6716 = vmatpush3.bf16.msra.mxu1 %v6998_v29  ;;  %v2528_v63 = vor.u32 %v8190_v18, %v8184_v38  ;;  %v2538_v29 = vor.u32 %v2537_v54, %v8217_v46  ;;  %v2583_v53 = vshrl.u32 %v8244_v47, 16  ;;  %v2565_v60 = vshll.u32 %v8241_v48, 16  ;;  %v6996_v38 = vld [vmem:[%s7114_s29 + $0x6c] sm:$0xff]   ;;  %v8279_v48 = vld [vmem:[%s7114_s29 + $0x18] sm:$0xe] }
  0xb6   : > { %6717 = vmatprep.subr.bf16.mxu1 %v7002_v49  ;;  %v2572_v37 = vrot.slane %v2570_v22, 4  ;;  %v2575_v11 = vrot.slane %v2573_v7, 5  ;;  %v8264_v55 = vrot.slane %v2579_v58, 5  ;;  %v2552_v18 = vor.u32 %v2551_v19, %v2548_v15  ;;  %v7010_v22 = vld [vmem:[%s9785_s1 + $0x140] sm:$0xff]   ;;  %v8276_v58 = vld [vmem:[%s7114_s29 + $0xc] sm:$0xe] }
  0xb7   : > { %6766 = vmatpush3.bf16.msra.mxu0 %v7003_v5  ;;  %v7011_v5 = vld [vmem:[%s9785_s1 + $0x180] sm:$0xff]   ;;  %v2562_v35 = vor.u32 %v2561_v1, %v8249_v14  ;;  %v2585_v54 = vrot.slane %v2583_v53, 4  ;;  %v2589_v47 = vshll.u32 %v8247_v51, 16  ;;  %v5769_v15 = vcombine.low %v2438_v21, %v2448_v57 }
  0xb8   : > { %6767 = vmatprep.subr.bf16.mxu0 %v7007_v52  ;;  %v2576_v7 = vor.u32 %v2575_v11, %v2572_v37  ;;  %v5770_v19 = vcombine.low %v2462_v9, %v2472_v13  ;;  %v8287_v1 = vrot.slane %v2528_v63, 4  ;;  %v8289_v11 = vrot.slane %v2538_v29, 4  ;;  %v6997_v9 = vld [vmem:[%s7114_s29 + $0x78] sm:$0xff]   ;;  %v7000_v37 = vld [vmem:[%s7114_s29 + $0x84] sm:$0xff]  }
  0xb9   : > { %6688 = vmatmul.mubr.bf16.gmra.mxu0 %v5767_v50  ;;  %6718 = vmatpush3.bf16.msra.mxu1 %v7002_v49  ;;  %v8284_v49 = vld [vmem:[%s9785_s1 + $0x238] sm:$0xff]   ;;  %v2586_v50 = vor.u32 %v2585_v54, %v8264_v55  ;;  %v8298_v53 = vrot.slane %v2562_v35, 4  ;;  %v8300_v21 = vrot.slane %v2565_v60, 5  ;;  %v8306_v63 = vrot.slane %v2589_v47, 5  ;;  %v5787_v60 = vld [vmem:[%s7114_s29 + $0x30] sm:$0xe] }
  0xba   : > { %6691 = vmatprep.mubr.bf16.mxu0 %v5768_v33  ;;  %6719 = vmatprep.subr.bf16.mxu1 %v7006_v24  ;;  %v8294_v33 = vld [vmem:[%s9785_s1 + $0x1f8] sm:$0xff]   ;;  %v8304_v13 = vrot.slane %v2576_v7, 4  ;;  %v2984_v29 = vrot.slane %v7726_v42, 5  ;;  %v9858_v35 = vld [vmem:[#allocation2_spill] sm:$0xff]  ;;  %v5803_v47 = vrot.slane %v5787_v60, 9  ;;  %v9861_v60 = vld [vmem:[#allocation3_spill] sm:$0xff] }
  0xbb   : > { %6768 = vmatpush3.bf16.msra.mxu0 %v7007_v52  ;;  %v8296_v52 = vrot.slane %v2552_v18, 4  ;;  %v9859_v7 = vld [vmem:[#allocation5_spill] sm:$0xff]  ;;  %v3005_v18 = vrot.slane %v7809_v0, 5  ;;  %v2520_v0 = vsel %vm7145_vm2, %v8201_v30, %v8182_v6  ;;  %v3019_v30 = vrot.slane %v7900_v41, 5 }
  0xbc   : > { %6640 = vmatmul.mubr.bf16.gmra.mxu1 %v6993_v2  ;;  %6769 = vmatprep.subr.bf16.mxu0 %v7011_v5  ;;  %v3002_v57 = vrot.slane %v9859_v7, 5  ;;  %v9860_v2 = vld [vmem:[#allocation4_spill] sm:$0xff] }
  0xbd   : > { %6643 = vmatprep.mubr.bf16.mxu1 %v6996_v38  ;;  %6720 = vmatpush3.bf16.msra.mxu1 %v7006_v24  ;;  %v8311_v24 = vrot.slane %v2586_v50, 4  ;;  %v2988_v38 = vrot.slane %v7743_v61, 5  ;;  %v2486_v50 = vsel %vm7145_vm2, %v8171_v12, %v8103_v36  ;;  %v3009_v54 = vrot.slane %v9860_v2, 5  ;;  %v5788_v12 = vld [vmem:[%s7114_s29 + $0x3c] sm:$0xe] }
  0xbe   : > { %6721 = vmatprep.subr.bf16.mxu1 %v7010_v22  ;;  %v8333_v7 = vsel %vm7456_vm5, %v5803_v47, %v3002_v57  ;;  %v3004_v36 = vrot.slane %v3002_v57, 4  ;;  %v5804_v2 = vrot.slane %v5788_v12, 9  ;;  %v7001_v47 = vld [vmem:[%s7114_s29 + $0x90] sm:$0xff]   ;;  %v3026_v12 = vrot.slane %v7920_v34, 5 }
  0xbf   : > { %6770 = vmatpush3.bf16.msra.mxu0 %v7011_v5  ;;  %v2496_v5 = vsel %vm7145_vm2, %v8180_v28, %v8173_v59  ;;  %v2510_v59 = vsel %vm7145_vm2, %v8199_v40, %v8146_v20  ;;  %v3011_v28 = vrot.slane %v3009_v54, 4  ;;  %v3016_v20 = vrot.slane %v7859_v39, 5 }
  0xc0   : > { %6851 = vmatprep.subr.bf16.mxu0 %v8284_v49  ;;  %v8347_v57 = vsel %vm7456_vm5, %v3004_v36, %v3005_v18  ;;  %v5772_v18 = vcombine.low %v2510_v59, %v2520_v0  ;;  %v8362_v39 = vsel %vm7456_vm5, %v5804_v2, %v3009_v54  ;;  %v2534_v36 = vsel %vm7145_vm2, %v8287_v1, %v8217_v46  ;;  %v5790_v54 = vld [vmem:[%s7114_s29 + $0x54] sm:$0xe] }
  0xc1   : > { %6692 = vmatmul.mubr.bf16.gmra.mxu0 %v5769_v15  ;;  %6722 = vmatpush3.bf16.msra.mxu1 %v7010_v22  ;;  %v2998_v15 = vrot.slane %v9861_v60, 5  ;;  %v3012_v22 = vrot.slane %v7838_v45, 5  ;;  %v5835_v40 = vcombine.low %v8333_v7, %v8347_v57  ;;  %v5789_v45 = vld [vmem:[%s7114_s29 + $0x48] sm:$0xe]  ;;  %v2544_v46 = vsel %vm7145_vm2, %v8289_v11, %v8259_v25  ;;  %v7021_v7 = vld [vmem:[%s7114_s29 + $0x54] sm:$0xff]  }
  0xc2   : > { %6695 = vmatprep.mubr.bf16.mxu0 %v5770_v19  ;;  %6803 = vmatprep.subr.bf16.mxu1 %v8294_v33  ;;  %v5771_v19 = vcombine.low %v2486_v50, %v2496_v5  ;;  %v3018_v50 = vrot.slane %v3016_v20, 4  ;;  %v7004_v5 = vld [vmem:[%s7114_s29 + $0x9c] sm:$0xff]   ;;  %v3030_v2 = vrot.slane %v7924_v31, 5  ;;  %v2558_v34 = vsel %vm7145_vm2, %v8296_v52, %v8249_v14 }
  0xc3   : > { %v8354_v6 = vsel %vm7456_vm5, %v3011_v28, %v3012_v22  ;;  %v5806_v28 = vrot.slane %v5790_v54, 9  ;;  %v5791_v22 = vld [vmem:[%s7114_s29 + $0x60] sm:$0xe]  ;;  %v3033_v25 = vrot.slane %v7972_v16, 5  ;;  %v2568_v11 = vsel %vm7145_vm2, %v8298_v53, %v8300_v21 }
  0xc4   : > { %6644 = vmatmul.mubr.bf16.gmra.mxu1 %v6997_v9  ;;  %v3023_v9 = vrot.slane %v7894_v10, 5  ;;  %v5836_v41 = vcombine.low %v8362_v39, %v8354_v6  ;;  %v8377_v59 = vsel %vm7456_vm5, %v3018_v50, %v3019_v30  ;;  %v3037_v14 = vrot.slane %v7964_v8, 5  ;;  %v6017_v6 = vld [vmem:[%s7114_s29 + $0x24] sm:$0xe] }
  0xc5   : > { %6647 = vmatprep.mubr.bf16.mxu1 %v7000_v37  ;;  %v5805_v37 = vrot.slane %v5789_v45, 9  ;;  %v3032_v45 = vrot.slane %v3030_v2, 4  ;;  %v5773_v52 = vcombine.low %v2534_v36, %v2544_v46  ;;  %v3040_v8 = vrot.slane %v7985_v62, 5  ;;  %v5793_v36 = vld [vmem:[%s7114_s29 + $0x78] sm:$0xe] }
  0xc6   : > { %v3025_v0 = vrot.slane %v3023_v9, 4  ;;  %v8404_v31 = vsel %vm7456_vm5, %v5806_v28, %v3023_v9  ;;  %v3039_v9 = vrot.slane %v3037_v14, 4  ;;  %v3044_v54 = vrot.slane %v7989_v44, 5 }
  0xc7   : > { %v8373_v10 = vsel %vm7456_vm5, %v5805_v37, %v3016_v20  ;;  %v5807_v20 = vrot.slane %v5791_v22, 9  ;;  %v8416_v53 = vsel %vm7456_vm5, %v3032_v45, %v3033_v25  ;;  %v5774_v37 = vcombine.low %v2558_v34, %v2568_v11 }
  0xc8   : > { %v8432_v46 = vsel %vm7456_vm5, %v3039_v9, %v3040_v8  ;;  %v5809_v62 = vrot.slane %v5793_v36, 9  ;;  %v3051_v28 = vrot.slane %v8032_v3, 5  ;;  %v3046_v44 = vrot.slane %v3044_v54, 4  ;;  %v7012_v8 = vld [vmem:[%s7114_s29 + $0x18] sm:$0xff]   ;;  %v9866_v36 = vld [vmem:[#allocation8_spill] sm:$0xff] }
  0xc9   : > { %6696 = vmatmul.mubr.bf16.gmra.mxu0 %v5771_v19  ;;  %v8395_v19 = vsel %vm7456_vm5, %v3025_v0, %v3026_v12  ;;  %v8411_v16 = vsel %vm7456_vm5, %v5807_v20, %v3030_v2  ;;  %v3047_v0 = vrot.slane %v7996_v26, 5  ;;  %v3054_v26 = vrot.slane %v8058_v17, 5  ;;  %v5794_v20 = vld [vmem:[%s7114_s29 + $0x84] sm:$0xe] }
  0xca   : > { %6699 = vmatprep.mubr.bf16.mxu0 %v5772_v18  ;;  %v5792_v18 = vld [vmem:[%s7114_s29 + $0x6c] sm:$0xe]  ;;  %v2582_v2 = vsel %vm7145_vm2, %v8304_v13, %v8264_v55  ;;  %v8444_v34 = vsel %vm7456_vm5, %v5809_v62, %v3044_v54  ;;  %v2592_v3 = vsel %vm7145_vm2, %v8311_v24, %v8306_v63  ;;  %v5810_v25 = vrot.slane %v5794_v20, 9  ;;  %v9864_v63 = vld [vmem:[#allocation6_spill] sm:$0xff] }
  0xcb   : > { %v5808_v21 = vrot.slane %v5792_v18, 9  ;;  %v8453_v17 = vsel %vm7456_vm5, %v3046_v44, %v3047_v0  ;;  %v3053_v11 = vrot.slane %v3051_v28, 4  ;;  %v9862_v45 = vrot.slane %v7652_v32, 5  ;;  %v5795_v18 = vld [vmem:[%s7114_s29 + $0x90] sm:$0xe]  ;;  %v7024_v62 = vld [vmem:[%s7114_s29 + $0x60] sm:$0xff]  }
  0xcc   : > { %6648 = vmatmul.mubr.bf16.gmra.mxu1 %v7001_v47  ;;  %v7005_v47 = vld [vmem:[%s7114_s29 + $0xa8] sm:$0xff]   ;;  %v9863_v55 = vrot.slane %v8276_v58, 9  ;;  %v3058_v24 = vrot.slane %v9864_v63, 5  ;;  %v8470_v32 = vsel %vm7456_vm5, %v5810_v25, %v3051_v28  ;;  %v3065_v54 = vrot.slane %v9866_v36, 5 }
  0xcd   : > { %6651 = vmatprep.mubr.bf16.mxu1 %v7004_v5  ;;  %v7008_v5 = vld [vmem:[%s7114_s29 + $0xb4] sm:$0xff]   ;;  %v8428_v12 = vsel %vm7456_vm5, %v5808_v21, %v3037_v14  ;;  %v5786_v14 = vld [vmem:[%s7114_s29 + $0x24] sm:$0xe]  ;;  %v9865_v21 = vld [vmem:[#allocation7_spill] sm:$0xff]  ;;  %v8474_v58 = vsel %vm7456_vm5, %v3053_v11, %v3054_v26  ;;  %v5775_v0 = vcombine.low %v2582_v2, %v2592_v3  ;;  %v2985_v28 = vsel %vm7456_vm5, %v8254_v43, %v2984_v29 }
  0xce   : > { %v2982_v13 = vsel %vm7456_vm5, %v9863_v55, %v9862_v45  ;;  %v3061_v9 = vrot.slane %v9865_v21, 5  ;;  %v3060_v44 = vrot.slane %v3058_v24, 4  ;;  %v7009_v45 = vld [vmem:[%s7114_s29 + $0xc0] sm:$0xff]   ;;  %v2990_v26 = vrot.slane %v2988_v38, 4  ;;  %v5796_v2 = vld [vmem:[%s7114_s29 + $0x9c] sm:$0xe] }
  0xcf   : > { %v3067_v3 = vrot.slane %v3065_v54, 4  ;;  %v5812_v11 = vrot.slane %v5796_v2, 9  ;;  %v9868_v55 = vld [vmem:[#allocation10_spill] sm:$0xff]  ;;  %v5797_v63 = vld [vmem:[%s7114_s29 + $0xa8] sm:$0xe]  ;;  %v5832_v21 = vcombine.low %v2982_v13, %v2985_v28  ;;  %v9872_v28 = vrot.slane %v8279_v48, 9 }
  0xd0   : > { %v8495_v25 = vsel %vm7456_vm5, %v3060_v44, %v3061_v9  ;;  %v3072_v42 = vrot.slane %v9868_v55, 5  ;;  %v8618_v43 = vld [vmem:[%s7114_s29 + $0x34] sm:$0xf] }
  0xd1   : > { %6700 = vmatmul.mubr.bf16.gmra.mxu0 %v5773_v52  ;;  %v8508_v9 = vsel %vm7456_vm5, %v5812_v11, %v3065_v54  ;;  %v5798_v54 = vld [vmem:[%s7114_s29 + $0xb4] sm:$0xe]  ;;  %v3906_v39 = vshll.u32 %v8618_v43, 16 }
  0xd2   : > { %6703 = vmatprep.mubr.bf16.mxu0 %v5774_v37  ;;  %v5811_v37 = vrot.slane %v5795_v18, 9  ;;  %v5802_v18 = vrot.slane %v5786_v14, 9  ;;  %v3074_v36 = vrot.slane %v3072_v42, 4  ;;  %v9869_v14 = vrot.slane %v9858_v35, 5 }
  0xd3   : > { %v5814_v55 = vrot.slane %v5798_v54, 9 }
  0xd4   : > { %6652 = vmatmul.mubr.bf16.gmra.mxu1 %v7005_v47  ;;  %v9867_v47 = vld [vmem:[#allocation9_spill] sm:$0xff]  ;;  %v2997_v44 = vrot.slane %v9869_v14, 4  ;;  %v9874_v61 = vmov %v9869_v14  ;;  %v3089_v14 = vrot.slane %v8247_v51, 5  ;;  %v5934_v51 = vld [vmem:[%s7114_s29 + $0x30] sm:$0xf] }
  0xd5   : > { %6655 = vmatprep.mubr.bf16.mxu1 %v7008_v5  ;;  %v3068_v20 = vrot.slane %v9867_v47, 5  ;;  %v8490_v5 = vsel %vm7456_vm5, %v5811_v37, %v3058_v24  ;;  %v3075_v24 = vrot.slane %v8166_v4, 5  ;;  %v5813_v37 = vrot.slane %v5797_v63, 9 }
  0xd6   : > { %v9873_v63 = vrot.slane %v7757_v23, 5  ;;  %v2996_v48 = vsel %vm7456_vm5, %v5802_v18, %v9874_v61  ;;  %v2999_v23 = vsel %vm7456_vm5, %v2997_v44, %v2998_v15  ;;  %v8588_v61 = vld [vmem:[%s7114_s29 + $0x28] sm:$0xf] }
  0xd7   : > { %v8502_v29 = vsel %vm7456_vm5, %v3067_v3, %v3068_v20  ;;  %v9870_v20 = vld [vmem:[#allocation11_spill] sm:$0xff]  ;;  %v8517_v4 = vsel %vm7456_vm5, %v5813_v37, %v3072_v42  ;;  %v8521_v13 = vsel %vm7456_vm5, %v3074_v36, %v3075_v24  ;;  %v2989_v3 = vsel %vm7456_vm5, %v9872_v28, %v2988_v38  ;;  %v5799_v37 = vld [vmem:[%s7114_s29 + $0xc0] sm:$0xe]  ;;  %v9875_v38 = vld [vmem:[#allocation13_spill] sm:$0xff] }
  0xd8   : > { %v3079_v2 = vrot.slane %v9870_v20, 5  ;;  %v2992_v24 = vsel %vm7456_vm5, %v2990_v26, %v9873_v63  ;;  %v3086_v36 = vrot.slane %v9875_v38, 5  ;;  %v5815_v18 = vrot.slane %v5799_v37, 9  ;;  %v7019_v20 = vld [vmem:[%s9785_s1 + $0x230] sm:$0xff]   ;;  %v5931_v63 = vld [vmem:[%s7114_s29 + $0x24] sm:$0xf] }
  0xd9   : > { %6704 = vmatmul.mubr.bf16.gmra.mxu0 %v5775_v0  ;;  %v5833_v15 = vcombine.low %v2989_v3, %v2992_v24  ;;  %v5834_v54 = vcombine.low %v2996_v48, %v2999_v23  ;;  %v7018_v28 = vld [vmem:[%s9785_s1 + $0x1f0] sm:$0xff]   ;;  %v7017_v48 = vld [vmem:[%s7114_s29 + $0x3c] sm:$0xff]   ;;  %v3873_v37 = vshrl.u32 %v5931_v63, 16  ;;  %v7020_v38 = vld [vmem:[%s7114_s29 + $0x48] sm:$0xff]   ;;  %v3882_v23 = vshll.u32 %v8588_v61, 16 }
  0xda   : > { %6771 = vmatprep.mubr.bf16.mxu0 %v7012_v8  ;;  %v9871_v8 = vld [vmem:[#allocation12_spill] sm:$0xff]  ;;  %v3081_v42 = vrot.slane %v3079_v2, 4  ;;  %v8552_v26 = vsel %vm7456_vm5, %v5814_v55, %v3079_v2  ;;  %v3088_v60 = vrot.slane %v3086_v36, 4  ;;  %v8565_v44 = vsel %vm7456_vm5, %v5815_v18, %v3086_v36  ;;  %v5928_v2 = vld [vmem:[%s7114_s29 + $0x18] sm:$0xf]  ;;  %v7023_v55 = vld [vmem:[%s9785_s1 + $0x228] sm:$0xff]  }
  0xdb   : > { %v3082_v0 = vrot.slane %v9871_v8, 5  ;;  %v3852_v24 = vshll.u32 %v5928_v2, 16  ;;  %v7022_v36 = vld [vmem:[%s9785_s1 + $0x1e8] sm:$0xff]   ;;  %v5930_v18 = vld [vmem:[%s7114_s29 + $0x20] sm:$0x1]  ;;  %v3875_v11 = vrot.slane %v3873_v37, 4 }
  0xdc   : > { %6656 = vmatmul.mubr.bf16.gmra.mxu1 %v7009_v45  ;;  %v7013_v45 = vld [vmem:[%s7114_s29 + $0x24] sm:$0xff]   ;;  %v8570_v8 = vsel %vm7456_vm5, %v3088_v60, %v3089_v14  ;;  %v3876_v14 = vshll.u32 %v5931_v63, 16  ;;  %v8608_v63 = vld [vmem:[%s7114_s29 + $0x2c] sm:$0x1]  ;;  %v3897_v37 = vshrl.u32 %v5934_v51, 16 }
  0xdd   : > { %6723 = vmatprep.mubr.bf16.mxu1 %v5832_v21  ;;  %v7016_v21 = vld [vmem:[%s7114_s29 + $0x30] sm:$0xff]   ;;  %v8556_v35 = vsel %vm7456_vm5, %v3081_v42, %v3082_v0  ;;  %v8573_v0 = vld [vmem:[%s7114_s29 + $0x1c] sm:$0xf]  ;;  %v3849_v42 = vshrl.u32 %v5928_v2, 16 }
  0xde   : > { %v4620_v3 = vrot.slane %v8573_v0, 5  ;;  %v3878_v47 = vrot.slane %v3876_v14, 5 }
  0xdf   : > { %v3851_v60 = vrot.slane %v3849_v42, 4  ;;  %v7026_v42 = vld [vmem:[%s9785_s1 + $0x1e0] sm:$0xff]  }
  0xe1   : > { %6772 = vmatmul.mubr.bf16.vlgmr.msra.gmra.mxu0 %v7013_v45  ;;  %v3862_v45 = vshrl.u32 %v8573_v0, 16 }
  0xe2   : > { %6852 = vmatpush3.bf16.msra.mxu0 %v8284_v49  ;;  %6775 = vmatprep.mubr.bf16.mxu0 %v7016_v21  ;;  %v3858_v49 = vshll.u32 %v8573_v0, 16  ;;  %v3886_v21 = vshrl.u32 %v8588_v61, 16 }
  0xe3   : > { %6853 = vmatprep.subr.bf16.mxu0 %v7019_v20 }
  0xe4   : > { %6724 = vmatmul.mubr.bf16.vlgmr.msra.gmra.mxu1 %v5833_v15  ;;  %v6016_v15 = vld [vmem:[%s7114_s29 + $0x18] sm:$0xe]  ;;  %v8603_v2 = vrot.slane %v3858_v49, 5  ;;  %v3868_v49 = vshll.u32 %v5930_v18, 16  ;;  %v3888_v0 = vrot.slane %v3886_v21, 4 }
  0xe5   : > { %6804 = vmatpush3.bf16.msra.mxu1 %v8294_v33  ;;  %6727 = vmatprep.mubr.bf16.mxu1 %v5834_v54  ;;  %v7027_v33 = vld [vmem:[%s9785_s1 + $0x220] sm:$0xff]   ;;  %v3864_v54 = vrot.slane %v3862_v45, 4  ;;  %v8615_v45 = vrot.slane %v3882_v23, 5  ;;  %v7031_v23 = vld [vmem:[%s9785_s1 + $0x218] sm:$0xff]  }
  0xe6   : > { %6805 = vmatprep.subr.bf16.mxu1 %v7018_v28  ;;  %6854 = vmatpush3.bf16.msra.mxu0 %v7019_v20  ;;  %v3854_v20 = vrot.slane %v3852_v24, 5 }
  0xe7   : > { %6855 = vmatprep.subr.bf16.mxu0 %v7023_v55  ;;  %v3865_v21 = vor.u32 %v3864_v54, %v8603_v2  ;;  %v3889_v54 = vor.u32 %v3888_v0, %v8615_v45 }
  0xe9   : > { %6776 = vmatmul.mubr.bf16.gmra.mxu0 %v7017_v48  ;;  %6806 = vmatpush3.bf16.msra.mxu1 %v7018_v28  ;;  %v6032_v48 = vrot.slane %v6016_v15, 9  ;;  %v4623_v28 = vrot.slane %v5930_v18, 5  ;;  %v4622_v18 = vrot.slane %v4620_v3, 4  ;;  %v3892_v15 = vshll.u32 %v8608_v63, 16 }
  0xea   : > { %6779 = vmatprep.mubr.bf16.mxu0 %v7020_v38  ;;  %6807 = vmatprep.subr.bf16.mxu1 %v7022_v36  ;;  %v3900_v38 = vshll.u32 %v5934_v51, 16  ;;  %v4627_v51 = vrot.slane %v8588_v61, 5  ;;  %v3910_v61 = vshrl.u32 %v8618_v43, 16 }
  0xeb   : > { %6856 = vmatpush3.bf16.msra.mxu0 %v7023_v55  ;;  %v3855_v55 = vor.u32 %v3854_v20, %v3851_v60  ;;  %v7030_v60 = vld [vmem:[%s9785_s1 + $0x1d8] sm:$0xff]   ;;  %v8641_v20 = vrot.slane %v3868_v49, 5  ;;  %v7035_v49 = vld [vmem:[%s9785_s1 + $0x210] sm:$0xff]  }
  0xec   : > { %v8613_v24 = vpop.f32.mrf.mxu0  ;;  %6728 = vmatmul.mubr.bf16.gmra.mxu1 %v5835_v40  ;;  %6857 = vmatprep.subr.bf16.mxu0 %v7027_v33  ;;  %v8623_v14 = vpop.f32.mrf.mxu1  ;;  %v3879_v40 = vor.u32 %v3878_v47, %v3875_v11  ;;  %v3899_v47 = vrot.slane %v3897_v37, 4  ;;  %v3902_v11 = vrot.slane %v3900_v38, 5  ;;  %v8668_v37 = vld [vmem:[%s7114_s29 + $0x40] sm:$0xf]  ;;  %v4629_v50 = vrot.slane %v4627_v51, 4 }
  0xed   : > { %9876 = vst [vmem:[#allocation2_spill] sm:$0xff] %v8623_v14  ;;  %6731 = vmatprep.mubr.bf16.mxu1 %v5836_v41  ;;  %6808 = vmatpush3.bf16.msra.mxu1 %v7022_v36  ;;  %v8648_v41 = vsel %vm7456_vm5, %v6032_v48, %v4620_v3  ;;  %v5937_v36 = vld [vmem:[%s7114_s29 + $0x3c] sm:$0xf]  ;;  %v8657_v0 = vrot.slane %v3855_v55, 4  ;;  %v8663_v3 = vsel %vm7456_vm5, %v4622_v18, %v4623_v28  ;;  %v8665_v48 = vrot.slane %v3892_v15, 5  ;;  %v7034_v55 = vld [vmem:[%s9785_s1 + $0x1d0] sm:$0xff]  }
  0xee   : > { %v8634_v57 = vpop.f32.mrf.mxu0  ;;  %6809 = vmatprep.subr.bf16.mxu1 %v7026_v42  ;;  %v8652_v52 = vpop.f32.mrf.mxu1  ;;  %v8675_v22 = vrot.slane %v3879_v40, 4  ;;  %v4630_v28 = vrot.slane %v8608_v63, 5  ;;  %v3890_v18 = vrot.slane %v3889_v54, 4  ;;  %v8679_v15 = vld [vmem:[%s7114_s29 + $0x38] sm:$0x1]  ;;  %v3924_v30 = vshll.u32 %v5937_v36, 16 }
  0xef   : > { %6858 = vmatpush3.bf16.msra.mxu0 %v7027_v33  ;;  %9877 = vst [vmem:[#allocation5_spill] sm:$0xff] %v8652_v52  ;;  %v8659_v33 = vrot.slane %v3865_v21, 4  ;;  %v6033_v21 = vrot.slane %v6017_v6, 9  ;;  %v3903_v1 = vor.u32 %v3902_v11, %v3899_v47  ;;  %v8683_v52 = vrot.slane %v3910_v61, 4  ;;  %v6018_v40 = vld [vmem:[%s7114_s29 + $0x30] sm:$0xe] }
  0xf0   : > { %6859 = vmatprep.subr.bf16.mxu0 %v7031_v23  ;;  %v8670_v38 = vpop.f32.mrf.mxu0  ;;  %v3930_v6 = vshll.u32 %v8668_v37, 16  ;;  %v3934_v63 = vshrl.u32 %v8668_v37, 16  ;;  %v8691_v54 = vpop.f32.mrf.mxu1  ;;  %v9880_v11 = vcombine.low %v8404_v31, %v8395_v19  ;;  %v7025_v61 = vld [vmem:[%s7114_s29 + $0x6c] sm:$0xff]   ;;  %v8724_v19 = vsel %vm7456_vm5, %v4629_v50, %v4630_v28  ;;  %v8742_v28 = vld [vmem:[%s7114_s29 + $0x44] sm:$0x1] }
  0xf1   : > { %6780 = vmatmul.mubr.bf16.gmra.mxu0 %v7021_v7  ;;  %6810 = vmatpush3.bf16.msra.mxu1 %v7026_v42  ;;  %v8681_v7 = vrot.slane %v3906_v39, 5  ;;  %v3921_v42 = vshrl.u32 %v5937_v36, 16  ;;  %9879 = vst [vmem:[#allocation4_spill] sm:$0xff] %v8691_v54  ;;  %v3861_v39 = vsel %vm7145_vm2, %v8657_v0, %v8603_v2  ;;  %v3871_v47 = vsel %vm7145_vm2, %v8659_v33, %v8641_v20  ;;  %v7028_v36 = vld [vmem:[%s7114_s29 + $0x78] sm:$0xff]   ;;  %v8735_v33 = vld [vmem:[%s7114_s29 + $0x4c] sm:$0xf] }
  0xf2   : > { %6783 = vmatprep.mubr.bf16.mxu0 %v7024_v62  ;;  %6811 = vmatprep.subr.bf16.mxu1 %v7030_v60  ;;  %v9878_v62 = vcombine.low %v8373_v10, %v8377_v59  ;;  %v4634_v59 = vrot.slane %v8618_v43, 5  ;;  %v3885_v2 = vsel %vm7145_vm2, %v8675_v22, %v8615_v45  ;;  %v8720_v20 = vsel %vm7456_vm5, %v6033_v21, %v4627_v51  ;;  %v5940_v43 = vld [vmem:[%s7114_s29 + $0x48] sm:$0xf]  ;;  %v8746_v54 = vpop.f32.mrf.mxu1  ;;  %v6019_v14 = vld [vmem:[%s7114_s29 + $0x3c] sm:$0xe] }
  0xf3   : > { %6860 = vmatpush3.bf16.msra.mxu0 %v7031_v23  ;;  %v7039_v23 = vld [vmem:[%s9785_s1 + $0x208] sm:$0xff]   ;;  %v3916_v31 = vshll.u32 %v8679_v15, 16  ;;  %v3895_v22 = vsel %vm7145_vm2, %v3890_v18, %v8665_v48  ;;  %v6034_v45 = vrot.slane %v6018_v40, 9  ;;  %v3923_v0 = vrot.slane %v3921_v42, 4  ;;  %9882 = vst [vmem:[#allocation6_spill] sm:$0xff] %v8746_v54  ;;  %v7042_v42 = vld [vmem:[%s9785_s1 + $0x1c0] sm:$0xff]  }
  0xf4   : > { %6732 = vmatmul.mubr.bf16.gmra.mxu1 %v9878_v62  ;;  %6861 = vmatprep.subr.bf16.mxu0 %v7035_v49  ;;  %v8712_v62 = vpop.f32.mrf.mxu0  ;;  %v3926_v51 = vrot.slane %v3924_v30, 5  ;;  %v8737_v50 = vrot.slane %v3903_v1, 4  ;;  %v3913_v21 = vor.u32 %v8683_v52, %v8681_v7  ;;  %v3936_v10 = vrot.slane %v3934_v63, 4  ;;  %v7043_v30 = vld [vmem:[%s9785_s1 + $0x200] sm:$0xff]  }
  0xf5   : > { %6735 = vmatprep.mubr.bf16.mxu1 %v9880_v11  ;;  %6812 = vmatpush3.bf16.msra.mxu1 %v7030_v60  ;;  %9881 = vst [vmem:[#allocation3_spill] sm:$0xff] %v8712_v62  ;;  %v7038_v60 = vld [vmem:[%s9785_s1 + $0x1c8] sm:$0xff]   ;;  %v8744_v11 = vrot.slane %v3930_v6, 5  ;;  %v4636_v48 = vrot.slane %v4634_v59, 4  ;;  %v3945_v1 = vshrl.u32 %v5940_v43, 16  ;;  %v3948_v18 = vshll.u32 %v5940_v43, 16 }
  0xf6   : > { %6813 = vmatprep.subr.bf16.mxu1 %v7034_v55  ;;  %v8757_v40 = vcombine.low %v3861_v39, %v3871_v47  ;;  %v3958_v63 = vshrl.u32 %v8735_v33, 16  ;;  %v8765_v43 = vrot.slane %v3916_v31, 5  ;;  %v3940_v54 = vshll.u32 %v8742_v28, 16  ;;  %v5943_v39 = vld [vmem:[%s7114_s29 + $0x54] sm:$0xf]  ;;  %v7029_v6 = vld [vmem:[%s7114_s29 + $0x84] sm:$0xff]  }
  0xf7   : > { %6862 = vmatpush3.bf16.msra.mxu0 %v7035_v49  ;;  %v4637_v49 = vrot.slane %v8679_v15, 5  ;;  %v8752_v52 = vpop.f32.mrf.mxu0  ;;  %v3954_v15 = vshll.u32 %v8735_v33, 16  ;;  %v4641_v31 = vrot.slane %v8668_v37, 5  ;;  %v9886_v37 = vcombine.low %v8428_v12, %v8432_v46  ;;  %v7032_v47 = vld [vmem:[%s7114_s29 + $0x90] sm:$0xff]  }
  0xf8   : > { %6863 = vmatprep.subr.bf16.mxu0 %v7039_v23  ;;  %9883 = vst [vmem:[#allocation7_spill] sm:$0xff] %v8752_v52 }
  0xf9   : > { %6784 = vmatmul.mubr.bf16.gmra.mxu0 %v7025_v61  ;;  %6814 = vmatpush3.bf16.msra.mxu1 %v7034_v55  ;;  %v8763_v61 = vcombine.low %v3885_v2, %v3895_v22  ;;  %v3927_v55 = vor.u32 %v3926_v51, %v3923_v0  ;;  %v3937_v2 = vor.u32 %v3936_v10, %v8744_v11  ;;  %v8781_v22 = vld [vmem:[%s7114_s29 + $0x58] sm:$0xf]  ;;  %v8788_v51 = vrot.slane %v3913_v21, 4 }
  0xfa   : > { %6787 = vmatprep.mubr.bf16.mxu0 %v7028_v36  ;;  %6815 = vmatprep.subr.bf16.mxu1 %v7038_v60  ;;  %v8776_v36 = vsel %vm7456_vm5, %v6034_v45, %v4634_v59  ;;  %v9884_v0 = vcombine.low %v8411_v16, %v8416_v53  ;;  %v8792_v59 = vsel %vm7456_vm5, %v4636_v48, %v4637_v49  ;;  %v3947_v45 = vrot.slane %v3945_v1, 4  ;;  %v8799_v16 = vpop.f32.mrf.mxu0  ;;  %v5942_v1 = vld [vmem:[%s7114_s29 + $0x50] sm:$0x1] }
  0xfb   : > { %6864 = vmatpush3.bf16.msra.mxu0 %v7039_v23  ;;  %v8786_v23 = vpop.f32.mrf.mxu1  ;;  %v3950_v10 = vrot.slane %v3948_v18, 5  ;;  %9887 = vst [vmem:[#allocation9_spill] sm:$0xff] %v8799_v16  ;;  %v6035_v53 = vrot.slane %v6019_v14, 9  ;;  %v3960_v21 = vrot.slane %v3958_v63, 4  ;;  %v3928_v48 = vrot.slane %v3927_v55, 4 }
  0xfc   : > { %6736 = vmatmul.mubr.bf16.gmra.mxu1 %v9884_v0  ;;  %9885 = vst [vmem:[#allocation8_spill] sm:$0xff] %v8786_v23  ;;  %6865 = vmatprep.subr.bf16.mxu0 %v7043_v30  ;;  %v8801_v0 = vrot.slane %v3954_v15, 5  ;;  %v3969_v23 = vshrl.u32 %v5943_v39, 16  ;;  %v3942_v49 = vrot.slane %v3940_v54, 5  ;;  %v3972_v18 = vshll.u32 %v5943_v39, 16  ;;  %v8817_v39 = vpop.f32.mrf.mxu0 }
  0xfd   : > { %6739 = vmatprep.mubr.bf16.mxu1 %v9886_v37  ;;  %6816 = vmatpush3.bf16.msra.mxu1 %v7038_v60  ;;  %v3978_v52 = vshll.u32 %v8781_v22, 16  ;;  %v3938_v12 = vrot.slane %v3937_v2, 4  ;;  %v4643_v46 = vrot.slane %v4641_v31, 4  ;;  %v4644_v37 = vrot.slane %v8742_v28, 5  ;;  %v8807_v60 = vpop.f32.mrf.mxu1  ;;  %v5946_v55 = vld [vmem:[%s7114_s29 + $0x60] sm:$0xf] }
  0xfe   : > { %6817 = vmatprep.subr.bf16.mxu1 %v7042_v42  ;;  %v3982_v14 = vshrl.u32 %v8781_v22, 16  ;;  %9888 = vst [vmem:[#allocation10_spill] sm:$0xff] %v8807_v60  ;;  %v3919_v15 = vsel %vm7145_vm2, %v8788_v51, %v8765_v43  ;;  %v3951_v63 = vor.u32 %v3950_v10, %v3947_v45  ;;  %v3961_v28 = vor.u32 %v3960_v21, %v8801_v0  ;;  %v6020_v60 = vld [vmem:[%s7114_s29 + $0x48] sm:$0xe] }
  0xff   : > { %6866 = vmatpush3.bf16.msra.mxu0 %v7043_v30  ;;  %v4648_v30 = vrot.slane %v8735_v33, 5  ;;  %v3964_v2 = vshll.u32 %v5942_v1, 16  ;;  %v3971_v16 = vrot.slane %v3969_v23, 4  ;;  %v3974_v62 = vrot.slane %v3972_v18, 5  ;;  %v8842_v10 = vpop.f32.mrf.mxu1 }
 0x100   : > { %v3933_v43 = vsel %vm7145_vm2, %v3928_v48, %v8744_v11  ;;  %v8826_v33 = vsel %vm7456_vm5, %v6035_v53, %v4641_v31  ;;  %v3943_v51 = vsel %vm7145_vm2, %v3938_v12, %v3942_v49  ;;  %v8834_v23 = vsel %vm7456_vm5, %v4643_v46, %v4644_v37  ;;  %9890 = vst [vmem:[#allocation11_spill] sm:$0xff] %v8842_v10  ;;  %v8845_v49 = vld [vmem:[%s7114_s29 + $0x64] sm:$0xf]  ;;  %v7033_v12 = vld [vmem:[%s7114_s29 + $0x9c] sm:$0xff]   ;;  %v8851_v46 = vpop.f32.mrf.mxu0 }
 0x101   : > { %6788 = vmatmul.mubr.bf16.gmra.mxu0 %v7029_v6  ;;  %6818 = vmatpush3.bf16.msra.mxu1 %v7042_v42  ;;  %v8828_v6 = vrot.slane %v3978_v52, 5  ;;  %v3984_v42 = vrot.slane %v3982_v14, 4  ;;  %v3993_v45 = vshrl.u32 %v5946_v55, 16  ;;  %v3996_v11 = vshll.u32 %v5946_v55, 16  ;;  %v7036_v55 = vld [vmem:[%s7114_s29 + $0xa8] sm:$0xff]  }
 0x102   : > { %6791 = vmatprep.mubr.bf16.mxu0 %v7032_v47  ;;  %v8837_v47 = vld [vmem:[%s7114_s29 + $0x5c] sm:$0x1]  ;;  %v9889_v31 = vcombine.low %v8444_v34, %v8453_v17  ;;  %v3952_v52 = vrot.slane %v3951_v63, 4  ;;  %v6036_v53 = vrot.slane %v6020_v60, 9  ;;  %v4650_v21 = vrot.slane %v4648_v30, 4 }
 0x103   : > { %v4651_v48 = vrot.slane %v5942_v1, 5  ;;  %v9891_v18 = vcombine.low %v8470_v32, %v8474_v58  ;;  %v3962_v37 = vrot.slane %v3961_v28, 4  ;;  %v3966_v14 = vrot.slane %v3964_v2, 5  ;;  %v6021_v63 = vld [vmem:[%s7114_s29 + $0x54] sm:$0xe]  ;;  %v8869_v28 = vpop.f32.mrf.mxu1 }
 0x104   : > { %6740 = vmatmul.mubr.bf16.gmra.mxu1 %v9889_v31  ;;  %v3975_v34 = vor.u32 %v3974_v62, %v3971_v16  ;;  %v4655_v17 = vrot.slane %v8781_v22, 5  ;;  %v3985_v60 = vor.u32 %v3984_v42, %v8828_v6  ;;  %v3988_v1 = vshll.u32 %v8837_v47, 16  ;;  %9893 = vst [vmem:[#allocation12_spill] sm:$0xff] %v8869_v28  ;;  %v6022_v62 = vld [vmem:[%s7114_s29 + $0x60] sm:$0xe] }
 0x105   : > { %6743 = vmatprep.mubr.bf16.mxu1 %v9891_v18  ;;  %v3995_v31 = vrot.slane %v3993_v45, 4  ;;  %v3998_v54 = vrot.slane %v3996_v11, 5  ;;  %v9892_v32 = vsel %vm7145_vm2, %v8737_v50, %v8681_v7  ;;  %v4002_v22 = vshll.u32 %v8845_v49, 16 }
 0x106   : > { %v8863_v58 = vcombine.low %v9892_v32, %v3919_v15  ;;  %v4006_v16 = vshrl.u32 %v8845_v49, 16  ;;  %v8871_v2 = vcombine.low %v3933_v43, %v3943_v51  ;;  %v3957_v42 = vsel %vm7145_vm2, %v3952_v52, %v8801_v0  ;;  %v5949_v15 = vld [vmem:[%s7114_s29 + $0x6c] sm:$0xf]  ;;  %v8889_v32 = vld [vmem:[%s7114_s29 + $0x70] sm:$0xf] }
 0x107   : > { %v8878_v7 = vsel %vm7456_vm5, %v6036_v53, %v4648_v30  ;;  %v8882_v50 = vsel %vm7456_vm5, %v4650_v21, %v4651_v48  ;;  %v8885_v45 = vpop.f32.mrf.mxu0  ;;  %v3976_v43 = vrot.slane %v3975_v34, 4  ;;  %v6037_v51 = vrot.slane %v6021_v63, 9  ;;  %v5948_v53 = vld [vmem:[%s7114_s29 + $0x68] sm:$0x1] }
 0x108   : > { %9894 = vst [vmem:[#allocation13_spill] sm:$0xff] %v8885_v45  ;;  %v4657_v11 = vrot.slane %v4655_v17, 4  ;;  %v4658_v18 = vrot.slane %v8837_v47, 5  ;;  %v3967_v0 = vsel %vm7145_vm2, %v3962_v37, %v3966_v14  ;;  %v3986_v30 = vrot.slane %v3985_v60, 4  ;;  %v6024_v45 = vld [vmem:[%s7114_s29 + $0x78] sm:$0xe] }
 0x109   : > { %6792 = vmatmul.mubr.bf16.gmra.mxu0 %v7033_v12  ;;  %v3990_v52 = vrot.slane %v3988_v1, 5  ;;  %v3999_v21 = vor.u32 %v3998_v54, %v3995_v31  ;;  %v8894_v48 = vrot.slane %v4002_v22, 5  ;;  %v4008_v12 = vrot.slane %v4006_v16, 4  ;;  %v7037_v31 = vld [vmem:[%s7114_s29 + $0xb4] sm:$0xff]  }
 0x10a   : > { %6795 = vmatprep.mubr.bf16.mxu0 %v7036_v55  ;;  %v4017_v34 = vshrl.u32 %v5949_v15, 16  ;;  %v4020_v63 = vshll.u32 %v5949_v15, 16  ;;  %v9895_v47 = vcombine.low %v8490_v5, %v8495_v25  ;;  %v4662_v14 = vrot.slane %v8845_v49, 5  ;;  %v8911_v5 = vpop.f32.mrf.mxu0 }
 0x10b   : > { %v4026_v54 = vshll.u32 %v8889_v32, 16  ;;  %v4030_v60 = vshrl.u32 %v8889_v32, 16  ;;  %v9897_v1 = vcombine.low %v8508_v9, %v8502_v29  ;;  %9898 = vst [vmem:[#allocation15_spill] sm:$0xff] %v8911_v5  ;;  %v8913_v25 = vcombine.low %v3957_v42, %v3967_v0  ;;  %v5952_v29 = vld [vmem:[%s7114_s29 + $0x78] sm:$0xf]  ;;  %v7040_v9 = vld [vmem:[%s7114_s29 + $0xc0] sm:$0xff]  }
 0x10c   : > { %6744 = vmatmul.mubr.bf16.gmra.mxu1 %v9895_v47  ;;  %v8900_v55 = vpop.f32.mrf.mxu1  ;;  %v3981_v22 = vsel %vm7145_vm2, %v3976_v43, %v8828_v6  ;;  %v8920_v49 = vsel %vm7456_vm5, %v6037_v51, %v4655_v17  ;;  %v8924_v16 = vsel %vm7456_vm5, %v4657_v11, %v4658_v18  ;;  %v3991_v15 = vsel %vm7145_vm2, %v3986_v30, %v3990_v52  ;;  %v8937_v43 = vld [vmem:[%s7114_s29 + $0x74] sm:$0x1]  ;;  %v8994_v5 = vld [vmem:[%s7114_s29 + $0x8c] sm:$0x1] }
 0x10d   : > { %9896 = vst [vmem:[#allocation14_spill] sm:$0xff] %v8900_v55  ;;  %6747 = vmatprep.mubr.bf16.mxu1 %v9897_v1  ;;  %v8930_v47 = vrot.slane %v3999_v21, 4  ;;  %v4012_v42 = vshll.u32 %v5948_v53, 16  ;;  %v6038_v0 = vrot.slane %v6022_v62, 9  ;;  %v8933_v1 = vld [vmem:[%s7114_s29 + $0x7c] sm:$0xf]  ;;  %v4009_v6 = vor.u32 %v4008_v12, %v8894_v48  ;;  %v8943_v21 = vpop.f32.mrf.mxu0 }
 0x10e   : > { %v4665_v17 = vrot.slane %v5948_v53, 5  ;;  %v4019_v51 = vrot.slane %v4017_v34, 4  ;;  %v4022_v11 = vrot.slane %v4020_v63, 5  ;;  %v8939_v18 = vpop.f32.mrf.mxu1  ;;  %v4664_v37 = vrot.slane %v4662_v14, 4  ;;  %9900 = vst [vmem:[#allocation17_spill] sm:$0xff] %v8943_v21 }
 0x10f   : > { %9899 = vst [vmem:[#allocation16_spill] sm:$0xff] %v8939_v18  ;;  %v8941_v55 = vrot.slane %v4026_v54, 5  ;;  %v4032_v30 = vrot.slane %v4030_v60, 4  ;;  %v4041_v52 = vshrl.u32 %v5952_v29, 16  ;;  %v6023_v53 = vld [vmem:[%s7114_s29 + $0x6c] sm:$0xe]  ;;  %v8950_v18 = vcombine.low %v3981_v22, %v3991_v15 }
 0x110   : > { %v4044_v12 = vshll.u32 %v5952_v29, 16  ;;  %v4050_v34 = vshll.u32 %v8933_v1, 16  ;;  %v4054_v63 = vshrl.u32 %v8933_v1, 16  ;;  %v8952_v54 = vrot.slane %v4012_v42, 5  ;;  %v5955_v62 = vld [vmem:[%s7114_s29 + $0x84] sm:$0xf]  ;;  %v8973_v42 = vpop.f32.mrf.mxu1 }
 0x111   : > { %6796 = vmatmul.mubr.bf16.gmra.mxu0 %v7037_v31  ;;  %9901 = vst [vmem:[#allocation18_spill] sm:$0xff] %v8950_v18  ;;  %v8956_v60 = vsel %vm7456_vm5, %v6038_v0, %v4662_v14  ;;  %v4036_v31 = vshll.u32 %v8937_v43, 16  ;;  %v8964_v28 = vrot.slane %v4009_v6, 4  ;;  %v4669_v22 = vrot.slane %v8889_v32, 5  ;;  %v8968_v15 = vld [vmem:[%s7114_s29 + $0x88] sm:$0xf] }
 0x112   : > { %6799 = vmatprep.mubr.bf16.mxu0 %v7040_v9  ;;  %v4023_v9 = vor.u32 %v4022_v11, %v4019_v51  ;;  %v9902_v14 = vcombine.low %v8517_v4, %v8521_v13  ;;  %9903 = vst [vmem:[#allocation19_spill] sm:$0xff] %v8973_v42  ;;  %v7041_v0 = vld [vmem:[%s7114_s29 + $0xcc] sm:$0xff]   ;;  %v8978_v10 = vsel %vm7456_vm5, %v4664_v37, %v4665_v17  ;;  %v6039_v6 = vrot.slane %v6023_v53, 9  ;;  %v8981_v11 = vpop.f32.mrf.mxu0  ;;  %v8987_v4 = vld [vmem:[%s7114_s29 + $0x80] sm:$0x1] }
 0x113   : > { %v4033_v29 = vor.u32 %v4032_v30, %v8941_v55  ;;  %v4043_v51 = vrot.slane %v4041_v52, 4  ;;  %9904 = vst [vmem:[#allocation20_spill] sm:$0xff] %v8981_v11  ;;  %v9905_v32 = vcombine.low %v8552_v26, %v8556_v35  ;;  %v4046_v13 = vrot.slane %v4044_v12, 5 }
 0x114   : > { %6748 = vmatmul.mubr.bf16.gmra.mxu1 %v9902_v14  ;;  %v8989_v14 = vrot.slane %v4050_v34, 5  ;;  %v4056_v42 = vrot.slane %v4054_v63, 4  ;;  %v4065_v21 = vshrl.u32 %v5955_v62, 16  ;;  %v4038_v37 = vrot.slane %v4036_v31, 5 }
 0x115   : > { %6751 = vmatprep.mubr.bf16.mxu1 %v9905_v32  ;;  %v4672_v17 = vrot.slane %v8937_v43, 5  ;;  %v4068_v30 = vshll.u32 %v5955_v62, 16  ;;  %v4074_v52 = vshll.u32 %v8968_v15, 16  ;;  %v4024_v53 = vrot.slane %v4023_v9, 4  ;;  %v8997_v32 = vpop.f32.mrf.mxu1 }
 0x116   : > { %v4671_v11 = vrot.slane %v4669_v22, 4  ;;  %v4067_v26 = vrot.slane %v4065_v21, 4  ;;  %v4078_v35 = vshrl.u32 %v8968_v15, 16  ;;  %v4034_v12 = vrot.slane %v4033_v29, 4 }
 0x117   : > { %v4060_v34 = vshll.u32 %v8987_v4, 16  ;;  %v4070_v63 = vrot.slane %v4068_v30, 5  ;;  %v9000_v31 = vrot.slane %v4074_v52, 5  ;;  %v4047_v62 = vor.u32 %v4046_v13, %v4043_v51  ;;  %v6025_v52 = vld [vmem:[%s7114_s29 + $0x84] sm:$0xe] }
 0x118   : > { %v9002_v43 = vpop.f32.mrf.mxu0  ;;  %v4057_v9 = vor.u32 %v4056_v42, %v8989_v14  ;;  %v4676_v21 = vrot.slane %v8933_v1, 5  ;;  %v4080_v18 = vrot.slane %v4078_v35, 4  ;;  %v9906_v29 = vcombine.low %v8648_v41, %v8663_v3 }
 0x119   : > { %6800 = vmatmul.mubr.bf16.gmra.mxu0 %v7041_v0  ;;  %v4015_v30 = vsel %vm7145_vm2, %v8964_v28, %v8952_v54  ;;  %v9018_v51 = vsel %vm7456_vm5, %v6039_v6, %v4669_v22  ;;  %v4084_v42 = vshll.u32 %v8994_v5, 16  ;;  %v4029_v41 = vsel %vm7145_vm2, %v4024_v53, %v8941_v55  ;;  %v5958_v54 = vld [vmem:[%s7114_s29 + $0x90] sm:$0xf] }
 0x11a   : > { %6867 = vmatprep.mubr.bf16.mxu0 %v9906_v29  ;;  %v9021_v1 = vpop.f32.mrf.mxu0  ;;  %v4071_v3 = vor.u32 %v4070_v63, %v4067_v26  ;;  %v4081_v13 = vor.u32 %v4080_v18, %v9000_v31  ;;  %v4683_v28 = vrot.slane %v8968_v15, 5  ;;  %v9908_v22 = vcombine.low %v8565_v44, %v8570_v8 }
 0x11b   : > { %v4039_v6 = vsel %vm7145_vm2, %v4034_v12, %v4038_v37  ;;  %v9039_v55 = vsel %vm7456_vm5, %v4671_v11, %v4672_v17  ;;  %v4062_v53 = vrot.slane %v4060_v34, 5  ;;  %v6040_v18 = vrot.slane %v6024_v45, 9  ;;  %v9048_v12 = vld [vmem:[%s7114_s29 + $0x94] sm:$0xf] }
 0x11c   : > { %v9030_v35 = vpop.f32.mrf.mxu1  ;;  %6752 = vmatmul.mubr.bf16.gmra.mxu1 %v9908_v22  ;;  %v9041_v26 = vpop.f32.mrf.mxu0  ;;  %v4048_v15 = vrot.slane %v4047_v62, 4  ;;  %v4058_v63 = vrot.slane %v4057_v9, 4  ;;  %v4678_v29 = vrot.slane %v4676_v21, 4  ;;  %v4679_v0 = vrot.slane %v8987_v4, 5 }
 0x11d   : > { %9907 = vst [vmem:[#allocation21_spill] sm:$0xff] %v9030_v35  ;;  %6819 = vmatprep.mubr.bf16.mxu1 %v8757_v40  ;;  %v4086_v8 = vrot.slane %v4084_v42, 5  ;;  %v6041_v37 = vrot.slane %v6025_v52, 9  ;;  %v4089_v11 = vshrl.u32 %v5958_v54, 16  ;;  %v4092_v17 = vshll.u32 %v5958_v54, 16 }
 0x11e   : > { %v9045_v44 = vpop.f32.mrf.mxu1  ;;  %v9050_v34 = vpop.f32.mrf.mxu0  ;;  %v4072_v45 = vrot.slane %v4071_v3, 4  ;;  %v4082_v22 = vrot.slane %v4081_v13, 4  ;;  %v4685_v40 = vrot.slane %v4683_v28, 4  ;;  %v4686_v62 = vrot.slane %v8994_v5, 5  ;;  %v9071_v54 = vld [vmem:[%s7114_s29 + $0x98] sm:$0x1] }
 0x11f   : > { %9909 = vst [vmem:[#allocation22_spill] sm:$0xff] %v9045_v44  ;;  %v9911_v4 = vsel %vm7145_vm2, %v8930_v47, %v8894_v48  ;;  %v9062_v52 = vcombine.low %v4029_v41, %v4039_v6  ;;  %v9068_v13 = vsel %vm7456_vm5, %v6040_v18, %v4676_v21  ;;  %v4053_v48 = vsel %vm7145_vm2, %v4048_v15, %v8989_v14  ;;  %v5961_v41 = vld [vmem:[%s7114_s29 + $0x9c] sm:$0xf]  ;;  %v9088_v6 = vld [vmem:[%s7114_s29 + $0xa0] sm:$0xf] }
 0x120   : > { %v9053_v9 = vpop.f32.mrf.mxu1  ;;  %v9060_v42 = vcombine.low %v9911_v4, %v4015_v30  ;;  %v6581_v5 = vpop.f32.mrf.mxu0  ;;  %v4063_v47 = vsel %vm7145_vm2, %v4058_v63, %v4062_v53  ;;  %v9083_v30 = vsel %vm7456_vm5, %v4678_v29, %v4679_v0  ;;  %v4098_v21 = vshll.u32 %v9048_v12, 16  ;;  %v9175_v35 = vld [vmem:[%s7114_s29 + $0xb0] sm:$0x1] }
 0x121   : > { %9910 = vst [vmem:[#allocation23_spill] sm:$0xff] %v9053_v9  ;;  %v9912_v9 = vcombine.low %v8720_v20, %v8724_v19  ;;  %v9914_v20 = vcombine.low %v8776_v36, %v8792_v59  ;;  %v9097_v19 = vsel %vm7456_vm5, %v6041_v37, %v4683_v28  ;;  %v4091_v14 = vrot.slane %v4089_v11, 4  ;;  %v9112_v37 = vld [vmem:[%s7114_s29 + $0x90] sm:$0xe] }
 0x122   : > { %v9090_v18 = vpop.f32.mrf.mxu1  ;;  %v4094_v53 = vrot.slane %v4092_v17, 5  ;;  %v4102_v0 = vshrl.u32 %v9048_v12, 16  ;;  %v1615_v15 = vpop.f32.mrf.mxu0  ;;  %v4077_v63 = vsel %vm7145_vm2, %v4072_v45, %v9000_v31  ;;  %v4087_v29 = vsel %vm7145_vm2, %v4082_v22, %v4086_v8 }
 0x123   : > { %6868 = vmatmul.mubr.bf16.vlgmr.msra.gmra.mxu0 %v9912_v9  ;;  %9913 = vst [vmem:[#allocation24_spill] sm:$0xff] %v9090_v18  ;;  %v9107_v36 = vsel %vm7456_vm5, %v4685_v40, %v4686_v62  ;;  %v4108_v59 = vshll.u32 %v9071_v54, 16  ;;  %v4113_v11 = vshrl.u32 %v5961_v41, 16  ;;  %v4116_v17 = vshll.u32 %v5961_v41, 16 }
 0x124   : > { %6871 = vmatprep.mubr.bf16.mxu0 %v9914_v20  ;;  %v6533_v28 = vpop.f32.mrf.mxu1  ;;  %6820 = vmatmul.mubr.bf16.vlgmr.msra.gmra.mxu1 %v8763_v61  ;;  %v4122_v9 = vshll.u32 %v9088_v6, 16  ;;  %v4126_v31 = vshrl.u32 %v9088_v6, 16  ;;  %v6582_v45 = vpop.f32.mrf.mxu0  ;;  %v9118_v22 = vcombine.low %v4053_v48, %v4063_v47  ;;  %v9122_v40 = vrot.slane %v4098_v21, 5  ;;  %v9136_v61 = vld [vmem:[%s7114_s29 + $0xa4] sm:$0x1] }
 0x125   : > { %v1171_v8 = vadd.f32 %v6533_v28, %v8613_v24  ;;  %6823 = vmatprep.mubr.bf16.mxu1 %v8863_v58  ;;  %v9124_v4 = vcombine.low %v4077_v63, %v4087_v29  ;;  %v4095_v20 = vor.u32 %v4094_v53, %v4091_v14  ;;  %v4104_v24 = vrot.slane %v4102_v0, 4  ;;  %v5964_v28 = vld [vmem:[%s7114_s29 + $0xa8] sm:$0xf]  ;;  %v9141_v14 = vld [vmem:[%s7114_s29 + $0xac] sm:$0xf] }
 0x126   : > { %v1162_v62 = vpop.f32.mrf.mxu1  ;;  %v1618_v48 = vpop.f32.mrf.mxu0  ;;  %v9132_v47 = vrot.slane %v4108_v59, 5  ;;  %v6042_v21 = vrot.slane %v9112_v37, 9  ;;  %v4115_v29 = vrot.slane %v4113_v11, 4  ;;  %v4118_v18 = vrot.slane %v4116_v17, 5 }
 0x127   : > { %v9129_v3 = vadd.f32 %v6581_v5, %v1171_v8  ;;  %v1163_v58 = vadd.f32 %v1162_v62, %v8634_v57  ;;  %v9138_v44 = vrot.slane %v4122_v9, 5  ;;  %v4128_v41 = vrot.slane %v4126_v31, 4  ;;  %v9920_v62 = vld [vmem:[#allocation3_spill] sm:$0xff] }
 0x128   : > { %v6534_v63 = vpop.f32.mrf.mxu1  ;;  %v6585_v5 = vpop.f32.mrf.mxu0  ;;  %v9917_v0 = vcombine.low %v8826_v33, %v8834_v23  ;;  %v4137_v59 = vshrl.u32 %v5964_v28, 16  ;;  %v4140_v37 = vshll.u32 %v5964_v28, 16  ;;  %v9918_v11 = vcombine.low %v8878_v7, %v8882_v50 }
 0x129   : > { %9915 = vst [vmem:[#allocation25_spill] sm:$0xff] %v9129_v3  ;;  %v9143_v53 = vadd.f32 %v1615_v15, %v1163_v58  ;;  %v1174_v57 = vadd.f32 %v6534_v63, %v8670_v38  ;;  %v9152_v17 = vrot.slane %v4095_v20, 4  ;;  %v4105_v15 = vor.u32 %v4104_v24, %v9122_v40  ;;  %v6027_v58 = vld [vmem:[%s7114_s29 + $0x9c] sm:$0xe] }
 0x12a   : > { %v1165_v8 = vpop.f32.mrf.mxu1  ;;  %v4690_v9 = vrot.slane %v9048_v12, 5  ;;  %v4132_v38 = vshll.u32 %v9136_v61, 16  ;;  %v1631_v23 = vpop.f32.mrf.mxu0  ;;  %v4693_v28 = vrot.slane %v9071_v54, 5  ;;  %v4146_v63 = vshll.u32 %v9141_v14, 16 }
 0x12b   : > { %9916 = vst [vmem:[#allocation26_spill] sm:$0xff] %v9143_v53  ;;  %6872 = vmatmul.mubr.bf16.gmra.mxu0 %v9917_v0  ;;  %v9157_v31 = vadd.f32 %v6582_v45, %v1174_v57  ;;  %v1166_v33 = vadd.f32 %v1165_v8, %v9920_v62  ;;  %v4119_v50 = vor.u32 %v4118_v18, %v4115_v29  ;;  %v4697_v12 = vrot.slane %v9088_v6, 5  ;;  %v9921_v57 = vld [vmem:[#allocation7_spill] sm:$0xff]  ;;  %v9922_v6 = vld [vmem:[#allocation9_spill] sm:$0xff] }
 0x12c   : > { %6875 = vmatprep.mubr.bf16.mxu0 %v9918_v11  ;;  %v6537_v7 = vpop.f32.mrf.mxu1  ;;  %6824 = vmatmul.mubr.bf16.gmra.mxu1 %v8871_v2  ;;  %v4129_v20 = vor.u32 %v4128_v41, %v9138_v44  ;;  %v4150_v45 = vshrl.u32 %v9141_v14, 16  ;;  %v6586_v8 = vpop.f32.mrf.mxu0  ;;  %v4139_v54 = vrot.slane %v4137_v59, 4  ;;  %v4142_v11 = vrot.slane %v4140_v37, 5 }
 0x12d   : > { %9919 = vst [vmem:[#allocation27_spill] sm:$0xff] %v9157_v31  ;;  %v9167_v24 = vadd.f32 %v1618_v48, %v1166_v33  ;;  %v1187_v0 = vadd.f32 %v6537_v7, %v9921_v57  ;;  %6827 = vmatprep.mubr.bf16.mxu1 %v8913_v25  ;;  %v4106_v31 = vrot.slane %v4105_v15, 4  ;;  %v4692_v2 = vrot.slane %v4690_v9, 4 }
 0x12e   : > { %v1178_v62 = vpop.f32.mrf.mxu1  ;;  %v4134_v18 = vrot.slane %v4132_v38, 5  ;;  %v6043_v29 = vrot.slane %v6027_v58, 9  ;;  %v1634_v3 = vpop.f32.mrf.mxu0  ;;  %v9177_v48 = vrot.slane %v4146_v63, 5  ;;  %v4152_v33 = vrot.slane %v4150_v45, 4 }
 0x12f   : > { %v9171_v41 = vadd.f32 %v6585_v5, %v1187_v0  ;;  %v1179_v53 = vadd.f32 %v1178_v62, %v9922_v6  ;;  %v4120_v57 = vrot.slane %v4119_v50, 4  ;;  %v4130_v25 = vrot.slane %v4129_v20, 4 }
 0x130   : > { %v6538_v7 = vpop.f32.mrf.mxu1  ;;  %v4699_v59 = vrot.slane %v4697_v12, 4  ;;  %v4700_v37 = vrot.slane %v9136_v61, 5  ;;  %v6589_v38 = vpop.f32.mrf.mxu0  ;;  %v9923_v58 = vcombine.low %v8920_v49, %v8924_v16  ;;  %v9188_v63 = vsel %vm7456_vm5, %v6042_v21, %v4690_v9  ;;  %v6028_v21 = vld [vmem:[%s7114_s29 + $0xa8] sm:$0xe] }
 0x131   : > { %v9180_v15 = vadd.f32 %v1631_v23, %v1179_v53  ;;  %v1190_v5 = vadd.f32 %v6538_v7, %v8817_v39  ;;  %v4143_v50 = vor.u32 %v4142_v11, %v4139_v54  ;;  %v9924_v20 = vcombine.low %v8956_v60, %v8978_v10 }
 0x132   : > { %v1181_v45 = vpop.f32.mrf.mxu1  ;;  %v4101_v39 = vsel %vm7145_vm2, %v9152_v17, %v9122_v40  ;;  %v4111_v49 = vsel %vm7145_vm2, %v4106_v31, %v9132_v47  ;;  %v9202_v16 = vsel %vm7456_vm5, %v4692_v2, %v4693_v28  ;;  %v4156_v61 = vshll.u32 %v9175_v35, 16  ;;  %v1647_v60 = vpop.f32.mrf.mxu0  ;;  %v5967_v17 = vld [vmem:[%s7114_s29 + $0xb4] sm:$0xf]  ;;  %v9925_v47 = vld [vmem:[#allocation18_spill] sm:$0xff]  ;;  %v9231_v2 = vld [vmem:[%s7114_s29 + $0xb8] sm:$0xf] }
 0x133   : > { %6876 = vmatmul.mubr.bf16.gmra.mxu0 %v9923_v58  ;;  %v9206_v53 = vadd.f32 %v6586_v8, %v1190_v5  ;;  %v1182_v10 = vadd.f32 %v1181_v45, %v8851_v46  ;;  %v4153_v9 = vor.u32 %v4152_v33, %v9177_v48  ;;  %v4704_v40 = vrot.slane %v9141_v14, 5  ;;  %v9926_v8 = vld [vmem:[#allocation13_spill] sm:$0xff] }
 0x134   : > { %6879 = vmatprep.mubr.bf16.mxu0 %v9924_v20  ;;  %v6541_v23 = vpop.f32.mrf.mxu1  ;;  %6828 = vmatmul.mubr.bf16.gmra.mxu1 %v9925_v47  ;;  %v4125_v31 = vsel %vm7145_vm2, %v4120_v57, %v9138_v44  ;;  %v4135_v28 = vsel %vm7145_vm2, %v4130_v25, %v4134_v18  ;;  %v9220_v46 = vsel %vm7456_vm5, %v6043_v29, %v4697_v12  ;;  %v6590_v11 = vpop.f32.mrf.mxu0  ;;  %v4144_v62 = vrot.slane %v4143_v50, 4  ;;  %v9927_v57 = vld [vmem:[#allocation15_spill] sm:$0xff]  ;;  %v9931_v47 = vld [vmem:[#allocation20_spill] sm:$0xff] }
 0x135   : > { %v9224_v0 = vsel %vm7456_vm5, %v4699_v59, %v4700_v37  ;;  %v9226_v14 = vadd.f32 %v1634_v3, %v1182_v10  ;;  %v1203_v54 = vadd.f32 %v6541_v23, %v9926_v8  ;;  %6831 = vmatprep.mubr.bf16.mxu1 %v9060_v42  ;;  %v6044_v44 = vrot.slane %v6028_v21, 9 }
 0x136   : > { %v1194_v18 = vpop.f32.mrf.mxu1  ;;  %v4158_v6 = vrot.slane %v4156_v61, 5  ;;  %v4707_v12 = vrot.slane %v9175_v35, 5  ;;  %v4161_v29 = vshrl.u32 %v5967_v17, 16  ;;  %v4164_v33 = vshll.u32 %v5967_v17, 16  ;;  %v1650_v25 = vpop.f32.mrf.mxu0 }
 0x137   : > { %v9234_v7 = vadd.f32 %v6589_v38, %v1203_v54  ;;  %v1195_v3 = vadd.f32 %v1194_v18, %v9927_v57  ;;  %v4154_v59 = vrot.slane %v4153_v9, 4  ;;  %v4706_v37 = vrot.slane %v4704_v40, 4  ;;  %v9928_v38 = vld [vmem:[#allocation17_spill] sm:$0xff] }
 0x138   : > { %v6542_v42 = vpop.f32.mrf.mxu1  ;;  %v9237_v5 = vcombine.low %v4101_v39, %v4111_v49  ;;  %v6074_v58 = vcombine.low %v9188_v63, %v9202_v16  ;;  %v9241_v50 = vcombine.low %v4125_v31, %v4135_v28  ;;  %v4170_v35 = vshll.u32 %v9231_v2, 16  ;;  %v6593_v61 = vpop.f32.mrf.mxu0  ;;  %v5970_v49 = vld [vmem:[%s7114_s29 + $0xc0] sm:$0xf]  ;;  %v9255_v16 = vld [vmem:[%s7114_s29 + $0xc4] sm:$0xf] }
 0x139   : > { %v9244_v45 = vadd.f32 %v1647_v60, %v1195_v3  ;;  %v1206_v20 = vadd.f32 %v6542_v42, %v9928_v38  ;;  %v9929_v21 = vcombine.low %v9018_v51, %v9039_v55  ;;  %v6075_v39 = vcombine.low %v9220_v46, %v9224_v0  ;;  %v9936_v46 = vld [vmem:[#allocation6_spill] sm:$0xff] }
 0x13a   : > { %v4174_v63 = vshrl.u32 %v9231_v2, 16  ;;  %v1197_v10 = vpop.f32.mrf.mxu1  ;;  %v9930_v60 = vcombine.low %v9068_v13, %v9083_v30  ;;  %v4149_v51 = vsel %vm7145_vm2, %v4144_v62, %v9177_v48  ;;  %v9265_v55 = vsel %vm7456_vm5, %v6044_v44, %v4704_v40  ;;  %v1663_v28 = vpop.f32.mrf.mxu0  ;;  %v9277_v30 = vld [vmem:[%s7114_s29 + $0xbc] sm:$0x1]  ;;  %v6029_v48 = vld [vmem:[%s7114_s29 + $0xb4] sm:$0xe] }
 0x13b   : > { %6880 = vmatmul.mubr.bf16.gmra.mxu0 %v9929_v21  ;;  %v4163_v9 = vrot.slane %v4161_v29, 4  ;;  %v4166_v17 = vrot.slane %v4164_v33, 5  ;;  %v9267_v23 = vadd.f32 %v6590_v11, %v1206_v20  ;;  %v1198_v31 = vadd.f32 %v1197_v10, %v9931_v47  ;;  %v9299_v20 = vld [vmem:[%s7114_s29 + $0xc8] sm:$0x1] }
 0x13c   : > { %6883 = vmatprep.mubr.bf16.mxu0 %v9930_v60  ;;  %v4159_v8 = vsel %vm7145_vm2, %v4154_v59, %v4158_v6  ;;  %v9274_v13 = vsel %vm7456_vm5, %v4706_v37, %v4707_v12  ;;  %v6545_v54 = vpop.f32.mrf.mxu1  ;;  %6832 = vmatmul.mubr.bf16.gmra.mxu1 %v9062_v52  ;;  %v9281_v40 = vrot.slane %v4170_v35, 5  ;;  %v4185_v11 = vshrl.u32 %v5970_v49, 16  ;;  %v6594_v29 = vpop.f32.mrf.mxu0 }
 0x13d   : > { %v4188_v62 = vshll.u32 %v5970_v49, 16  ;;  %v4194_v44 = vshll.u32 %v9255_v16, 16  ;;  %v9284_v18 = vadd.f32 %v1650_v25, %v1198_v31  ;;  %v1219_v6 = vadd.f32 %v6545_v54, %v9002_v43  ;;  %6835 = vmatprep.mubr.bf16.mxu1 %v9118_v22 }
 0x13e   : > { %v4176_v12 = vrot.slane %v4174_v63, 4  ;;  %v4198_v33 = vshrl.u32 %v9255_v16, 16  ;;  %v1210_v57 = vpop.f32.mrf.mxu1  ;;  %v4167_v3 = vor.u32 %v4166_v17, %v4163_v9  ;;  %v4180_v52 = vshll.u32 %v9277_v30, 16  ;;  %v1666_v43 = vpop.f32.mrf.mxu0  ;;  %v5973_v9 = vld [vmem:[%s7114_s29 + $0xcc] sm:$0xf] }
 0x13f   : > { %v6045_v59 = vrot.slane %v6029_v48, 9  ;;  %v4711_v37 = vrot.slane %v9231_v2, 5  ;;  %v9291_v42 = vadd.f32 %v6593_v61, %v1219_v6  ;;  %v1211_v25 = vadd.f32 %v1210_v57, %v9021_v1  ;;  %v6030_v48 = vld [vmem:[%s7114_s29 + $0xc0] sm:$0xe] }
 0x140   : > { %v9294_v35 = vcombine.low %v4149_v51, %v4159_v8  ;;  %v6076_v22 = vcombine.low %v9265_v55, %v9274_v13  ;;  %v6546_v38 = vpop.f32.mrf.mxu1  ;;  %v4187_v21 = vrot.slane %v4185_v11, 4  ;;  %v4190_v63 = vrot.slane %v4188_v62, 5  ;;  %v6597_v10 = vpop.f32.mrf.mxu0  ;;  %v9321_v8 = vld [vmem:[%s7114_s29 + $0xd0] sm:$0xf] }
 0x141   : > { %v9301_v49 = vrot.slane %v4194_v44, 5  ;;  %v4200_v2 = vrot.slane %v4198_v33, 4  ;;  %v9303_v61 = vadd.f32 %v1663_v28, %v1211_v25  ;;  %v1222_v1 = vadd.f32 %v6546_v38, %v9041_v26 }
 0x142   : > { %v9932_v60 = vcombine.low %v9097_v19, %v9107_v36  ;;  %v4177_v51 = vor.u32 %v4176_v12, %v9281_v40  ;;  %v4714_v55 = vrot.slane %v9277_v30, 5  ;;  %v1213_v17 = vpop.f32.mrf.mxu1  ;;  %v9312_v47 = vrot.slane %v4167_v3, 4  ;;  %v1679_v13 = vpop.f32.mrf.mxu0 }
 0x143   : > { %v9314_v31 = vrot.slane %v4180_v52, 5  ;;  %v9318_v26 = vsel %vm7456_vm5, %v6045_v59, %v4711_v37  ;;  %v4713_v28 = vrot.slane %v4711_v37, 4  ;;  %v9323_v19 = vadd.f32 %v6594_v29, %v1222_v1  ;;  %v9933_v29 = vld [vmem:[#allocation2_spill] sm:$0xff] }
 0x144   : > { %6884 = vmatmul.mubr.bf16.gmra.mxu0 %v9932_v60  ;;  %v1214_v36 = vadd.f32 %v1213_v17, %v9050_v34  ;;  %v4204_v30 = vshll.u32 %v9299_v20, 16  ;;  %v6549_v54 = vpop.f32.mrf.mxu1  ;;  %6836 = vmatmul.mubr.bf16.gmra.mxu1 %v9124_v4  ;;  %v4191_v11 = vor.u32 %v4190_v63, %v4187_v21  ;;  %v4201_v62 = vor.u32 %v4200_v2, %v9301_v49  ;;  %v6598_v57 = vpop.f32.mrf.mxu0 }
 0x145   : > { %6887 = vmatprep.mubr.bf16.mxu0 %v6074_v58  ;;  %v4718_v58 = vrot.slane %v9255_v16, 5  ;;  %v4209_v44 = vshrl.u32 %v5973_v9, 16  ;;  %v4212_v6 = vshll.u32 %v5973_v9, 16  ;;  %v1235_v33 = vadd.f32 %v6549_v54, %v9933_v29  ;;  %6839 = vmatprep.mubr.bf16.mxu1 %v9237_v5 }
 0x146   : > { %v9331_v12 = vadd.f32 %v1666_v43, %v1214_v36  ;;  %v4218_v34 = vshll.u32 %v9321_v8, 16  ;;  %v4222_v3 = vshrl.u32 %v9321_v8, 16  ;;  %v1226_v16 = vpop.f32.mrf.mxu1  ;;  %v4178_v52 = vrot.slane %v4177_v51, 4  ;;  %v9934_v43 = vld [vmem:[#allocation5_spill] sm:$0xff]  ;;  %v1682_v21 = vpop.f32.mrf.mxu0  ;;  %v9935_v36 = vld [vmem:[#allocation4_spill] sm:$0xff] }
 0x147   : > { %v4715_v4 = vsel %vm7456_vm5, %v4713_v28, %v4714_v55  ;;  %v6046_v59 = vrot.slane %v6030_v48, 9  ;;  %v4721_v37 = vrot.slane %v9299_v20, 5  ;;  %v9340_v25 = vadd.f32 %v6597_v10, %v1235_v33  ;;  %v5975_v20 = vld [vmem:[%s7114_s29 + $0xd4] sm:$0x1] }
 0x148   : > { %v1227_v38 = vadd.f32 %v1226_v16, %v9934_v43  ;;  %v4206_v63 = vrot.slane %v4204_v30, 5  ;;  %v4720_v5 = vrot.slane %v4718_v58, 4  ;;  %v6550_v2 = vpop.f32.mrf.mxu1  ;;  %v4192_v1 = vrot.slane %v4191_v11, 4 }
 0x149   : > { %v4202_v60 = vrot.slane %v4201_v62, 4  ;;  %v4211_v9 = vrot.slane %v4209_v44, 4  ;;  %v4214_v17 = vrot.slane %v4212_v6, 5  ;;  %v1238_v55 = vadd.f32 %v6550_v2, %v9935_v36  ;;  %v6601_v28 = vpop.f32.mrf.mxu0  ;;  %v6031_v6 = vld [vmem:[%s7114_s29 + $0xcc] sm:$0xe] }
 0x14a   : > { %v9343_v51 = vadd.f32 %v1679_v13, %v1227_v38  ;;  %v9350_v10 = vrot.slane %v4218_v34, 5  ;;  %v4224_v30 = vrot.slane %v4222_v3, 4  ;;  %v1229_v48 = vpop.f32.mrf.mxu1  ;;  %v4173_v13 = vsel %vm7145_vm2, %v9312_v47, %v9281_v40 }
 0x14b   : > { %v4183_v54 = vsel %vm7145_vm2, %v4178_v52, %v9314_v31  ;;  %v4725_v11 = vrot.slane %v9321_v8, 5  ;;  %v9360_v62 = vadd.f32 %v6598_v57, %v1238_v55  ;;  %v1230_v0 = vadd.f32 %v1229_v48, %v9936_v46  ;;  %v9937_v57 = vld [vmem:[#allocation8_spill] sm:$0xff] }
 0x14c   : > { %6888 = vmatmul.mubr.bf16.gmra.mxu0 %v6075_v39  ;;  %v1695_v39 = vpop.f32.mrf.mxu0  ;;  %v4719_v44 = vsel %vm7456_vm5, %v6046_v59, %v4718_v58  ;;  %v6553_v29 = vpop.f32.mrf.mxu1  ;;  %6840 = vmatmul.mubr.bf16.gmra.mxu1 %v9241_v50  ;;  %v6077_v40 = vcombine.low %v9318_v26, %v4715_v4  ;;  %v4197_v47 = vsel %vm7145_vm2, %v4192_v1, %v9301_v49  ;;  %v4228_v8 = vshll.u32 %v5975_v20, 16  ;;  %v9940_v48 = vld [vmem:[#allocation12_spill] sm:$0xff] }
 0x14d   : > { %6891 = vmatprep.mubr.bf16.mxu0 %v6076_v22  ;;  %v4722_v22 = vsel %vm7456_vm5, %v4720_v5, %v4721_v37  ;;  %v4215_v31 = vor.u32 %v4214_v17, %v4211_v9  ;;  %v9373_v33 = vadd.f32 %v1682_v21, %v1230_v0  ;;  %v1251_v34 = vadd.f32 %v6553_v29, %v9937_v57  ;;  %v9938_v37 = vld [vmem:[#allocation10_spill] sm:$0xff]  ;;  %v9939_v9 = vld [vmem:[#allocation11_spill] sm:$0xff] }
 0x14e   : > { %v6602_v58 = vpop.f32.mrf.mxu0  ;;  %6843 = vmatprep.mubr.bf16.mxu1 %v9294_v35  ;;  %v4207_v3 = vsel %vm7145_vm2, %v4202_v60, %v4206_v63  ;;  %v4225_v50 = vor.u32 %v4224_v30, %v9350_v10  ;;  %v1242_v16 = vpop.f32.mrf.mxu1  ;;  %v6078_v26 = vcombine.low %v4719_v44, %v4722_v22  ;;  %v6047_v52 = vrot.slane %v6031_v6, 9  ;;  %v9941_v44 = vld [vmem:[#allocation14_spill] sm:$0xff] }
 0x14f   : > { %v4727_v4 = vrot.slane %v4725_v11, 4  ;;  %v4728_v59 = vrot.slane %v5975_v20, 5  ;;  %v9380_v49 = vadd.f32 %v6601_v28, %v1251_v34  ;;  %v1243_v43 = vadd.f32 %v1242_v16, %v9938_v37  ;;  %v9944_v37 = vld [vmem:[#allocation21_spill] sm:$0xff] }
 0x150   : > { %v1698_v38 = vpop.f32.mrf.mxu0  ;;  %v6554_v21 = vpop.f32.mrf.mxu1  ;;  %v6005_v5 = vcombine.low %v4173_v13, %v4183_v54  ;;  %v6006_v2 = vcombine.low %v4197_v47, %v4207_v3  ;;  %v4216_v1 = vrot.slane %v4215_v31, 4  ;;  %v4226_v17 = vrot.slane %v4225_v50, 4  ;;  %v9942_v47 = vld [vmem:[#allocation16_spill] sm:$0xff] }
 0x151   : > { %v9383_v35 = vadd.f32 %v1695_v39, %v1243_v43  ;;  %v1254_v63 = vadd.f32 %v6554_v21, %v9939_v9  ;;  %v4230_v36 = vrot.slane %v4228_v8, 5  ;;  %v4726_v28 = vsel %vm7456_vm5, %v6047_v52, %v4725_v11 }
 0x152   : > { %v6605_v60 = vpop.f32.mrf.mxu0  ;;  %v1245_v55 = vpop.f32.mrf.mxu1  ;;  %v4729_v20 = vsel %vm7456_vm5, %v4727_v4, %v4728_v59  ;;  %v4221_v0 = vsel %vm7145_vm2, %v4216_v1, %v9350_v10  ;;  %v9943_v10 = vld [vmem:[#allocation19_spill] sm:$0xff] }
 0x153   : > { %v9390_v30 = vadd.f32 %v6602_v58, %v1254_v63  ;;  %v1246_v13 = vadd.f32 %v1245_v55, %v9940_v48  ;;  %v4231_v56 = vsel %vm7145_vm2, %v4226_v17, %v4230_v36  ;;  %v6079_v11 = vcombine.low %v4726_v28, %v4729_v20  ;;  %v9946_v17 = vld [vmem:[#allocation23_spill] sm:$0xff]  ;;  %v9947_v20 = vld [vmem:[#allocation24_spill] sm:$0xff] }
 0x154   : > { %6892 = vmatmul.mubr.bf16.gmra.mxu0 %v6077_v40  ;;  %v1711_v54 = vpop.f32.mrf.mxu0  ;;  %v6557_v46 = vpop.f32.mrf.mxu1  ;;  %6844 = vmatmul.mubr.bf16.gmra.mxu1 %v6005_v5  ;;  %v6007_v34 = vcombine.low %v4221_v0, %v4231_v56  ;;  %v9948_v0 = vld [vmem:[#allocation25_spill] sm:$0xff] }
 0x155   : > { %6895 = vmatprep.mubr.bf16.mxu0 %v6078_v26  ;;  %v9396_v39 = vadd.f32 %v1698_v38, %v1246_v13  ;;  %v1267_v22 = vadd.f32 %v6557_v46, %v9941_v44  ;;  %6847 = vmatprep.mubr.bf16.mxu1 %v6006_v2  ;;  %v9945_v2 = vld [vmem:[#allocation22_spill] sm:$0xff] }
 0x156   : > { %v6606_v6 = vpop.f32.mrf.mxu0  ;;  %v1258_v29 = vpop.f32.mrf.mxu1 }
 0x157   : > { %v9401_v40 = vadd.f32 %v6605_v60, %v1267_v22  ;;  %v1259_v31 = vadd.f32 %v1258_v29, %v9942_v47 }
 0x158   : > { %v1714_v8 = vpop.f32.mrf.mxu0  ;;  %v6558_v57 = vpop.f32.mrf.mxu1 }
 0x159   : > { %v9404_v58 = vadd.f32 %v1711_v54, %v1259_v31  ;;  %v1270_v3 = vadd.f32 %v6558_v57, %v9943_v10  ;;  %v9950_v57 = vld [vmem:[#allocation27_spill] sm:$0xff] }
 0x15a   : > { %v6609_v50 = vpop.f32.mrf.mxu0  ;;  %v1261_v16 = vpop.f32.mrf.mxu1 }
 0x15b   : > { %v9407_v26 = vadd.f32 %v6606_v6, %v1270_v3  ;;  %v1262_v27 = vadd.f32 %v1261_v16, %v8997_v32 }
 0x15c   : > { %6896 = vmatmul.mubr.bf16.gmra.mxu0 %v6079_v11  ;;  %v1727_v52 = vpop.f32.mrf.mxu0  ;;  %v6561_v4 = vpop.f32.mrf.mxu1  ;;  %6848 = vmatmul.mubr.bf16.gmra.mxu1 %v6007_v34  ;;  %v9949_v11 = vld [vmem:[#allocation26_spill] sm:$0xff] }
 0x15d   : > { %v9410_v59 = vadd.f32 %v1714_v8, %v1262_v27  ;;  %v1283_v43 = vadd.f32 %v6561_v4, %v9944_v37 }
 0x15e   : > { %v6610_v38 = vpop.f32.mrf.mxu0  ;;  %v1274_v21 = vpop.f32.mrf.mxu1 }
 0x15f   : > { %v9413_v5 = vadd.f32 %v6609_v50, %v1283_v43  ;;  %v1275_v1 = vadd.f32 %v1274_v21, %v9945_v2 }
 0x160   : > { %v1730_v9 = vpop.f32.mrf.mxu0  ;;  %v6562_v63 = vpop.f32.mrf.mxu1 }
 0x161   : > { %v9416_v60 = vadd.f32 %v1727_v52, %v1275_v1  ;;  %v1286_v36 = vadd.f32 %v6562_v63, %v9946_v17 }
 0x162   : > { %v6677_v32 = vpop.f32.mrf.mxu0  ;;  %v1277_v55 = vpop.f32.mrf.mxu1 }
 0x163   : > { %v9419_v28 = vadd.f32 %v6610_v38, %v1286_v36  ;;  %v1278_v48 = vadd.f32 %v1277_v55, %v9947_v20 }
 0x164   : > { %v2756_v13 = vpop.f32.mrf.mxu0  ;;  %v6629_v54 = vpop.f32.mrf.mxu1 }
 0x165   : > { %v9422_v46 = vadd.f32 %v1730_v9, %v1278_v48  ;;  %v2131_v44 = vadd.f32 %v6629_v54, %v9948_v0 }
 0x166   : > { %v6678_v22 = vpop.f32.mrf.mxu0  ;;  %v2002_v6 = vpop.f32.mrf.mxu1 }
 0x167   : > { %v9425_v56 = vadd.f32 %v6677_v32, %v2131_v44  ;;  %v2129_v29 = vadd.f32 %v2002_v6, %v9949_v11 }
 0x168   : > { %v2759_v47 = vpop.f32.mrf.mxu0  ;;  %v6630_v31 = vpop.f32.mrf.mxu1 }
 0x169   : > { %v9428_v8 = vadd.f32 %v2756_v13, %v2129_v29  ;;  %v2132_v34 = vadd.f32 %v6630_v31, %v9950_v57 }
 0x16a   : > { %v6681_v10 = vpop.f32.mrf.mxu0  ;;  %v2005_v3 = vpop.f32.mrf.mxu1 }
 0x16b   : > { %v9431_v50 = vadd.f32 %v6678_v22, %v2132_v34  ;;  %v2130_v16 = vadd.f32 %v2005_v3, %v9167_v24 }
 0x16c   : > { %v2772_v27 = vpop.f32.mrf.mxu0  ;;  %v6633_v52 = vpop.f32.mrf.mxu1 }
 0x16d   : > { %v9434_v4 = vadd.f32 %v2759_v47, %v2130_v16  ;;  %v2135_v37 = vadd.f32 %v6633_v52, %v9171_v41 }
 0x16e   : > { %v6682_v43 = vpop.f32.mrf.mxu0  ;;  %v2018_v38 = vpop.f32.mrf.mxu1 }
 0x16f   : > { %v9437_v21 = vadd.f32 %v6681_v10, %v2135_v37  ;;  %v2133_v2 = vadd.f32 %v2018_v38, %v9180_v15 }
 0x170   : > { %v2775_v1 = vpop.f32.mrf.mxu0  ;;  %v6634_v9 = vpop.f32.mrf.mxu1 }
 0x171   : > { %v9440_v63 = vadd.f32 %v2772_v27, %v2133_v2  ;;  %v2136_v17 = vadd.f32 %v6634_v9, %v9206_v53 }
 0x172   : > { %v6685_v36 = vpop.f32.mrf.mxu0  ;;  %v2021_v24 = vpop.f32.mrf.mxu1 }
 0x173   : > { %v9443_v32 = vadd.f32 %v6682_v43, %v2136_v17  ;;  %v2134_v55 = vadd.f32 %v2021_v24, %v9226_v14 }
 0x174   : > { %v2788_v20 = vpop.f32.mrf.mxu0  ;;  %v6637_v41 = vpop.f32.mrf.mxu1 }
 0x175   : > { %v9446_v48 = vadd.f32 %v2775_v1, %v2134_v55  ;;  %v2139_v13 = vadd.f32 %v6637_v41, %v9234_v7 }
 0x176   : > { %v6686_v54 = vpop.f32.mrf.mxu0  ;;  %v2034_v15 = vpop.f32.mrf.mxu1 }
 0x177   : > { %v9449_v0 = vadd.f32 %v6685_v36, %v2139_v13  ;;  %v2137_v44 = vadd.f32 %v2034_v15, %v9244_v45 }
 0x178   : > { %v2791_v22 = vpop.f32.mrf.mxu0  ;;  %v6638_v53 = vpop.f32.mrf.mxu1 }
 0x179   : > { %v9452_v6 = vadd.f32 %v2788_v20, %v2137_v44  ;;  %v2140_v11 = vadd.f32 %v6638_v53, %v9267_v23 }
 0x17a   : > { %v6689_v29 = vpop.f32.mrf.mxu0  ;;  %v2037_v14 = vpop.f32.mrf.mxu1 }
 0x17b   : > { %v9455_v47 = vadd.f32 %v6686_v54, %v2140_v11  ;;  %v2138_v31 = vadd.f32 %v2037_v14, %v9284_v18 }
 0x17c   : > { %v2804_v57 = vpop.f32.mrf.mxu0  ;;  %v6641_v7 = vpop.f32.mrf.mxu1 }
 0x17d   : > { %v9458_v34 = vadd.f32 %v2791_v22, %v2138_v31  ;;  %v2143_v10 = vadd.f32 %v6641_v7, %v9291_v42 }
 0x17e   : > { %v6690_v3 = vpop.f32.mrf.mxu0  ;;  %v2050_v45 = vpop.f32.mrf.mxu1 }
 0x17f   : > { %v9461_v16 = vadd.f32 %v6689_v29, %v2143_v10  ;;  %v2141_v27 = vadd.f32 %v2050_v45, %v9303_v61 }
 0x180   : > { %v2807_v52 = vpop.f32.mrf.mxu0  ;;  %v6642_v23 = vpop.f32.mrf.mxu1 }
 0x181   : > { %v9464_v37 = vadd.f32 %v2804_v57, %v2141_v27  ;;  %v2144_v43 = vadd.f32 %v6642_v23, %v9323_v19 }
 0x182   : > { %v6693_v38 = vpop.f32.mrf.mxu0  ;;  %v2053_v18 = vpop.f32.mrf.mxu1 }
 0x183   : > { %v9467_v2 = vadd.f32 %v6690_v3, %v2144_v43  ;;  %v2142_v1 = vadd.f32 %v2053_v18, %v9331_v12 }
 0x184   : > { %v2820_v9 = vpop.f32.mrf.mxu0  ;;  %v6645_v42 = vpop.f32.mrf.mxu1 }
 0x185   : > { %v9470_v17 = vadd.f32 %v2807_v52, %v2142_v1  ;;  %v2147_v36 = vadd.f32 %v6645_v42, %v9340_v25 }
 0x186   : > { %v6694_v24 = vpop.f32.mrf.mxu0  ;;  %v2066_v61 = vpop.f32.mrf.mxu1 }
 0x187   : > { %v9473_v55 = vadd.f32 %v6693_v38, %v2147_v36  ;;  %v2145_v20 = vadd.f32 %v2066_v61, %v9343_v51 }
 0x188   : > { %v2823_v41 = vpop.f32.mrf.mxu0  ;;  %v6646_v19 = vpop.f32.mrf.mxu1 }
 0x189   : > { %v9476_v13 = vadd.f32 %v2820_v9, %v2145_v20  ;;  %v2148_v54 = vadd.f32 %v6646_v19, %v9360_v62 }
 0x18a   : > { %v6697_v15 = vpop.f32.mrf.mxu0  ;;  %v2069_v12 = vpop.f32.mrf.mxu1 }
 0x18b   : > { %v9479_v44 = vadd.f32 %v6694_v24, %v2148_v54  ;;  %v2146_v22 = vadd.f32 %v2069_v12, %v9373_v33 }
 0x18c   : > { %v2836_v53 = vpop.f32.mrf.mxu0  ;;  %v6649_v25 = vpop.f32.mrf.mxu1 }
 0x18d   : > { %v9482_v11 = vadd.f32 %v2823_v41, %v2146_v22  ;;  %v2151_v29 = vadd.f32 %v6649_v25, %v9380_v49 }
 0x18e   : > { %v6698_v14 = vpop.f32.mrf.mxu0  ;;  %v2082_v51 = vpop.f32.mrf.mxu1 }
 0x18f   : > { %v9485_v31 = vadd.f32 %v6697_v15, %v2151_v29  ;;  %v2149_v57 = vadd.f32 %v2082_v51, %v9383_v35 }
 0x190   : > { %v2839_v7 = vpop.f32.mrf.mxu0  ;;  %v6650_v62 = vpop.f32.mrf.mxu1 }
 0x191   : > { %v9488_v10 = vadd.f32 %v2836_v53, %v2149_v57  ;;  %v2152_v3 = vadd.f32 %v6650_v62, %v9390_v30 }
 0x192   : > { %v6701_v45 = vpop.f32.mrf.mxu0  ;;  %v2085_v33 = vpop.f32.mrf.mxu1 }
 0x193   : > { %v9491_v27 = vadd.f32 %v6698_v14, %v2152_v3  ;;  %v2150_v52 = vadd.f32 %v2085_v33, %v9396_v39 }
 0x194   : > { %v2852_v23 = vpop.f32.mrf.mxu0  ;;  %v6653_v49 = vpop.f32.mrf.mxu1 }
 0x195   : > { %v9494_v43 = vadd.f32 %v2839_v7, %v2150_v52  ;;  %v2155_v38 = vadd.f32 %v6653_v49, %v9401_v40 }
 0x196   : > { %v6702_v18 = vpop.f32.mrf.mxu0  ;;  %v2098_v35 = vpop.f32.mrf.mxu1 }
 0x197   : > { %v9497_v1 = vadd.f32 %v6701_v45, %v2155_v38  ;;  %v2153_v9 = vadd.f32 %v2098_v35, %v9404_v58 }
 0x198   : > { %v2855_v42 = vpop.f32.mrf.mxu0  ;;  %v6654_v30 = vpop.f32.mrf.mxu1 }
 0x199   : > { %v9500_v36 = vadd.f32 %v2852_v23, %v2153_v9  ;;  %v2156_v24 = vadd.f32 %v6654_v30, %v9407_v26 }
 0x19a   : > { %v6705_v61 = vpop.f32.mrf.mxu0  ;;  %v2101_v39 = vpop.f32.mrf.mxu1 }
 0x19b   : > { %v9503_v20 = vadd.f32 %v6702_v18, %v2156_v24  ;;  %v2154_v41 = vadd.f32 %v2101_v39, %v9410_v59 }
 0x19c   : > { %v2868_v19 = vpop.f32.mrf.mxu0  ;;  %v6657_v40 = vpop.f32.mrf.mxu1 }
 0x19d   : > { %9951 = vst [vmem:[#allocation3_spill] sm:$0xff] %v9503_v20  ;;  %v9506_v54 = vadd.f32 %v2855_v42, %v2154_v41  ;;  %v2159_v15 = vadd.f32 %v6657_v40, %v9413_v5 }
 0x19e   : > { %v6706_v12 = vpop.f32.mrf.mxu0  ;;  %v2114_v58 = vpop.f32.mrf.mxu1 }
 0x19f   : > { %9952 = vst [vmem:[#allocation7_spill] sm:$0xff] %v9506_v54  ;;  %v9509_v22 = vadd.f32 %v6705_v61, %v2159_v15  ;;  %v2157_v53 = vadd.f32 %v2114_v58, %v9416_v60 }
 0x1a0   : > { %v2871_v25 = vpop.f32.mrf.mxu0  ;;  %v6658_v26 = vpop.f32.mrf.mxu1 }
 0x1a1   : > { %v9512_v29 = vadd.f32 %v2868_v19, %v2157_v53  ;;  %v2160_v14 = vadd.f32 %v6658_v26, %v9419_v28 }
 0x1a2   : > { %v6773_v51 = vpop.f32.mrf.mxu0  ;;  %v2117_v59 = vpop.f32.mrf.mxu1 }
 0x1a3   : > { %v9515_v57 = vadd.f32 %v6706_v12, %v2160_v14  ;;  %v2158_v7 = vadd.f32 %v2117_v59, %v9422_v46 }
 0x1a4   : > { %v3641_v62 = vpop.f32.mrf.mxu0  ;;  %v6725_v5 = vpop.f32.mrf.mxu1 }
 0x1a5   : > { %9953 = vst [vmem:[#allocation9_spill] sm:$0xff] %v9515_v57  ;;  %v9518_v3 = vadd.f32 %v2871_v25, %v2158_v7  ;;  %v3383_v45 = vadd.f32 %v6725_v5, %v9425_v56 }
 0x1a6   : > { %v9521_v33 = vpop.f32.mrf.mxu0  ;;  %v3254_v60 = vpop.f32.mrf.mxu1 }
 0x1a7   : > { %9954 = vst [vmem:[#allocation18_spill] sm:$0xff] %v9518_v3  ;;  %v9523_v52 = vadd.f32 %v6773_v51, %v3383_v45  ;;  %v3381_v23 = vadd.f32 %v3254_v60, %v9428_v8 }
 0x1a8   : > { %v9526_v28 = vpop.f32.mrf.mxu0  ;;  %v9528_v49 = vpop.f32.mrf.mxu1 }
 0x1a9   : > { %v9530_v38 = vadd.f32 %v3641_v62, %v3381_v23 }
 0x1aa   : > { %v6777_v46 = vpop.f32.mrf.mxu0  ;;  %v9532_v18 = vpop.f32.mrf.mxu1 }
 0x1ac   : > { %v3657_v35 = vpop.f32.mrf.mxu0  ;;  %v6729_v9 = vpop.f32.mrf.mxu1 }
 0x1ad   : > { %v3387_v56 = vadd.f32 %v6729_v9, %v9437_v21 }
 0x1ae   : > { %v9535_v42 = vpop.f32.mrf.mxu0  ;;  %v3270_v30 = vpop.f32.mrf.mxu1 }
 0x1af   : > { %v9537_v24 = vadd.f32 %v6777_v46, %v3387_v56  ;;  %v3385_v8 = vadd.f32 %v3270_v30, %v9440_v63 }
 0x1b0   : > { %v9540_v61 = vpop.f32.mrf.mxu0  ;;  %v9542_v39 = vpop.f32.mrf.mxu1 }
 0x1b1   : > { %v9544_v41 = vadd.f32 %v3657_v35, %v3385_v8 }
 0x1b2   : > { %v6781_v19 = vpop.f32.mrf.mxu0  ;;  %v9546_v40 = vpop.f32.mrf.mxu1 }
 0x1b4   : > { %v3673_v15 = vpop.f32.mrf.mxu0  ;;  %v6733_v12 = vpop.f32.mrf.mxu1 }
 0x1b5   : > { %v3391_v21 = vadd.f32 %v6733_v12, %v9449_v0 }
 0x1b6   : > { %v9549_v58 = vpop.f32.mrf.mxu0  ;;  %v3286_v53 = vpop.f32.mrf.mxu1 }
 0x1b7   : > { %v9551_v25 = vadd.f32 %v6781_v19, %v3391_v21  ;;  %v3389_v63 = vadd.f32 %v3286_v53, %v9452_v6 }
 0x1b8   : > { %v9554_v26 = vpop.f32.mrf.mxu0  ;;  %v9556_v14 = vpop.f32.mrf.mxu1 }
 0x1b9   : > { %v9558_v51 = vadd.f32 %v3673_v15, %v3389_v63 }
 0x1ba   : > { %v6785_v59 = vpop.f32.mrf.mxu0  ;;  %v9560_v7 = vpop.f32.mrf.mxu1 }
 0x1bc   : > { %v3689_v62 = vpop.f32.mrf.mxu0  ;;  %v6737_v5 = vpop.f32.mrf.mxu1 }
 0x1bd   : > { %v3395_v0 = vadd.f32 %v6737_v5, %v9461_v16 }
 0x1be   : > { %v9563_v45 = vpop.f32.mrf.mxu0  ;;  %v3302_v60 = vpop.f32.mrf.mxu1 }
 0x1bf   : > { %v9565_v23 = vadd.f32 %v6785_v59, %v3395_v0  ;;  %v3393_v6 = vadd.f32 %v3302_v60, %v9464_v37 }
 0x1c0   : > { %v9568_v46 = vpop.f32.mrf.mxu0  ;;  %v9570_v35 = vpop.f32.mrf.mxu1 }
 0x1c1   : > { %v9572_v9 = vadd.f32 %v3689_v62, %v3393_v6 }
 0x1c2   : > { %v6789_v56 = vpop.f32.mrf.mxu0  ;;  %v9574_v30 = vpop.f32.mrf.mxu1 }
 0x1c4   : > { %v3705_v8 = vpop.f32.mrf.mxu0  ;;  %v6741_v19 = vpop.f32.mrf.mxu1 }
 0x1c5   : > { %v3399_v16 = vadd.f32 %v6741_v19, %v9473_v55 }
 0x1c6   : > { %v9577_v15 = vpop.f32.mrf.mxu0  ;;  %v3318_v12 = vpop.f32.mrf.mxu1 }
 0x1c7   : > { %v9579_v21 = vadd.f32 %v6789_v56, %v3399_v16  ;;  %v3397_v37 = vadd.f32 %v3318_v12, %v9476_v13 }
 0x1c8   : > { %v9582_v53 = vpop.f32.mrf.mxu0  ;;  %v9584_v63 = vpop.f32.mrf.mxu1 }
 0x1c9   : > { %v9586_v59 = vadd.f32 %v3705_v8, %v3397_v37 }
 0x1ca   : > { %v6793_v62 = vpop.f32.mrf.mxu0  ;;  %v9588_v5 = vpop.f32.mrf.mxu1 }
 0x1cc   : > { %v3721_v0 = vpop.f32.mrf.mxu0  ;;  %v6745_v60 = vpop.f32.mrf.mxu1 }
 0x1cd   : > { %v3403_v55 = vadd.f32 %v6745_v60, %v9485_v31 }
 0x1ce   : > { %v9591_v6 = vpop.f32.mrf.mxu0  ;;  %v3334_v19 = vpop.f32.mrf.mxu1 }
 0x1cf   : > { %v9593_v56 = vadd.f32 %v6793_v62, %v3403_v55  ;;  %v3401_v13 = vadd.f32 %v3334_v19, %v9488_v10 }
 0x1d0   : > { %v9596_v16 = vpop.f32.mrf.mxu0  ;;  %v9598_v12 = vpop.f32.mrf.mxu1 }
 0x1d1   : > { %9955 = vst [vmem:[#allocation13_spill] sm:$0xff] %v9593_v56  ;;  %9956 = vst [vmem:[#allocation15_spill] sm:$0xff] %v9596_v16  ;;  %v9600_v8 = vadd.f32 %v3721_v0, %v3401_v13 }
 0x1d2   : > { %v6797_v37 = vpop.f32.mrf.mxu0  ;;  %v9602_v3 = vpop.f32.mrf.mxu1 }
 0x1d3   : > { %9957 = vst [vmem:[#allocation17_spill] sm:$0xff] %v9600_v8 }
 0x1d4   : > { %v3737_v57 = vpop.f32.mrf.mxu0  ;;  %v6749_v54 = vpop.f32.mrf.mxu1 }
 0x1d5   : > { %v3407_v31 = vadd.f32 %v6749_v54, %v9497_v1 }
 0x1d6   : > { %v9605_v60 = vpop.f32.mrf.mxu0  ;;  %v3350_v20 = vpop.f32.mrf.mxu1 }
 0x1d7   : > { %9958 = vst [vmem:[#allocation20_spill] sm:$0xff] %v9605_v60  ;;  %v9607_v62 = vadd.f32 %v6797_v37, %v3407_v31  ;;  %v3405_v10 = vadd.f32 %v3350_v20, %v9500_v36 }
 0x1d8   : > { %v9610_v55 = vpop.f32.mrf.mxu0  ;;  %v9612_v19 = vpop.f32.mrf.mxu1 }
 0x1d9   : > { %9959 = vst [vmem:[#allocation2_spill] sm:$0xff] %v9607_v62  ;;  %v9614_v0 = vadd.f32 %v3737_v57, %v3405_v10  ;;  %v3384_v62 = vadd.f32 %v9528_v49, %v9431_v50 }
 0x1da   : > { %v6801_v13 = vpop.f32.mrf.mxu0  ;;  %v9616_v16 = vpop.f32.mrf.mxu1 }
 0x1db   : > { %9960 = vst [vmem:[#allocation5_spill] sm:$0xff] %v9614_v0 }
 0x1dc   : > { %v3753_v8 = vpop.f32.mrf.mxu0  ;;  %v6753_v56 = vpop.f32.mrf.mxu1 }
 0x1dd   : > { %v3411_v1 = vadd.f32 %v6753_v56, %v9509_v22 }
 0x1de   : > { %v9619_v54 = vpop.f32.mrf.mxu0  ;;  %v3366_v60 = vpop.f32.mrf.mxu1 }
 0x1df   : > { %9961 = vst [vmem:[#allocation4_spill] sm:$0xff] %v9619_v54  ;;  %v9621_v37 = vadd.f32 %v6801_v13, %v3411_v1  ;;  %v3409_v36 = vadd.f32 %v3366_v60, %v9512_v29  ;;  %v3382_v13 = vadd.f32 %v9532_v18, %v9434_v4  ;;  %v3386_v54 = vadd.f32 %v9546_v40, %v9446_v48 }
 0x1e0   : > { %v9624_v20 = vpop.f32.mrf.mxu0  ;;  %v9626_v31 = vpop.f32.mrf.mxu1  ;;  %v3394_v48 = vadd.f32 %v9574_v30, %v9470_v17 }
 0x1e1   : > { %9962 = vst [vmem:[#allocation6_spill] sm:$0xff] %v9621_v37  ;;  %9963 = vst [vmem:[#allocation8_spill] sm:$0xff] %v9624_v20  ;;  %v9628_v57 = vadd.f32 %v3753_v8, %v3409_v36  ;;  %v3771_v20 = vadd.f32 %v9521_v33, %v3384_v62  ;;  %v3769_v49 = vadd.f32 %v9526_v28, %v3382_v13 }
 0x1e2   : > { %v9630_v0 = vpop.f32.mrf.mxu1  ;;  %v3392_v28 = vadd.f32 %v9556_v14, %v9455_v47 }
 0x1e3   : > { %9964 = vst [vmem:[#allocation10_spill] sm:$0xff] %v9628_v57  ;;  %v6869_v10 = vpop.f32.mrf.mxu0  ;;  %v9642_v57 = vld [vmem:[%s9786_s2] ss:$0 sm:$0xff] }
 0x1e4   : > { %v6821_v56 = vpop.f32.mrf.mxu1 }
 0x1e5   : > { %v4893_v22 = vpop.f32.mrf.mxu0  ;;  %v4524_v1 = vadd.f32 %v6821_v56, %v9523_v52  ;;  %v3388_v56 = vadd.f32 %v9542_v39, %v9443_v32  ;;  %v3396_v32 = vadd.f32 %v9570_v35, %v9467_v2 }
 0x1e6   : > { %v4395_v60 = vpop.f32.mrf.mxu1 }
 0x1e7   : > { %v6870_v29 = vpop.f32.mrf.mxu0  ;;  %v5022_v37 = vadd.f32 %v6869_v10, %v4524_v1  ;;  %v4522_v8 = vadd.f32 %v4395_v60, %v9530_v38  ;;  %v9674_v30 = vadd.f32 %v9563_v45, %v3396_v32 }
 0x1e8   : > { %v6822_v50 = vpop.f32.mrf.mxu1 }
 0x1e9   : > { %v4896_v36 = vpop.f32.mrf.mxu0  ;;  %v5020_v4 = vadd.f32 %v4893_v22, %v4522_v8  ;;  %v4525_v18 = vadd.f32 %v6822_v50, %v3771_v20  ;;  %v5061_v62 = vadd.f32 %v9642_v57, %v5022_v37  ;;  %v3390_v20 = vadd.f32 %v9560_v7, %v9458_v34 }
 0x1ea   : > { %v4398_v33 = vpop.f32.mrf.mxu1  ;;  %v3773_v50 = vadd.f32 %v9540_v61, %v3386_v54  ;;  %v9677_v61 = vadd.f32 %v9568_v46, %v3394_v48 }
 0x1eb   : > { %v6873_v52 = vpop.f32.mrf.mxu0  ;;  %v5059_v38 = vadd.f32 %v9642_v57, %v5020_v4  ;;  %v5023_v10 = vadd.f32 %v6870_v29, %v4525_v18  ;;  %v4523_v1 = vadd.f32 %v4398_v33, %v3769_v49  ;;  %v3775_v29 = vadd.f32 %v9535_v42, %v3388_v56 }
 0x1ec   : > { %v6825_v22 = vpop.f32.mrf.mxu1  ;;  %v5093_v8 = vmax.f32 %v5061_v62, 0.0  ;;  %v3777_v42 = vadd.f32 %v9554_v26, %v3390_v20 }
 0x1ed   : > { %v4909_v60 = vpop.f32.mrf.mxu0  ;;  %v5062_v39 = vadd.f32 %v9642_v57, %v5023_v10  ;;  %v5021_v37 = vadd.f32 %v4896_v36, %v4523_v1  ;;  %v5091_v40 = vmax.f32 %v5059_v38, 0.0  ;;  %v4528_v47 = vadd.f32 %v6825_v22, %v9537_v24 }
 0x1ee   : > { %v4411_v14 = vpop.f32.mrf.mxu1  ;;  %v3779_v36 = vadd.f32 %v9549_v58, %v3392_v28  ;;  %v3400_v58 = vadd.f32 %v9584_v63, %v9479_v44  ;;  %v5163_v10 = vmul.f32 %v5093_v8, %v5093_v8 }
 0x1ef   : > { %v6874_v13 = vpop.f32.mrf.mxu0  ;;  %v5094_v34 = vmax.f32 %v5062_v39, 0.0  ;;  %v5060_v7 = vadd.f32 %v9642_v57, %v5021_v37  ;;  %v4526_v2 = vadd.f32 %v4411_v14, %v9544_v41  ;;  %v5026_v17 = vadd.f32 %v6873_v52, %v4528_v47 }
 0x1f0   : > { %v6826_v24 = vpop.f32.mrf.mxu1  ;;  %v5161_v26 = vmul.f32 %v5091_v40, %v5091_v40  ;;  %v9687_v39 = vadd.f32 %v9577_v15, %v3400_v58  ;;  %v3398_v37 = vadd.f32 %v9588_v5, %v9482_v11 }
 0x1f1   : > { %v4912_v35 = vpop.f32.mrf.mxu0  ;;  %v6164_v49 = vpack.c.bf16 %v5094_v34, %v5093_v8  ;;  %v5092_v41 = vmax.f32 %v5060_v7, 0.0  ;;  %v5024_v4 = vadd.f32 %v4909_v60, %v4526_v2  ;;  %v4529_v54 = vadd.f32 %v6826_v24, %v3775_v29 }
 0x1f2   : > { %v4414_v56 = vpop.f32.mrf.mxu1  ;;  %v5065_v1 = vadd.f32 %v9642_v57, %v5026_v17 }
 0x1f3   : > { %v6877_v18 = vpop.f32.mrf.mxu0  ;;  %6236 = vst [vmem:[%s9671_s15 + $0x8] sm:$0xff] %v6164_v49   ;;  %v5123_v52 = vadd.f32 %v5092_v41, %v5091_v40  ;;  %v5162_v33 = vmul.f32 %v5092_v41, %v5092_v41  ;;  %v6159_v62 = vpack.c.bf16 %v5092_v41, %v5091_v40  ;;  %v5063_v45 = vadd.f32 %v9642_v57, %v5024_v4 }
 0x1f4   : > { %v5027_v60 = vadd.f32 %v6874_v13, %v4529_v54  ;;  %v4527_v46 = vadd.f32 %v4414_v56, %v3773_v50  ;;  %v6829_v28 = vpop.f32.mrf.mxu1  ;;  %v5164_v13 = vmul.f32 %v5094_v34, %v5094_v34  ;;  %v5097_v2 = vmax.f32 %v5065_v1, 0.0 }
 0x1f5   : > { %v4925_v38 = vpop.f32.mrf.mxu0  ;;  %v5124_v20 = vadd.f32 %v5123_v52, %v5093_v8  ;;  %v5193_v22 = vadd.f32 %v5162_v33, %v5161_v26  ;;  %6160 = vst [vmem:[%s9671_s15] sm:$0xff] %v6159_v62   ;;  %v5095_v44 = vmax.f32 %v5063_v45, 0.0  ;;  %v4532_v63 = vadd.f32 %v6829_v28, %v9551_v25 }
 0x1f6   : > { %v5066_v29 = vadd.f32 %v9642_v57, %v5027_v60  ;;  %v5025_v48 = vadd.f32 %v4912_v35, %v4527_v46  ;;  %v4427_v40 = vpop.f32.mrf.mxu1  ;;  %v3404_v26 = vadd.f32 %v9598_v12, %v9491_v27  ;;  %v5167_v1 = vmul.f32 %v5097_v2, %v5097_v2 }
 0x1f7   : > { %v6878_v32 = vpop.f32.mrf.mxu0  ;;  %v5194_v47 = vadd.f32 %v5193_v22, %v5163_v10  ;;  %v5125_v14 = vadd.f32 %v5124_v20, %v5094_v34  ;;  %v5030_v8 = vadd.f32 %v6877_v18, %v4532_v63  ;;  %v4530_v17 = vadd.f32 %v4427_v40, %v9558_v51 }
 0x1f8   : > { %v5098_v50 = vmax.f32 %v5066_v29, 0.0  ;;  %v5064_v25 = vadd.f32 %v9642_v57, %v5025_v48  ;;  %v6830_v15 = vpop.f32.mrf.mxu1  ;;  %v5165_v49 = vmul.f32 %v5095_v44, %v5095_v44  ;;  %v9705_v40 = vadd.f32 %v9582_v53, %v3398_v37 }
 0x1f9   : > { %v4928_v7 = vpop.f32.mrf.mxu0  ;;  %v5126_v24 = vadd.f32 %v5125_v14, %v5095_v44  ;;  %v5195_v11 = vadd.f32 %v5194_v47, %v5164_v13  ;;  %v4533_v5 = vadd.f32 %v6830_v15, %v3779_v36  ;;  %v5069_v58 = vadd.f32 %v9642_v57, %v5030_v8 }
 0x1fa   : > { %v6174_v35 = vpack.c.bf16 %v5098_v50, %v5097_v2  ;;  %v5096_v4 = vmax.f32 %v5064_v25, 0.0  ;;  %v5028_v34 = vadd.f32 %v4925_v38, %v4530_v17  ;;  %v4430_v18 = vpop.f32.mrf.mxu1  ;;  %v5168_v13 = vmul.f32 %v5098_v50, %v5098_v50 }
 0x1fb   : > { %v6881_v41 = vpop.f32.mrf.mxu0  ;;  %v5196_v54 = vadd.f32 %v5195_v11, %v5165_v49  ;;  %v5031_v56 = vadd.f32 %v6878_v32, %v4533_v5  ;;  %v4531_v51 = vadd.f32 %v4430_v18, %v3777_v42  ;;  %v5101_v20 = vmax.f32 %v5069_v58, 0.0 }
 0x1fc   : > { %6238 = vst [vmem:[%s9671_s15 + $0x18] sm:$0xff] %v6174_v35   ;;  %v5127_v33 = vadd.f32 %v5126_v24, %v5096_v4  ;;  %v5166_v62 = vmul.f32 %v5096_v4, %v5096_v4  ;;  %v6169_v45 = vpack.c.bf16 %v5096_v4, %v5095_v44  ;;  %v5067_v36 = vadd.f32 %v9642_v57, %v5028_v34  ;;  %v6833_v10 = vpop.f32.mrf.mxu1 }
 0x1fd   : > { %v4941_v52 = vpop.f32.mrf.mxu0  ;;  %v5070_v60 = vadd.f32 %v9642_v57, %v5031_v56  ;;  %v5029_v38 = vadd.f32 %v4928_v7, %v4531_v51  ;;  %v4536_v46 = vadd.f32 %v6833_v10, %v9565_v23  ;;  %v9708_v8 = vadd.f32 %v9591_v6, %v3404_v26 }
 0x1fe   : > { %v5128_v27 = vadd.f32 %v5127_v33, %v5097_v2  ;;  %v5197_v12 = vadd.f32 %v5196_v54, %v5166_v62  ;;  %6237 = vst [vmem:[%s9671_s15 + $0x10] sm:$0xff] %v6169_v45   ;;  %v5099_v42 = vmax.f32 %v5067_v36, 0.0  ;;  %v4443_v22 = vpop.f32.mrf.mxu1  ;;  %v9717_v18 = vadd.f32 %v9602_v3, %v9494_v43 }
 0x1ff   : > { %v6882_v28 = vpop.f32.mrf.mxu0  ;;  %v5102_v63 = vmax.f32 %v5070_v60, 0.0  ;;  %v5068_v32 = vadd.f32 %v9642_v57, %v5029_v38  ;;  %v5034_v44 = vadd.f32 %v6881_v41, %v4536_v46  ;;  %v4534_v29 = vadd.f32 %v4443_v22, %v9572_v9 }
 0x200   : > { %v5198_v23 = vadd.f32 %v5197_v12, %v5167_v1  ;;  %v5129_v47 = vadd.f32 %v5128_v27, %v5098_v50  ;;  %v6834_v14 = vpop.f32.mrf.mxu1  ;;  %v5169_v7 = vmul.f32 %v5099_v42, %v5099_v42 }
 0x201   : > { %v4944_v48 = vpop.f32.mrf.mxu0  ;;  %v6184_v2 = vpack.c.bf16 %v5102_v63, %v5101_v20  ;;  %v5100_v25 = vmax.f32 %v5068_v32, 0.0  ;;  %v5032_v49 = vadd.f32 %v4941_v52, %v4534_v29  ;;  %v4537_v9 = vadd.f32 %v6834_v14, %v9674_v30 }
 0x202   : > { %v5130_v15 = vadd.f32 %v5129_v47, %v5099_v42  ;;  %v5199_v24 = vadd.f32 %v5198_v23, %v5168_v13  ;;  %v4446_v11 = vpop.f32.mrf.mxu1  ;;  %v5073_v50 = vadd.f32 %v9642_v57, %v5034_v44  ;;  %v5171_v30 = vmul.f32 %v5101_v20, %v5101_v20 }
 0x203   : > { %6240 = vst [vmem:[%s9671_s15 + $0x28] sm:$0xff] %v6184_v2   ;;  %v5170_v53 = vmul.f32 %v5100_v25, %v5100_v25  ;;  %v6179_v37 = vpack.c.bf16 %v5100_v25, %v5099_v42  ;;  %v4535_v5 = vadd.f32 %v4446_v11, %v9677_v61  ;;  %v5071_v4 = vadd.f32 %v9642_v57, %v5032_v49 }
 0x204   : > { %v6885_v17 = vpop.f32.mrf.mxu0  ;;  %v5200_v41 = vadd.f32 %v5199_v24, %v5169_v7  ;;  %v5131_v35 = vadd.f32 %v5130_v15, %v5100_v25  ;;  %v5035_v58 = vadd.f32 %v6882_v28, %v4537_v9  ;;  %v6837_v34 = vpop.f32.mrf.mxu1  ;;  %v5172_v45 = vmul.f32 %v5102_v63, %v5102_v63  ;;  %v9967_v9 = vld [vmem:[#allocation13_spill] sm:$0xff] }
 0x205   : > { %6239 = vst [vmem:[%s9671_s15 + $0x20] sm:$0xff] %v6179_v37   ;;  %v5033_v26 = vadd.f32 %v4944_v48, %v4535_v5  ;;  %v4540_v54 = vadd.f32 %v6837_v34, %v9579_v21  ;;  %v5103_v61 = vmax.f32 %v5071_v4, 0.0  ;;  %v5105_v60 = vmax.f32 %v5073_v50, 0.0  ;;  %v9965_v21 = vld [vmem:[#allocation3_spill] sm:$0xff] }
 0x206   : > { %v4957_v6 = vpop.f32.mrf.mxu0  ;;  %v5132_v51 = vadd.f32 %v5131_v35, %v5101_v20  ;;  %v5201_v52 = vadd.f32 %v5200_v41, %v5170_v53  ;;  %v5074_v33 = vadd.f32 %v9642_v57, %v5035_v58  ;;  %v4459_v62 = vpop.f32.mrf.mxu1  ;;  %v3408_v27 = vadd.f32 %v9612_v19, %v9965_v21 }
 0x207   : > { %v5072_v36 = vadd.f32 %v9642_v57, %v5033_v26  ;;  %v5038_v10 = vadd.f32 %v6885_v17, %v4540_v54  ;;  %v4538_v1 = vadd.f32 %v4459_v62, %v9586_v59  ;;  %v5173_v44 = vmul.f32 %v5103_v61, %v5103_v61  ;;  %v9966_v17 = vld [vmem:[#allocation7_spill] sm:$0xff] }
 0x208   : > { %v6886_v56 = vpop.f32.mrf.mxu0  ;;  %v5202_v3 = vadd.f32 %v5201_v52, %v5171_v30  ;;  %v5133_v38 = vadd.f32 %v5132_v51, %v5102_v63  ;;  %v5106_v46 = vmax.f32 %v5074_v33, 0.0  ;;  %v6838_v28 = vpop.f32.mrf.mxu1  ;;  %v3406_v15 = vadd.f32 %v9616_v16, %v9966_v17  ;;  %v9969_v52 = vld [vmem:[#allocation15_spill] sm:$0xff]  ;;  %v9970_v33 = vld [vmem:[#allocation20_spill] sm:$0xff] }
 0x209   : > { %v5104_v12 = vmax.f32 %v5072_v36, 0.0  ;;  %v5036_v20 = vadd.f32 %v4957_v6, %v4538_v1  ;;  %v4541_v42 = vadd.f32 %v6838_v28, %v9687_v39  ;;  %v5077_v63 = vadd.f32 %v9642_v57, %v5038_v10 }
 0x20a   : > { %v4960_v43 = vpop.f32.mrf.mxu0  ;;  %v5134_v32 = vadd.f32 %v5133_v38, %v5103_v61  ;;  %v5203_v29 = vadd.f32 %v5202_v3, %v5172_v45  ;;  %v6194_v59 = vpack.c.bf16 %v5106_v46, %v5105_v60  ;;  %v4462_v48 = vpop.f32.mrf.mxu1  ;;  %v5175_v24 = vmul.f32 %v5105_v60, %v5105_v60 }
 0x20b   : > { %v5174_v13 = vmul.f32 %v5104_v12, %v5104_v12  ;;  %v6189_v23 = vpack.c.bf16 %v5104_v12, %v5103_v61  ;;  %v5075_v47 = vadd.f32 %v9642_v57, %v5036_v20  ;;  %v5039_v2 = vadd.f32 %v6886_v56, %v4541_v42 }
 0x20c   : > { %v6889_v22 = vpop.f32.mrf.mxu0  ;;  %v5204_v19 = vadd.f32 %v5203_v29, %v5173_v44  ;;  %6242 = vst [vmem:[%s9671_s15 + $0x38] sm:$0xff] %v6194_v59   ;;  %v5135_v7 = vadd.f32 %v5134_v32, %v5104_v12  ;;  %v4539_v39 = vadd.f32 %v4462_v48, %v9705_v40  ;;  %v6841_v25 = vpop.f32.mrf.mxu1  ;;  %v5176_v35 = vmul.f32 %v5106_v46, %v5106_v46  ;;  %v9968_v40 = vld [vmem:[#allocation17_spill] sm:$0xff] }
 0x20d   : > { %6241 = vst [vmem:[%s9671_s15 + $0x30] sm:$0xff] %v6189_v23   ;;  %v5107_v49 = vmax.f32 %v5075_v47, 0.0  ;;  %v4544_v11 = vadd.f32 %v6841_v25, %v9967_v9  ;;  %v5078_v5 = vadd.f32 %v9642_v57, %v5039_v2  ;;  %v5109_v4 = vmax.f32 %v5077_v63, 0.0  ;;  %v9972_v47 = vld [vmem:[#allocation2_spill] sm:$0xff] }
 0x20e   : > { %v4973_v14 = vpop.f32.mrf.mxu0  ;;  %v5136_v37 = vadd.f32 %v5135_v7, %v5105_v60  ;;  %v5205_v50 = vadd.f32 %v5204_v19, %v5174_v13  ;;  %v5037_v6 = vadd.f32 %v4960_v43, %v4539_v39  ;;  %v4475_v41 = vpop.f32.mrf.mxu1  ;;  %v3789_v61 = vadd.f32 %v9969_v52, %v9717_v18  ;;  %v9971_v18 = vld [vmem:[#allocation9_spill] sm:$0xff] }
 0x20f   : > { %v5042_v58 = vadd.f32 %v6889_v22, %v4544_v11  ;;  %v4542_v34 = vadd.f32 %v4475_v41, %v9968_v40  ;;  %v5110_v54 = vmax.f32 %v5078_v5, 0.0  ;;  %v3795_v62 = vadd.f32 %v9970_v33, %v3408_v27  ;;  %v9973_v39 = vld [vmem:[#allocation5_spill] sm:$0xff] }
 0x210   : > { %v6890_v53 = vpop.f32.mrf.mxu0  ;;  %v5206_v26 = vadd.f32 %v5205_v50, %v5175_v24  ;;  %v5137_v16 = vadd.f32 %v5136_v37, %v5106_v46  ;;  %v5076_v56 = vadd.f32 %v9642_v57, %v5037_v6  ;;  %v6842_v51 = vpop.f32.mrf.mxu1  ;;  %v5177_v43 = vmul.f32 %v5107_v49, %v5107_v49 }
 0x211   : > { %v5040_v45 = vadd.f32 %v4973_v14, %v4542_v34  ;;  %v4545_v36 = vadd.f32 %v6842_v51, %v9708_v8  ;;  %v6204_v60 = vpack.c.bf16 %v5110_v54, %v5109_v4  ;;  %v3793_v46 = vadd.f32 %v9610_v55, %v3406_v15 }
 0x212   : > { %v4976_v30 = vpop.f32.mrf.mxu0  ;;  %v5138_v1 = vadd.f32 %v5137_v16, %v5107_v49  ;;  %v5207_v3 = vadd.f32 %v5206_v26, %v5176_v35  ;;  %v4478_v38 = vpop.f32.mrf.mxu1  ;;  %v5108_v28 = vmax.f32 %v5076_v56, 0.0  ;;  %v3412_v27 = vadd.f32 %v9626_v31, %v9971_v18  ;;  %v9974_v56 = vld [vmem:[#allocation18_spill] sm:$0xff] }
 0x213   : > { %v5079_v21 = vadd.f32 %v9642_v57, %v5040_v45  ;;  %v5043_v12 = vadd.f32 %v6890_v53, %v4545_v36  ;;  %6244 = vst [vmem:[%s9671_s15 + $0x48] sm:$0xff] %v6204_v60   ;;  %v5081_v8 = vadd.f32 %v9642_v57, %v5042_v58  ;;  %v4543_v22 = vadd.f32 %v4478_v38, %v3789_v61  ;;  %v9975_v45 = vld [vmem:[#allocation4_spill] sm:$0xff] }
 0x214   : > { %v6893_v10 = vpop.f32.mrf.mxu0  ;;  %v5208_v42 = vadd.f32 %v5207_v3, %v5177_v43  ;;  %v6845_v32 = vpop.f32.mrf.mxu1  ;;  %v5179_v44 = vmul.f32 %v5109_v4, %v5109_v4  ;;  %v5139_v29 = vadd.f32 %v5138_v1, %v5108_v28  ;;  %v5178_v59 = vmul.f32 %v5108_v28, %v5108_v28 }
 0x215   : > { %v6199_v48 = vpack.c.bf16 %v5108_v28, %v5107_v49  ;;  %v5111_v13 = vmax.f32 %v5079_v21, 0.0  ;;  %v5082_v23 = vadd.f32 %v9642_v57, %v5043_v12  ;;  %v5041_v63 = vadd.f32 %v4976_v30, %v4543_v22  ;;  %v9976_v28 = vld [vmem:[#allocation6_spill] sm:$0xff] }
 0x216   : > { %v4989_v20 = vpop.f32.mrf.mxu0  ;;  %v4548_v14 = vadd.f32 %v6845_v32, %v9972_v47  ;;  %v4491_v19 = vpop.f32.mrf.mxu1  ;;  %v5180_v31 = vmul.f32 %v5110_v54, %v5110_v54  ;;  %v5140_v7 = vadd.f32 %v5139_v29, %v5109_v4  ;;  %v5209_v2 = vadd.f32 %v5208_v42, %v5178_v59  ;;  %v9978_v32 = vld [vmem:[#allocation10_spill] sm:$0xff] }
 0x217   : > { %6243 = vst [vmem:[%s9671_s15 + $0x40] sm:$0xff] %v6199_v48   ;;  %v4546_v25 = vadd.f32 %v4491_v19, %v9973_v39  ;;  %v5113_v15 = vmax.f32 %v5081_v8, 0.0  ;;  %v5114_v24 = vmax.f32 %v5082_v23, 0.0  ;;  %v5080_v9 = vadd.f32 %v9642_v57, %v5041_v63 }
 0x218   : > { %v6894_v55 = vpop.f32.mrf.mxu0  ;;  %v5046_v49 = vadd.f32 %v6893_v10, %v4548_v14  ;;  %v6846_v11 = vpop.f32.mrf.mxu1  ;;  %v5210_v53 = vadd.f32 %v5209_v2, %v5179_v44  ;;  %v5141_v37 = vadd.f32 %v5140_v7, %v5110_v54  ;;  %v5181_v41 = vmul.f32 %v5111_v13, %v5111_v13 }
 0x219   : > { %v5044_v50 = vadd.f32 %v4989_v20, %v4546_v25  ;;  %v4549_v5 = vadd.f32 %v6846_v11, %v3795_v62  ;;  %v6214_v35 = vpack.c.bf16 %v5114_v24, %v5113_v15  ;;  %v5112_v4 = vmax.f32 %v5080_v9, 0.0 }
 0x21a   : > { %v4992_v17 = vpop.f32.mrf.mxu0  ;;  %v5085_v58 = vadd.f32 %v9642_v57, %v5046_v49  ;;  %v4494_v40 = vpop.f32.mrf.mxu1  ;;  %v5142_v34 = vadd.f32 %v5141_v37, %v5111_v13  ;;  %v5211_v30 = vadd.f32 %v5210_v53, %v5180_v31  ;;  %v3410_v51 = vadd.f32 %v9630_v0, %v9974_v56 }
 0x21b   : > { %v5083_v26 = vadd.f32 %v9642_v57, %v5044_v50  ;;  %v5047_v16 = vadd.f32 %v6894_v55, %v4549_v5  ;;  %6246 = vst [vmem:[%s9671_s15 + $0x58] sm:$0xff] %v6214_v35   ;;  %v5182_v54 = vmul.f32 %v5112_v4, %v5112_v4  ;;  %v6209_v52 = vpack.c.bf16 %v5112_v4, %v5111_v13 }
 0x21c   : > { %v6897_v6 = vpop.f32.mrf.mxu0  ;;  %v4547_v61 = vadd.f32 %v4494_v40, %v3793_v46  ;;  %v6849_v33 = vpop.f32.mrf.mxu1  ;;  %v3799_v36 = vadd.f32 %v9975_v45, %v3412_v27  ;;  %v5212_v10 = vadd.f32 %v5211_v30, %v5181_v41  ;;  %v5143_v1 = vadd.f32 %v5142_v34, %v5112_v4  ;;  %v9977_v46 = vld [vmem:[#allocation8_spill] sm:$0xff] }
 0x21d   : > { %v5086_v43 = vadd.f32 %v9642_v57, %v5047_v16  ;;  %v5183_v3 = vmul.f32 %v5113_v15, %v5113_v15  ;;  %6245 = vst [vmem:[%s9671_s15 + $0x50] sm:$0xff] %v6209_v52   ;;  %v5117_v60 = vmax.f32 %v5085_v58, 0.0  ;;  %v4552_v21 = vadd.f32 %v6849_v33, %v9976_v28 }
 0x21e   : > { %v5005_v62 = vpop.f32.mrf.mxu0  ;;  %v5045_v38 = vadd.f32 %v4992_v17, %v4547_v61  ;;  %v4507_v12 = vpop.f32.mrf.mxu1  ;;  %v5144_v0 = vadd.f32 %v5143_v1, %v5113_v15  ;;  %v5213_v20 = vadd.f32 %v5212_v10, %v5182_v54  ;;  %v5115_v18 = vmax.f32 %v5083_v26, 0.0 }
 0x21f   : > { %v5118_v42 = vmax.f32 %v5086_v43, 0.0  ;;  %v3797_v8 = vadd.f32 %v9977_v46, %v3410_v51  ;;  %v5050_v27 = vadd.f32 %v6897_v6, %v4552_v21  ;;  %v4550_v44 = vadd.f32 %v4507_v12, %v9978_v32 }
 0x220   : > { %v5084_v22 = vadd.f32 %v9642_v57, %v5045_v38  ;;  %v6850_v29 = vpop.f32.mrf.mxu1  ;;  %v6898_v59 = vpop.f32.mrf.mxu0  ;;  %v5184_v48 = vmul.f32 %v5114_v24, %v5114_v24  ;;  %v5214_v55 = vadd.f32 %v5213_v20, %v5183_v3  ;;  %v5145_v13 = vadd.f32 %v5144_v0, %v5114_v24 }
 0x221   : > { %v6224_v23 = vpack.c.bf16 %v5118_v42, %v5117_v60  ;;  %v5048_v47 = vadd.f32 %v5005_v62, %v4550_v44  ;;  %v4553_v14 = vadd.f32 %v6850_v29, %v3799_v36  ;;  %v5185_v7 = vmul.f32 %v5115_v18, %v5115_v18 }
 0x222   : > { %v5116_v63 = vmax.f32 %v5084_v22, 0.0  ;;  %v4510_v19 = vpop.f32.mrf.mxu1  ;;  %v5146_v31 = vadd.f32 %v5145_v13, %v5115_v18  ;;  %v5215_v2 = vadd.f32 %v5214_v55, %v5184_v48  ;;  %v5089_v15 = vadd.f32 %v9642_v57, %v5050_v27  ;;  %v5008_v49 = vpop.f32.mrf.mxu0 }
 0x223   : > { %6248 = vst [vmem:[%s9671_s15 + $0x68] sm:$0xff] %v6224_v23   ;;  %v4551_v39 = vadd.f32 %v4510_v19, %v3797_v8  ;;  %v5087_v9 = vadd.f32 %v9642_v57, %v5048_v47  ;;  %v5051_v53 = vadd.f32 %v6898_v59, %v4553_v14  ;;  %v5187_v50 = vmul.f32 %v5117_v60, %v5117_v60 }
 0x224   : > { %v5186_v25 = vmul.f32 %v5116_v63, %v5116_v63  ;;  %v6219_v17 = vpack.c.bf16 %v5116_v63, %v5115_v18  ;;  %v5216_v11 = vadd.f32 %v5215_v2, %v5185_v7  ;;  %v5147_v24 = vadd.f32 %v5146_v31, %v5116_v63 }
 0x225   : > { %v5049_v37 = vadd.f32 %v5008_v49, %v4551_v39  ;;  %v5119_v5 = vmax.f32 %v5087_v9, 0.0  ;;  %v5090_v35 = vadd.f32 %v9642_v57, %v5051_v53  ;;  %v5188_v58 = vmul.f32 %v5118_v42, %v5118_v42 }
 0x226   : > { %6247 = vst [vmem:[%s9671_s15 + $0x60] sm:$0xff] %v6219_v17   ;;  %v5148_v6 = vadd.f32 %v5147_v24, %v5117_v60  ;;  %v5217_v41 = vadd.f32 %v5216_v11, %v5186_v25  ;;  %v5121_v40 = vmax.f32 %v5089_v15, 0.0 }
 0x227   : > { %v5088_v4 = vadd.f32 %v9642_v57, %v5049_v37  ;;  %v5122_v26 = vmax.f32 %v5090_v35, 0.0  ;;  %v5189_v51 = vmul.f32 %v5119_v5, %v5119_v5 }
 0x228   : > { %v5218_v34 = vadd.f32 %v5217_v41, %v5187_v50  ;;  %v5149_v30 = vadd.f32 %v5148_v6, %v5118_v42  ;;  %v5191_v36 = vmul.f32 %v5121_v40, %v5121_v40 }
 0x229   : > { %v5120_v16 = vmax.f32 %v5088_v4, 0.0  ;;  %v6234_v52 = vpack.c.bf16 %v5122_v26, %v5121_v40  ;;  %v5192_v1 = vmul.f32 %v5122_v26, %v5122_v26 }
 0x22a   : > { %v5150_v56 = vadd.f32 %v5149_v30, %v5119_v5  ;;  %v5219_v54 = vadd.f32 %v5218_v34, %v5188_v58 }
 0x22b   : > { %v5190_v61 = vmul.f32 %v5120_v16, %v5120_v16  ;;  %v6229_v33 = vpack.c.bf16 %v5120_v16, %v5119_v5  ;;  %6250 = vst [vmem:[%s9671_s15 + $0x78] sm:$0xff] %v6234_v52  }
 0x22c   : > { %v5220_v62 = vadd.f32 %v5219_v54, %v5189_v51  ;;  %v5151_v45 = vadd.f32 %v5150_v56, %v5120_v16 }
 0x22d   : > { %6249 = vst [vmem:[%s9671_s15 + $0x70] sm:$0xff] %v6229_v33  }
 0x22e   : > { %v5152_v57 = vadd.f32 %v5151_v45, %v5121_v40  ;;  %v5221_v10 = vadd.f32 %v5220_v62, %v5190_v61 }
 0x230   : > { %v5153_v43 = vadd.f32 %v5152_v57, %v5122_v26  ;;  %v5222_v3 = vadd.f32 %v5221_v10, %v5191_v36 }
 0x232   : > { %v5154_v60 = vrot.slane %v5153_v43, 4  ;;  %v5223_v38 = vadd.f32 %v5222_v3, %v5192_v1 }
 0x234   : > { %v5155_v28 = vadd.f32 %v5154_v60, %v5153_v43  ;;  %v5224_v21 = vrot.slane %v5223_v38, 4 }
 0x236   : > { %v5156_v12 = vrot.slane %v5155_v28, 2  ;;  %v5225_v0 = vadd.f32 %v5224_v21, %v5223_v38 }
 0x238   : > { %v5157_v20 = vadd.f32 %v5156_v12, %v5155_v28  ;;  %v5226_v18 = vrot.slane %v5225_v0, 2 }
 0x23a   : > { %v5158_v42 = vrot.slane %v5157_v20, 1  ;;  %v5227_v46 = vadd.f32 %v5226_v18, %v5225_v0 }
 0x23c   : > { %v5159_v8 = vadd.f32 %v5158_v42, %v5157_v20  ;;  %v5228_v22 = vrot.slane %v5227_v46, 1 }
 0x23e   : > { %5160 = vst [vmem:[%s238_s20] sm:$0x1] %v5159_v8  ;;  %v5229_v27 = vadd.f32 %v5228_v22, %v5227_v46 }
 0x240   : > { %5230 = vst [vmem:[%s241_s23] sm:$0x1] %v5229_v27 }
 0x241 PF: > { %s16_s18 = sadd.s32 1, %s7059_s18  }
 0x242   : > { %p13_p4 = scmp.ge.s32.totalorder %s16_s18, 4  }
 0x244   :  { %15 = sbr.rel (!%p13_p4) target bundleno = 1 (0x1), region = 96 }

// kernel: block_forward.4
= control target key start
LH: loop header
LB: loop body
LE: loop exit
PB: predicated region body
PF: predicated region fallthrough
CT: control target
= control target key end

     0   :  { %s7884_s24 = smov 0   ;;  %s10537_s0 = inlined_call_operand.vmem [shape: bf16[2,16,16,128], index: 0, kind: input, shape index: {}]   ;;  %s10538_s1 = inlined_call_operand.vmem [shape: f32[1,128], index: 1, kind: input, shape index: {}]   ;;  %s10539_s2 = inlined_call_operand.vmem [shape: f32[2,1,128], index: 2, kind: input, shape index: {}]   ;;  %s10540_s3 = inlined_call_operand.vmem [shape: bf16[9,128,128], index: 3, kind: input, shape index: {}]   ;;  %s10541_s4 = inlined_call_operand.vmem [shape: f32[1,128], index: 4, kind: input, shape index: {}]   ;;  %s10542_s5 = inlined_call_operand.vmem [shape: bf16[2,16,16,128], index: 5, kind: output, shape index: {0}]   ;;  %s10543_s6 = inlined_call_operand.vmem [shape: f32[2,1,128], index: 6, kind: output, shape index: {1}]   ;;  %s10544_s7 = inlined_call_operand.vmem [shape: f32[2,1,128], index: 7, kind: output, shape index: {2}]  }
   0x1 LB: > { %s6305_s25 = sadd.s32 4294967295, %s7841_s24   ;;  %p6309_p0 = scmp.ge.s32.totalorder %s7841_s24, 1  ;;  %s7841_s24 = sphi %s7884_s24, %s18_s24  }
   0x2   : > { %p250_p1 = scmp.lt.s32.totalorder %s7841_s24, 3 }
   0x4   : > { %p251_p2 = pnand %p6309_p0, %p250_p1 }
   0x6   : > { %254 = sbr.rel (%p251_p2) target bundleno = 679 (0x2a7), region = 40 }
   0xb   : > { %v7688_v0 = vld [vmem:[%s10540_s3 + $0x78] sm:$0xff]   ;;  %v7898_v1 = vld [vmem:[%s10540_s3 + $0x70] sm:$0xff]   ;;  %v7843_v2 = vmov 0   ;;  %p291_p3 = scmp.lt.s32.totalorder %s6305_s25, 1  ;;  %v7690_v3 = vld [vmem:[%s10540_s3 + $0x68] sm:$0xff]   ;;  %vm927_vm2 = vcmask 1043456  }
   0xc   : > { %453 = vst [vmem:[#allocation2] sm:$0xf] %v7843_v2  ;;  %454 = vst [vmem:[#allocation2 + $0x4] sm:$0xf] %v7843_v2  ;;  %7231 = vmatprep.subr.bf16.mxu0 %v7688_v0  ;;  %7663 = vmatprep.subr.bf16.mxu1 %v7688_v0  ;;  %v7691_v4 = vld [vmem:[%s10540_s3 + $0x60] sm:$0xff]   ;;  %v7692_v14 = vld [vmem:[%s10540_s3 + $0x58] sm:$0xff]  }
   0xd   : > { %455 = vst [vmem:[#allocation2 + $0x8] sm:$0x1] %v7843_v2  ;;  %456 = vst [vmem:[#allocation2 + $0xc] sm:$0xf] %v7843_v2  ;;  %7232 = vmatpush3.bf16.msra.mxu0 %v7688_v0  ;;  %7671 = vmatpush3.bf16.msra.mxu1 %v7688_v0  ;;  %s10751_s25 = smov (!%p291_p3, %s6305_s25), 1  ;;  %vm934_vm3 = vcmask 1040384  }
   0xe   : > { %457 = vst [vmem:[#allocation2 + $0x10] sm:$0xf] %v7843_v2  ;;  %458 = vst [vmem:[#allocation2 + $0x14] sm:$0x1] %v7843_v2  ;;  %7233 = vmatprep.subr.bf16.mxu0 %v7898_v1  ;;  %7664 = vmatprep.subr.bf16.mxu1 %v7898_v1  ;;  %s6775_s9 = sshll.u32 %s10751_s25, 7  ;;  %s7930_s17 = scalar_lea.vmem %s10539_s2, %s10751_s25  ;;  %v7693_v32 = vld [vmem:[%s10540_s3 + $0x50] sm:$0xff]  }
   0xf   : > { %459 = vst [vmem:[#allocation2 + $0x18] sm:$0xf] %v7843_v2  ;;  %460 = vst [vmem:[#allocation2 + $0x1c] sm:$0xf] %v7843_v2  ;;  %s7922_s14 = scalar_lea.vmem %s10537_s0, %s6775_s9  ;;  %vm1108_vm0 = vsmask.f32 3328  ;;  %s306_s20 = scalar_lea.vmem %s10543_s6, %s10751_s25 }
  0x10   : > { %461 = vst [vmem:[#allocation2 + $0x20] sm:$0x1] %v7843_v2  ;;  %462 = vst [vmem:[#allocation2 + $0x24] sm:$0xf] %v7843_v2  ;;  %vm1109_vm1 = vsmask.f32 7440  ;;  %s309_s23 = scalar_lea.vmem %s10544_s7, %s10751_s25 }
  0x11   : > { %463 = vst [vmem:[#allocation2 + $0x28] sm:$0xf] %v7843_v2  ;;  %464 = vst [vmem:[#allocation2 + $0x2c] sm:$0x1] %v7843_v2  ;;  %7234 = vmatpush3.bf16.msra.mxu0 %v7898_v1  ;;  %7672 = vmatpush3.bf16.msra.mxu1 %v7898_v1  ;;  %v6842_v13 = vld [vmem:[%s7922_s14] sm:$0xff]   ;;  %v6991_v20 = vld [vmem:[%s7922_s14 + $0x38] sm:$0xff]  }
  0x12   : > { %465 = vst [vmem:[#allocation2 + $0x30] sm:$0xf] %v7843_v2  ;;  %466 = vst [vmem:[#allocation2 + $0x34] sm:$0xf] %v7843_v2  ;;  %7235 = vmatprep.subr.bf16.mxu0 %v7690_v3  ;;  %7665 = vmatprep.subr.bf16.mxu1 %v7690_v3  ;;  %v6843_v17 = vunpack.c.l.bf16 %v6842_v13  ;;  %v6844_v18 = vunpack.c.h.bf16 %v6842_v13  ;;  %v7940_v19 = vld [vmem:[%s10538_s1] ss:$0 sm:$0xff]  ;;  %v6871_v30 = vunpack.c.l.bf16 %v6991_v20  ;;  %v6872_v31 = vunpack.c.h.bf16 %v6991_v20 }
  0x13   : > { %467 = vst [vmem:[#allocation2 + $0x38] sm:$0x1] %v7843_v2  ;;  %468 = vst [vmem:[#allocation2 + $0x3c] sm:$0xf] %v7843_v2  ;;  %v1044_v5 = vld [vmem:[#allocation2] sm:$0xf] }
  0x14   : > { %469 = vst [vmem:[#allocation2 + $0x40] sm:$0xf] %v7843_v2  ;;  %470 = vst [vmem:[#allocation2 + $0x44] sm:$0x1] %v7843_v2  ;;  %v1045_v6 = vld [vmem:[#allocation2 + $0x4] sm:$0xf]  ;;  %v382_v26 = vmul.f32 %v6843_v17, %v7940_v19  ;;  %v383_v27 = vmul.f32 %v6844_v18, %v7940_v19  ;;  %v396_v38 = vmul.f32 %v6871_v30, %v7940_v19 }
  0x15   : > { %471 = vst [vmem:[#allocation2 + $0x48] sm:$0xf] %v7843_v2  ;;  %472 = vst [vmem:[#allocation2 + $0x4c] sm:$0xf] %v7843_v2  ;;  %v7924_v7 = vld [vmem:[#allocation2 + $0x8] sm:$0x1]  ;;  %7236 = vmatpush3.bf16.msra.mxu0 %v7690_v3  ;;  %7673 = vmatpush3.bf16.msra.mxu1 %v7690_v3  ;;  %v397_v39 = vmul.f32 %v6872_v31, %v7940_v19 }
  0x16   : > { %473 = vst [vmem:[#allocation2 + $0x50] sm:$0x1] %v7843_v2  ;;  %474 = vst [vmem:[#allocation2 + $0x54] sm:$0xf] %v7843_v2  ;;  %v1112_v8 = vshrl.u32 %v1044_v5, 16  ;;  %v1115_v9 = vshll.u32 %v1044_v5, 16  ;;  %7237 = vmatprep.subr.bf16.mxu0 %v7691_v4  ;;  %7666 = vmatprep.subr.bf16.mxu1 %v7691_v4 }
  0x17   : > { %475 = vst [vmem:[#allocation2 + $0x58] sm:$0xf] %v7843_v2  ;;  %476 = vst [vmem:[#allocation2 + $0x5c] sm:$0x1] %v7843_v2  ;;  %v1121_v10 = vshll.u32 %v1045_v6, 16  ;;  %v1125_v11 = vshrl.u32 %v1045_v6, 16 }
  0x18   : > { %477 = vst [vmem:[#allocation2 + $0x60] sm:$0xf] %v7843_v2  ;;  %478 = vst [vmem:[#allocation2 + $0x64] sm:$0xf] %v7843_v2  ;;  %v1131_v12 = vshll.u32 %v7924_v7, 16  ;;  %v1114_v15 = vrot.slane %v1112_v8, 4 }
  0x19   : > { %479 = vst [vmem:[#allocation2 + $0x68] sm:$0x1] %v7843_v2  ;;  %480 = vst [vmem:[#allocation2 + $0x6c] sm:$0xf] %v7843_v2  ;;  %v1117_v16 = vrot.slane %v1115_v9, 5  ;;  %v1123_v21 = vrot.slane %v1121_v10, 5  ;;  %7238 = vmatpush3.bf16.msra.mxu0 %v7691_v4  ;;  %7674 = vmatpush3.bf16.msra.mxu1 %v7691_v4 }
  0x1a   : > { %481 = vst [vmem:[#allocation2 + $0x70] sm:$0xf] %v7843_v2  ;;  %482 = vst [vmem:[#allocation2 + $0x74] sm:$0x1] %v7843_v2  ;;  %v1127_v22 = vrot.slane %v1125_v11, 4  ;;  %v1133_v23 = vrot.slane %v1131_v12, 5  ;;  %7239 = vmatprep.subr.bf16.mxu0 %v7692_v14  ;;  %7667 = vmatprep.subr.bf16.mxu1 %v7692_v14 }
  0x1b   : > { %483 = vst [vmem:[#allocation2 + $0x78] sm:$0xf] %v7843_v2  ;;  %484 = vst [vmem:[#allocation2 + $0x7c] sm:$0xf] %v7843_v2  ;;  %v7944_v24 = vld [vmem:[%s7930_s17] ss:$0 sm:$0xff]  ;;  %v1118_v25 = vor.u32 %v1117_v16, %v1114_v15 }
  0x1c   : > { %485 = vst [vmem:[#allocation2 + $0x80] sm:$0x1] %v7843_v2  ;;  %486 = vst [vmem:[#allocation2 + $0x84] sm:$0xf] %v7843_v2  ;;  %vm603_vm4 = vsmask.f32 256  ;;  %v1128_v29 = vor.u32 %v1127_v22, %v1123_v21  ;;  %v421_v34 = vadd.f32 %v7944_v24, %v382_v26  ;;  %v422_v35 = vadd.f32 %v7944_v24, %v383_v27 }
  0x1d   : > { %487 = vst [vmem:[#allocation2 + $0x88] sm:$0xf] %v7843_v2  ;;  %488 = vst [vmem:[#allocation2 + $0x8c] sm:$0x1] %v7843_v2  ;;  %vm604_vm6 = vsmask.f32 4368  ;;  %v435_v45 = vadd.f32 %v7944_v24, %v396_v38  ;;  %v436_v46 = vadd.f32 %v7944_v24, %v397_v39  ;;  %7240 = vmatpush3.bf16.msra.mxu0 %v7692_v14  ;;  %7675 = vmatpush3.bf16.msra.mxu1 %v7692_v14 }
  0x1e   : > { %489 = vst [vmem:[#allocation2 + $0x90] sm:$0xf] %v7843_v2  ;;  %490 = vst [vmem:[#allocation2 + $0x94] sm:$0xf] %v7843_v2  ;;  %v1119_v33 = vrot.slane %v1118_v25, 4  ;;  %v1129_v36 = vrot.slane %v1128_v29, 4  ;;  %v6777_v41 = vpack.c.bf16 %v421_v34, %v421_v34  ;;  %v6778_v42 = vpack.c.bf16 %v422_v35, %v422_v35  ;;  %7241 = vmatprep.subr.bf16.mxu0 %v7693_v32 }
  0x1f   : > { %491 = vst [vmem:[#allocation2 + $0x98] sm:$0x1] %v7843_v2  ;;  %492 = vst [vmem:[#allocation2 + $0x9c] sm:$0xf] %v7843_v2  ;;  %v2146_v37 = vrot.slane %v7924_v7, 5  ;;  %v6992_v43 = vld [vmem:[%s7922_s14 + $0x40] sm:$0xff]   ;;  %7668 = vmatprep.subr.bf16.mxu1 %v7693_v32  ;;  %v6791_v55 = vpack.c.bf16 %v435_v45, %v435_v45  ;;  %v6792_v56 = vpack.c.bf16 %v436_v46, %v436_v46 }
  0x20   : > { %493 = vst [vmem:[#allocation2 + $0xa0] sm:$0xf] %v7843_v2  ;;  %494 = vst [vmem:[#allocation2 + $0xa4] sm:$0x1] %v7843_v2  ;;  %vm928_vm7 = vsmask.f32 7938  ;;  %v6875_v47 = vunpack.c.l.bf16 %v6992_v43  ;;  %v6876_v57 = vunpack.c.h.bf16 %v6992_v43 }
  0x21   : > { %495 = vst [vmem:[#allocation2 + $0xa8] sm:$0xf] %v7843_v2  ;;  %496 = vst [vmem:[#allocation2 + $0xac] sm:$0xf] %v7843_v2  ;;  %v7694_v48 = vld [vmem:[%s10540_s3 + $0x48] sm:$0xff]   ;;  %v607_v50 = vshrl.u32 %v6777_v41, 16  ;;  %7242 = vmatpush3.bf16.msra.mxu0 %v7693_v32  ;;  %7676 = vmatpush3.bf16.msra.mxu1 %v7693_v32 }
  0x22   : > { %497 = vst [vmem:[#allocation2 + $0xb0] sm:$0x1] %v7843_v2  ;;  %498 = vst [vmem:[#allocation2 + $0xb4] sm:$0xf] %v7843_v2  ;;  %v610_v51 = vshll.u32 %v6777_v41, 16  ;;  %v615_v52 = vshrl.u32 %v6778_v42, 16  ;;  %v398_v63 = vmul.f32 %v6875_v47, %v7940_v19  ;;  %7243 = vmatprep.subr.bf16.mxu0 %v7694_v48  ;;  %7669 = vmatprep.subr.bf16.mxu1 %v7694_v48 }
  0x23   : > { %499 = vst [vmem:[#allocation2 + $0xb8] sm:$0xf] %v7843_v2  ;;  %500 = vst [vmem:[#allocation2 + $0xbc] sm:$0x1] %v7843_v2  ;;  %v618_v53 = vshll.u32 %v6778_v42, 16  ;;  %v10559_v54 = vmov 0  ;;  %v399_v16 = vmul.f32 %v6876_v57, %v7940_v19 }
  0x24   : > { %501 = vst [vmem:[#allocation2 + $0xc0] sm:$0xf] %v7843_v2  ;;  %502 = vst [vmem:[#allocation2 + $0xc4] sm:$0xf] %v7843_v2  ;;  %v7979_v58 = vld [vmem:[%s7922_s14 + $0x8] sm:$0xff]   ;;  %v10562_v59 = vmov 0  ;;  %v437_v17 = vadd.f32 %v7944_v24, %v398_v63 }
  0x25   : > { %503 = vst [vmem:[#allocation2 + $0xc8] sm:$0x1] %v7843_v2  ;;  %504 = vst [vmem:[#allocation2 + $0xcc] sm:$0xf] %v7843_v2  ;;  %v609_v60 = vrot.slane %v607_v50, 7  ;;  %v617_v61 = vrot.slane %v615_v52, 7  ;;  %v6847_v0 = vunpack.c.l.bf16 %v7979_v58  ;;  %v6848_v25 = vunpack.c.h.bf16 %v7979_v58  ;;  %7244 = vmatpush3.bf16.msra.mxu0 %v7694_v48  ;;  %7677 = vmatpush3.bf16.msra.mxu1 %v7694_v48 }
  0x26   : > { %505 = vst [vmem:[#allocation2 + $0xd0] sm:$0xf] %v7843_v2  ;;  %506 = vst [vmem:[#allocation2 + $0xd4] sm:$0x1] %v7843_v2  ;;  %v930_v62 = vld [vmem:[#allocation2 + $0xc] sm:$0xf]  ;;  %v438_v32 = vadd.f32 %v7944_v24, %v399_v16 }
  0x27   : > { %vm7950_vm5 = vmor %vm1108_vm0, %vm1109_vm1  ;;  %v10565_v1 = vmov 0  ;;  %v936_v2 = vld [vmem:[#allocation2 + $0x14] sm:$0x1]  ;;  %v726_v3 = vshrl.u32 %v6791_v55, 16  ;;  %v729_v4 = vshll.u32 %v6791_v55, 16  ;;  %v734_v5 = vshrl.u32 %v6792_v56, 16 }
  0x28   : > { %v1124_v40 = vsel %vm7950_vm5, %v1119_v33, %v1123_v21  ;;  %v1134_v44 = vsel %vm7950_vm5, %v1129_v36, %v1133_v23  ;;  %vm7974_vm8 = vmand %vm934_vm3, %vm603_vm4  ;;  %v737_v6 = vshll.u32 %v6792_v56, 16  ;;  %v612_v8 = vor.u32 %v610_v51, %v609_v60  ;;  %v981_v12 = vld [vmem:[#allocation2 + $0x60] sm:$0xf]  ;;  %v6986_v18 = vld [vmem:[%s7922_s14 + $0x10] sm:$0xff]  }
  0x29   : > { %v6364_v49 = vcombine.low %v1124_v40, %v1134_v44  ;;  %v10560_v54 = vsel %vm7974_vm8, 4294967295, %v10559_v54  ;;  %vm7983_vm9 = vmor %vm603_vm4, %vm604_vm6  ;;  %v613_v9 = vrot.slane %v609_v60, 4  ;;  %v620_v10 = vor.u32 %v618_v53, %v617_v61  ;;  %v7695_v13 = vld [vmem:[%s10540_s3 + $0x40] sm:$0xff]   ;;  %v985_v23 = vld [vmem:[#allocation2 + $0x68] sm:$0x1] }
  0x2a   : > { %10561 = vst [vmem:[#allocation3_spill] sm:$0xff] %v10560_v54  ;;  %v10563_v59 = vsel %vm7983_vm9, 4294967295, %v10562_v59  ;;  %vm7991_vm10 = vmand %vm927_vm2, %vm928_vm7  ;;  %v622_v11 = vrot.slane %v617_v61, 4  ;;  %v728_v14 = vrot.slane %v726_v3, 7  ;;  %v736_v15 = vrot.slane %v734_v5, 7  ;;  %v8011_v31 = vld [vmem:[%s10540_s3 + $0x38] sm:$0xff]   ;;  %7245 = vmatprep.subr.bf16.mxu0 %v7695_v13  ;;  %7670 = vmatprep.subr.bf16.mxu1 %v7695_v13 }
  0x2b   : > { %7247 = vmatprep.mubr.bf16.mxu0 %v6364_v49  ;;  %10564 = vst [vmem:[#allocation4_spill] sm:$0xff] %v10563_v59  ;;  %v10566_v1 = vsel %vm7991_vm10, 4294967295, %v10565_v1  ;;  %v621_v20 = vsel %vm7983_vm9, %v613_v9, %v620_v10  ;;  %v931_v21 = vsel %vm7991_vm10, %v612_v8, %v930_v62  ;;  %v6793_v33 = vpack.c.bf16 %v437_v17, %v437_v17  ;;  %v8016_v36 = vld [vmem:[%s7922_s14 + $0x48] sm:$0xff]   ;;  %v8027_v41 = vld [vmem:[%s10540_s3 + $0xb8] sm:$0xff]   ;;  %v8035_v51 = vld [vmem:[%s7922_s14 + $0x50] sm:$0xff]  }
  0x2c   : > { %10567 = vst [vmem:[#allocation5_spill] sm:$0xff] %v10566_v1  ;;  %v937_v22 = vsel %vm7974_vm8, %v622_v11, %v936_v2  ;;  %932 = vst [vmem:[#allocation2 + $0xc] sm:$0xf] %v931_v21  ;;  %v731_v26 = vor.u32 %v729_v4, %v728_v14  ;;  %v732_v27 = vrot.slane %v728_v14, 4  ;;  %v739_v29 = vor.u32 %v737_v6, %v736_v15  ;;  %v988_v57 = vld [vmem:[#allocation2 + $0x6c] sm:$0xf] }
  0x2d   : > { %933 = vst [vmem:[#allocation2 + $0x10] sm:$0xf] %v621_v20  ;;  %938 = vst [vmem:[#allocation2 + $0x14] sm:$0x1] %v937_v22  ;;  %v741_v30 = vrot.slane %v736_v15, 4  ;;  %v384_v34 = vmul.f32 %v6847_v0, %v7940_v19  ;;  %v6851_v35 = vunpack.c.l.bf16 %v6986_v18  ;;  %v6852_v42 = vunpack.c.h.bf16 %v6986_v18  ;;  %7246 = vmatpush3.bf16.msra.mxu0 %v7695_v13  ;;  %7678 = vmatpush3.bf16.msra.mxu1 %v7695_v13  ;;  %v7819_v54 = vld [vmem:[%s10540_s3 + $0x138] sm:$0xff]  }
  0x2e   : > { %v740_v38 = vsel %vm7983_vm9, %v732_v27, %v739_v29  ;;  %v982_v39 = vsel %vm7991_vm10, %v731_v26, %v981_v12  ;;  %v6794_v43 = vpack.c.bf16 %v438_v32, %v438_v32  ;;  %v743_v44 = vshrl.u32 %v6793_v33, 16  ;;  %7279 = vmatprep.subr.bf16.mxu1 %v8011_v31  ;;  %7327 = vmatprep.subr.bf16.mxu0 %v8027_v41 }
  0x2f   : > { %v986_v40 = vsel %vm7974_vm8, %v741_v30, %v985_v23  ;;  %983 = vst [vmem:[#allocation2 + $0x60] sm:$0xf] %v982_v39  ;;  %984 = vst [vmem:[#allocation2 + $0x64] sm:$0xf] %v740_v38  ;;  %v746_v45 = vshll.u32 %v6793_v33, 16  ;;  %v385_v46 = vmul.f32 %v6848_v25, %v7940_v19  ;;  %v423_v47 = vadd.f32 %v7944_v24, %v384_v34 }
  0x30   : > { %987 = vst [vmem:[#allocation2 + $0x68] sm:$0x1] %v986_v40  ;;  %v386_v48 = vmul.f32 %v6851_v35, %v7940_v19  ;;  %v387_v49 = vmul.f32 %v6852_v42, %v7940_v19  ;;  %v6879_v50 = vunpack.c.l.bf16 %v8016_v36  ;;  %v745_v52 = vrot.slane %v743_v44, 7 }
  0x31   : > { %v751_v53 = vshrl.u32 %v6794_v43, 16  ;;  %v754_v55 = vshll.u32 %v6794_v43, 16  ;;  %v424_v56 = vadd.f32 %v7944_v24, %v385_v46  ;;  %v8040_v58 = vpack.c.bf16 %v423_v47, %v423_v47  ;;  %v992_v46 = vld [vmem:[#allocation2 + $0x74] sm:$0x1] }
  0x32   : > { %v8043_v60 = vadd.f32 %v7944_v24, %v386_v48  ;;  %v8046_v61 = vadd.f32 %v7944_v24, %v387_v49  ;;  %v6880_v62 = vunpack.c.h.bf16 %v8016_v36  ;;  %v748_v3 = vor.u32 %v746_v45, %v745_v52  ;;  %v7701_v36 = vld [vmem:[%s10540_s3 + $0xa8] sm:$0xff]  }
  0x33   : > { %v1046_v63 = vld [vmem:[#allocation2 + $0xc] sm:$0xf]  ;;  %v8051_v4 = vpack.c.bf16 %v424_v56, %v424_v56  ;;  %v8054_v5 = vmul.f32 %v6879_v50, %v7940_v19  ;;  %v6883_v6 = vunpack.c.l.bf16 %v8035_v51  ;;  %v749_v14 = vrot.slane %v745_v52, 4 }
  0x34   : > { %v1047_v0 = vld [vmem:[#allocation2 + $0x10] sm:$0xf]  ;;  %v8049_v2 = vld [vmem:[#allocation2 + $0x14] sm:$0x1]  ;;  %v1136_v8 = vshrl.u32 %v1046_v63, 16  ;;  %v1139_v9 = vshll.u32 %v1046_v63, 16  ;;  %v989_v29 = vsel %vm7991_vm10, %v748_v3, %v988_v57 }
  0x35   : > { %v1145_v10 = vshll.u32 %v1047_v0, 16  ;;  %v1149_v11 = vshrl.u32 %v1047_v0, 16  ;;  %v1155_v12 = vshll.u32 %v8049_v2, 16  ;;  %v2153_v13 = vrot.slane %v8049_v2, 5  ;;  %990 = vst [vmem:[#allocation2 + $0x6c] sm:$0xf] %v989_v29 }
  0x36   : > { %v753_v15 = vrot.slane %v751_v53, 7  ;;  %v1138_v16 = vrot.slane %v1136_v8, 4  ;;  %v1141_v17 = vrot.slane %v1139_v9, 5  ;;  %v1060_v21 = vld [vmem:[#allocation2 + $0x60] sm:$0xf]  ;;  %v624_v56 = vshrl.u32 %v8040_v58, 16 }
  0x37   : > { %v1147_v18 = vrot.slane %v1145_v10, 5  ;;  %v1151_v20 = vrot.slane %v1149_v11, 4  ;;  %v1157_v22 = vrot.slane %v1155_v12, 5  ;;  %v1061_v23 = vld [vmem:[#allocation2 + $0x64] sm:$0xf]  ;;  %v1304_v26 = vshrl.u32 %v1060_v21, 16 }
  0x38   : > { %v8059_v25 = vld [vmem:[#allocation2 + $0x68] sm:$0x1]  ;;  %v756_v27 = vor.u32 %v754_v55, %v753_v15  ;;  %v1142_v30 = vor.u32 %v1141_v17, %v1138_v16  ;;  %v1307_v33 = vshll.u32 %v1060_v21, 16  ;;  %v1313_v34 = vshll.u32 %v1061_v23, 16  ;;  %v7699_v3 = vld [vmem:[%s10540_s3 + $0xb0] sm:$0xff]  }
  0x39   : > { %v1152_v32 = vor.u32 %v1151_v20, %v1147_v18  ;;  %v1306_v35 = vrot.slane %v1304_v26, 4  ;;  %v1317_v38 = vshrl.u32 %v1061_v23, 16  ;;  %v1323_v39 = vshll.u32 %v8059_v25, 16  ;;  %v939_v16 = vld [vmem:[#allocation2 + $0x18] sm:$0xf] }
  0x3a   : > { %v1143_v42 = vrot.slane %v1142_v30, 4  ;;  %v1309_v44 = vrot.slane %v1307_v33, 5  ;;  %v1315_v45 = vrot.slane %v1313_v34, 5  ;;  %v757_v49 = vsel %vm7983_vm9, %v749_v14, %v756_v27 }
  0x3b   : > { %v1153_v43 = vrot.slane %v1152_v32, 4  ;;  %v1319_v47 = vrot.slane %v1317_v38, 4  ;;  %v1325_v48 = vrot.slane %v1323_v39, 5  ;;  %v758_v50 = vrot.slane %v753_v15, 4  ;;  %991 = vst [vmem:[#allocation2 + $0x70] sm:$0xf] %v757_v49 }
  0x3c   : > { %v1148_v52 = vsel %vm7950_vm5, %v1143_v42, %v1147_v18  ;;  %v1310_v55 = vor.u32 %v1309_v44, %v1306_v35  ;;  %v627_v8 = vshll.u32 %v8040_v58, 16  ;;  %v626_v10 = vrot.slane %v624_v56, 7  ;;  %v1062_v15 = vld [vmem:[#allocation2 + $0x6c] sm:$0xf]  ;;  %v943_v32 = vld [vmem:[#allocation2 + $0x20] sm:$0x1] }
  0x3d   : > { %v1158_v53 = vsel %vm7950_vm5, %v1153_v43, %v1157_v22  ;;  %v1320_v63 = vor.u32 %v1319_v47, %v1315_v45  ;;  %v993_v0 = vsel %vm7974_vm8, %v758_v50, %v992_v46  ;;  %v632_v11 = vshrl.u32 %v8051_v4, 16 }
  0x3e   : > { %v6365_v57 = vcombine.low %v1148_v52, %v1158_v53  ;;  %v1311_v9 = vrot.slane %v1310_v55, 4  ;;  %994 = vst [vmem:[#allocation2 + $0x74] sm:$0x1] %v993_v0  ;;  %v635_v12 = vshll.u32 %v8051_v4, 16  ;;  %v6781_v17 = vpack.c.bf16 %v8043_v60, %v8043_v60  ;;  %v7703_v52 = vld [vmem:[%s10540_s3 + $0xa0] sm:$0xff]  }
  0x3f   : > { %v1321_v14 = vrot.slane %v1320_v63, 4  ;;  %v6782_v18 = vpack.c.bf16 %v8046_v61, %v8046_v61  ;;  %v401_v58 = vmul.f32 %v6880_v62, %v7940_v19  ;;  %v1328_v21 = vshrl.u32 %v1062_v15, 16 }
  0x40   : > { %7248 = vmatmul.mubr.bf16.vlgmr.msra.gmra.mxu0 %v6365_v57  ;;  %v1316_v20 = vsel %vm7950_vm5, %v1311_v9, %v1315_v45  ;;  %v1331_v22 = vshll.u32 %v1062_v15, 16  ;;  %v629_v4 = vor.u32 %v627_v8, %v626_v10  ;;  %v630_v60 = vrot.slane %v626_v10, 4  ;;  %v8109_v9 = vld [vmem:[%s7922_s14 + $0x18] sm:$0xff]  }
  0x41   : > { %7328 = vmatpush3.bf16.msra.mxu0 %v8027_v41  ;;  %v1326_v23 = vsel %vm7950_vm5, %v1321_v14, %v1325_v48  ;;  %v634_v26 = vrot.slane %v632_v11, 7  ;;  %v641_v27 = vshrl.u32 %v6781_v17, 16  ;;  %v1330_v62 = vrot.slane %v1328_v21, 4  ;;  %v946_v41 = vld [vmem:[#allocation2 + $0x24] sm:$0xf] }
  0x42   : > { %7329 = vmatprep.subr.bf16.mxu0 %v7699_v3  ;;  %v6372_v61 = vcombine.low %v1316_v20, %v1326_v23  ;;  %v1333_v29 = vrot.slane %v1331_v22, 5  ;;  %v940_v30 = vsel %vm7991_vm10, %v629_v4, %v939_v16  ;;  %v1063_v33 = vld [vmem:[#allocation2 + $0x70] sm:$0xf]  ;;  %v644_v39 = vshll.u32 %v6781_v17, 16  ;;  %v950_v14 = vld [vmem:[#allocation2 + $0x2c] sm:$0x1] }
  0x43   : > { %v637_v34 = vor.u32 %v635_v12, %v634_v26  ;;  %v639_v35 = vrot.slane %v634_v26, 4  ;;  %941 = vst [vmem:[#allocation2 + $0x18] sm:$0xf] %v940_v30  ;;  %v643_v38 = vrot.slane %v641_v27, 7  ;;  %v1337_v43 = vshll.u32 %v1063_v33, 16  ;;  %v7707_v30 = vld [vmem:[%s10540_s3 + $0x90] sm:$0xff]  }
  0x44   : > { %7263 = vmatprep.mubr.bf16.mxu1 %v6372_v61  ;;  %v1334_v42 = vor.u32 %v1333_v29, %v1330_v62  ;;  %v1341_v44 = vshrl.u32 %v1063_v33, 16  ;;  %v649_v45 = vshrl.u32 %v6782_v18, 16  ;;  %v652_v0 = vshll.u32 %v6782_v18, 16 }
  0x45   : > { %7330 = vmatpush3.bf16.msra.mxu0 %v7699_v3  ;;  %v1101_v46 = vld [vmem:[#allocation2 + $0x74] sm:$0x1]  ;;  %v638_v47 = vsel %vm7983_vm9, %v630_v60, %v637_v34  ;;  %v944_v48 = vsel %vm7974_vm8, %v639_v35, %v943_v32  ;;  %v646_v49 = vor.u32 %v644_v39, %v643_v38  ;;  %v647_v50 = vrot.slane %v643_v38, 4 }
  0x46   : > { %7331 = vmatprep.subr.bf16.mxu0 %v7701_v36  ;;  %v1335_v53 = vrot.slane %v1334_v42, 4  ;;  %v1339_v55 = vrot.slane %v1337_v43, 5  ;;  %v1343_v56 = vrot.slane %v1341_v44, 4  ;;  %v1347_v57 = vshll.u32 %v1101_v46, 16  ;;  %942 = vst [vmem:[#allocation2 + $0x1c] sm:$0xf] %v638_v47 }
  0x47   : > { %945 = vst [vmem:[#allocation2 + $0x20] sm:$0x1] %v944_v48  ;;  %v651_v63 = vrot.slane %v649_v45, 7  ;;  %v947_v3 = vsel %vm7991_vm10, %v646_v49, %v946_v41  ;;  %v439_v8 = vadd.f32 %v7944_v24, %v8054_v5  ;;  %v440_v15 = vadd.f32 %v7944_v24, %v401_v58  ;;  %v7705_v5 = vld [vmem:[%s10540_s3 + $0x98] sm:$0xff]   ;;  %v7698_v60 = vld [vmem:[%s10540_s3 + $0x30] sm:$0xff]  }
  0x48   : > { %v1340_v10 = vsel %vm7950_vm5, %v1335_v53, %v1339_v55  ;;  %v1344_v11 = vor.u32 %v1343_v56, %v1339_v55  ;;  %v1349_v12 = vrot.slane %v1347_v57, 5  ;;  %948 = vst [vmem:[#allocation2 + $0x24] sm:$0xf] %v947_v3  ;;  %v6884_v20 = vunpack.c.h.bf16 %v8035_v51  ;;  %v995_v45 = vld [vmem:[#allocation2 + $0x78] sm:$0xf] }
  0x49   : > { %7332 = vmatpush3.bf16.msra.mxu0 %v7701_v36  ;;  %v654_v16 = vor.u32 %v652_v0, %v651_v63  ;;  %v656_v17 = vrot.slane %v651_v63, 4  ;;  %v6795_v18 = vpack.c.bf16 %v439_v8, %v439_v8  ;;  %v6796_v4 = vpack.c.bf16 %v440_v15, %v440_v15  ;;  %v999_v8 = vld [vmem:[#allocation2 + $0x80] sm:$0x1]  ;;  %v7709_v15 = vld [vmem:[%s10540_s3 + $0x88] sm:$0xff]  }
  0x4a   : > { %7333 = vmatprep.subr.bf16.mxu0 %v7703_v52  ;;  %v1345_v21 = vrot.slane %v1344_v11, 4  ;;  %v1048_v22 = vld [vmem:[#allocation2 + $0x18] sm:$0xf]  ;;  %v402_v23 = vmul.f32 %v6883_v6, %v7940_v19  ;;  %v6855_v58 = vunpack.c.l.bf16 %v8109_v9  ;;  %v403_v38 = vmul.f32 %v6884_v20, %v7940_v19 }
  0x4b   : > { %v1160_v26 = vshrl.u32 %v1048_v22, 16  ;;  %v1163_v27 = vshll.u32 %v1048_v22, 16  ;;  %v655_v36 = vsel %vm7983_vm9, %v647_v50, %v654_v16  ;;  %v951_v61 = vsel %vm7974_vm8, %v656_v17, %v950_v14  ;;  %v7702_v22 = vld [vmem:[%s10540_s3 + $0x20] sm:$0xff]  }
  0x4c   : > { %v1350_v62 = vsel %vm7950_vm5, %v1345_v21, %v1349_v12  ;;  %949 = vst [vmem:[#allocation2 + $0x28] sm:$0xf] %v655_v36  ;;  %952 = vst [vmem:[#allocation2 + $0x2c] sm:$0x1] %v951_v61  ;;  %v760_v51 = vshrl.u32 %v6795_v18, 16  ;;  %v763_v6 = vshll.u32 %v6795_v18, 16  ;;  %v441_v50 = vadd.f32 %v7944_v24, %v402_v23 }
  0x4d   : > { %v768_v29 = vshrl.u32 %v6796_v4, 16  ;;  %7334 = vmatpush3.bf16.msra.mxu0 %v7703_v52  ;;  %v6373_v32 = vcombine.low %v1340_v10, %v1350_v62  ;;  %v1049_v41 = vld [vmem:[#allocation2 + $0x1c] sm:$0xf]  ;;  %v1162_v34 = vrot.slane %v1160_v26, 4  ;;  %v1165_v35 = vrot.slane %v1163_v27, 5  ;;  %v7700_v10 = vld [vmem:[%s10540_s3 + $0x28] sm:$0xff]  }
  0x4e   : > { %v1094_v33 = vld [vmem:[#allocation2 + $0x20] sm:$0x1]  ;;  %7335 = vmatprep.subr.bf16.mxu0 %v7705_v5  ;;  %v1169_v39 = vshll.u32 %v1049_v41, 16  ;;  %v1173_v42 = vshrl.u32 %v1049_v41, 16  ;;  %v762_v44 = vrot.slane %v760_v51, 7  ;;  %v771_v49 = vshll.u32 %v6796_v4, 16 }
  0x4f   : > { %v1179_v43 = vshll.u32 %v1094_v33, 16  ;;  %7264 = vmatmul.mubr.bf16.vlgmr.msra.gmra.mxu1 %v6373_v32  ;;  %v1166_v46 = vor.u32 %v1165_v35, %v1162_v34  ;;  %v1050_v47 = vld [vmem:[#allocation2 + $0x24] sm:$0xf]  ;;  %v770_v48 = vrot.slane %v768_v29, 7  ;;  %v442_v21 = vadd.f32 %v7944_v24, %v403_v38 }
  0x50   : > { %7280 = vmatpush3.bf16.msra.mxu1 %v8011_v31  ;;  %v1171_v52 = vrot.slane %v1169_v39, 5  ;;  %v1175_v53 = vrot.slane %v1173_v42, 4  ;;  %v1184_v56 = vshrl.u32 %v1050_v47, 16  ;;  %v1187_v63 = vshll.u32 %v1050_v47, 16 }
  0x51   : > { %v1181_v55 = vrot.slane %v1179_v43, 5  ;;  %7336 = vmatpush3.bf16.msra.mxu0 %v7705_v5  ;;  %7281 = vmatprep.subr.bf16.mxu1 %v7698_v60  ;;  %v1167_v57 = vrot.slane %v1166_v46, 4  ;;  %v765_v0 = vor.u32 %v763_v6, %v762_v44  ;;  %v766_v3 = vrot.slane %v762_v44, 4  ;;  %v8156_v6 = vld [vmem:[%s7922_s14 + $0x20] sm:$0xff]   ;;  %v7704_v46 = vld [vmem:[%s10540_s3 + $0x18] sm:$0xff]  }
  0x52   : > { %7337 = vmatprep.subr.bf16.mxu0 %v7707_v30  ;;  %v1176_v11 = vor.u32 %v1175_v53, %v1171_v52  ;;  %v1186_v12 = vrot.slane %v1184_v56, 4  ;;  %v773_v14 = vor.u32 %v771_v49, %v770_v48  ;;  %v775_v31 = vrot.slane %v770_v48, 4  ;;  %v1002_v43 = vld [vmem:[#allocation2 + $0x84] sm:$0xf] }
  0x53   : > { %v1172_v16 = vsel %vm7950_vm5, %v1167_v57, %v1171_v52  ;;  %v1051_v17 = vld [vmem:[#allocation2 + $0x28] sm:$0xf]  ;;  %v1095_v18 = vld [vmem:[#allocation2 + $0x2c] sm:$0x1]  ;;  %v1189_v20 = vrot.slane %v1187_v63, 5  ;;  %v996_v5 = vsel %vm7991_vm10, %v765_v0, %v995_v45  ;;  %v6797_v51 = vpack.c.bf16 %v441_v50, %v441_v50  ;;  %v7715_v52 = vld [vmem:[%s10540_s3 + $0x138] sm:$0xff]  }
  0x54   : > { %7282 = vmatpush3.bf16.msra.mxu1 %v7698_v60  ;;  %v1177_v4 = vrot.slane %v1176_v11, 4  ;;  %v1193_v23 = vshll.u32 %v1051_v17, 16  ;;  %v1197_v26 = vshrl.u32 %v1051_v17, 16  ;;  %v1203_v27 = vshll.u32 %v1095_v18, 16  ;;  %997 = vst [vmem:[#allocation2 + $0x78] sm:$0xf] %v996_v5 }
  0x55   : > { %7338 = vmatpush3.bf16.msra.mxu0 %v7707_v30  ;;  %v1190_v36 = vor.u32 %v1189_v20, %v1186_v12  ;;  %v774_v61 = vsel %vm7983_vm9, %v766_v3, %v773_v14  ;;  %v1000_v62 = vsel %vm7974_vm8, %v775_v31, %v999_v8  ;;  %7283 = vmatprep.subr.bf16.mxu1 %v7700_v10  ;;  %v7711_v30 = vld [vmem:[%s10540_s3 + $0x80] sm:$0xff]   ;;  %v777_v38 = vshrl.u32 %v6797_v51, 16  ;;  %v7706_v5 = vld [vmem:[%s10540_s3 + $0x10] sm:$0xff]  }
  0x56   : > { %v1182_v60 = vsel %vm7950_vm5, %v1177_v4, %v1181_v55  ;;  %v1195_v29 = vrot.slane %v1193_v23, 5  ;;  %v1199_v32 = vrot.slane %v1197_v26, 4  ;;  %v1205_v41 = vrot.slane %v1203_v27, 5  ;;  %998 = vst [vmem:[#allocation2 + $0x7c] sm:$0xf] %v774_v61  ;;  %7339 = vmatprep.subr.bf16.mxu0 %v7709_v15 }
  0x57   : > { %1001 = vst [vmem:[#allocation2 + $0x80] sm:$0x1] %v1000_v62  ;;  %v6366_v33 = vcombine.low %v1172_v16, %v1182_v60  ;;  %v1191_v34 = vrot.slane %v1190_v36, 4  ;;  %v6798_v35 = vpack.c.bf16 %v442_v21, %v442_v21  ;;  %v780_v42 = vshll.u32 %v6797_v51, 16  ;;  %v8192_v62 = vld [vmem:[%s7922_s14 + $0x58] sm:$0xff]  }
  0x58   : > { %v1200_v39 = vor.u32 %v1199_v32, %v1195_v29  ;;  %7284 = vmatpush3.bf16.msra.mxu1 %v7700_v10  ;;  %v6856_v44 = vunpack.c.h.bf16 %v8109_v9  ;;  %v388_v45 = vmul.f32 %v6855_v58, %v7940_v19  ;;  %v779_v48 = vrot.slane %v777_v38, 7  ;;  %v1006_v9 = vld [vmem:[#allocation2 + $0x8c] sm:$0x1] }
  0x59   : > { %7340 = vmatpush3.bf16.msra.mxu0 %v7709_v15  ;;  %7251 = vmatprep.mubr.bf16.mxu0 %v6366_v33  ;;  %v1196_v47 = vsel %vm7950_vm5, %v1191_v34, %v1195_v29  ;;  %v785_v49 = vshrl.u32 %v6798_v35, 16  ;;  %v788_v50 = vshll.u32 %v6798_v35, 16  ;;  %v6859_v56 = vunpack.c.l.bf16 %v8156_v6  ;;  %v7708_v34 = vld [vmem:[%s10540_s3 + $0x8] sm:$0xff]  }
  0x5a   : > { %7285 = vmatprep.subr.bf16.mxu1 %v7702_v22  ;;  %v1201_v53 = vrot.slane %v1200_v39, 4  ;;  %v389_v58 = vmul.f32 %v6856_v44, %v7940_v19  ;;  %v427_v55 = vadd.f32 %v7944_v24, %v388_v45  ;;  %7341 = vmatprep.subr.bf16.mxu0 %v7711_v30  ;;  %v782_v63 = vor.u32 %v780_v42, %v779_v48 }
  0x5b   : > { %v1064_v57 = vld [vmem:[#allocation2 + $0x78] sm:$0xf]  ;;  %v783_v0 = vrot.slane %v779_v48, 4  ;;  %v787_v3 = vrot.slane %v785_v49, 7  ;;  %v6860_v8 = vunpack.c.h.bf16 %v8156_v6  ;;  %v390_v33 = vmul.f32 %v6859_v56, %v7940_v19 }
  0x5c   : > { %v1206_v10 = vsel %vm7950_vm5, %v1201_v53, %v1205_v41  ;;  %v1352_v11 = vshrl.u32 %v1064_v57, 16  ;;  %v1355_v12 = vshll.u32 %v1064_v57, 16  ;;  %7286 = vmatpush3.bf16.msra.mxu1 %v7702_v22  ;;  %v428_v14 = vadd.f32 %v7944_v24, %v389_v58 }
  0x5d   : > { %7342 = vmatpush3.bf16.msra.mxu0 %v7711_v30  ;;  %v6367_v31 = vcombine.low %v1196_v47, %v1206_v10  ;;  %v1065_v15 = vld [vmem:[#allocation2 + $0x7c] sm:$0xf]  ;;  %v790_v17 = vor.u32 %v788_v50, %v787_v3  ;;  %v792_v18 = vrot.slane %v787_v3, 4  ;;  %v1003_v20 = vsel %vm7991_vm10, %v782_v63, %v1002_v43  ;;  %7287 = vmatprep.subr.bf16.mxu1 %v7704_v46  ;;  %v953_v43 = vld [vmem:[#allocation2 + $0x30] sm:$0xf] }
  0x5e   : > { %v1102_v16 = vld [vmem:[#allocation2 + $0x80] sm:$0x1]  ;;  %7423 = vmatprep.subr.bf16.mxu0 %v7715_v52  ;;  %v1354_v21 = vrot.slane %v1352_v11, 4  ;;  %v1357_v22 = vrot.slane %v1355_v12, 5  ;;  %v1361_v4 = vshll.u32 %v1065_v15, 16  ;;  %v1365_v23 = vshrl.u32 %v1065_v15, 16 }
  0x5f   : > { %1004 = vst [vmem:[#allocation2 + $0x84] sm:$0xf] %v1003_v20  ;;  %7252 = vmatmul.mubr.bf16.gmra.mxu0 %v6367_v31  ;;  %v1371_v26 = vshll.u32 %v1102_v16, 16  ;;  %v791_v27 = vsel %vm7983_vm9, %v783_v0, %v790_v17  ;;  %v1007_v36 = vsel %vm7974_vm8, %v792_v18, %v1006_v9  ;;  %v6783_v61 = vpack.c.bf16 %v427_v55, %v427_v55  ;;  %v7713_v20 = vld [vmem:[%s10540_s3 + $0xf8] sm:$0xff]  }
  0x60   : > { %v1358_v51 = vor.u32 %v1357_v22, %v1354_v21  ;;  %v1363_v6 = vrot.slane %v1361_v4, 5  ;;  %v1367_v60 = vrot.slane %v1365_v23, 4  ;;  %1005 = vst [vmem:[#allocation2 + $0x88] sm:$0xf] %v791_v27  ;;  %1008 = vst [vmem:[#allocation2 + $0x8c] sm:$0x1] %v1007_v36  ;;  %v6784_v29 = vpack.c.bf16 %v428_v14, %v428_v14  ;;  %7288 = vmatpush3.bf16.msra.mxu1 %v7704_v46 }
  0x61   : > { %v1373_v32 = vrot.slane %v1371_v26, 5  ;;  %v658_v41 = vshrl.u32 %v6783_v61, 16  ;;  %v661_v30 = vshll.u32 %v6783_v61, 16  ;;  %7289 = vmatprep.subr.bf16.mxu1 %v7706_v5  ;;  %v391_v45 = vmul.f32 %v6860_v8, %v7940_v19  ;;  %v7710_v19 = vld [vmem:[%s10540_s3] sm:$0xff]   ;;  %v957_v8 = vld [vmem:[#allocation2 + $0x38] sm:$0x1] }
  0x62   : > { %v1359_v35 = vrot.slane %v1358_v51, 4  ;;  %v1368_v38 = vor.u32 %v1367_v60, %v1363_v6  ;;  %v666_v39 = vshrl.u32 %v6784_v29, 16  ;;  %v669_v42 = vshll.u32 %v6784_v29, 16  ;;  %v960_v61 = vld [vmem:[#allocation2 + $0x3c] sm:$0xf] }
  0x63   : > { %v660_v44 = vrot.slane %v658_v41, 7  ;;  %v429_v46 = vadd.f32 %v7944_v24, %v390_v33  ;;  %v6887_v47 = vunpack.c.l.bf16 %v8192_v62  ;;  %v6888_v52 = vunpack.c.h.bf16 %v8192_v62  ;;  %v8220_v62 = vld [vmem:[%s7922_s14 + $0x60] sm:$0xff]  }
  0x64   : > { %v1364_v48 = vsel %vm7950_vm5, %v1359_v35, %v1363_v6  ;;  %v1369_v49 = vrot.slane %v1368_v38, 4  ;;  %v668_v50 = vrot.slane %v666_v39, 7  ;;  %7290 = vmatpush3.bf16.msra.mxu1 %v7706_v5  ;;  %v430_v55 = vadd.f32 %v7944_v24, %v391_v45  ;;  %v8225_v33 = vld [vmem:[%s10538_s1] ss:$0 sm:$0xff] }
  0x65   : > { %v663_v9 = vor.u32 %v661_v30, %v660_v44  ;;  %v664_v58 = vrot.slane %v660_v44, 4  ;;  %v6785_v56 = vpack.c.bf16 %v429_v46, %v429_v46  ;;  %7291 = vmatprep.subr.bf16.mxu1 %v7708_v34  ;;  %v964_v30 = vld [vmem:[#allocation2 + $0x44] sm:$0x1]  ;;  %v405_v35 = vmul.f32 %v8225_v33, %v6888_v52  ;;  %v8233_v46 = vld [vmem:[%s7930_s17] ss:$0 sm:$0xff] }
  0x66   : > { %v1066_v53 = vld [vmem:[#allocation2 + $0x84] sm:$0xf]  ;;  %v1374_v57 = vsel %vm7950_vm5, %v1369_v49, %v1373_v32  ;;  %v671_v3 = vor.u32 %v669_v42, %v668_v50  ;;  %v673_v14 = vrot.slane %v668_v50, 4  ;;  %v6786_v31 = vpack.c.bf16 %v430_v55, %v430_v55 }
  0x67   : > { %v1376_v63 = vshrl.u32 %v1066_v53, 16  ;;  %v1379_v0 = vshll.u32 %v1066_v53, 16  ;;  %v6374_v10 = vcombine.low %v1364_v48, %v1374_v57  ;;  %v1067_v11 = vld [vmem:[#allocation2 + $0x88] sm:$0xf]  ;;  %v1103_v12 = vld [vmem:[#allocation2 + $0x8c] sm:$0x1]  ;;  %v954_v24 = vsel %vm7991_vm10, %v663_v9, %v953_v43 }
  0x68   : > { %v1385_v17 = vshll.u32 %v1067_v11, 16  ;;  %v1389_v18 = vshrl.u32 %v1067_v11, 16  ;;  %955 = vst [vmem:[#allocation2 + $0x30] sm:$0xf] %v954_v24  ;;  %7292 = vmatpush3.bf16.msra.mxu1 %v7708_v34  ;;  %v1395_v5 = vshll.u32 %v1103_v12, 16  ;;  %v672_v21 = vsel %vm7983_vm9, %v664_v58, %v671_v3  ;;  %v8255_v11 = vld [vmem:[%s7922_s14 + $0x28] sm:$0xff]  }
  0x69   : > { %v1378_v15 = vrot.slane %v1376_v63, 4  ;;  %v1381_v16 = vrot.slane %v1379_v0, 5  ;;  %7267 = vmatprep.mubr.bf16.mxu1 %v6374_v10  ;;  %v958_v22 = vsel %vm7974_vm8, %v673_v14, %v957_v8  ;;  %v675_v4 = vshrl.u32 %v6785_v56, 16  ;;  %7293 = vmatprep.subr.bf16.mxu1 %v7710_v19  ;;  %956 = vst [vmem:[#allocation2 + $0x34] sm:$0xf] %v672_v21 }
  0x6a   : > { %v1387_v26 = vrot.slane %v1385_v17, 5  ;;  %v1391_v27 = vrot.slane %v1389_v18, 4  ;;  %959 = vst [vmem:[#allocation2 + $0x38] sm:$0x1] %v958_v22  ;;  %v678_v36 = vshll.u32 %v6785_v56, 16  ;;  %v1397_v51 = vrot.slane %v1395_v5, 5 }
  0x6b   : > { %v1382_v23 = vor.u32 %v1381_v16, %v1378_v15  ;;  %v677_v6 = vrot.slane %v675_v4, 7  ;;  %v683_v60 = vshrl.u32 %v6786_v31, 16  ;;  %v686_v29 = vshll.u32 %v6786_v31, 16  ;;  %v1009_v4 = vld [vmem:[#allocation2 + $0x90] sm:$0xf] }
  0x6c   : > { %v1392_v41 = vor.u32 %v1391_v27, %v1387_v26  ;;  %v404_v34 = vmul.f32 %v8225_v33, %v6887_v47  ;;  %7294 = vmatpush3.bf16.msra.mxu1 %v7710_v19  ;;  %v6891_v43 = vunpack.c.l.bf16 %v8220_v62  ;;  %v444_v49 = vadd.f32 %v8233_v46, %v405_v35 }
  0x6d   : > { %v1383_v32 = vrot.slane %v1382_v23, 4  ;;  %v680_v38 = vor.u32 %v678_v36, %v677_v6  ;;  %v681_v39 = vrot.slane %v677_v6, 4  ;;  %v685_v42 = vrot.slane %v683_v60, 7  ;;  %7375 = vmatprep.subr.bf16.mxu1 %v7713_v20  ;;  %v1013_v23 = vld [vmem:[#allocation2 + $0x98] sm:$0x1] }
  0x6e   : > { %v1393_v45 = vrot.slane %v1392_v41, 4  ;;  %v443_v48 = vadd.f32 %v8233_v46, %v404_v34  ;;  %v6892_v9 = vunpack.c.h.bf16 %v8220_v62  ;;  %v6800_v10 = vpack.c.bf16 %v444_v49, %v444_v49 }
  0x6f   : > { %v1388_v44 = vsel %vm7950_vm5, %v1383_v32, %v1387_v26  ;;  %v8237_v47 = vld [vmem:[#allocation2 + $0x30] sm:$0xf]  ;;  %v688_v50 = vor.u32 %v686_v29, %v685_v42  ;;  %v690_v52 = vrot.slane %v685_v42, 4  ;;  %v961_v53 = vsel %vm7991_vm10, %v680_v38, %v960_v61 }
  0x70   : > { %v1398_v58 = vsel %vm7950_vm5, %v1393_v45, %v1397_v51  ;;  %v1208_v55 = vshrl.u32 %v8237_v47, 16  ;;  %v1211_v56 = vshll.u32 %v8237_v47, 16  ;;  %962 = vst [vmem:[#allocation2 + $0x3c] sm:$0xf] %v961_v53  ;;  %v6799_v19 = vpack.c.bf16 %v443_v48, %v443_v48  ;;  %v8246_v63 = vld [vmem:[#allocation2 + $0x34] sm:$0xf] }
  0x71   : > { %v6375_v57 = vcombine.low %v1388_v44, %v1398_v58  ;;  %v8248_v0 = vld [vmem:[#allocation2 + $0x38] sm:$0x1]  ;;  %v689_v3 = vsel %vm7983_vm9, %v681_v39, %v688_v50  ;;  %v965_v8 = vsel %vm7974_vm8, %v690_v52, %v964_v30  ;;  %v1217_v24 = vshll.u32 %v8246_v63, 16 }
  0x72   : > { %v1210_v12 = vrot.slane %v1208_v55, 4  ;;  %v1213_v14 = vrot.slane %v1211_v56, 5  ;;  %v1221_v31 = vshrl.u32 %v8246_v63, 16  ;;  %963 = vst [vmem:[#allocation2 + $0x40] sm:$0xf] %v689_v3  ;;  %v1227_v15 = vshll.u32 %v8248_v0, 16 }
  0x73   : > { %966 = vst [vmem:[#allocation2 + $0x44] sm:$0x1] %v965_v8  ;;  %7268 = vmatmul.mubr.bf16.gmra.mxu1 %v6375_v57  ;;  %v794_v16 = vshrl.u32 %v6799_v19, 16  ;;  %v797_v17 = vshll.u32 %v6799_v19, 16  ;;  %v802_v18 = vshrl.u32 %v6800_v10, 16  ;;  %v1219_v5 = vrot.slane %v1217_v24, 5 }
  0x74   : > { %v1214_v20 = vor.u32 %v1213_v14, %v1210_v12  ;;  %v1223_v21 = vrot.slane %v1221_v31, 4  ;;  %v805_v22 = vshll.u32 %v6800_v10, 16  ;;  %v1229_v26 = vrot.slane %v1227_v15, 5 }
  0x75   : > { %v796_v27 = vrot.slane %v794_v16, 7  ;;  %v804_v36 = vrot.slane %v802_v18, 7  ;;  %v406_v61 = vmul.f32 %v8225_v33, %v6891_v43  ;;  %v407_v6 = vmul.f32 %v8225_v33, %v6892_v9  ;;  %v6990_v16 = vld [vmem:[%s7922_s14 + $0x30] sm:$0xff]  }
  0x76   : > { %v1215_v62 = vrot.slane %v1214_v20, 4  ;;  %v1224_v51 = vor.u32 %v1223_v21, %v1219_v5  ;;  %v6863_v60 = vunpack.c.l.bf16 %v8255_v11  ;;  %v6864_v12 = vunpack.c.h.bf16 %v8255_v11 }
  0x77   : > { %v8263_v29 = vld [vmem:[#allocation2 + $0x3c] sm:$0xf]  ;;  %v799_v32 = vor.u32 %v797_v17, %v796_v27  ;;  %v800_v41 = vrot.slane %v796_v27, 4  ;;  %v807_v30 = vor.u32 %v805_v22, %v804_v36  ;;  %v809_v34 = vrot.slane %v804_v36, 4 }
  0x78   : > { %v1220_v35 = vsel %vm7950_vm5, %v1215_v62, %v1219_v5  ;;  %v1225_v38 = vrot.slane %v1224_v51, 4  ;;  %v1232_v39 = vshrl.u32 %v8263_v29, 16  ;;  %v1235_v42 = vshll.u32 %v8263_v29, 16 }
  0x79   : > { %v8269_v43 = vld [vmem:[#allocation2 + $0x40] sm:$0xf]  ;;  %v808_v45 = vsel %vm7983_vm9, %v800_v41, %v807_v30  ;;  %v1010_v48 = vsel %vm7991_vm10, %v799_v32, %v1009_v4  ;;  %v1014_v49 = vsel %vm7974_vm8, %v809_v34, %v1013_v23  ;;  %v445_v50 = vadd.f32 %v8233_v46, %v406_v61 }
  0x7a   : > { %v8271_v44 = vld [vmem:[#allocation2 + $0x44] sm:$0x1]  ;;  %v1230_v52 = vsel %vm7950_vm5, %v1225_v38, %v1229_v26  ;;  %v1234_v53 = vrot.slane %v1232_v39, 4  ;;  %v1237_v9 = vrot.slane %v1235_v42, 5  ;;  %v1241_v58 = vshll.u32 %v8269_v43, 16 }
  0x7b   : > { %1011 = vst [vmem:[#allocation2 + $0x90] sm:$0xf] %v1010_v48  ;;  %1012 = vst [vmem:[#allocation2 + $0x94] sm:$0xf] %v808_v45  ;;  %v6368_v55 = vcombine.low %v1220_v35, %v1230_v52  ;;  %v1245_v56 = vshrl.u32 %v8269_v43, 16  ;;  %v1251_v19 = vshll.u32 %v8271_v44, 16  ;;  %v446_v57 = vadd.f32 %v8233_v46, %v407_v6 }
  0x7c   : > { %1015 = vst [vmem:[#allocation2 + $0x98] sm:$0x1] %v1014_v49  ;;  %v1238_v3 = vor.u32 %v1237_v9, %v1234_v53  ;;  %v1243_v8 = vrot.slane %v1241_v58, 5  ;;  %v6801_v10 = vpack.c.bf16 %v445_v50, %v445_v50  ;;  %v392_v15 = vmul.f32 %v8225_v33, %v6863_v60  ;;  %v1016_v49 = vld [vmem:[#allocation2 + $0x9c] sm:$0xf] }
  0x7d   : > { %7255 = vmatprep.mubr.bf16.mxu0 %v6368_v55  ;;  %v1247_v14 = vrot.slane %v1245_v56, 4  ;;  %v1253_v24 = vrot.slane %v1251_v19, 5  ;;  %v6802_v31 = vpack.c.bf16 %v446_v57, %v446_v57  ;;  %v393_v5 = vmul.f32 %v8225_v33, %v6864_v12  ;;  %v1020_v58 = vld [vmem:[#allocation2 + $0xa4] sm:$0x1] }
  0x7e   : > { %v1239_v17 = vrot.slane %v1238_v3, 4  ;;  %v811_v18 = vshrl.u32 %v6801_v10, 16  ;;  %v814_v20 = vshll.u32 %v6801_v10, 16  ;;  %v431_v23 = vadd.f32 %v8233_v46, %v392_v15 }
  0x7f   : > { %v1248_v21 = vor.u32 %v1247_v14, %v1243_v8  ;;  %v819_v22 = vshrl.u32 %v6802_v31, 16  ;;  %v822_v4 = vshll.u32 %v6802_v31, 16  ;;  %v432_v27 = vadd.f32 %v8233_v46, %v393_v5  ;;  %v6997_v14 = vld [vmem:[%s7922_s14 + $0x68] sm:$0xff]  }
  0x80   : > { %v1244_v11 = vsel %vm7950_vm5, %v1239_v17, %v1243_v8  ;;  %v813_v26 = vrot.slane %v811_v18, 7  ;;  %v6867_v36 = vunpack.c.l.bf16 %v6990_v16  ;;  %v6787_v60 = vpack.c.bf16 %v431_v23, %v431_v23 }
  0x81   : > { %v1249_v61 = vrot.slane %v1248_v21, 4  ;;  %v821_v6 = vrot.slane %v819_v22, 7  ;;  %v6868_v32 = vunpack.c.h.bf16 %v6990_v16  ;;  %v6788_v10 = vpack.c.bf16 %v432_v27, %v432_v27  ;;  %v967_v22 = vld [vmem:[#allocation2 + $0x48] sm:$0xf]  ;;  %v8317_v27 = vld [vmem:[%s7922_s14 + $0x70] sm:$0xff]  }
  0x82   : > { %v8294_v62 = vld [vmem:[#allocation2 + $0x90] sm:$0xf]  ;;  %v8296_v51 = vld [vmem:[#allocation2 + $0x94] sm:$0xf]  ;;  %v816_v45 = vor.u32 %v814_v20, %v813_v26  ;;  %v817_v48 = vrot.slane %v813_v26, 4  ;;  %v692_v12 = vshrl.u32 %v6787_v60, 16  ;;  %v394_v23 = vmul.f32 %v8225_v33, %v6867_v36 }
  0x83   : > { %v8298_v41 = vld [vmem:[#allocation2 + $0x98] sm:$0x1]  ;;  %v1400_v30 = vshrl.u32 %v8294_v62, 16  ;;  %v1403_v34 = vshll.u32 %v8294_v62, 16  ;;  %v1409_v35 = vshll.u32 %v8296_v51, 16  ;;  %v1413_v38 = vshrl.u32 %v8296_v51, 16 }
  0x84   : > { %v1254_v39 = vsel %vm7950_vm5, %v1249_v61, %v1253_v24  ;;  %v1419_v42 = vshll.u32 %v8298_v41, 16  ;;  %v824_v19 = vor.u32 %v822_v4, %v821_v6  ;;  %v826_v57 = vrot.slane %v821_v6, 4  ;;  %v971_v4 = vld [vmem:[#allocation2 + $0x50] sm:$0x1] }
  0x85   : > { %v6369_v50 = vcombine.low %v1244_v11, %v1254_v39  ;;  %v1402_v52 = vrot.slane %v1400_v30, 4  ;;  %v1405_v53 = vrot.slane %v1403_v34, 5  ;;  %v1411_v9 = vrot.slane %v1409_v35, 5 }
  0x86   : > { %v1415_v55 = vrot.slane %v1413_v38, 4  ;;  %v1421_v56 = vrot.slane %v1419_v42, 5  ;;  %v1017_v8 = vsel %vm7991_vm10, %v816_v45, %v1016_v49  ;;  %v825_v31 = vsel %vm7983_vm9, %v817_v48, %v824_v19 }
  0x87   : > { %7256 = vmatmul.mubr.bf16.gmra.mxu0 %v6369_v50  ;;  %v1406_v3 = vor.u32 %v1405_v53, %v1402_v52  ;;  %1018 = vst [vmem:[#allocation2 + $0x9c] sm:$0xf] %v1017_v8  ;;  %v1021_v15 = vsel %vm7974_vm8, %v826_v57, %v1020_v58  ;;  %v695_v16 = vshll.u32 %v6787_v60, 16  ;;  %1019 = vst [vmem:[#allocation2 + $0xa0] sm:$0xf] %v825_v31  ;;  %v694_v18 = vrot.slane %v692_v12, 7 }
  0x88   : > { %v1416_v24 = vor.u32 %v1415_v55, %v1411_v9  ;;  %1022 = vst [vmem:[#allocation2 + $0xa4] sm:$0x1] %v1021_v15  ;;  %v700_v20 = vshrl.u32 %v6788_v10, 16  ;;  %v703_v5 = vshll.u32 %v6788_v10, 16  ;;  %v395_v11 = vmul.f32 %v8225_v33, %v6868_v32 }
  0x89   : > { %v1407_v17 = vrot.slane %v1406_v3, 4  ;;  %v6895_v26 = vunpack.c.l.bf16 %v6997_v14  ;;  %v697_v6 = vor.u32 %v695_v16, %v694_v18  ;;  %v698_v60 = vrot.slane %v694_v18, 4 }
  0x8a   : > { %v1417_v21 = vrot.slane %v1416_v24, 4  ;;  %v702_v30 = vrot.slane %v700_v20, 7  ;;  %v433_v35 = vadd.f32 %v8233_v46, %v394_v23  ;;  %v434_v38 = vadd.f32 %v8233_v46, %v395_v11  ;;  %v974_v23 = vld [vmem:[#allocation2 + $0x54] sm:$0xf] }
  0x8b   : > { %v1412_v61 = vsel %vm7950_vm5, %v1407_v17, %v1411_v9  ;;  %v6896_v39 = vunpack.c.h.bf16 %v6997_v14  ;;  %v968_v45 = vsel %vm7991_vm10, %v697_v6, %v967_v22  ;;  %v408_v50 = vmul.f32 %v8225_v33, %v6895_v26 }
  0x8c   : > { %v1422_v34 = vsel %vm7950_vm5, %v1417_v21, %v1421_v56  ;;  %v705_v42 = vor.u32 %v703_v5, %v702_v30  ;;  %v707_v32 = vrot.slane %v702_v30, 4  ;;  %969 = vst [vmem:[#allocation2 + $0x48] sm:$0xf] %v968_v45  ;;  %v6789_v48 = vpack.c.bf16 %v433_v35, %v433_v35  ;;  %v978_v45 = vld [vmem:[#allocation2 + $0x5c] sm:$0x1] }
  0x8d   : > { %v6376_v36 = vcombine.low %v1412_v61, %v1422_v34  ;;  %v6790_v49 = vpack.c.bf16 %v434_v38, %v434_v38  ;;  %v409_v52 = vmul.f32 %v8225_v33, %v6896_v39  ;;  %v6899_v55 = vunpack.c.l.bf16 %v8317_v27 }
  0x8e   : > { %v8329_v53 = vld [vmem:[#allocation2 + $0x9c] sm:$0xf]  ;;  %v706_v9 = vsel %vm7983_vm9, %v698_v60, %v705_v42  ;;  %v972_v58 = vsel %vm7974_vm8, %v707_v32, %v971_v4  ;;  %v6900_v56 = vunpack.c.h.bf16 %v8317_v27  ;;  %v8337_v19 = vld [vmem:[#allocation2 + $0xa0] sm:$0xf]  ;;  %v447_v10 = vadd.f32 %v8233_v46, %v408_v50 }
  0x8f   : > { %7271 = vmatprep.mubr.bf16.mxu1 %v6376_v36  ;;  %v8339_v57 = vld [vmem:[#allocation2 + $0xa4] sm:$0x1]  ;;  %v1424_v3 = vshrl.u32 %v8329_v53, 16  ;;  %v1427_v8 = vshll.u32 %v8329_v53, 16  ;;  %970 = vst [vmem:[#allocation2 + $0x4c] sm:$0xf] %v706_v9  ;;  %v448_v12 = vadd.f32 %v8233_v46, %v409_v52 }
  0x90   : > { %973 = vst [vmem:[#allocation2 + $0x50] sm:$0x1] %v972_v58  ;;  %v1433_v14 = vshll.u32 %v8337_v19, 16  ;;  %v1437_v24 = vshrl.u32 %v8337_v19, 16  ;;  %v1443_v31 = vshll.u32 %v8339_v57, 16  ;;  %v709_v15 = vshrl.u32 %v6789_v48, 16 }
  0x91   : > { %v1426_v16 = vrot.slane %v1424_v3, 4  ;;  %v1429_v17 = vrot.slane %v1427_v8, 5  ;;  %v712_v18 = vshll.u32 %v6789_v48, 16  ;;  %v717_v20 = vshrl.u32 %v6790_v49, 16 }
  0x92   : > { %v1435_v5 = vrot.slane %v1433_v14, 5  ;;  %v1439_v21 = vrot.slane %v1437_v24, 4  ;;  %v1445_v22 = vrot.slane %v1443_v31, 5  ;;  %v711_v4 = vrot.slane %v709_v15, 7 }
  0x93   : > { %v1430_v11 = vor.u32 %v1429_v17, %v1426_v16  ;;  %v719_v26 = vrot.slane %v717_v20, 7  ;;  %v720_v61 = vshll.u32 %v6790_v49, 16  ;;  %v6803_v6 = vpack.c.bf16 %v447_v10, %v447_v10  ;;  %v8348_v30 = vld [vmem:[#allocation2 + $0x48] sm:$0xf] }
  0x94   : > { %v1440_v60 = vor.u32 %v1439_v21, %v1435_v5  ;;  %v714_v34 = vor.u32 %v712_v18, %v711_v4  ;;  %v715_v35 = vrot.slane %v711_v4, 4  ;;  %v6804_v38 = vpack.c.bf16 %v448_v12, %v448_v12 }
  0x95   : > { %v1431_v39 = vrot.slane %v1430_v11, 4  ;;  %v1256_v36 = vshrl.u32 %v8348_v30, 16  ;;  %v1259_v42 = vshll.u32 %v8348_v30, 16  ;;  %v722_v32 = vor.u32 %v720_v61, %v719_v26 }
  0x96   : > { %v1441_v48 = vrot.slane %v1440_v60, 4  ;;  %v8352_v50 = vld [vmem:[#allocation2 + $0x4c] sm:$0xf]  ;;  %v724_v49 = vrot.slane %v719_v26, 4  ;;  %v975_v9 = vsel %vm7991_vm10, %v714_v34, %v974_v23  ;;  %v410_v58 = vmul.f32 %v8225_v33, %v6899_v55 }
  0x97   : > { %v8354_v52 = vld [vmem:[#allocation2 + $0x50] sm:$0x1]  ;;  %v1436_v3 = vsel %vm7950_vm5, %v1431_v39, %v1435_v5  ;;  %v1258_v8 = vrot.slane %v1256_v36, 4  ;;  %v1261_v10 = vrot.slane %v1259_v42, 5  ;;  %v1265_v12 = vshll.u32 %v8352_v50, 16 }
  0x98   : > { %976 = vst [vmem:[#allocation2 + $0x54] sm:$0xf] %v975_v9  ;;  %v1446_v14 = vsel %vm7950_vm5, %v1441_v48, %v1445_v22  ;;  %v1269_v24 = vshrl.u32 %v8352_v50, 16  ;;  %v1275_v31 = vshll.u32 %v8354_v52, 16  ;;  %v723_v15 = vsel %vm7983_vm9, %v715_v35, %v722_v32  ;;  %v1023_v36 = vld [vmem:[#allocation2 + $0xa8] sm:$0xf] }
  0x99   : > { %v6377_v16 = vcombine.low %v1436_v3, %v1446_v14  ;;  %v1262_v55 = vor.u32 %v1261_v10, %v1258_v8  ;;  %v1267_v17 = vrot.slane %v1265_v12, 5  ;;  %977 = vst [vmem:[#allocation2 + $0x58] sm:$0xf] %v723_v15  ;;  %v979_v18 = vsel %vm7974_vm8, %v724_v49, %v978_v45  ;;  %v1027_v9 = vld [vmem:[#allocation2 + $0xb0] sm:$0x1] }
  0x9a   : > { %v1271_v20 = vrot.slane %v1269_v24, 4  ;;  %v1277_v5 = vrot.slane %v1275_v31, 5  ;;  %980 = vst [vmem:[#allocation2 + $0x5c] sm:$0x1] %v979_v18  ;;  %v828_v21 = vshrl.u32 %v6803_v6, 16  ;;  %v831_v4 = vshll.u32 %v6803_v6, 16 }
  0x9b   : > { %7272 = vmatmul.mubr.bf16.gmra.mxu1 %v6377_v16  ;;  %v1263_v22 = vrot.slane %v1262_v55, 4  ;;  %v836_v23 = vshrl.u32 %v6804_v38, 16  ;;  %v839_v11 = vshll.u32 %v6804_v38, 16  ;;  %v411_v26 = vmul.f32 %v8225_v33, %v6900_v56 }
  0x9c   : > { %v1272_v61 = vor.u32 %v1271_v20, %v1267_v17  ;;  %v830_v60 = vrot.slane %v828_v21, 7  ;;  %v449_v34 = vadd.f32 %v8233_v46, %v410_v58  ;;  %vm2138_vm11 = vcmask 1042432   ;;  %v1030_v20 = vld [vmem:[#allocation2 + $0xb4] sm:$0xf] }
  0x9d   : > { %v1268_v35 = vsel %vm7950_vm5, %v1263_v22, %v1267_v17  ;;  %v838_v39 = vrot.slane %v836_v23, 7  ;;  %v450_v6 = vadd.f32 %v8233_v46, %v411_v26  ;;  %vm2139_vm12 = vcmask 1046532  }
  0x9e   : > { %v1273_v42 = vrot.slane %v1272_v61, 4  ;;  %v833_v38 = vor.u32 %v831_v4, %v830_v60  ;;  %v834_v27 = vrot.slane %v830_v60, 4  ;;  %v6805_v45 = vpack.c.bf16 %v449_v34, %v449_v34  ;;  %v2091_v34 = vld [vmem:[#allocation2 + $0xc] sm:$0xe]  ;;  %vm8398_vm13 = vmor %vm2138_vm11, %vm2139_vm12 }
  0x9f   : > { %v8377_v32 = vld [vmem:[#allocation2 + $0x54] sm:$0xf]  ;;  %v841_v48 = vor.u32 %v839_v11, %v838_v39  ;;  %v843_v49 = vrot.slane %v838_v39, 4  ;;  %v6806_v8 = vpack.c.bf16 %v450_v6, %v450_v6  ;;  %v10568_v6 = vmov 0 }
  0xa0   : > { %v1280_v33 = vshrl.u32 %v8377_v32, 16  ;;  %v1283_v56 = vshll.u32 %v8377_v32, 16  ;;  %v1278_v58 = vsel %vm7950_vm5, %v1273_v42, %v1277_v5  ;;  %v8383_v3 = vld [vmem:[#allocation2 + $0x58] sm:$0xf]  ;;  %v1024_v46 = vsel %vm7991_vm10, %v833_v38, %v1023_v36  ;;  %v2090_v5 = vld [vmem:[#allocation2] sm:$0xe] }
  0xa1   : > { %v845_v10 = vshrl.u32 %v6805_v45, 16  ;;  %v6370_v12 = vcombine.low %v1268_v35, %v1278_v58  ;;  %v8387_v14 = vld [vmem:[#allocation2 + $0x5c] sm:$0x1]  ;;  %v1289_v15 = vshll.u32 %v8383_v3, 16  ;;  %1025 = vst [vmem:[#allocation2 + $0xa8] sm:$0xf] %v1024_v46  ;;  %v842_v17 = vsel %vm7983_vm9, %v834_v27, %v841_v48 }
  0xa2   : > { %v1282_v24 = vrot.slane %v1280_v33, 4  ;;  %v1285_v31 = vrot.slane %v1283_v56, 5  ;;  %v1293_v16 = vshrl.u32 %v8383_v3, 16  ;;  %v1299_v55 = vshll.u32 %v8387_v14, 16  ;;  %1026 = vst [vmem:[#allocation2 + $0xac] sm:$0xf] %v842_v17 }
  0xa3   : > { %v1028_v18 = vsel %vm7974_vm8, %v843_v49, %v1027_v9  ;;  %7259 = vmatprep.mubr.bf16.mxu0 %v6370_v12  ;;  %v1291_v4 = vrot.slane %v1289_v15, 5  ;;  %v847_v22 = vrot.slane %v845_v10, 7  ;;  %v848_v23 = vshll.u32 %v6805_v45, 16  ;;  %v8402_v33 = vld [vmem:[#allocation2 + $0x4] sm:$0xf] }
  0xa4   : > { %v1286_v21 = vor.u32 %v1285_v31, %v1282_v24  ;;  %1029 = vst [vmem:[#allocation2 + $0xb0] sm:$0x1] %v1028_v18  ;;  %v1295_v11 = vrot.slane %v1293_v16, 4  ;;  %v1301_v26 = vrot.slane %v1299_v55, 5  ;;  %v853_v61 = vshrl.u32 %v6806_v8, 16 }
  0xa5   : > { %v856_v60 = vshll.u32 %v6806_v8, 16  ;;  %v850_v39 = vor.u32 %v848_v23, %v847_v22  ;;  %v851_v36 = vrot.slane %v847_v22, 4  ;;  %v10569_v6 = vsel %vm8398_vm13, 4294967295, %v10568_v6  ;;  %v8405_v56 = vld [vmem:[#allocation2] sm:$0xf] }
  0xa6   : > { %v1287_v35 = vrot.slane %v1286_v21, 4  ;;  %10570 = vst [vmem:[#allocation6_spill] sm:$0xff] %v10569_v6  ;;  %v6412_v42 = vrot.slane %v2090_v5, 9  ;;  %v1296_v38 = vor.u32 %v1295_v11, %v1291_v4  ;;  %v855_v27 = vrot.slane %v853_v61, 7  ;;  %v1034_v58 = vld [vmem:[#allocation2 + $0xbc] sm:$0x1] }
  0xa7   : > { %v2143_v45 = vrot.slane %v8402_v33, 5  ;;  %v1031_v9 = vsel %vm7991_vm10, %v850_v39, %v1030_v20  ;;  %v6413_v46 = vrot.slane %v2091_v34, 9  ;;  %v8413_v8 = vld [vmem:[#allocation2 + $0x10] sm:$0xf]  ;;  %v2092_v39 = vld [vmem:[#allocation2 + $0x18] sm:$0xe] }
  0xa8   : > { %v1292_v49 = vsel %vm7950_vm5, %v1287_v35, %v1291_v4  ;;  %v2150_v10 = vrot.slane %v8413_v8, 5  ;;  %v1297_v12 = vrot.slane %v1296_v38, 4  ;;  %v8416_v24 = vld [vmem:[#allocation2 + $0xa8] sm:$0xf]  ;;  %v858_v31 = vor.u32 %v856_v60, %v855_v27  ;;  %1032 = vst [vmem:[#allocation2 + $0xb4] sm:$0xf] %v1031_v9 }
  0xa9   : > { %v860_v15 = vrot.slane %v855_v27, 4  ;;  %v2144_v16 = vsel %vm8398_vm13, %v6412_v42, %v2143_v45  ;;  %v1448_v55 = vshrl.u32 %v8416_v24, 16  ;;  %v1451_v17 = vshll.u32 %v8416_v24, 16  ;;  %v8428_v21 = vld [vmem:[#allocation2 + $0xac] sm:$0xf] }
  0xaa   : > { %v2145_v18 = vrot.slane %v2143_v45, 4  ;;  %v8424_v20 = vsel %vm8398_vm13, %v6413_v46, %v2150_v10  ;;  %v1302_v5 = vsel %vm7950_vm5, %v1297_v12, %v1301_v26  ;;  %v859_v22 = vsel %vm7983_vm9, %v851_v36, %v858_v31  ;;  %v8448_v12 = vld [vmem:[#allocation2 + $0xc] sm:$0xf] }
  0xab   : > { %v8430_v4 = vld [vmem:[#allocation2 + $0xb0] sm:$0x1]  ;;  %v1035_v23 = vsel %vm7974_vm8, %v860_v15, %v1034_v58  ;;  %v2152_v11 = vrot.slane %v2150_v10, 4  ;;  %v6371_v61 = vcombine.low %v1292_v49, %v1302_v5  ;;  %v1450_v60 = vrot.slane %v1448_v55, 4  ;;  %1033 = vst [vmem:[#allocation2 + $0xb8] sm:$0xf] %v859_v22 }
  0xac   : > { %v1453_v34 = vrot.slane %v1451_v17, 5  ;;  %v1457_v35 = vshll.u32 %v8428_v21, 16  ;;  %1036 = vst [vmem:[#allocation2 + $0xbc] sm:$0x1] %v1035_v23  ;;  %v1461_v26 = vshrl.u32 %v8428_v21, 16  ;;  %v1467_v42 = vshll.u32 %v8430_v4, 16 }
  0xad   : > { %v2147_v36 = vsel %vm8398_vm13, %v2145_v18, %v2146_v37  ;;  %v2154_v38 = vsel %vm8398_vm13, %v2152_v11, %v2153_v13  ;;  %7260 = vmatmul.mubr.bf16.gmra.mxu0 %v6371_v61  ;;  %v2093_v58 = vld [vmem:[#allocation2 + $0x24] sm:$0xe]  ;;  %v6414_v37 = vrot.slane %v2092_v39, 9  ;;  %v8454_v13 = vld [vmem:[#allocation2 + $0x1c] sm:$0xf]  ;;  %v7719_v39 = vld [vmem:[%s10540_s3 + $0x130] sm:$0xff]  }
  0xae   : > { %v1454_v27 = vor.u32 %v1453_v34, %v1450_v60  ;;  %v1459_v45 = vrot.slane %v1457_v35, 5  ;;  %v6444_v49 = vcombine.low %v2144_v16, %v2147_v36  ;;  %v6445_v9 = vcombine.low %v8424_v20, %v2154_v38  ;;  %v7815_v16 = vld [vmem:[#allocation2 + $0x20] sm:$0x1]  ;;  %v8457_v17 = vld [vmem:[#allocation2 + $0x18] sm:$0xf] }
  0xaf   : > { %v1463_v46 = vrot.slane %v1461_v26, 4  ;;  %v1469_v10 = vrot.slane %v1467_v42, 5  ;;  %v8452_v2 = vld [vmem:[#allocation2 + $0xb4] sm:$0xf]  ;;  %v2157_v15 = vrot.slane %v8454_v13, 5  ;;  %v2160_v55 = vrot.slane %v7815_v16, 5 }
  0xb0   : > { %v1455_v31 = vrot.slane %v1454_v27, 4  ;;  %7343 = vmatprep.mubr.bf16.mxu0 %v6444_v49  ;;  %v1472_v5 = vshrl.u32 %v8452_v2, 16  ;;  %v1475_v22 = vshll.u32 %v8452_v2, 16  ;;  %v6415_v23 = vrot.slane %v2093_v58, 9  ;;  %v8467_v34 = vld [vmem:[#allocation2 + $0x28] sm:$0xf] }
  0xb1   : > { %v1464_v20 = vor.u32 %v1463_v46, %v1459_v45  ;;  %v2158_v61 = vsel %vm8398_vm13, %v6414_v37, %v2157_v15  ;;  %v2159_v60 = vrot.slane %v2157_v15, 4  ;;  %v2164_v35 = vrot.slane %v8467_v34, 5  ;;  %v2094_v26 = vld [vmem:[#allocation2 + $0x30] sm:$0xe]  ;;  %v2095_v16 = vld [vmem:[#allocation2 + $0x3c] sm:$0xe] }
  0xb2   : > { %v1460_v11 = vsel %vm7950_vm5, %v1455_v31, %v1459_v45  ;;  %v8473_v36 = vld [vmem:[#allocation2 + $0xb8] sm:$0xf]  ;;  %v1474_v27 = vrot.slane %v1472_v5, 4  ;;  %v8477_v45 = vld [vmem:[#allocation2 + $0x24] sm:$0xf]  ;;  %v1477_v46 = vrot.slane %v1475_v22, 5 }
  0xb3   : > { %v1465_v42 = vrot.slane %v1464_v20, 4  ;;  %v8475_v38 = vld [vmem:[#allocation2 + $0xbc] sm:$0x1]  ;;  %v1481_v37 = vshll.u32 %v8473_v36, 16  ;;  %v1485_v31 = vshrl.u32 %v8473_v36, 16  ;;  %v2161_v5 = vsel %vm8398_vm13, %v2159_v60, %v2160_v55 }
  0xb4   : > { %v1491_v15 = vshll.u32 %v8475_v38, 16  ;;  %v2165_v49 = vsel %vm8398_vm13, %v6415_v23, %v2164_v35  ;;  %v2166_v18 = vrot.slane %v2164_v35, 4  ;;  %v1478_v58 = vor.u32 %v1477_v46, %v1474_v27  ;;  %v8752_v6 = vld [vmem:[#allocation2 + $0x2c] sm:$0x1] }
  0xb5   : > { %v1470_v20 = vsel %vm7950_vm5, %v1465_v42, %v1469_v10  ;;  %v1483_v22 = vrot.slane %v1481_v37, 5  ;;  %v1487_v40 = vrot.slane %v1485_v31, 4  ;;  %7344 = vmatmul.mubr.bf16.vlgmr.msra.gmra.mxu0 %v6445_v9  ;;  %v6446_v1 = vcombine.low %v2158_v61, %v2161_v5  ;;  %v7820_v10 = vld [vmem:[#allocation2 + $0x2c] sm:$0x1] }
  0xb6   : > { %v6378_v7 = vcombine.low %v1460_v11, %v1470_v20  ;;  %v1493_v48 = vrot.slane %v1491_v15, 5  ;;  %7424 = vmatpush3.bf16.msra.mxu0 %v7819_v54  ;;  %v2167_v42 = vrot.slane %v7820_v10, 5  ;;  %v6416_v59 = vrot.slane %v2094_v26, 9  ;;  %v7723_v9 = vld [vmem:[%s10540_s3 + $0x128] sm:$0xff]  }
  0xb7   : > { %v1479_v55 = vrot.slane %v1478_v58, 4  ;;  %v1488_v60 = vor.u32 %v1487_v40, %v1483_v22  ;;  %7425 = vmatprep.subr.bf16.mxu0 %v7719_v39  ;;  %v2171_v23 = vrot.slane %v8246_v63, 5  ;;  %v2174_v11 = vrot.slane %v8248_v0, 5  ;;  %7347 = vmatprep.mubr.bf16.mxu0 %v6446_v1  ;;  %v2096_v26 = vld [vmem:[#allocation2 + $0x48] sm:$0xe] }
  0xb8   : > { %7275 = vmatprep.mubr.bf16.mxu1 %v6378_v7  ;;  %v2168_v54 = vsel %vm8398_vm13, %v2166_v18, %v2167_v42  ;;  %v6417_v61 = vrot.slane %v2095_v16, 9  ;;  %v2178_v35 = vrot.slane %v8269_v43, 5  ;;  %v2181_v7 = vrot.slane %v8271_v44, 5  ;;  %v2098_v44 = vld [vmem:[#allocation2 + $0x60] sm:$0xe] }
  0xb9   : > { %v1484_v40 = vsel %vm7950_vm5, %v1479_v55, %v1483_v22  ;;  %v1489_v27 = vrot.slane %v1488_v60, 4  ;;  %v6447_v58 = vcombine.low %v2165_v49, %v2168_v54  ;;  %v2172_v0 = vsel %vm8398_vm13, %v6416_v59, %v2171_v23  ;;  %v7727_v16 = vld [vmem:[%s10540_s3 + $0x120] sm:$0xff]   ;;  %v2099_v20 = vld [vmem:[#allocation2 + $0x6c] sm:$0xe] }
  0xba   : > { %7426 = vmatpush3.bf16.msra.mxu0 %v7719_v39  ;;  %v2173_v46 = vrot.slane %v2171_v23, 4  ;;  %v8510_v1 = vsel %vm8398_vm13, %v6417_v61, %v2178_v35  ;;  %v2180_v18 = vrot.slane %v2178_v35, 4  ;;  %v6418_v15 = vrot.slane %v2096_v26, 9  ;;  %v2097_v39 = vld [vmem:[#allocation2 + $0x54] sm:$0xe] }
  0xbb   : > { %v1494_v31 = vsel %vm7950_vm5, %v1489_v27, %v1493_v48  ;;  %7427 = vmatprep.subr.bf16.mxu0 %v7723_v9  ;;  %v2185_v49 = vrot.slane %v8352_v50, 5  ;;  %v2188_v59 = vrot.slane %v8354_v52, 5  ;;  %v6419_v23 = vrot.slane %v2097_v39, 9  ;;  %v8542_v27 = vld [vmem:[#allocation2 + $0x60] sm:$0xf]  ;;  %v8563_v39 = vld [vmem:[%s10540_s3 + $0xf0] sm:$0xff]  }
  0xbc   : > { %v6379_v5 = vcombine.low %v1484_v40, %v1494_v31  ;;  %v2175_v22 = vsel %vm8398_vm13, %v2173_v46, %v2174_v11  ;;  %v2182_v10 = vsel %vm8398_vm13, %v2180_v18, %v2181_v7  ;;  %v2192_v54 = vrot.slane %v8383_v3, 5  ;;  %v8539_v40 = vld [vmem:[#allocation2 + $0x64] sm:$0xf]  ;;  %v8557_v31 = vld [vmem:[#allocation2 + $0x70] sm:$0xf] }
  0xbd   : > { %7348 = vmatmul.mubr.bf16.gmra.mxu0 %v6447_v58  ;;  %v6448_v42 = vcombine.low %v2172_v0, %v2175_v22  ;;  %v6449_v52 = vcombine.low %v8510_v1, %v2182_v10  ;;  %v2186_v55 = vsel %vm8398_vm13, %v6418_v15, %v2185_v49  ;;  %v2187_v60 = vrot.slane %v2185_v49, 4  ;;  %v7731_v58 = vld [vmem:[%s10540_s3 + $0x118] sm:$0xff]   ;;  %v7824_v49 = vld [vmem:[#allocation2 + $0x74] sm:$0x1] }
  0xbe   : > { %7276 = vmatmul.mubr.bf16.gmra.mxu1 %v6379_v5  ;;  %7428 = vmatpush3.bf16.msra.mxu0 %v7723_v9  ;;  %v2195_v11 = vrot.slane %v8387_v14, 5  ;;  %v10571_v35 = vcombine.low %v8405_v56, %v8402_v33  ;;  %v6420_v26 = vrot.slane %v2098_v44, 9  ;;  %v2199_v9 = vrot.slane %v8539_v40, 5  ;;  %v2100_v33 = vld [vmem:[#allocation2 + $0x78] sm:$0xe] }
  0xbf   : > { %7351 = vmatprep.mubr.bf16.mxu0 %v6448_v42  ;;  %v2189_v7 = vsel %vm8398_vm13, %v2187_v60, %v2188_v59  ;;  %v8551_v0 = vsel %vm8398_vm13, %v6419_v23, %v2192_v54  ;;  %v2194_v46 = vrot.slane %v2192_v54, 4  ;;  %7429 = vmatprep.subr.bf16.mxu0 %v7727_v16  ;;  %v6421_v1 = vrot.slane %v2099_v20, 9  ;;  %v8569_v20 = vld [vmem:[#allocation2 + $0x6c] sm:$0xf]  ;;  %v8573_v42 = vld [vmem:[#allocation2 + $0x7c] sm:$0xf] }
  0xc0   : > { %7295 = vmatprep.mubr.bf16.mxu1 %v10571_v35  ;;  %v6450_v56 = vcombine.low %v2186_v55, %v2189_v7  ;;  %v8555_v18 = vsel %vm8398_vm13, %v6420_v26, %v2199_v9  ;;  %v2201_v44 = vrot.slane %v2199_v9, 4  ;;  %v2206_v15 = vrot.slane %v8557_v31, 5  ;;  %v2101_v60 = vld [vmem:[#allocation2 + $0x84] sm:$0xe]  ;;  %v2102_v23 = vld [vmem:[#allocation2 + $0x90] sm:$0xe] }
  0xc1   : > { %v2209_v59 = vrot.slane %v7824_v49, 5  ;;  %v8567_v5 = vsel %vm8398_vm13, %v2194_v46, %v2195_v11  ;;  %v6422_v10 = vrot.slane %v2100_v33, 9  ;;  %v2213_v55 = vrot.slane %v8573_v42, 5  ;;  %v7735_v26 = vld [vmem:[%s10540_s3 + $0x110] sm:$0xff]   ;;  %v2103_v9 = vld [vmem:[#allocation2 + $0x9c] sm:$0xe] }
  0xc2   : > { %7430 = vmatpush3.bf16.msra.mxu0 %v7727_v16  ;;  %v6451_v54 = vcombine.low %v8551_v0, %v8567_v5  ;;  %v10572_v35 = vrot.slane %v8059_v25, 5  ;;  %v8586_v11 = vsel %vm8398_vm13, %v6421_v1, %v2206_v15  ;;  %v2208_v7 = vrot.slane %v2206_v15, 4  ;;  %v8601_v15 = vld [vmem:[#allocation2 + $0x78] sm:$0xf]  ;;  %v8605_v14 = vld [vmem:[#allocation2 + $0x88] sm:$0xf] }
  0xc3   : > { %7431 = vmatprep.subr.bf16.mxu0 %v7731_v58  ;;  %v8595_v25 = vsel %vm8398_vm13, %v6422_v10, %v2213_v55  ;;  %v2215_v46 = vrot.slane %v2213_v55, 4  ;;  %v6423_v22 = vrot.slane %v2101_v60, 9  ;;  %v2220_v61 = vrot.slane %v8605_v14, 5  ;;  %v7830_v60 = vld [vmem:[#allocation2 + $0x8c] sm:$0x1]  ;;  %v7729_v5 = vld [vmem:[%s10540_s3 + $0xd8] sm:$0xff]  }
  0xc4   : > { %v8582_v16 = vsel %vm8398_vm13, %v2201_v44, %v10572_v35  ;;  %v7827_v44 = vld [vmem:[#allocation2 + $0x80] sm:$0x1]  ;;  %v8599_v1 = vsel %vm8398_vm13, %v2208_v7, %v2209_v59  ;;  %v10573_v10 = vcombine.low %v8448_v12, %v8413_v8  ;;  %v2223_v7 = vrot.slane %v7830_v60, 5  ;;  %v2104_v12 = vld [vmem:[#allocation2 + $0xa8] sm:$0xe] }
  0xc5   : > { %v6452_v33 = vcombine.low %v8555_v18, %v8582_v16  ;;  %v2216_v49 = vrot.slane %v7827_v44, 5  ;;  %7352 = vmatmul.mubr.bf16.gmra.mxu0 %v6449_v52  ;;  %v8614_v52 = vld [vmem:[%s10540_s3 + $0xe8] sm:$0xff]   ;;  %v8622_v44 = vld [vmem:[#allocation2 + $0x84] sm:$0xf]  ;;  %v2222_v60 = vrot.slane %v2220_v61, 4  ;;  %v6424_v35 = vrot.slane %v2102_v23, 9 }
  0xc6   : > { %7296 = vmatmul.mubr.bf16.vlgmr.msra.gmra.mxu1 %v10573_v10  ;;  %7355 = vmatprep.mubr.bf16.mxu0 %v6450_v56  ;;  %v7832_v10 = vld [vmem:[%s10540_s3 + $0xf8] sm:$0xff]   ;;  %v10574_v56 = vcombine.low %v8457_v17, %v8454_v13  ;;  %v2227_v8 = vrot.slane %v8296_v51, 5  ;;  %v6425_v17 = vrot.slane %v2103_v9, 9  ;;  %v2105_v23 = vld [vmem:[#allocation2 + $0xb4] sm:$0xe]  ;;  %v2241_v9 = vrot.slane %v8428_v21, 5 }
  0xc7   : > { %v8620_v55 = vsel %vm8398_vm13, %v2215_v46, %v2216_v49  ;;  %7376 = vmatpush3.bf16.msra.mxu1 %v7832_v10  ;;  %v8636_v49 = vsel %vm8398_vm13, %v6423_v22, %v2220_v61  ;;  %7432 = vmatpush3.bf16.msra.mxu0 %v7731_v58  ;;  %v2230_v10 = vrot.slane %v8298_v41, 5  ;;  %v8648_v22 = vsel %vm8398_vm13, %v2222_v60, %v2223_v7  ;;  %v2961_v7 = vld [vmem:[#allocation2 + $0xc] sm:$0xf] }
  0xc8   : > { %7299 = vmatprep.mubr.bf16.mxu1 %v10574_v56  ;;  %7377 = vmatprep.subr.bf16.mxu1 %v8563_v39  ;;  %v7739_v56 = vld [vmem:[%s10540_s3 + $0x108] sm:$0xff]   ;;  %v2234_v61 = vrot.slane %v8337_v19, 5  ;;  %v2237_v58 = vrot.slane %v8339_v57, 5  ;;  %v8658_v13 = vsel %vm8398_vm13, %v6424_v35, %v2227_v8  ;;  %v2229_v48 = vrot.slane %v2227_v8, 4  ;;  %v7725_v57 = vld [vmem:[%s10540_s3 + $0xe0] sm:$0xff]  }
  0xc9   : > { %7433 = vmatprep.subr.bf16.mxu0 %v7735_v26  ;;  %v6426_v46 = vrot.slane %v2104_v12, 9  ;;  %v2244_v37 = vrot.slane %v8430_v4, 5  ;;  %v6427_v8 = vrot.slane %v2105_v23, 9  ;;  %v2248_v12 = vrot.slane %v8473_v36, 5  ;;  %v2964_v23 = vld [vmem:[#allocation2 + $0x18] sm:$0xf] }
  0xca   : > { %v8666_v60 = vsel %vm8398_vm13, %v6425_v17, %v2234_v61  ;;  %v2236_v41 = vrot.slane %v2234_v61, 4  ;;  %v8673_v35 = vsel %vm8398_vm13, %v2229_v48, %v2230_v10  ;;  %v8678_v17 = vld [vmem:[#allocation2 + $0x10] sm:$0xf]  ;;  %v2243_v10 = vrot.slane %v2241_v9, 4  ;;  %v7743_v61 = vld [vmem:[%s10540_s3 + $0x100] sm:$0xff]  }
  0xcb   : > { %7378 = vmatpush3.bf16.msra.mxu1 %v8563_v39  ;;  %7434 = vmatpush3.bf16.msra.mxu0 %v7735_v26  ;;  %v8691_v48 = vsel %vm8398_vm13, %v6426_v46, %v2241_v9  ;;  %v10575_v0 = vcombine.low %v8477_v45, %v8467_v34  ;;  %v8709_v46 = vsel %vm8398_vm13, %v6427_v8, %v2248_v12  ;;  %v8712_v34 = vld [vmem:[#allocation2 + $0x14] sm:$0x1]  ;;  %v8714_v45 = vld [vmem:[#allocation2 + $0x1c] sm:$0xf]  ;;  %v3010_v9 = vshrl.u32 %v2961_v7, 16 }
  0xcc   : > { %7379 = vmatprep.subr.bf16.mxu1 %v8614_v52  ;;  %v8687_v26 = vsel %vm8398_vm13, %v2236_v41, %v2237_v58  ;;  %7435 = vmatprep.subr.bf16.mxu0 %v7739_v56  ;;  %v2250_v58 = vrot.slane %v2248_v12, 4  ;;  %v2251_v41 = vrot.slane %v8475_v38, 5  ;;  %10576 = vst [vmem:[#allocation7_spill] sm:$0xff] %v8712_v34  ;;  %10577 = vst [vmem:[#allocation8_spill] sm:$0xff] %v8714_v45  ;;  %v3013_v8 = vshll.u32 %v2961_v7, 16 }
  0xcd   : > { %7356 = vmatmul.mubr.bf16.gmra.mxu0 %v6451_v54  ;;  %v10578_v18 = vcombine.low %v8237_v47, %v8246_v63  ;;  %v8722_v16 = vsel %vm8398_vm13, %v2243_v10, %v2244_v37  ;;  %v8726_v38 = vld [vmem:[#allocation2 + $0x20] sm:$0x1]  ;;  %v3019_v63 = vshll.u32 %v8678_v17, 16  ;;  %v3023_v37 = vshrl.u32 %v8678_v17, 16  ;;  %v8744_v12 = vld [vmem:[#allocation2 + $0x28] sm:$0xf] }
  0xce   : > { %7300 = vmatmul.mubr.bf16.gmra.mxu1 %v10575_v0  ;;  %7359 = vmatprep.mubr.bf16.mxu0 %v6452_v33  ;;  %10579 = vst [vmem:[#allocation9_spill] sm:$0xff] %v8726_v38  ;;  %v8732_v47 = vsel %vm8398_vm13, %v2250_v58, %v2251_v41  ;;  %v3012_v7 = vrot.slane %v3010_v9, 4  ;;  %v3015_v0 = vrot.slane %v3013_v8, 5  ;;  %v3034_v33 = vshrl.u32 %v2964_v23, 16  ;;  %v7733_v8 = vld [vmem:[%s10540_s3 + $0xd0] sm:$0xff]  }
  0xcf   : > { %7303 = vmatprep.mubr.bf16.mxu1 %v10578_v18  ;;  %7380 = vmatpush3.bf16.msra.mxu1 %v8614_v52  ;;  %v2967_v52 = vld [vmem:[#allocation2 + $0x24] sm:$0xf]  ;;  %v8742_v18 = vld [vmem:[%s10540_s3 + $0x1b8] sm:$0xff]   ;;  %v3021_v58 = vrot.slane %v3019_v63, 5  ;;  %v3025_v41 = vrot.slane %v3023_v37, 4  ;;  %v3037_v39 = vshll.u32 %v2964_v23, 16 }
  0xd0   : > { %7381 = vmatprep.subr.bf16.mxu1 %v7725_v57  ;;  %7436 = vmatpush3.bf16.msra.mxu0 %v7739_v56  ;;  %v3029_v56 = vshll.u32 %v8712_v34, 16  ;;  %v3016_v54 = vor.u32 %v3015_v0, %v3012_v7  ;;  %v3043_v10 = vshll.u32 %v8714_v45, 16  ;;  %v3047_v9 = vshrl.u32 %v8714_v45, 16  ;;  %v2970_v34 = vld [vmem:[#allocation2 + $0x30] sm:$0xf] }
  0xd1   : > { %7437 = vmatprep.subr.bf16.mxu0 %v7743_v61  ;;  %v3026_v59 = vor.u32 %v3025_v41, %v3021_v58  ;;  %v3036_v63 = vrot.slane %v3034_v33, 4  ;;  %v3039_v37 = vrot.slane %v3037_v39, 5  ;;  %v3053_v23 = vshll.u32 %v8726_v38, 16 }
  0xd2   : > { %v3031_v4 = vrot.slane %v3029_v56, 5  ;;  %v3017_v7 = vrot.slane %v3016_v54, 4  ;;  %v3045_v0 = vrot.slane %v3043_v10, 5  ;;  %v3049_v56 = vrot.slane %v3047_v9, 4 }
  0xd3   : > { %7382 = vmatpush3.bf16.msra.mxu1 %v7725_v57  ;;  %v10580_v57 = vcombine.low %v8586_v11, %v8599_v1  ;;  %v3058_v45 = vshrl.u32 %v2967_v52, 16  ;;  %v10582_v39 = vcombine.low %v8595_v25, %v8620_v55  ;;  %v3027_v33 = vrot.slane %v3026_v59, 4  ;;  %v7737_v25 = vld [vmem:[%s10540_s3 + $0xc8] sm:$0xff]  }
  0xd4   : > { %7383 = vmatprep.subr.bf16.mxu1 %v7729_v5  ;;  %7438 = vmatpush3.bf16.msra.mxu0 %v7743_v61  ;;  %v10581_v61 = vcombine.low %v8263_v29, %v8269_v43  ;;  %v3040_v41 = vor.u32 %v3039_v37, %v3036_v63  ;;  %v3055_v38 = vrot.slane %v3053_v23, 5  ;;  %v3061_v11 = vshll.u32 %v2967_v52, 16  ;;  %v8770_v43 = vld [vmem:[#allocation2 + $0x34] sm:$0xf]  ;;  %v2973_v37 = vld [vmem:[#allocation2 + $0x3c] sm:$0xf] }
  0xd5   : > { %7360 = vmatmul.mubr.bf16.gmra.mxu0 %v10580_v57  ;;  %7519 = vmatprep.subr.bf16.mxu0 %v8742_v18  ;;  %v10583_v1 = vcombine.low %v8348_v30, %v8352_v50  ;;  %v3022_v54 = vsel %vm7950_vm5, %v3017_v7, %v3021_v58  ;;  %v3050_v10 = vor.u32 %v3049_v56, %v3045_v0  ;;  %v3060_v9 = vrot.slane %v3058_v45, 4 }
  0xd6   : > { %7304 = vmatmul.mubr.bf16.gmra.mxu1 %v10581_v61  ;;  %7363 = vmatprep.mubr.bf16.mxu0 %v10582_v39  ;;  %v3067_v29 = vshll.u32 %v8744_v12, 16  ;;  %v3032_v59 = vsel %vm7950_vm5, %v3027_v33, %v3031_v4  ;;  %v3041_v30 = vrot.slane %v3040_v41, 4  ;;  %v3063_v50 = vrot.slane %v3061_v11, 5  ;;  %v8785_v4 = vld [vmem:[#allocation2 + $0x40] sm:$0xf] }
  0xd7   : > { %7307 = vmatprep.mubr.bf16.mxu1 %v10583_v1  ;;  %7384 = vmatpush3.bf16.msra.mxu1 %v7729_v5  ;;  %v3071_v55 = vshrl.u32 %v8744_v12, 16  ;;  %v8778_v5 = vld [vmem:[#allocation2 + $0x38] sm:$0x1]  ;;  %v8780_v52 = vcombine.low %v3022_v54, %v3032_v59  ;;  %v3051_v45 = vrot.slane %v3050_v10, 4  ;;  %v3077_v63 = vshll.u32 %v8752_v6, 16  ;;  %v7741_v61 = vld [vmem:[%s10540_s3 + $0xc0] sm:$0xff]  }
  0xd8   : > { %7385 = vmatprep.subr.bf16.mxu1 %v7733_v8  ;;  %v3069_v58 = vrot.slane %v3067_v29, 5  ;;  %v3046_v23 = vsel %vm7950_vm5, %v3041_v30, %v3045_v0  ;;  %v3064_v57 = vor.u32 %v3063_v50, %v3060_v9  ;;  %v3082_v56 = vshrl.u32 %v2970_v34, 16  ;;  %v8800_v30 = vld [vmem:[#allocation2 + $0x44] sm:$0x1] }
  0xd9   : > { %v3073_v7 = vrot.slane %v3071_v55, 4  ;;  %v3056_v39 = vsel %vm7950_vm5, %v3051_v45, %v3055_v38  ;;  %v3079_v33 = vrot.slane %v3077_v63, 5  ;;  %v3085_v41 = vshll.u32 %v2970_v34, 16  ;;  %v2976_v34 = vld [vmem:[#allocation2 + $0x48] sm:$0xf] }
  0xda   : > { %v3091_v11 = vshll.u32 %v8770_v43, 16  ;;  %v8793_v1 = vcombine.low %v3046_v23, %v3056_v39  ;;  %v3065_v0 = vrot.slane %v3064_v57, 4  ;;  %v3084_v10 = vrot.slane %v3082_v56, 4  ;;  %v8810_v23 = vld [vmem:[#allocation2 + $0x4c] sm:$0xf] }
  0xdb   : > { %7386 = vmatpush3.bf16.msra.mxu1 %v7733_v8  ;;  %v3074_v54 = vor.u32 %v3073_v7, %v3069_v58  ;;  %v10584_v8 = vcombine.low %v8636_v49, %v8648_v22  ;;  %v3087_v9 = vrot.slane %v3085_v41, 5  ;;  %v3095_v59 = vshrl.u32 %v8770_v43, 16 }
  0xdc   : > { %7387 = vmatprep.subr.bf16.mxu1 %v7737_v25  ;;  %v3093_v29 = vrot.slane %v3091_v11, 5  ;;  %v3101_v38 = vshll.u32 %v8778_v5, 16  ;;  %v10585_v50 = vcombine.low %v8377_v32, %v8383_v3  ;;  %v10586_v55 = vcombine.low %v8658_v13, %v8673_v35  ;;  %v8819_v13 = vld [vmem:[%s10540_s3 + $0x178] sm:$0xff]   ;;  %v8826_v11 = vld [vmem:[#allocation2 + $0x50] sm:$0x1] }
  0xdd   : > { %7364 = vmatmul.mubr.bf16.gmra.mxu0 %v10584_v8  ;;  %v3070_v49 = vsel %vm7950_vm5, %v3065_v0, %v3069_v58  ;;  %v3075_v22 = vrot.slane %v3074_v54, 4  ;;  %v3106_v45 = vshrl.u32 %v2973_v37, 16  ;;  %v3109_v63 = vshll.u32 %v2973_v37, 16 }
  0xde   : > { %7308 = vmatmul.mubr.bf16.gmra.mxu1 %v10585_v50  ;;  %7367 = vmatprep.mubr.bf16.mxu0 %v10586_v55  ;;  %v10587_v57 = vcombine.low %v8542_v27, %v8539_v40  ;;  %v3088_v7 = vor.u32 %v3087_v9, %v3084_v10  ;;  %v3097_v32 = vrot.slane %v3095_v59, 4  ;;  %v3103_v3 = vrot.slane %v3101_v38, 5  ;;  %v2979_v9 = vld [vmem:[#allocation2 + $0x54] sm:$0xf]  ;;  %v8832_v55 = vld [vmem:[#allocation2 + $0x58] sm:$0xf] }
  0xdf   : > { %7388 = vmatpush3.bf16.msra.mxu1 %v7737_v25  ;;  %v3115_v56 = vshll.u32 %v8785_v4, 16  ;;  %v3080_v35 = vsel %vm7950_vm5, %v3075_v22, %v3079_v33  ;;  %v3108_v58 = vrot.slane %v3106_v45, 4  ;;  %v3111_v37 = vrot.slane %v3109_v63, 5 }
  0xe0   : > { %7311 = vmatprep.mubr.bf16.mxu1 %v10587_v57  ;;  %7389 = vmatprep.subr.bf16.mxu1 %v7741_v61  ;;  %v3119_v40 = vshrl.u32 %v8785_v4, 16  ;;  %v8824_v27 = vcombine.low %v3070_v49, %v3080_v35  ;;  %v3089_v25 = vrot.slane %v3088_v7, 4  ;;  %v3098_v39 = vor.u32 %v3097_v32, %v3093_v29 }
  0xe1   : > { %v3117_v41 = vrot.slane %v3115_v56, 5  ;;  %v3112_v0 = vor.u32 %v3111_v37, %v3108_v58  ;;  %v3125_v10 = vshll.u32 %v8800_v30, 16  ;;  %v3130_v8 = vshrl.u32 %v2976_v34, 16  ;;  %v8852_v58 = vld [vmem:[#allocation2 + $0x5c] sm:$0x1] }
  0xe2   : > { %v3121_v54 = vrot.slane %v3119_v40, 4  ;;  %v3094_v33 = vsel %vm7950_vm5, %v3089_v25, %v3093_v29  ;;  %v3099_v59 = vrot.slane %v3098_v39, 4  ;;  %v3133_v38 = vshll.u32 %v2976_v34, 16  ;;  %v2982_v37 = vld [vmem:[#allocation2 + $0x60] sm:$0xf] }
  0xe3   : > { %7390 = vmatpush3.bf16.msra.mxu1 %v7741_v61  ;;  %v3139_v50 = vshll.u32 %v8810_v23, 16  ;;  %v3113_v49 = vrot.slane %v3112_v0, 4  ;;  %v3127_v45 = vrot.slane %v3125_v10, 5  ;;  %v3132_v63 = vrot.slane %v3130_v8, 4 }
  0xe4   : > { %7471 = vmatprep.subr.bf16.mxu1 %v8819_v13  ;;  %v3122_v22 = vor.u32 %v3121_v54, %v3117_v41  ;;  %v10588_v57 = vcombine.low %v8666_v60, %v8687_v26  ;;  %v3104_v61 = vsel %vm7950_vm5, %v3099_v59, %v3103_v3  ;;  %v3135_v29 = vrot.slane %v3133_v38, 5 }
  0xe5   : > { %v3141_v7 = vrot.slane %v3139_v50, 5  ;;  %v3143_v34 = vshrl.u32 %v8810_v23, 16  ;;  %v10589_v32 = vcombine.low %v8569_v20, %v8557_v31  ;;  %v10590_v56 = vcombine.low %v8691_v48, %v8722_v16  ;;  %v8857_v16 = vld [vmem:[#allocation2 + $0x64] sm:$0xf]  ;;  %v8866_v50 = vld [vmem:[#allocation2 + $0x68] sm:$0x1] }
  0xe6   : > { %7368 = vmatmul.mubr.bf16.gmra.mxu0 %v10588_v57  ;;  %v8847_v35 = vcombine.low %v3094_v33, %v3104_v61  ;;  %v3118_v60 = vsel %vm7950_vm5, %v3113_v49, %v3117_v41  ;;  %v3123_v26 = vrot.slane %v3122_v22, 4  ;;  %v3149_v3 = vshll.u32 %v8826_v11, 16  ;;  %v2985_v49 = vld [vmem:[#allocation2 + $0x6c] sm:$0xf]  ;;  %v8870_v61 = vld [vmem:[#allocation2 + $0x70] sm:$0xf] }
  0xe7   : > { %7312 = vmatmul.mubr.bf16.gmra.mxu1 %v10589_v32  ;;  %7371 = vmatprep.mubr.bf16.mxu0 %v10590_v56  ;;  %v10591_v40 = vcombine.low %v8601_v15, %v8573_v42  ;;  %v3136_v31 = vor.u32 %v3135_v29, %v3132_v63  ;;  %v3145_v20 = vrot.slane %v3143_v34, 4  ;;  %v3154_v25 = vshrl.u32 %v2979_v9, 16 }
  0xe8   : > { %v3157_v48 = vshll.u32 %v2979_v9, 16  ;;  %v3128_v39 = vsel %vm7950_vm5, %v3123_v26, %v3127_v45  ;;  %v3151_v41 = vrot.slane %v3149_v3, 5  ;;  %v3163_v0 = vshll.u32 %v8832_v55, 16 }
  0xe9   : > { %7315 = vmatprep.mubr.bf16.mxu1 %v10591_v40  ;;  %v3167_v54 = vshrl.u32 %v8832_v55, 16  ;;  %v8863_v10 = vcombine.low %v3118_v60, %v3128_v39  ;;  %v3137_v8 = vrot.slane %v3136_v31, 4  ;;  %v3146_v33 = vor.u32 %v3145_v20, %v3141_v7 }
  0xea   : > { %v3156_v42 = vrot.slane %v3154_v25, 4  ;;  %v3159_v15 = vrot.slane %v3157_v48, 5  ;;  %v3165_v59 = vrot.slane %v3163_v0, 5  ;;  %v3173_v9 = vshll.u32 %v8852_v58, 16 }
  0xeb   : > { %v3169_v38 = vrot.slane %v3167_v54, 4  ;;  %v3142_v22 = vsel %vm7950_vm5, %v3137_v8, %v3141_v7  ;;  %v3147_v45 = vrot.slane %v3146_v33, 4  ;;  %v3178_v63 = vshrl.u32 %v2982_v37, 16 }
  0xec   : > { %v3181_v57 = vshll.u32 %v2982_v37, 16  ;;  %v3160_v29 = vor.u32 %v3159_v15, %v3156_v42  ;;  %v3175_v32 = vrot.slane %v3173_v9, 5  ;;  %v3187_v56 = vshll.u32 %v8857_v16, 16 }
  0xed   : > { %v3170_v34 = vor.u32 %v3169_v38, %v3165_v59  ;;  %v10592_v60 = vcombine.low %v8709_v46, %v8732_v47  ;;  %v3152_v26 = vsel %vm7950_vm5, %v3147_v45, %v3151_v41  ;;  %v3180_v3 = vrot.slane %v3178_v63, 4  ;;  %v8885_v46 = vld [vmem:[#allocation2 + $0x74] sm:$0x1]  ;;  %v2988_v47 = vld [vmem:[#allocation2 + $0x78] sm:$0xf] }
  0xee   : > { %v3183_v40 = vrot.slane %v3181_v57, 5  ;;  %v3191_v7 = vshrl.u32 %v8857_v16, 16  ;;  %v10593_v37 = vcombine.low %v8622_v44, %v8605_v14  ;;  %v8883_v31 = vcombine.low %v3142_v22, %v3152_v26  ;;  %v8901_v57 = vld [vmem:[#allocation2 + $0x80] sm:$0x1] }
  0xef   : > { %7372 = vmatmul.mubr.bf16.gmra.mxu0 %v10592_v60  ;;  %v3161_v20 = vrot.slane %v3160_v29, 4  ;;  %v3171_v25 = vrot.slane %v3170_v34, 4  ;;  %v3189_v48 = vrot.slane %v3187_v56, 5  ;;  %v10594_v39 = vcombine.low %v8294_v62, %v8296_v51  ;;  %v8898_v51 = vld [vmem:[#allocation2 + $0x7c] sm:$0xf]  ;;  %v7751_v56 = vld [vmem:[%s10540_s3 + $0x1b0] sm:$0xff]  }
  0xf0   : > { %7316 = vmatmul.mubr.bf16.gmra.mxu1 %v10593_v37  ;;  %7439 = vmatprep.mubr.bf16.mxu0 %v8780_v52  ;;  %v3184_v41 = vor.u32 %v3183_v40, %v3180_v3  ;;  %v3193_v0 = vrot.slane %v3191_v7, 4  ;;  %v3197_v54 = vshll.u32 %v8866_v50, 16  ;;  %v3202_v14 = vshrl.u32 %v2985_v49, 16  ;;  %v8910_v7 = vld [vmem:[#allocation2 + $0x88] sm:$0xf] }
  0xf1   : > { %7319 = vmatprep.mubr.bf16.mxu1 %v10594_v39  ;;  %v3166_v44 = vsel %vm7950_vm5, %v3161_v20, %v3165_v59  ;;  %v3176_v52 = vsel %vm7950_vm5, %v3171_v25, %v3175_v32  ;;  %v3205_v8 = vshll.u32 %v2985_v49, 16  ;;  %v3211_v33 = vshll.u32 %v8870_v61, 16  ;;  %v2991_v59 = vld [vmem:[#allocation2 + $0x84] sm:$0xf]  ;;  %v7755_v37 = vld [vmem:[%s10540_s3 + $0x1a8] sm:$0xff]  }
  0xf2   : > { %v8896_v42 = vcombine.low %v3166_v44, %v3176_v52  ;;  %v3185_v15 = vrot.slane %v3184_v41, 4  ;;  %v3194_v38 = vor.u32 %v3193_v0, %v3189_v48  ;;  %v3199_v62 = vrot.slane %v3197_v54, 5 }
  0xf3   : > { %v3204_v9 = vrot.slane %v3202_v14, 4  ;;  %v3207_v22 = vrot.slane %v3205_v8, 5  ;;  %v3213_v45 = vrot.slane %v3211_v33, 5  ;;  %v3215_v63 = vshrl.u32 %v8870_v61, 16  ;;  %v8925_v14 = vld [vmem:[#allocation2 + $0x8c] sm:$0x1] }
  0xf4   : > { %v3190_v49 = vsel %vm7950_vm5, %v3185_v15, %v3189_v48  ;;  %v3195_v29 = vrot.slane %v3194_v38, 4  ;;  %v3221_v34 = vshll.u32 %v8885_v46, 16  ;;  %v3226_v32 = vshrl.u32 %v2988_v47, 16 }
  0xf5   : > { %v3208_v60 = vor.u32 %v3207_v22, %v3204_v9  ;;  %v3217_v26 = vrot.slane %v3215_v63, 4  ;;  %v3229_v3 = vshll.u32 %v2988_v47, 16  ;;  %v3235_v40 = vshll.u32 %v8898_v51, 16  ;;  %v8934_v9 = vld [vmem:[#allocation2 + $0x94] sm:$0xf]  ;;  %v7744_v63 = vld [vmem:[#allocation2 + $0xc] sm:$0xff]  }
  0xf6   : > { %v3200_v20 = vsel %vm7950_vm5, %v3195_v29, %v3199_v62  ;;  %v3223_v25 = vrot.slane %v3221_v34, 5  ;;  %v3228_v48 = vrot.slane %v3226_v32, 4  ;;  %v3239_v39 = vshrl.u32 %v8898_v51, 16  ;;  %v2994_v62 = vld [vmem:[#allocation2 + $0x90] sm:$0xf] }
  0xf7   : > { %7440 = vmatmul.mubr.bf16.vlgmr.msra.gmra.mxu0 %v8793_v1  ;;  %v10595_v47 = vcombine.low %v8329_v53, %v8337_v19  ;;  %v8923_v41 = vcombine.low %v3190_v49, %v3200_v20  ;;  %v3209_v1 = vrot.slane %v3208_v60, 4  ;;  %v3218_v0 = vor.u32 %v3217_v26, %v3213_v45  ;;  %v8940_v32 = vld [vmem:[#allocation2 + $0x98] sm:$0x1] }
  0xf8   : > { %7520 = vmatpush3.bf16.msra.mxu0 %v8742_v18  ;;  %v3231_v54 = vrot.slane %v3229_v3, 5  ;;  %v10596_v44 = vcombine.low %v8416_v24, %v8428_v21  ;;  %7443 = vmatprep.mubr.bf16.mxu0 %v8824_v27  ;;  %v3237_v52 = vrot.slane %v3235_v40, 5  ;;  %v3241_v8 = vrot.slane %v3239_v39, 4  ;;  %v2997_v40 = vld [vmem:[#allocation2 + $0x9c] sm:$0xf] }
  0xf9   : > { %7320 = vmatmul.mubr.bf16.gmra.mxu1 %v10595_v47  ;;  %v3245_v53 = vshll.u32 %v8901_v57, 16  ;;  %v3250_v19 = vshrl.u32 %v2991_v59, 16  ;;  %7521 = vmatprep.subr.bf16.mxu0 %v7751_v56  ;;  %v3214_v18 = vsel %vm7950_vm5, %v3209_v1, %v3213_v45  ;;  %v3219_v33 = vrot.slane %v3218_v0, 4 }
  0xfa   : > { %7323 = vmatprep.mubr.bf16.mxu1 %v10596_v44  ;;  %v3232_v15 = vor.u32 %v3231_v54, %v3228_v48  ;;  %v3253_v38 = vshll.u32 %v2991_v59, 16  ;;  %v3242_v22 = vor.u32 %v3241_v8, %v3237_v52  ;;  %v3259_v27 = vshll.u32 %v8910_v7, 16  ;;  %v7759_v59 = vld [vmem:[%s10540_s3 + $0x1a0] sm:$0xff]  }
  0xfb   : > { %v3247_v24 = vrot.slane %v3245_v53, 5  ;;  %v3252_v21 = vrot.slane %v3250_v19, 4  ;;  %v3224_v49 = vsel %vm7950_vm5, %v3219_v33, %v3223_v25  ;;  %v3263_v45 = vshrl.u32 %v8910_v7, 16 }
  0xfc   : > { %7522 = vmatpush3.bf16.msra.mxu0 %v7751_v56  ;;  %v3233_v29 = vrot.slane %v3232_v15, 4  ;;  %v3255_v34 = vrot.slane %v3253_v38, 5  ;;  %v8945_v60 = vcombine.low %v3214_v18, %v3224_v49  ;;  %v3243_v26 = vrot.slane %v3242_v22, 4  ;;  %v8960_v18 = vld [vmem:[#allocation2 + $0xa0] sm:$0xf] }
  0xfd   : > { %7523 = vmatprep.subr.bf16.mxu0 %v7755_v37  ;;  %v3261_v3 = vrot.slane %v3259_v27, 5  ;;  %v3269_v56 = vshll.u32 %v8925_v14, 16  ;;  %v3265_v48 = vrot.slane %v3263_v45, 4  ;;  %v3274_v39 = vshrl.u32 %v2994_v62, 16  ;;  %v3000_v49 = vld [vmem:[#allocation2 + $0xa8] sm:$0xf] }
  0xfe   : > { %v3238_v20 = vsel %vm7950_vm5, %v3233_v29, %v3237_v52  ;;  %v3256_v25 = vor.u32 %v3255_v34, %v3252_v21  ;;  %v3248_v47 = vsel %vm7950_vm5, %v3243_v26, %v3247_v24  ;;  %v3277_v0 = vshll.u32 %v2994_v62, 16  ;;  %v8969_v62 = vld [vmem:[#allocation2 + $0xa4] sm:$0x1]  ;;  %v7746_v29 = vld [vmem:[#allocation2 + $0x18] sm:$0xff]  }
  0xff   : > { %7444 = vmatmul.mubr.bf16.gmra.mxu0 %v8847_v35  ;;  %v3271_v1 = vrot.slane %v3269_v56, 5  ;;  %v3283_v54 = vshll.u32 %v8934_v9, 16  ;;  %v10597_v44 = vcombine.low %v8452_v2, %v8473_v36  ;;  %v8958_v8 = vcombine.low %v3238_v20, %v3248_v47  ;;  %v7763_v2 = vld [vmem:[%s10540_s3 + $0x198] sm:$0xff]   ;;  %v7748_v20 = vld [vmem:[#allocation2 + $0x24] sm:$0xff]   ;;  %v7749_v47 = vld [vmem:[%s10540_s3 + $0x170] sm:$0xff]  }
 0x100   : > { %7447 = vmatprep.mubr.bf16.mxu0 %v8863_v10  ;;  %v3257_v52 = vrot.slane %v3256_v25, 4  ;;  %v3266_v53 = vor.u32 %v3265_v48, %v3261_v3  ;;  %v3276_v19 = vrot.slane %v3274_v39, 4  ;;  %7524 = vmatpush3.bf16.msra.mxu0 %v7755_v37  ;;  %v3279_v35 = vrot.slane %v3277_v0, 5 }
 0x101   : > { %7324 = vmatmul.mubr.bf16.gmra.mxu1 %v10597_v44  ;;  %v3285_v33 = vrot.slane %v3283_v54, 5  ;;  %v3287_v15 = vshrl.u32 %v8934_v9, 16  ;;  %v3293_v38 = vshll.u32 %v8940_v32, 16  ;;  %7525 = vmatprep.subr.bf16.mxu0 %v7759_v59  ;;  %v3298_v22 = vshrl.u32 %v2997_v40, 16 }
 0x102   : > { %7391 = vmatprep.mubr.bf16.mxu1 %v7744_v63  ;;  %v3262_v36 = vsel %vm7950_vm5, %v3257_v52, %v3261_v3  ;;  %v3267_v10 = vrot.slane %v3266_v53, 4  ;;  %v3301_v24 = vshll.u32 %v2997_v40, 16  ;;  %v3280_v37 = vor.u32 %v3279_v35, %v3276_v19  ;;  %v8975_v3 = vld [vmem:[#allocation2 + $0xac] sm:$0xf]  ;;  %v7767_v53 = vld [vmem:[%s10540_s3 + $0x190] sm:$0xff]  }
 0x103   : > { %v3289_v21 = vrot.slane %v3287_v15, 4  ;;  %v3295_v27 = vrot.slane %v3293_v38, 5  ;;  %v3307_v63 = vshll.u32 %v8960_v18, 16  ;;  %v3300_v45 = vrot.slane %v3298_v22, 4  ;;  %v8989_v19 = vld [vmem:[#allocation2 + $0xb0] sm:$0x1] }
 0x104   : > { %v3272_v34 = vsel %vm7950_vm5, %v3267_v10, %v3271_v1  ;;  %v3303_v26 = vrot.slane %v3301_v24, 5  ;;  %v3311_v56 = vshrl.u32 %v8960_v18, 16  ;;  %7526 = vmatpush3.bf16.msra.mxu0 %v7759_v59  ;;  %v3281_v40 = vrot.slane %v3280_v37, 4  ;;  %v3003_v22 = vld [vmem:[#allocation2 + $0xb4] sm:$0xf] }
 0x105   : > { %v8977_v25 = vcombine.low %v3262_v36, %v3272_v34  ;;  %v3290_v48 = vor.u32 %v3289_v21, %v3285_v33  ;;  %v3309_v39 = vrot.slane %v3307_v63, 5  ;;  %7527 = vmatprep.subr.bf16.mxu0 %v7763_v2  ;;  %v3317_v54 = vshll.u32 %v8969_v62, 16  ;;  %v8997_v63 = vld [vmem:[#allocation2 + $0xb8] sm:$0xf] }
 0x106   : > { %v3304_v0 = vor.u32 %v3303_v26, %v3300_v45  ;;  %v3313_v1 = vrot.slane %v3311_v56, 4  ;;  %v3322_v44 = vshrl.u32 %v3000_v49, 16  ;;  %v3286_v59 = vsel %vm7950_vm5, %v3281_v40, %v3285_v33  ;;  %v7771_v26 = vld [vmem:[%s10540_s3 + $0x188] sm:$0xff]   ;;  %v9010_v56 = vld [vmem:[#allocation2 + $0xbc] sm:$0x1]  ;;  %v7750_v40 = vld [vmem:[#allocation2 + $0x30] sm:$0xff]  }
 0x107   : > { %7448 = vmatmul.mubr.bf16.gmra.mxu0 %v8883_v31  ;;  %v3291_v52 = vrot.slane %v3290_v48, 4  ;;  %v3325_v35 = vshll.u32 %v3000_v49, 16  ;;  %v3331_v15 = vshll.u32 %v8975_v3, 16  ;;  %v3319_v10 = vrot.slane %v3317_v54, 5  ;;  %v6999_v54 = vld [vmem:[%s7922_s14 + $0x78] sm:$0xff]  }
 0x108   : > { %7451 = vmatprep.mubr.bf16.mxu0 %v8896_v42  ;;  %v3305_v38 = vrot.slane %v3304_v0, 4  ;;  %v3314_v36 = vor.u32 %v3313_v1, %v3309_v39  ;;  %v3324_v31 = vrot.slane %v3322_v44, 4  ;;  %v3335_v21 = vshrl.u32 %v8975_v3, 16  ;;  %v7753_v42 = vld [vmem:[%s10540_s3 + $0x168] sm:$0xff]   ;;  %7528 = vmatpush3.bf16.msra.mxu0 %v7763_v2  ;;  %v7752_v44 = vld [vmem:[#allocation2 + $0x3c] sm:$0xff]  }
 0x109   : > { %7392 = vmatmul.mubr.bf16.vlgmr.msra.gmra.mxu1 %v7746_v29  ;;  %v3296_v33 = vsel %vm7950_vm5, %v3291_v52, %v3295_v27  ;;  %v3327_v24 = vrot.slane %v3325_v35, 5  ;;  %v3333_v37 = vrot.slane %v3331_v15, 5  ;;  %v3341_v27 = vshll.u32 %v8989_v19, 16  ;;  %7529 = vmatprep.subr.bf16.mxu0 %v7767_v53 }
 0x10a   : > { %7472 = vmatpush3.bf16.msra.mxu1 %v8819_v13  ;;  %7395 = vmatprep.mubr.bf16.mxu1 %v7748_v20  ;;  %v9002_v49 = vcombine.low %v3286_v59, %v3296_v33  ;;  %v3310_v13 = vsel %vm7950_vm5, %v3305_v38, %v3309_v39  ;;  %v3315_v29 = vrot.slane %v3314_v36, 4  ;;  %v3337_v45 = vrot.slane %v3335_v21, 4  ;;  %v3715_v38 = vld [vmem:[#allocation2 + $0xc] sm:$0xe]  ;;  %v7757_v36 = vld [vmem:[%s10540_s3 + $0x160] sm:$0xff]  }
 0x10b   : > { %7473 = vmatprep.subr.bf16.mxu1 %v7749_v47  ;;  %v3328_v34 = vor.u32 %v3327_v24, %v3324_v31  ;;  %v3346_v20 = vshrl.u32 %v3003_v22, 16  ;;  %v3349_v2 = vshll.u32 %v3003_v22, 16  ;;  %v3343_v0 = vrot.slane %v3341_v27, 5 }
 0x10c   : > { %v3320_v48 = vsel %vm7950_vm5, %v3315_v29, %v3319_v10  ;;  %v3355_v39 = vshll.u32 %v8997_v63, 16  ;;  %v3359_v1 = vshrl.u32 %v8997_v63, 16  ;;  %v3338_v35 = vor.u32 %v3337_v45, %v3333_v37  ;;  %7530 = vmatpush3.bf16.msra.mxu0 %v7767_v53  ;;  %v7775_v29 = vld [vmem:[%s10540_s3 + $0x180] sm:$0xff]  }
 0x10d   : > { %v9017_v59 = vcombine.low %v3310_v13, %v3320_v48  ;;  %v3329_v52 = vrot.slane %v3328_v34, 4  ;;  %v3348_v15 = vrot.slane %v3346_v20, 4  ;;  %v3351_v10 = vrot.slane %v3349_v2, 5  ;;  %7531 = vmatprep.subr.bf16.mxu0 %v7771_v26  ;;  %v3716_v48 = vld [vmem:[#allocation2 + $0x18] sm:$0xe] }
 0x10e   : > { %7474 = vmatpush3.bf16.msra.mxu1 %v7749_v47  ;;  %v3357_v31 = vrot.slane %v3355_v39, 5  ;;  %v3361_v22 = vrot.slane %v3359_v1, 4  ;;  %v3365_v33 = vshll.u32 %v9010_v56, 16  ;;  %v3339_v24 = vrot.slane %v3338_v35, 4 }
 0x10f   : > { %7475 = vmatprep.subr.bf16.mxu1 %v7753_v42  ;;  %7452 = vmatmul.mubr.bf16.gmra.mxu0 %v8923_v41  ;;  %v3334_v47 = vsel %vm7950_vm5, %v3329_v52, %v3333_v37  ;;  %v6903_v21 = vunpack.c.l.bf16 %v6999_v54  ;;  %v6904_v13 = vunpack.c.h.bf16 %v6999_v54  ;;  %v3352_v53 = vor.u32 %v3351_v10, %v3348_v15  ;;  %v7833_v37 = vld [vmem:[%s10538_s1] ss:$0 sm:$0xff]  ;;  %v9050_v10 = vld [vmem:[%s10540_s3 + $0x238] sm:$0xff]  }
 0x110   : > { %7455 = vmatprep.mubr.bf16.mxu0 %v8945_v60  ;;  %v3362_v27 = vor.u32 %v3361_v22, %v3357_v31  ;;  %v3367_v34 = vrot.slane %v3365_v33, 5  ;;  %v6548_v45 = vrot.slane %v3715_v38, 9  ;;  %v3344_v41 = vsel %vm7950_vm5, %v3339_v24, %v3343_v0  ;;  %v7761_v60 = vld [vmem:[%s10540_s3 + $0x158] sm:$0xff]   ;;  %7532 = vmatpush3.bf16.msra.mxu0 %v7771_v26  ;;  %v7754_v22 = vld [vmem:[#allocation2 + $0x48] sm:$0xff]   ;;  %v10600_v24 = vld [vmem:[#allocation8_spill] sm:$0xff] }
 0x111   : > { %7396 = vmatmul.mubr.bf16.gmra.mxu1 %v7750_v40  ;;  %v412_v20 = vmul.f32 %v7833_v37, %v6903_v21  ;;  %v413_v2 = vmul.f32 %v7833_v37, %v6904_v13  ;;  %v3781_v40 = vrot.slane %v8678_v17, 5  ;;  %v9039_v39 = vcombine.low %v3334_v47, %v3344_v41  ;;  %v10598_v0 = vld [vmem:[#allocation7_spill] sm:$0xff]  ;;  %7533 = vmatprep.subr.bf16.mxu0 %v7775_v29  ;;  %v3717_v37 = vld [vmem:[#allocation2 + $0x24] sm:$0xe] }
 0x112   : > { %7399 = vmatprep.mubr.bf16.mxu1 %v7752_v44  ;;  %7476 = vmatpush3.bf16.msra.mxu1 %v7753_v42  ;;  %v3353_v42 = vrot.slane %v3352_v53, 4  ;;  %v3363_v1 = vrot.slane %v3362_v27, 4  ;;  %v3784_v54 = vrot.slane %v10598_v0, 5  ;;  %v7834_v44 = vld [vmem:[%s7930_s17] ss:$0 sm:$0xff]  ;;  %v6549_v47 = vrot.slane %v3716_v48, 9  ;;  %s10378_s17 = scalar_lea.vmem %s10542_s5, %s6775_s9 }
 0x113   : > { %7477 = vmatprep.subr.bf16.mxu1 %v7757_v36  ;;  %v451_v52 = vadd.f32 %v7834_v44, %v412_v20  ;;  %v452_v35 = vadd.f32 %v7834_v44, %v413_v2  ;;  %v9045_v17 = vsel %vm8398_vm13, %v6548_v45, %v3781_v40  ;;  %v3783_v38 = vrot.slane %v3781_v40, 4  ;;  %v7756_v13 = vld [vmem:[#allocation2 + $0x54] sm:$0xff]   ;;  %v10601_v2 = vld [vmem:[#allocation9_spill] sm:$0xff]  ;;  %v3718_v48 = vld [vmem:[#allocation2 + $0x30] sm:$0xe] }
 0x114   : > { %v3358_v26 = vsel %vm7950_vm5, %v3353_v42, %v3357_v31  ;;  %v3368_v33 = vsel %vm7950_vm5, %v3363_v1, %v3367_v34  ;;  %v3788_v21 = vrot.slane %v10600_v24, 5  ;;  %v7765_v31 = vld [vmem:[%s10540_s3 + $0x150] sm:$0xff]   ;;  %7534 = vmatpush3.bf16.msra.mxu0 %v7775_v29  ;;  %v3791_v40 = vrot.slane %v10601_v2, 5  ;;  %v1037_v29 = vld [vmem:[#allocation2 + $0xc0] sm:$0xf] }
 0x115   : > { %v9057_v53 = vcombine.low %v3358_v26, %v3368_v33  ;;  %v6807_v27 = vpack.c.bf16 %v451_v52, %v451_v52  ;;  %v6808_v45 = vpack.c.bf16 %v452_v35, %v452_v35  ;;  %v9061_v41 = vsel %vm8398_vm13, %v3783_v38, %v3784_v54  ;;  %7615 = vmatprep.subr.bf16.mxu0 %v9050_v10  ;;  %v1041_v24 = vld [vmem:[#allocation2 + $0xc8] sm:$0x1]  ;;  %v7758_v2 = vld [vmem:[#allocation2 + $0x60] sm:$0xff]  }
 0x116   : > { %7478 = vmatpush3.bf16.msra.mxu1 %v7757_v36  ;;  %v6580_v34 = vcombine.low %v9045_v17, %v9061_v41  ;;  %v9070_v36 = vsel %vm8398_vm13, %v6549_v47, %v3788_v21  ;;  %v3790_v20 = vrot.slane %v3788_v21, 4  ;;  %v6550_v52 = vrot.slane %v3717_v37, 9  ;;  %v3719_v47 = vld [vmem:[#allocation2 + $0x3c] sm:$0xe]  ;;  %v7782_v17 = vld [vmem:[%s10540_s3 + $0x1f0] sm:$0xff]  }
 0x117   : > { %7479 = vmatprep.subr.bf16.mxu1 %v7761_v60  ;;  %7456 = vmatmul.mubr.bf16.gmra.mxu0 %v8958_v8  ;;  %v862_v42 = vshrl.u32 %v6807_v27, 16  ;;  %v865_v1 = vshll.u32 %v6807_v27, 16  ;;  %v870_v0 = vshrl.u32 %v6808_v45, 16  ;;  %v873_v54 = vshll.u32 %v6808_v45, 16  ;;  %v7785_v41 = vld [vmem:[#allocation2 + $0x54] sm:$0xff]  }
 0x118   : > { %7459 = vmatprep.mubr.bf16.mxu0 %v8977_v25  ;;  %v9078_v44 = vsel %vm8398_vm13, %v3790_v20, %v3791_v40  ;;  %v3795_v35 = vrot.slane %v8744_v12, 5  ;;  %v3798_v38 = vrot.slane %v8752_v6, 5  ;;  %v7769_v25 = vld [vmem:[%s10540_s3 + $0x148] sm:$0xff]   ;;  %v3805_v21 = vrot.slane %v8778_v5, 5  ;;  %v7762_v5 = vld [vmem:[#allocation2 + $0x78] sm:$0xff]  }
 0x119   : > { %7400 = vmatmul.mubr.bf16.gmra.mxu1 %v7754_v22  ;;  %v864_v8 = vrot.slane %v862_v42, 7  ;;  %v872_v26 = vrot.slane %v870_v0, 7  ;;  %v6581_v33 = vcombine.low %v9070_v36, %v9078_v44  ;;  %v6551_v22 = vrot.slane %v3718_v48, 9  ;;  %v3720_v20 = vld [vmem:[#allocation2 + $0x48] sm:$0xe] }
 0x11a   : > { %7403 = vmatprep.mubr.bf16.mxu1 %v7756_v13  ;;  %7480 = vmatpush3.bf16.msra.mxu1 %v7761_v60  ;;  %v9089_v12 = vsel %vm8398_vm13, %v6550_v52, %v3795_v35  ;;  %v3797_v6 = vrot.slane %v3795_v35, 4  ;;  %v3802_v60 = vrot.slane %v8770_v43, 5  ;;  %v6552_v0 = vrot.slane %v3719_v47, 9  ;;  %v3721_v52 = vld [vmem:[#allocation2 + $0x54] sm:$0xe]  ;;  %v7760_v43 = vld [vmem:[#allocation2 + $0x6c] sm:$0xff]  }
 0x11b   : > { %7481 = vmatprep.subr.bf16.mxu1 %v7765_v31  ;;  %v867_v13 = vor.u32 %v865_v1, %v864_v8  ;;  %v868_v27 = vrot.slane %v864_v8, 4  ;;  %v875_v45 = vor.u32 %v873_v54, %v872_v26  ;;  %v877_v37 = vrot.slane %v872_v26, 4  ;;  %v7786_v36 = vld [vmem:[%s10540_s3 + $0x1e8] sm:$0xff]  }
 0x11c   : > { %v9095_v40 = vsel %vm8398_vm13, %v3797_v6, %v3798_v38  ;;  %v9099_v48 = vsel %vm8398_vm13, %v6551_v22, %v3802_v60  ;;  %v3804_v42 = vrot.slane %v3802_v60, 4  ;;  %v3812_v47 = vrot.slane %v8800_v30, 5  ;;  %v3722_v6 = vld [vmem:[#allocation2 + $0x60] sm:$0xe] }
 0x11d   : > { %v876_v1 = vsel %vm7983_vm9, %v868_v27, %v875_v45  ;;  %v1038_v35 = vsel %vm7991_vm10, %v867_v13, %v1037_v29  ;;  %v1042_v26 = vsel %vm7974_vm8, %v877_v37, %v1041_v24  ;;  %v6582_v38 = vcombine.low %v9089_v12, %v9095_v40 }
 0x11e   : > { %7482 = vmatpush3.bf16.msra.mxu1 %v7765_v31  ;;  %1039 = vst [vmem:[#allocation2 + $0xc0] sm:$0xf] %v1038_v35  ;;  %1040 = vst [vmem:[#allocation2 + $0xc4] sm:$0xf] %v876_v1  ;;  %v7773_v31 = vld [vmem:[%s10540_s3 + $0x140] sm:$0xff]   ;;  %v9114_v22 = vsel %vm8398_vm13, %v3804_v42, %v3805_v21  ;;  %v3809_v29 = vrot.slane %v8785_v4, 5 }
 0x11f   : > { %7483 = vmatprep.subr.bf16.mxu1 %v7769_v25  ;;  %1043 = vst [vmem:[#allocation2 + $0xc8] sm:$0x1] %v1042_v26  ;;  %v6553_v24 = vrot.slane %v3720_v20, 9  ;;  %7460 = vmatmul.mubr.bf16.gmra.mxu0 %v9002_v49  ;;  %v3816_v13 = vrot.slane %v8810_v23, 5  ;;  %v3819_v27 = vrot.slane %v8826_v11, 5  ;;  %v6554_v45 = vrot.slane %v3721_v52, 9 }
 0x120   : > { %7463 = vmatprep.mubr.bf16.mxu0 %v9017_v59  ;;  %v9126_v4 = vsel %vm8398_vm13, %v6552_v0, %v3809_v29  ;;  %v3811_v30 = vrot.slane %v3809_v29, 4  ;;  %v3823_v21 = vrot.slane %v8832_v55, 5  ;;  %v3826_v49 = vrot.slane %v8852_v58, 5  ;;  %v3723_v59 = vld [vmem:[#allocation2 + $0x6c] sm:$0xe]  ;;  %v7764_v1 = vld [vmem:[#allocation2 + $0x84] sm:$0xff]  }
 0x121   : > { %7404 = vmatmul.mubr.bf16.gmra.mxu1 %v7758_v2  ;;  %v9132_v23 = vsel %vm8398_vm13, %v6553_v24, %v3816_v13  ;;  %v3818_v11 = vrot.slane %v3816_v13, 4  ;;  %v6555_v37 = vrot.slane %v3722_v6, 9  ;;  %v3830_v20 = vrot.slane %v8857_v16, 5  ;;  %v9138_v2 = vld [vmem:[%s10540_s3 + $0x1f8] sm:$0xff]   ;;  %v3726_v16 = vld [vmem:[#allocation2 + $0x90] sm:$0xe] }
 0x122   : > { %7407 = vmatprep.mubr.bf16.mxu1 %v7760_v43  ;;  %7484 = vmatpush3.bf16.msra.mxu1 %v7769_v25  ;;  %v9142_v55 = vsel %vm8398_vm13, %v3811_v30, %v3812_v47  ;;  %v9146_v58 = vsel %vm8398_vm13, %v6554_v45, %v3823_v21  ;;  %v3825_v25 = vrot.slane %v3823_v21, 4  ;;  %v3833_v42 = vrot.slane %v8866_v50, 5  ;;  %v3724_v26 = vld [vmem:[#allocation2 + $0x78] sm:$0xe] }
 0x123   : > { %7485 = vmatprep.subr.bf16.mxu1 %v7773_v31  ;;  %v9153_v0 = vsel %vm8398_vm13, %v3818_v11, %v3819_v27  ;;  %v9157_v52 = vsel %vm8398_vm13, %v6555_v37, %v3830_v20  ;;  %v3832_v43 = vrot.slane %v3830_v20, 4  ;;  %v6556_v35 = vrot.slane %v3723_v59, 9  ;;  %v3725_v37 = vld [vmem:[#allocation2 + $0x84] sm:$0xe] }
 0x124   : > { %v9163_v50 = vsel %vm8398_vm13, %v3825_v25, %v3826_v49  ;;  %v3837_v8 = vrot.slane %v8870_v61, 5 }
 0x125   : > { %v3006_v29 = vld [vmem:[#allocation2 + $0xc0] sm:$0xf]  ;;  %v9166_v47 = vld [vmem:[#allocation2 + $0xc4] sm:$0xf]  ;;  %v9174_v13 = vsel %vm8398_vm13, %v3832_v43, %v3833_v42  ;;  %v3840_v43 = vrot.slane %v8885_v46, 5  ;;  %v3851_v46 = vrot.slane %v8910_v7, 5 }
 0x126   : > { %v9168_v24 = vld [vmem:[#allocation2 + $0xc8] sm:$0x1]  ;;  %7486 = vmatpush3.bf16.msra.mxu1 %v7773_v31  ;;  %v3370_v27 = vshrl.u32 %v3006_v29, 16  ;;  %v3373_v45 = vshll.u32 %v3006_v29, 16  ;;  %v3379_v30 = vshll.u32 %v9166_v47, 16  ;;  %v3383_v61 = vshrl.u32 %v9166_v47, 16 }
 0x127   : > { %7567 = vmatprep.subr.bf16.mxu1 %v9138_v2  ;;  %7464 = vmatmul.mubr.bf16.gmra.mxu0 %v9039_v39  ;;  %v3389_v21 = vshll.u32 %v9168_v24, 16  ;;  %v9185_v49 = vsel %vm8398_vm13, %v6556_v35, %v3837_v8  ;;  %v3839_v11 = vrot.slane %v3837_v8, 4  ;;  %v6557_v29 = vrot.slane %v3724_v26, 9  ;;  %v7766_v26 = vld [vmem:[#allocation2 + $0x90] sm:$0xff]  }
 0x128   : > { %7467 = vmatprep.mubr.bf16.mxu0 %v9057_v53  ;;  %v3372_v20 = vrot.slane %v3370_v27, 4  ;;  %v3375_v59 = vrot.slane %v3373_v45, 5  ;;  %v3381_v25 = vrot.slane %v3379_v30, 5  ;;  %v3385_v42 = vrot.slane %v3383_v61, 4  ;;  %v3727_v30 = vld [vmem:[#allocation2 + $0x9c] sm:$0xe] }
 0x129   : > { %7408 = vmatmul.mubr.bf16.gmra.mxu1 %v7762_v5  ;;  %v3391_v39 = vrot.slane %v3389_v21, 5  ;;  %v3844_v31 = vrot.slane %v8898_v51, 5  ;;  %v3847_v35 = vrot.slane %v8901_v57, 5  ;;  %v6558_v8 = vrot.slane %v3725_v37, 9  ;;  %v7768_v61 = vld [vmem:[#allocation2 + $0x9c] sm:$0xff]  }
 0x12a   : > { %7411 = vmatprep.mubr.bf16.mxu1 %v7764_v1  ;;  %v3376_v6 = vor.u32 %v3375_v59, %v3372_v20  ;;  %v3386_v54 = vor.u32 %v3385_v42, %v3381_v25  ;;  %v9193_v53 = vsel %vm8398_vm13, %v3839_v11, %v3840_v43  ;;  %v3854_v57 = vrot.slane %v8925_v14, 5  ;;  %v7776_v37 = vld [vmem:[#allocation2 + $0x18] sm:$0xff]   ;;  %v3728_v59 = vld [vmem:[#allocation2 + $0xa8] sm:$0xe] }
 0x12b   : > { %v9197_v5 = vsel %vm8398_vm13, %v6557_v29, %v3844_v31  ;;  %v3846_v1 = vrot.slane %v3844_v31, 4  ;;  %v9209_v11 = vsel %vm8398_vm13, %v6558_v8, %v3851_v46  ;;  %v3853_v31 = vrot.slane %v3851_v46, 4 }
 0x12c   : > { %v3377_v27 = vrot.slane %v3376_v6, 4  ;;  %v3387_v51 = vrot.slane %v3386_v54, 4  ;;  %v6559_v7 = vrot.slane %v3726_v16, 9  ;;  %v3858_v20 = vrot.slane %v8934_v9, 5 }
 0x12d   : > { %v9205_v21 = vsel %vm8398_vm13, %v3846_v1, %v3847_v35  ;;  %v9220_v43 = vsel %vm8398_vm13, %v3853_v31, %v3854_v57  ;;  %v3861_v16 = vrot.slane %v8940_v32, 5  ;;  %v6560_v29 = vrot.slane %v3727_v30, 9  ;;  %v3729_v35 = vld [vmem:[#allocation2 + $0xb4] sm:$0xe]  ;;  %v7770_v31 = vld [vmem:[#allocation2 + $0xa8] sm:$0xff]  }
 0x12e   : > { %v3382_v54 = vsel %vm7950_vm5, %v3377_v27, %v3381_v25  ;;  %v3392_v6 = vsel %vm7950_vm5, %v3387_v51, %v3391_v39  ;;  %v9227_v39 = vsel %vm8398_vm13, %v6559_v7, %v3858_v20  ;;  %v3860_v8 = vrot.slane %v3858_v20, 4  ;;  %v7772_v20 = vld [vmem:[#allocation2 + $0xb4] sm:$0xff]  }
 0x12f   : > { %v6539_v42 = vcombine.low %v3382_v54, %v3392_v6  ;;  %v3865_v9 = vrot.slane %v8960_v18, 5  ;;  %v3868_v1 = vrot.slane %v8969_v62, 5  ;;  %v6561_v46 = vrot.slane %v3728_v59, 9  ;;  %v7777_v59 = vld [vmem:[#allocation2 + $0x24] sm:$0xff]   ;;  %v4606_v62 = vld [vmem:[#allocation2 + $0x30] sm:$0xf] }
 0x130   : > { %v3872_v32 = vrot.slane %v8975_v3, 5  ;;  %v3875_v27 = vrot.slane %v8989_v19, 5  ;;  %v9235_v51 = vsel %vm8398_vm13, %v3860_v8, %v3861_v16  ;;  %v6562_v30 = vrot.slane %v3729_v35, 9  ;;  %v7780_v35 = vld [vmem:[#allocation2 + $0x30] sm:$0xff]  }
 0x131   : > { %7412 = vmatmul.mubr.bf16.gmra.mxu1 %v7766_v26  ;;  %7468 = vmatmul.mubr.bf16.gmra.mxu0 %v6539_v42  ;;  %v3730_v26 = vld [vmem:[#allocation2 + $0xc0] sm:$0xe]  ;;  %v9239_v57 = vsel %vm8398_vm13, %v6560_v29, %v3865_v9  ;;  %v3867_v18 = vrot.slane %v3865_v9, 4  ;;  %v3882_v54 = vrot.slane %v9010_v56, 5  ;;  %v3889_v9 = vrot.slane %v9168_v24, 5 }
 0x132   : > { %7415 = vmatprep.mubr.bf16.mxu1 %v7768_v61  ;;  %7535 = vmatprep.mubr.bf16.mxu0 %v7776_v37  ;;  %v9245_v3 = vsel %vm8398_vm13, %v6561_v46, %v3872_v32  ;;  %v3874_v19 = vrot.slane %v3872_v32, 4  ;;  %v3879_v61 = vrot.slane %v8997_v63, 5  ;;  %v6563_v6 = vrot.slane %v3730_v26, 9  ;;  %v7787_v26 = vld [vmem:[%s10540_s3 + $0x228] sm:$0xff]   ;;  %v5355_v42 = vld [vmem:[#allocation2 + $0x24] sm:$0xe] }
 0x133   : > { %v9250_v7 = vsel %vm8398_vm13, %v3867_v18, %v3868_v1  ;;  %v3886_v37 = vrot.slane %v9166_v47, 5  ;;  %v7783_v1 = vld [vmem:[%s10540_s3 + $0x230] sm:$0xff]   ;;  %v7774_v18 = vld [vmem:[#allocation2 + $0xc0] sm:$0xff]   ;;  %v4604_v32 = vld [vmem:[#allocation2 + $0x28] sm:$0xf] }
 0x134   : > { %v9258_v16 = vsel %vm8398_vm13, %v3874_v19, %v3875_v27  ;;  %v9262_v63 = vsel %vm8398_vm13, %v6562_v30, %v3879_v61  ;;  %v3881_v29 = vrot.slane %v3879_v61, 4  ;;  %v7781_v30 = vld [vmem:[#allocation2 + $0x3c] sm:$0xff]   ;;  %v7784_v19 = vld [vmem:[#allocation2 + $0x48] sm:$0xff]   ;;  %v5427_v44 = vrot.slane %v4604_v32, 5 }
 0x135   : > { %v9268_v47 = vsel %vm8398_vm13, %v6563_v6, %v3886_v37  ;;  %v3888_v8 = vrot.slane %v3886_v37, 4  ;;  %v7791_v61 = vld [vmem:[%s10540_s3 + $0x220] sm:$0xff]   ;;  %v7795_v6 = vld [vmem:[%s10540_s3 + $0x218] sm:$0xff]  }
 0x136   : > { %10605 = vst [vmem:[#allocation7_spill] sm:$0xff] %v9268_v47  ;;  %v9276_v46 = vsel %vm8398_vm13, %v3881_v29, %v3882_v54  ;;  %v4601_v37 = vld [vmem:[#allocation2 + $0x1c] sm:$0xf]  ;;  %v4602_v29 = vld [vmem:[#allocation2 + $0x20] sm:$0x1]  ;;  %v5429_v25 = vrot.slane %v5427_v44, 4 }
 0x137   : > { %v9282_v27 = vsel %vm8398_vm13, %v3888_v8, %v3889_v9  ;;  %v4662_v24 = vshrl.u32 %v4601_v37, 16  ;;  %v4668_v40 = vshll.u32 %v4602_v29, 16  ;;  %v7797_v47 = vld [vmem:[#allocation2 + $0x9c] sm:$0xff]  }
 0x138   : > { %10606 = vst [vmem:[#allocation6_spill] sm:$0xff] %v9282_v27  ;;  %v4615_v27 = vld [vmem:[#allocation2 + $0x54] sm:$0xf] }
 0x139   : > { %7416 = vmatmul.mubr.bf16.gmra.mxu1 %v7770_v31  ;;  %7536 = vmatmul.mubr.bf16.vlgmr.msra.gmra.mxu0 %v7777_v59  ;;  %v9293_v31 = vpop.f32.mrf.mxu0  ;;  %v5420_v59 = vrot.slane %v4601_v37, 5 }
 0x13a   : > { %7419 = vmatprep.mubr.bf16.mxu1 %v7772_v20  ;;  %7616 = vmatpush3.bf16.msra.mxu0 %v9050_v10  ;;  %10607 = vst [vmem:[#allocation8_spill] sm:$0xff] %v9293_v31  ;;  %v4600_v10 = vld [vmem:[#allocation2 + $0x18] sm:$0xf]  ;;  %v10620_v31 = vcombine.low %v9132_v23, %v9153_v0  ;;  %v7802_v23 = vld [vmem:[%s10540_s3 + $0x1c8] sm:$0xff]  }
 0x13b   : > { %7539 = vmatprep.mubr.bf16.mxu0 %v7780_v35  ;;  %7617 = vmatprep.subr.bf16.mxu0 %v7783_v1  ;;  %v9298_v54 = vpop.f32.mrf.mxu0  ;;  %v5354_v20 = vld [vmem:[#allocation2 + $0x18] sm:$0xe]  ;;  %v4649_v35 = vshrl.u32 %v4600_v10, 16  ;;  %v4652_v8 = vshll.u32 %v4600_v10, 16  ;;  %v4658_v10 = vshll.u32 %v4601_v37, 16 }
 0x13c   : > { %10608 = vst [vmem:[#allocation9_spill] sm:$0xff] %v9298_v54  ;;  %v7798_v54 = vld [vmem:[%s10540_s3 + $0x1d0] sm:$0xff]  }
 0x13d   : > { %v9306_v9 = vpop.f32.mrf.mxu0  ;;  %v4654_v56 = vrot.slane %v4652_v8, 5  ;;  %v7789_v8 = vld [vmem:[#allocation2 + $0x6c] sm:$0xff]  }
 0x13e   : > { %7618 = vmatpush3.bf16.msra.mxu0 %v7783_v1  ;;  %10609 = vst [vmem:[#allocation4_spill] sm:$0xff] %v9306_v9  ;;  %v7799_v1 = vld [vmem:[%s10540_s3 + $0x210] sm:$0xff]  }
 0x13f   : > { %7619 = vmatprep.subr.bf16.mxu0 %v7787_v26  ;;  %v9321_v37 = vpop.f32.mrf.mxu0 }
 0x140   : > { %10610 = vst [vmem:[#allocation5_spill] sm:$0xff] %v9321_v37  ;;  %v9355_v37 = vpop.f32.mrf.mxu1 }
 0x141   : > { %7420 = vmatmul.mubr.bf16.gmra.mxu1 %v7774_v18  ;;  %7540 = vmatmul.mubr.bf16.gmra.mxu0 %v7781_v30  ;;  %v4603_v18 = vld [vmem:[#allocation2 + $0x24] sm:$0xf]  ;;  %v5422_v30 = vrot.slane %v5420_v59, 4  ;;  %v9344_v60 = vpop.f32.mrf.mxu0  ;;  %10613 = vst [vmem:[#allocation10_spill] sm:$0xff] %v9355_v37 }
 0x142   : > { %7487 = vmatprep.mubr.bf16.mxu1 %v6580_v34  ;;  %7543 = vmatprep.mubr.bf16.mxu0 %v7784_v19  ;;  %v7788_v34 = vld [vmem:[#allocation2 + $0x60] sm:$0xff]   ;;  %v5423_v19 = vrot.slane %v4602_v29, 5  ;;  %10611 = vst [vmem:[#allocation3_spill] sm:$0xff] %v9344_v60  ;;  %v9388_v9 = vpop.f32.mrf.mxu1 }
 0x143   : > { %7620 = vmatpush3.bf16.msra.mxu0 %v7787_v26  ;;  %v6684_v26 = vrot.slane %v5354_v20, 9  ;;  %v4676_v20 = vshll.u32 %v4603_v18, 16  ;;  %v7790_v29 = vld [vmem:[%s10540_s3 + $0x1e0] sm:$0xff]   ;;  %10618 = vst [vmem:[#allocation14_spill] sm:$0xff] %v9388_v9  ;;  %v4612_v9 = vld [vmem:[#allocation2 + $0x48] sm:$0xf] }
 0x144   : > { %7621 = vmatprep.subr.bf16.mxu0 %v7791_v61 }
 0x145   : > { %v9325_v12 = vsel %vm8398_vm13, %v6684_v26, %v5420_v59  ;;  %v6685_v59 = vrot.slane %v5355_v42, 9  ;;  %v9341_v26 = vld [vmem:[#allocation2 + $0x34] sm:$0xf] }
 0x146   : > { %v4710_v42 = vshrl.u32 %v9341_v26, 16 }
 0x147   : > { %7622 = vmatpush3.bf16.msra.mxu0 %v7791_v61  ;;  %v4651_v61 = vrot.slane %v4649_v35, 4  ;;  %v4686_v35 = vshrl.u32 %v4604_v32, 16 }
 0x148   : > { %7623 = vmatprep.subr.bf16.mxu0 %v7795_v6 }
 0x149   : > { %7488 = vmatmul.mubr.bf16.vlgmr.msra.gmra.mxu1 %v6581_v33  ;;  %7544 = vmatmul.mubr.bf16.gmra.mxu0 %v7785_v41  ;;  %v4673_v33 = vshrl.u32 %v4603_v18, 16  ;;  %v7803_v41 = vld [vmem:[%s10540_s3 + $0x208] sm:$0xff]   ;;  %v4664_v18 = vrot.slane %v4662_v24, 4  ;;  %v9348_v24 = vrot.slane %v4668_v40, 5  ;;  %v4697_v40 = vshrl.u32 %v4606_v62, 16 }
 0x14a   : > { %7568 = vmatpush3.bf16.msra.mxu1 %v9138_v2  ;;  %7491 = vmatprep.mubr.bf16.mxu1 %v6582_v38  ;;  %v9327_v38 = vld [vmem:[#allocation2 + $0x2c] sm:$0x1]  ;;  %v4682_v2 = vshll.u32 %v4604_v32, 16  ;;  %v4655_v32 = vor.u32 %v4654_v56, %v4651_v61  ;;  %v10612_v61 = vcombine.low %v9099_v48, %v9114_v22  ;;  %v10615_v48 = vcombine.low %v9126_v4, %v9142_v55  ;;  %v5356_v22 = vld [vmem:[#allocation2 + $0x30] sm:$0xe] }
 0x14b   : > { %7569 = vmatprep.subr.bf16.mxu1 %v7782_v17  ;;  %7547 = vmatprep.mubr.bf16.mxu0 %v7788_v34  ;;  %v9336_v34 = vrot.slane %v4658_v10, 5  ;;  %v5430_v14 = vrot.slane %v9327_v38, 5  ;;  %v4675_v45 = vrot.slane %v4673_v33, 4  ;;  %v7792_v10 = vld [vmem:[#allocation2 + $0x78] sm:$0xff]   ;;  %v7807_v33 = vld [vmem:[%s10540_s3 + $0x200] sm:$0xff]  }
 0x14c   : > { %7624 = vmatpush3.bf16.msra.mxu0 %v7795_v6  ;;  %v9334_v6 = vsel %vm8398_vm13, %v5422_v30, %v5423_v19  ;;  %v4678_v30 = vrot.slane %v4676_v20, 5  ;;  %v4609_v19 = vld [vmem:[#allocation2 + $0x3c] sm:$0xf]  ;;  %v9350_v56 = vrot.slane %v4682_v2, 5  ;;  %v9363_v20 = vsel %vm8398_vm13, %v6685_v59, %v5427_v44  ;;  %v9382_v59 = vpop.f32.mrf.mxu0 }
 0x14d   : > { %7625 = vmatprep.subr.bf16.mxu0 %v7799_v1  ;;  %10614 = vst [vmem:[#allocation11_spill] sm:$0xff] %v9363_v20  ;;  %v4700_v2 = vshll.u32 %v4606_v62, 16  ;;  %v4721_v37 = vshrl.u32 %v4609_v19, 16  ;;  %v7794_v62 = vld [vmem:[%s10540_s3 + $0x1d8] sm:$0xff]   ;;  %v9375_v44 = vrot.slane %v4655_v32, 4  ;;  %v9379_v4 = vsel %vm8398_vm13, %v5429_v25, %v5430_v14  ;;  %10617 = vst [vmem:[#allocation13_spill] sm:$0xff] %v9382_v59 }
 0x14e   : > { %7570 = vmatpush3.bf16.msra.mxu1 %v7782_v17  ;;  %v4688_v17 = vrot.slane %v4686_v35, 4  ;;  %v9365_v35 = vld [vmem:[#allocation2 + $0x40] sm:$0xf]  ;;  %10616 = vst [vmem:[#allocation12_spill] sm:$0xff] %v9379_v4  ;;  %v4679_v55 = vor.u32 %v4678_v30, %v4675_v45  ;;  %v6686_v45 = vrot.slane %v5356_v22, 9  ;;  %v4699_v25 = vrot.slane %v4697_v40, 4  ;;  %v9403_v22 = vpop.f32.mrf.mxu0 }
 0x14f   : > { %7571 = vmatprep.subr.bf16.mxu1 %v7786_v36  ;;  %v4730_v60 = vshll.u32 %v9365_v35, 16  ;;  %v4734_v32 = vshrl.u32 %v9365_v35, 16  ;;  %v7796_v59 = vld [vmem:[#allocation2 + $0x90] sm:$0xff]   ;;  %10619 = vst [vmem:[#allocation15_spill] sm:$0xff] %v9403_v22 }
 0x150   : > { %7626 = vmatpush3.bf16.msra.mxu0 %v7799_v1  ;;  %v4665_v1 = vor.u32 %v4664_v18, %v9336_v34  ;;  %v4724_v18 = vshll.u32 %v4609_v19, 16  ;;  %v4692_v19 = vshll.u32 %v9327_v38, 16  ;;  %v7793_v38 = vld [vmem:[#allocation2 + $0x84] sm:$0xff]   ;;  %v9401_v40 = vrot.slane %v4679_v55, 4  ;;  %v5357_v55 = vld [vmem:[#allocation2 + $0x3c] sm:$0xe] }
 0x151   : > { %7492 = vmatmul.mubr.bf16.gmra.mxu1 %v10612_v61  ;;  %7627 = vmatprep.subr.bf16.mxu0 %v7803_v41  ;;  %v4706_v61 = vshll.u32 %v9341_v26, 16 }
 0x152   : > { %7495 = vmatprep.mubr.bf16.mxu1 %v10615_v48  ;;  %7572 = vmatpush3.bf16.msra.mxu1 %v7786_v36  ;;  %v5434_v36 = vrot.slane %v9341_v26, 5  ;;  %v4608_v48 = vld [vmem:[#allocation2 + $0x38] sm:$0x1]  ;;  %v9390_v14 = vrot.slane %v4665_v1, 4  ;;  %v4702_v26 = vrot.slane %v4700_v2, 5  ;;  %v9414_v1 = vpop.f32.mrf.mxu1 }
 0x153   : > { %7548 = vmatmul.mubr.bf16.gmra.mxu0 %v7789_v8  ;;  %7573 = vmatprep.subr.bf16.mxu1 %v7790_v29  ;;  %v4689_v8 = vor.u32 %v4688_v17, %v9350_v56  ;;  %v9392_v30 = vrot.slane %v4706_v61, 5  ;;  %v4726_v17 = vrot.slane %v4724_v18, 5  ;;  %v5437_v2 = vrot.slane %v4608_v48, 5  ;;  %10621 = vst [vmem:[#allocation16_spill] sm:$0xff] %v9414_v1  ;;  %v9451_v1 = vld [vmem:[#allocation2 + $0x50] sm:$0x1] }
 0x154   : > { %7551 = vmatprep.mubr.bf16.mxu0 %v7792_v10  ;;  %7628 = vmatpush3.bf16.msra.mxu0 %v7803_v41  ;;  %v4712_v41 = vrot.slane %v4710_v42, 4  ;;  %v4723_v10 = vrot.slane %v4721_v37, 4  ;;  %v9407_v42 = vrot.slane %v4692_v19, 5  ;;  %v9409_v61 = vrot.slane %v4730_v60, 5  ;;  %v4611_v60 = vld [vmem:[#allocation2 + $0x44] sm:$0x1] }
 0x155   : > { %7629 = vmatprep.subr.bf16.mxu0 %v7807_v33  ;;  %v9405_v37 = vrot.slane %v4689_v8, 4  ;;  %v4736_v18 = vrot.slane %v4734_v32, 4  ;;  %v4703_v8 = vor.u32 %v4702_v26, %v4699_v25  ;;  %v4716_v19 = vshll.u32 %v4608_v48, 16 }
 0x156   : > { %7574 = vmatpush3.bf16.msra.mxu1 %v7790_v29  ;;  %v5436_v29 = vrot.slane %v5434_v36, 4  ;;  %v10622_v32 = vcombine.low %v9146_v58, %v9163_v50  ;;  %v9430_v0 = vsel %vm8398_vm13, %v6686_v45, %v5434_v36  ;;  %v5441_v25 = vrot.slane %v9365_v35, 5  ;;  %v5358_v36 = vld [vmem:[#allocation2 + $0x48] sm:$0xe] }
 0x157   : > { %7575 = vmatprep.subr.bf16.mxu1 %v7794_v62  ;;  %v4727_v48 = vor.u32 %v4726_v17, %v4723_v10  ;;  %v4745_v45 = vshrl.u32 %v4612_v9, 16  ;;  %v4748_v26 = vshll.u32 %v4612_v9, 16  ;;  %v4737_v10 = vor.u32 %v4736_v18, %v9409_v61  ;;  %v7806_v18 = vld [vmem:[%s10540_s3 + $0x1c0] sm:$0xff]  }
 0x158   : > { %7630 = vmatpush3.bf16.msra.mxu0 %v7807_v33  ;;  %v9440_v50 = vsel %vm8398_vm13, %v5436_v29, %v5437_v2  ;;  %v4740_v17 = vshll.u32 %v4611_v60, 16  ;;  %v4704_v29 = vrot.slane %v4703_v8, 4  ;;  %v4718_v2 = vrot.slane %v4716_v19, 5 }
 0x159   : > { %7496 = vmatmul.mubr.bf16.gmra.mxu1 %v10620_v31  ;;  %v4713_v31 = vor.u32 %v4712_v41, %v9392_v30  ;;  %v9442_v41 = vpop.f32.mrf.mxu0  ;;  %v6687_v33 = vrot.slane %v5357_v55, 9  ;;  %v5444_v58 = vrot.slane %v4611_v60, 5  ;;  %v6688_v22 = vrot.slane %v5358_v36, 9  ;;  %v7800_v55 = vld [vmem:[#allocation2 + $0xa8] sm:$0xff]  }
 0x15a   : > { %7499 = vmatprep.mubr.bf16.mxu1 %v10622_v32  ;;  %7576 = vmatpush3.bf16.msra.mxu1 %v7794_v62  ;;  %v4613_v62 = vld [vmem:[#allocation2 + $0x4c] sm:$0xf]  ;;  %10623 = vst [vmem:[#allocation17_spill] sm:$0xff] %v9442_v41  ;;  %v9449_v32 = vpop.f32.mrf.mxu1  ;;  %v4728_v41 = vrot.slane %v4727_v48, 4  ;;  %v4747_v35 = vrot.slane %v4745_v45, 4  ;;  %v4738_v4 = vrot.slane %v4737_v10, 4  ;;  %v10626_v36 = vcombine.low %v9157_v52, %v9174_v13 }
 0x15b   : > { %7552 = vmatmul.mubr.bf16.gmra.mxu0 %v7793_v38  ;;  %7577 = vmatprep.subr.bf16.mxu1 %v7798_v54  ;;  %v5448_v38 = vrot.slane %v4613_v62, 5  ;;  %10624 = vst [vmem:[#allocation18_spill] sm:$0xff] %v9449_v32  ;;  %v4714_v9 = vrot.slane %v4713_v31, 4  ;;  %v4750_v32 = vrot.slane %v4748_v26, 5  ;;  %v4754_v8 = vshll.u32 %v4613_v62, 16  ;;  %v9456_v60 = vpop.f32.mrf.mxu0 }
 0x15c   : > { %7555 = vmatprep.mubr.bf16.mxu0 %v7796_v59  ;;  %v5443_v59 = vrot.slane %v5441_v25, 4  ;;  %v4758_v19 = vshrl.u32 %v4613_v62, 16  ;;  %10625 = vst [vmem:[#allocation19_spill] sm:$0xff] %v9456_v60  ;;  %v5451_v48 = vrot.slane %v9451_v1, 5  ;;  %v9462_v20 = vpop.f32.mrf.mxu1  ;;  %v4709_v45 = vsel %vm7950_vm5, %v4704_v29, %v9392_v30  ;;  %v5359_v26 = vld [vmem:[#allocation2 + $0x54] sm:$0xe] }
 0x15d   : > { %v5450_v31 = vrot.slane %v5448_v38, 4  ;;  %10627 = vst [vmem:[#allocation20_spill] sm:$0xff] %v9462_v20  ;;  %v9469_v62 = vsel %vm8398_vm13, %v6687_v33, %v5441_v25  ;;  %v4769_v10 = vshrl.u32 %v4615_v27, 16  ;;  %v10628_v60 = vcombine.low %v9185_v49, %v9193_v53  ;;  %v4616_v33 = vld [vmem:[#allocation2 + $0x58] sm:$0xf]  ;;  %v9489_v25 = vpop.f32.mrf.mxu0 }
 0x15e   : > { %7578 = vmatpush3.bf16.msra.mxu1 %v7798_v54  ;;  %v4742_v54 = vrot.slane %v4740_v17, 5  ;;  %v4772_v17 = vshll.u32 %v4615_v27, 16  ;;  %v4719_v52 = vsel %vm7950_vm5, %v4714_v9, %v4718_v2  ;;  %v9478_v13 = vsel %vm8398_vm13, %v5443_v59, %v5444_v58  ;;  %v9498_v29 = vpop.f32.mrf.mxu1  ;;  %v7801_v9 = vld [vmem:[#allocation2 + $0xb4] sm:$0xff]  }
 0x15f   : > { %7579 = vmatprep.subr.bf16.mxu1 %v7802_v23  ;;  %v9482_v30 = vsel %vm8398_vm13, %v6688_v22, %v5448_v38  ;;  %v4733_v49 = vsel %vm7950_vm5, %v4728_v41, %v9409_v61  ;;  %v4751_v53 = vor.u32 %v4750_v32, %v4747_v35  ;;  %v9487_v27 = vrot.slane %v4754_v8, 5  ;;  %10629 = vst [vmem:[#allocation21_spill] sm:$0xff] %v9498_v29  ;;  %v9500_v61 = vld [vmem:[#allocation2 + $0x5c] sm:$0x1] }
 0x160   : > { %v4743_v58 = vsel %vm7950_vm5, %v4738_v4, %v4742_v54  ;;  %v9495_v22 = vsel %vm8398_vm13, %v5450_v31, %v5451_v48  ;;  %v6689_v38 = vrot.slane %v5359_v26, 9  ;;  %v4771_v41 = vrot.slane %v4769_v10, 4  ;;  %v9537_v54 = vpop.f32.mrf.mxu0  ;;  %v9549_v26 = vpop.f32.mrf.mxu1 }
 0x161   : > { %7500 = vmatmul.mubr.bf16.gmra.mxu1 %v10626_v36  ;;  %v4774_v35 = vrot.slane %v4772_v17, 5  ;;  %v4778_v32 = vshll.u32 %v4616_v33, 16  ;;  %v4782_v2 = vshrl.u32 %v4616_v33, 16  ;;  %v10630_v4 = vsel %vm7950_vm5, %v9390_v14, %v9348_v24  ;;  %10634 = vst [vmem:[#allocation22_spill] sm:$0xff] %v9537_v54  ;;  %10636 = vst [vmem:[#allocation23_spill] sm:$0xff] %v9549_v26 }
 0x162   : > { %7503 = vmatprep.mubr.bf16.mxu1 %v10628_v60  ;;  %7580 = vmatpush3.bf16.msra.mxu1 %v7802_v23  ;;  %v4760_v23 = vrot.slane %v4758_v19, 4  ;;  %v10632_v8 = vsel %vm7950_vm5, %v9405_v37, %v9407_v42  ;;  %v9532_v14 = vrot.slane %v4751_v53, 4  ;;  %v5455_v37 = vrot.slane %v4616_v33, 5  ;;  %v9535_v42 = vld [vmem:[#allocation2 + $0x64] sm:$0xf] }
 0x163   : > { %7556 = vmatmul.mubr.bf16.gmra.mxu0 %v7797_v47  ;;  %7581 = vmatprep.subr.bf16.mxu1 %v7806_v18  ;;  %v4764_v47 = vshll.u32 %v9451_v1, 16  ;;  %v10631_v1 = vsel %vm7950_vm5, %v9375_v44, %v9336_v34  ;;  %v9530_v44 = vcombine.low %v4709_v45, %v4719_v52  ;;  %v4618_v60 = vld [vmem:[#allocation2 + $0x60] sm:$0xf]  ;;  %v5458_v36 = vrot.slane %v9500_v61, 5  ;;  %v4621_v53 = vld [vmem:[#allocation2 + $0x6c] sm:$0xf] }
 0x164   : > { %7559 = vmatprep.mubr.bf16.mxu0 %v7800_v55  ;;  %v9512_v59 = vcombine.low %v10631_v1, %v10630_v4  ;;  %v4761_v55 = vor.u32 %v4760_v23, %v9487_v27  ;;  %v10635_v45 = vcombine.low %v9197_v5, %v9205_v21  ;;  %v9553_v10 = vsel %vm8398_vm13, %v6689_v38, %v5455_v37  ;;  %v7805_v34 = vld [vmem:[#allocation2 + $0xcc] sm:$0xff]  }
 0x165   : > { %v9543_v48 = vrot.slane %v4764_v47, 5  ;;  %v4775_v17 = vor.u32 %v4774_v35, %v4771_v41  ;;  %v9555_v52 = vrot.slane %v4778_v32, 5  ;;  %v4784_v33 = vrot.slane %v4782_v2, 4 }
 0x166   : > { %7582 = vmatpush3.bf16.msra.mxu1 %v7806_v18  ;;  %v10633_v18 = vsel %vm7950_vm5, %v9401_v40, %v9350_v56  ;;  %v7804_v56 = vld [vmem:[#allocation2 + $0xc0] sm:$0xff]   ;;  %v9539_v40 = vcombine.low %v4733_v49, %v4743_v58  ;;  %v9557_v49 = vld [vmem:[#allocation2 + $0x70] sm:$0xf]  ;;  %v10637_v23 = vcombine.low %v9209_v11, %v9220_v43  ;;  %v4793_v5 = vshrl.u32 %v4618_v60, 16  ;;  %v9571_v11 = vpop.f32.mrf.mxu0  ;;  %v4620_v43 = vld [vmem:[#allocation2 + $0x68] sm:$0x1] }
 0x167   : > { %v9524_v19 = vcombine.low %v10633_v18, %v10632_v8  ;;  %v5360_v58 = vld [vmem:[#allocation2 + $0x60] sm:$0xe]  ;;  %v4796_v21 = vshll.u32 %v4618_v60, 16  ;;  %v4802_v47 = vshll.u32 %v9535_v42, 16  ;;  %v4806_v4 = vshrl.u32 %v9535_v42, 16  ;;  %10638 = vst [vmem:[#allocation24_spill] sm:$0xff] %v9571_v11  ;;  %v9575_v18 = vpop.f32.mrf.mxu1 }
 0x168   : > { %v9568_v41 = vrot.slane %v4761_v55, 4  ;;  %v5457_v35 = vrot.slane %v5455_v37, 4  ;;  %v5462_v32 = vrot.slane %v9535_v42, 5  ;;  %v4817_v2 = vshrl.u32 %v4621_v53, 16  ;;  %10639 = vst [vmem:[#allocation25_spill] sm:$0xff] %v9575_v18 }
 0x169   : > { %7504 = vmatmul.mubr.bf16.gmra.mxu1 %v10635_v45  ;;  %v4820_v1 = vshll.u32 %v4621_v53, 16  ;;  %v4826_v8 = vshll.u32 %v9557_v49, 16  ;;  %v9577_v60 = vrot.slane %v4775_v17, 4  ;;  %v4785_v55 = vor.u32 %v4784_v33, %v9555_v52  ;;  %v4623_v18 = vld [vmem:[#allocation2 + $0x74] sm:$0x1] }
 0x16a   : > { %7507 = vmatprep.mubr.bf16.mxu1 %v10637_v23  ;;  %v4788_v37 = vshll.u32 %v9500_v61, 16  ;;  %v6690_v45 = vrot.slane %v5360_v58, 9  ;;  %v4795_v42 = vrot.slane %v4793_v5, 4  ;;  %v4798_v23 = vrot.slane %v4796_v21, 5  ;;  %v5361_v33 = vld [vmem:[#allocation2 + $0x6c] sm:$0xe] }
 0x16b   : > { %7560 = vmatmul.mubr.bf16.gmra.mxu0 %v7801_v9  ;;  %v4830_v9 = vshrl.u32 %v9557_v49, 16  ;;  %v9581_v31 = vrot.slane %v4802_v47, 5  ;;  %v9585_v53 = vsel %vm8398_vm13, %v5457_v35, %v5458_v36  ;;  %v5464_v24 = vrot.slane %v5462_v32, 4 }
 0x16c   : > { %7563 = vmatprep.mubr.bf16.mxu0 %v7804_v56  ;;  %v4808_v56 = vrot.slane %v4806_v4, 4  ;;  %v5465_v38 = vrot.slane %v4620_v43, 5  ;;  %v5469_v17 = vrot.slane %v9557_v49, 5  ;;  %v4819_v61 = vrot.slane %v4817_v2, 4  ;;  %v9595_v4 = vpop.f32.mrf.mxu1 }
 0x16d   : > { %v9588_v26 = vpop.f32.mrf.mxu0  ;;  %v4822_v58 = vrot.slane %v4820_v1, 5  ;;  %v9590_v5 = vrot.slane %v4826_v8, 5  ;;  %v4832_v21 = vrot.slane %v4830_v9, 4  ;;  %v10641_v47 = vcombine.low %v9227_v39, %v9235_v51  ;;  %10642 = vst [vmem:[#allocation27_spill] sm:$0xff] %v9595_v4 }
 0x16e   : > { %10640 = vst [vmem:[#allocation26_spill] sm:$0xff] %v9588_v26  ;;  %v4767_v36 = vsel %vm7950_vm5, %v9568_v41, %v9543_v48  ;;  %v4786_v49 = vrot.slane %v4785_v55, 4  ;;  %v4790_v35 = vrot.slane %v4788_v37, 5  ;;  %v4812_v29 = vshll.u32 %v4620_v43, 16  ;;  %v4624_v41 = vld [vmem:[#allocation2 + $0x78] sm:$0xf] }
 0x16f   : > { %v10643_v2 = vcombine.low %v9239_v57, %v9250_v7  ;;  %v9604_v1 = vpop.f32.mrf.mxu0  ;;  %v4781_v39 = vsel %vm7950_vm5, %v9577_v60, %v9555_v52  ;;  %v9612_v51 = vsel %vm8398_vm13, %v6690_v45, %v5462_v32  ;;  %v4799_v8 = vor.u32 %v4798_v23, %v4795_v42  ;;  %v4625_v55 = vld [vmem:[#allocation2 + $0x7c] sm:$0xf]  ;;  %v5362_v45 = vld [vmem:[#allocation2 + $0x78] sm:$0xe]  ;;  %v9625_v42 = vpop.f32.mrf.mxu1  ;;  %v9784_v26 = vld [vmem:[#allocation2 + $0xac] sm:$0xf] }
 0x170   : > { %10644 = vst [vmem:[#allocation28_spill] sm:$0xff] %v9604_v1  ;;  %v4809_v48 = vor.u32 %v4808_v56, %v9581_v31  ;;  %v6691_v43 = vrot.slane %v5361_v33, 9  ;;  %v5471_v9 = vrot.slane %v5469_v17, 4  ;;  %v5472_v57 = vrot.slane %v4623_v18, 5  ;;  %10647 = vst [vmem:[#allocation30_spill] sm:$0xff] %v9625_v42 }
 0x171   : > { %7508 = vmatmul.mubr.bf16.gmra.mxu1 %v10641_v47  ;;  %v4836_v7 = vshll.u32 %v4623_v18, 16  ;;  %v9615_v37 = vpop.f32.mrf.mxu0  ;;  %v10646_v47 = vcombine.low %v9325_v12, %v9334_v6  ;;  %v9622_v52 = vsel %vm8398_vm13, %v5464_v24, %v5465_v38  ;;  %v4823_v32 = vor.u32 %v4822_v58, %v4819_v61  ;;  %v4626_v56 = vld [vmem:[#allocation2 + $0x80] sm:$0x1] }
 0x172   : > { %7511 = vmatprep.mubr.bf16.mxu1 %v10643_v2  ;;  %10645 = vst [vmem:[#allocation29_spill] sm:$0xff] %v9615_v37  ;;  %v4833_v60 = vor.u32 %v4832_v21, %v9590_v5  ;;  %v4791_v18 = vsel %vm7950_vm5, %v4786_v49, %v4790_v35  ;;  %v4814_v23 = vrot.slane %v4812_v29, 5  ;;  %v4841_v33 = vshrl.u32 %v4624_v41, 16 }
 0x173   : > { %7564 = vmatmul.mubr.bf16.gmra.mxu0 %v7805_v34  ;;  %v5476_v34 = vrot.slane %v4625_v55, 5  ;;  %v4844_v2 = vshll.u32 %v4624_v41, 16  ;;  %v9629_v12 = vpop.f32.mrf.mxu0  ;;  %v4800_v6 = vrot.slane %v4799_v8, 4  ;;  %v4850_v24 = vshll.u32 %v4625_v55, 16 }
 0x174   : > { %7631 = vmatprep.mubr.bf16.mxu0 %v10646_v47  ;;  %10648 = vst [vmem:[#allocation31_spill] sm:$0xff] %v9629_v12  ;;  %v4810_v47 = vrot.slane %v4809_v48, 4  ;;  %v4854_v38 = vshrl.u32 %v4625_v55, 16  ;;  %v9633_v61 = vsel %vm8398_vm13, %v6691_v43, %v5469_v17  ;;  %v9637_v58 = vsel %vm8398_vm13, %v5471_v9, %v5472_v57  ;;  %v9644_v48 = vpop.f32.mrf.mxu1 }
 0x175   : > { %v4838_v21 = vrot.slane %v4836_v7, 5  ;;  %v6692_v49 = vrot.slane %v5362_v45, 9  ;;  %v9639_v29 = vpop.f32.mrf.mxu0  ;;  %v4824_v35 = vrot.slane %v4823_v32, 4  ;;  %v4834_v41 = vrot.slane %v4833_v60, 4  ;;  %10650 = vst [vmem:[#allocation32_spill] sm:$0xff] %v9644_v48  ;;  %v10653_v60 = vld [vmem:[#allocation11_spill] sm:$0xff] }
 0x176   : > { %v5478_v42 = vrot.slane %v5476_v34, 4  ;;  %v5479_v4 = vrot.slane %v4626_v56, 5  ;;  %v10649_v8 = vcombine.low %v9245_v3, %v9258_v16  ;;  %v10651_v17 = vsel %vm7950_vm5, %v9532_v14, %v9487_v27  ;;  %v4627_v32 = vld [vmem:[#allocation2 + $0x84] sm:$0xf] }
 0x177   : > { %v9651_v43 = vcombine.low %v10651_v17, %v4767_v36  ;;  %v4843_v57 = vrot.slane %v4841_v33, 4  ;;  %v4846_v7 = vrot.slane %v4844_v2, 5  ;;  %v10652_v55 = vcombine.low %v9262_v63, %v9276_v46  ;;  %v9658_v3 = vpop.f32.mrf.mxu0  ;;  %v10654_v45 = vld [vmem:[#allocation12_spill] sm:$0xff]  ;;  %v4633_v46 = vld [vmem:[#allocation2 + $0x9c] sm:$0xf] }
 0x178   : > { %v4805_v16 = vsel %vm7950_vm5, %v4800_v6, %v9581_v31  ;;  %v4815_v27 = vsel %vm7950_vm5, %v4810_v47, %v4814_v23  ;;  %v9665_v14 = vrot.slane %v4850_v24, 5  ;;  %v4856_v36 = vrot.slane %v4854_v38, 4  ;;  %v4628_v6 = vld [vmem:[#allocation2 + $0x88] sm:$0xf]  ;;  %v5363_v24 = vld [vmem:[#allocation2 + $0x84] sm:$0xe]  ;;  %v9694_v38 = vpop.f32.mrf.mxu1 }
 0x179   : > { %7512 = vmatmul.mubr.bf16.gmra.mxu1 %v10649_v8  ;;  %v10655_v33 = vcombine.low %v10653_v60, %v10654_v45  ;;  %v9670_v2 = vcombine.low %v4781_v39, %v4791_v18  ;;  %v4860_v31 = vshll.u32 %v4626_v56, 16  ;;  %v9676_v8 = vpop.f32.mrf.mxu0  ;;  %v10656_v23 = vcombine.low %v9430_v0, %v9440_v50  ;;  %10657 = vst [vmem:[#allocation11_spill] sm:$0xff] %v9694_v38 }
 0x17a   : > { %7515 = vmatprep.mubr.bf16.mxu1 %v10652_v55  ;;  %v4829_v47 = vsel %vm7950_vm5, %v4824_v35, %v9590_v5  ;;  %v4839_v39 = vsel %vm7950_vm5, %v4834_v41, %v4838_v21  ;;  %v9688_v18 = vsel %vm8398_vm13, %v6692_v49, %v5476_v34  ;;  %v9692_v56 = vsel %vm8398_vm13, %v5478_v42, %v5479_v4  ;;  %v9698_v5 = vld [vmem:[#allocation2 + $0x94] sm:$0xf]  ;;  %v4630_v35 = vld [vmem:[#allocation2 + $0x90] sm:$0xf]  ;;  %v9703_v49 = vld [vmem:[#allocation2 + $0x8c] sm:$0x1] }
 0x17b   : > { %7632 = vmatmul.mubr.bf16.vlgmr.msra.gmra.mxu0 %v10655_v33  ;;  %v9696_v0 = vcombine.low %v4805_v16, %v4815_v27  ;;  %v4847_v50 = vor.u32 %v4846_v7, %v4843_v57  ;;  %v4865_v17 = vshrl.u32 %v4627_v32, 16  ;;  %v4868_v55 = vshll.u32 %v4627_v32, 16  ;;  %v9700_v21 = vpop.f32.mrf.mxu0  ;;  %v9711_v27 = vld [vmem:[#allocation2 + $0xa0] sm:$0xf] }
 0x17c   : > { %7635 = vmatprep.mubr.bf16.mxu0 %v10656_v23  ;;  %v4857_v34 = vor.u32 %v4856_v36, %v9665_v14  ;;  %v5483_v41 = vrot.slane %v4628_v6, 5  ;;  %v4874_v4 = vshll.u32 %v4628_v6, 16  ;;  %v4878_v42 = vshrl.u32 %v4628_v6, 16 }
 0x17d   : > { %v9705_v60 = vcombine.low %v4829_v47, %v4839_v39  ;;  %v9709_v57 = vrot.slane %v4860_v31, 5  ;;  %v6693_v7 = vrot.slane %v5363_v24, 9  ;;  %v9713_v32 = vpop.f32.mrf.mxu0  ;;  %v4889_v45 = vshrl.u32 %v4630_v35, 16  ;;  %v10660_v47 = vld [vmem:[#allocation7_spill] sm:$0xff]  ;;  %v10661_v39 = vld [vmem:[#allocation6_spill] sm:$0xff] }
 0x17e   : > { %v4892_v33 = vshll.u32 %v4630_v35, 16  ;;  %v4898_v36 = vshll.u32 %v9698_v5, 16  ;;  %v4902_v23 = vshrl.u32 %v9698_v5, 16  ;;  %v9717_v6 = vpop.f32.mrf.mxu1  ;;  %v10662_v63 = vcombine.low %v10660_v47, %v10661_v39 }
 0x17f   : > { %10658 = vst [vmem:[#allocation12_spill] sm:$0xff] %v9705_v60  ;;  %10659 = vst [vmem:[#allocation33_spill] sm:$0xff] %v9717_v6  ;;  %v9722_v31 = vrot.slane %v4847_v50, 4  ;;  %v5486_v24 = vrot.slane %v9703_v49, 5  ;;  %v4867_v16 = vrot.slane %v4865_v17, 4  ;;  %v4870_v9 = vrot.slane %v4868_v55, 5  ;;  %v9726_v35 = vpop.f32.mrf.mxu0 }
 0x180   : > { %v9728_v38 = vrot.slane %v4857_v34, 4  ;;  %v5485_v48 = vrot.slane %v5483_v41, 4  ;;  %v9730_v20 = vrot.slane %v4874_v4, 5  ;;  %v4880_v6 = vrot.slane %v4878_v42, 4  ;;  %v9732_v12 = vpop.f32.mrf.mxu1  ;;  %v9737_v50 = vld [vmem:[#allocation2 + $0x98] sm:$0x1] }
 0x181   : > { %7516 = vmatmul.mubr.bf16.gmra.mxu1 %v10662_v63  ;;  %10663 = vst [vmem:[#allocation7_spill] sm:$0xff] %v9732_v12  ;;  %v10664_v63 = vcombine.low %v9469_v62, %v9478_v13  ;;  %v4913_v17 = vshrl.u32 %v4633_v46, 16  ;;  %v4916_v55 = vshll.u32 %v4633_v46, 16  ;;  %v4926_v47 = vshrl.u32 %v9711_v27, 16  ;;  %v9741_v34 = vpop.f32.mrf.mxu0 }
 0x182   : > { %7583 = vmatprep.mubr.bf16.mxu1 %v9512_v59  ;;  %v4922_v59 = vshll.u32 %v9711_v27, 16  ;;  %v10665_v4 = vcombine.low %v9482_v30, %v9495_v22  ;;  %v4891_v42 = vrot.slane %v4889_v45, 4  ;;  %v4894_v39 = vrot.slane %v4892_v33, 5  ;;  %v9748_v13 = vpop.f32.mrf.mxu1 }
 0x183   : > { %7636 = vmatmul.mubr.bf16.gmra.mxu0 %v10664_v63  ;;  %v9746_v12 = vrot.slane %v4898_v36, 5  ;;  %v4904_v62 = vrot.slane %v4902_v23, 4  ;;  %10666 = vst [vmem:[#allocation6_spill] sm:$0xff] %v9748_v13  ;;  %v9756_v63 = vsel %vm8398_vm13, %v6693_v7, %v5483_v41  ;;  %v4871_v37 = vor.u32 %v4870_v9, %v4867_v16  ;;  %v9759_v22 = vpop.f32.mrf.mxu0  ;;  %v5364_v36 = vld [vmem:[#allocation2 + $0x90] sm:$0xe] }
 0x184   : > { %7639 = vmatprep.mubr.bf16.mxu0 %v10665_v4  ;;  %v4884_v30 = vshll.u32 %v9703_v49, 16  ;;  %10667 = vst [vmem:[#allocation34_spill] sm:$0xff] %v9759_v22  ;;  %v9763_v45 = vsel %vm8398_vm13, %v5485_v48, %v5486_v24  ;;  %v4881_v33 = vor.u32 %v4880_v6, %v9730_v20  ;;  %v5490_v23 = vrot.slane %v9698_v5, 5  ;;  %v9768_v46 = vpop.f32.mrf.mxu1  ;;  %v4635_v41 = vld [vmem:[#allocation2 + $0xa4] sm:$0x1] }
 0x185   : > { %v4908_v4 = vshll.u32 %v9737_v50, 16  ;;  %10668 = vst [vmem:[#allocation35_spill] sm:$0xff] %v9768_v46  ;;  %v4915_v7 = vrot.slane %v4913_v17, 4  ;;  %v4918_v9 = vrot.slane %v4916_v55, 5  ;;  %v9770_v16 = vrot.slane %v4922_v59, 5  ;;  %v9772_v13 = vpop.f32.mrf.mxu0 }
 0x186   : > { %v4928_v49 = vrot.slane %v4926_v47, 4  ;;  %10669 = vst [vmem:[#allocation36_spill] sm:$0xff] %v9772_v13  ;;  %v4863_v48 = vsel %vm7950_vm5, %v9728_v38, %v9709_v57  ;;  %v4895_v6 = vor.u32 %v4894_v39, %v4891_v42  ;;  %v4905_v5 = vor.u32 %v4904_v62, %v9746_v12  ;;  %v5365_v24 = vld [vmem:[#allocation2 + $0x9c] sm:$0xe]  ;;  %v9780_v46 = vpop.f32.mrf.mxu1  ;;  %v9799_v22 = vld [vmem:[#allocation2 + $0xb0] sm:$0x1] }
 0x187   : > { %v5497_v1 = vrot.slane %v9711_v27, 5  ;;  %v4872_v17 = vrot.slane %v4871_v37, 4  ;;  %v4886_v55 = vrot.slane %v4884_v30, 5  ;;  %v6694_v59 = vrot.slane %v5364_v36, 9  ;;  %v9787_v38 = vpop.f32.mrf.mxu0  ;;  %v4636_v27 = vld [vmem:[#allocation2 + $0xa8] sm:$0xf] }
 0x188   : > { %v5493_v47 = vrot.slane %v9737_v50, 5  ;;  %10670 = vst [vmem:[#allocation37_spill] sm:$0xff] %v9787_v38  ;;  %v4882_v57 = vrot.slane %v4881_v33, 4  ;;  %v5492_v42 = vrot.slane %v5490_v23, 4  ;;  %v4910_v39 = vrot.slane %v4908_v4, 5  ;;  %v1963_v60 = vpop.f32.mrf.mxu1 }
 0x189   : > { %7584 = vmatmul.mubr.bf16.vlgmr.msra.gmra.mxu1 %v9524_v19  ;;  %v4932_v62 = vshll.u32 %v4635_v41, 16  ;;  %v10671_v19 = vcombine.low %v9553_v10, %v9585_v53  ;;  %v6695_v37 = vrot.slane %v5365_v24, 9  ;;  %v4919_v30 = vor.u32 %v4918_v9, %v4915_v7  ;;  %v5366_v36 = vld [vmem:[#allocation2 + $0xa8] sm:$0xe] }
 0x18a   : > { %7587 = vmatprep.mubr.bf16.mxu1 %v9530_v44  ;;  %v4929_v50 = vor.u32 %v4928_v49, %v9770_v16  ;;  %v5504_v11 = vrot.slane %v9784_v26, 5  ;;  %v9794_v44 = vpop.f32.mrf.mxu0  ;;  %v10672_v33 = vcombine.low %v9612_v51, %v9622_v52  ;;  %v4896_v4 = vrot.slane %v4895_v6, 4  ;;  %v7298_v10 = vpop.f32.mrf.mxu1 }
 0x18b   : > { %7640 = vmatmul.mubr.bf16.gmra.mxu0 %v10671_v19  ;;  %v4906_v38 = vrot.slane %v4905_v5, 4  ;;  %v5499_v54 = vrot.slane %v5497_v1, 4  ;;  %v5500_v13 = vrot.slane %v4635_v41, 5  ;;  %v4877_v53 = vsel %vm7950_vm5, %v4872_v17, %v9730_v20 }
 0x18c   : > { %7643 = vmatprep.mubr.bf16.mxu0 %v10672_v33  ;;  %v9806_v7 = vsel %vm8398_vm13, %v6694_v59, %v5490_v23  ;;  %v4937_v9 = vshrl.u32 %v4636_v27, 16  ;;  %v4940_v49 = vshll.u32 %v4636_v27, 16  ;;  %v9808_v24 = vpop.f32.mrf.mxu0  ;;  %v4887_v51 = vsel %vm7950_vm5, %v4882_v57, %v4886_v55  ;;  %v1966_v5 = vpop.f32.mrf.mxu1  ;;  %v5367_v33 = vld [vmem:[#allocation2 + $0xb4] sm:$0xe] }
 0x18d   : > { %v9814_v52 = vsel %vm8398_vm13, %v5492_v42, %v5493_v47  ;;  %v4934_v41 = vrot.slane %v4932_v62, 5  ;;  %v6696_v6 = vrot.slane %v5366_v36, 9  ;;  %v4920_v19 = vrot.slane %v4919_v30, 4 }
 0x18e   : > { %v4930_v20 = vrot.slane %v4929_v50, 4  ;;  %v5506_v17 = vrot.slane %v5504_v11, 4  ;;  %v5507_v23 = vrot.slane %v9799_v22, 5  ;;  %v9817_v59 = vpop.f32.mrf.mxu0  ;;  %v4901_v27 = vsel %vm7950_vm5, %v4896_v4, %v9746_v12  ;;  %v7301_v42 = vpop.f32.mrf.mxu1  ;;  %v10677_v4 = vld [vmem:[#allocation9_spill] sm:$0xff] }
 0x18f   : > { %v4911_v55 = vsel %vm7950_vm5, %v4906_v38, %v4910_v39  ;;  %v9826_v47 = vsel %vm8398_vm13, %v6695_v37, %v5497_v1  ;;  %v9830_v57 = vsel %vm8398_vm13, %v5499_v54, %v5500_v13  ;;  %v4939_v62 = vrot.slane %v4937_v9, 4 }
 0x190   : > { %v4942_v30 = vrot.slane %v4940_v49, 5  ;;  %v4946_v50 = vshll.u32 %v9784_v26, 16  ;;  %v4950_v12 = vshrl.u32 %v9784_v26, 16  ;;  %v9836_v38 = vpop.f32.mrf.mxu0  ;;  %v10673_v1 = vsel %vm7950_vm5, %v9722_v31, %v9665_v14  ;;  %v1979_v26 = vpop.f32.mrf.mxu1 }
 0x191   : > { %7588 = vmatmul.mubr.bf16.gmra.mxu1 %v9539_v40  ;;  %v9843_v54 = vcombine.low %v10673_v1, %v4863_v48  ;;  %v6725_v40 = vcombine.low %v9756_v63, %v9763_v45  ;;  %v9847_v13 = vcombine.low %v4877_v53, %v4887_v51  ;;  %v6726_v39 = vcombine.low %v9806_v7, %v9814_v52  ;;  %v10675_v45 = vld [vmem:[#allocation8_spill] sm:$0xff] }
 0x192   : > { %7591 = vmatprep.mubr.bf16.mxu1 %v9651_v43  ;;  %v10674_v43 = vcombine.low %v9633_v61, %v9637_v58  ;;  %v4925_v37 = vsel %vm7950_vm5, %v4920_v19, %v9770_v16  ;;  %v4935_v14 = vsel %vm7950_vm5, %v4930_v20, %v4934_v41  ;;  %v9861_v31 = vsel %vm8398_vm13, %v6696_v6, %v5504_v11  ;;  %v9869_v61 = vpop.f32.mrf.mxu0  ;;  %v7302_v7 = vpop.f32.mrf.mxu1  ;;  %v10678_v51 = vld [vmem:[#allocation4_spill] sm:$0xff]  ;;  %v10679_v41 = vld [vmem:[#allocation5_spill] sm:$0xff]  ;;  %v10680_v20 = vld [vmem:[#allocation3_spill] sm:$0xff] }
 0x193   : > { %v9865_v63 = vsel %vm8398_vm13, %v5506_v17, %v5507_v23  ;;  %v1972_v48 = vadd.f32 %v9780_v46, %v10675_v45  ;;  %v10676_v58 = vcombine.low %v9688_v18, %v9692_v56  ;;  %v9874_v16 = vcombine.low %v4901_v27, %v4911_v55  ;;  %v10681_v17 = vld [vmem:[#allocation13_spill] sm:$0xff]  ;;  %v10682_v27 = vld [vmem:[#allocation15_spill] sm:$0xff] }
 0x194   : > { %7644 = vmatmul.mubr.bf16.gmra.mxu0 %v10674_v43  ;;  %v6727_v36 = vcombine.low %v9826_v47, %v9830_v57  ;;  %v4956_v11 = vshll.u32 %v9799_v22, 16  ;;  %v1964_v53 = vadd.f32 %v1963_v60, %v10677_v4  ;;  %v4943_v9 = vor.u32 %v4942_v30, %v4939_v62  ;;  %v9884_v56 = vpop.f32.mrf.mxu0  ;;  %v9890_v22 = vld [vmem:[#allocation2 + $0xbc] sm:$0x1]  ;;  %v1982_v62 = vpop.f32.mrf.mxu1  ;;  %v9895_v30 = vld [vmem:[#allocation2 + $0xb8] sm:$0xf] }
 0x195   : > { %7647 = vmatprep.mubr.bf16.mxu0 %v10676_v58  ;;  %v9880_v49 = vrot.slane %v4946_v50, 5  ;;  %v4952_v46 = vrot.slane %v4950_v12, 4  ;;  %v1975_v52 = vadd.f32 %v7298_v10, %v10678_v51  ;;  %v1967_v18 = vadd.f32 %v1966_v5, %v10679_v41  ;;  %v4639_v5 = vld [vmem:[#allocation2 + $0xb4] sm:$0xf]  ;;  %v10683_v50 = vld [vmem:[#allocation17_spill] sm:$0xff]  ;;  %v10684_v4 = vld [vmem:[#allocation19_spill] sm:$0xff] }
 0x196   : > { %v9886_v6 = vcombine.low %v4925_v37, %v4935_v14  ;;  %v1988_v60 = vadd.f32 %v7301_v42, %v10680_v20  ;;  %v1980_v23 = vadd.f32 %v1979_v26, %v10681_v17  ;;  %v1991_v55 = vadd.f32 %v7302_v7, %v10682_v27  ;;  %v9898_v1 = vpop.f32.mrf.mxu0  ;;  %v7305_v42 = vpop.f32.mrf.mxu1  ;;  %v4642_v41 = vld [vmem:[#allocation2 + $0xc0] sm:$0xf]  ;;  %v10687_v27 = vld [vmem:[#allocation22_spill] sm:$0xff]  ;;  %v5369_v47 = vld [vmem:[#allocation2 + $0xcc] sm:$0xe] }
 0x197   : > { %v6697_v10 = vrot.slane %v5367_v33, 9  ;;  %v1983_v12 = vadd.f32 %v1982_v62, %v10683_v50  ;;  %v9900_v43 = vrot.slane %v4956_v11, 5  ;;  %v5511_v37 = vrot.slane %v9895_v30, 5 }
 0x198   : > { %v9904_v14 = vadd.f32 %v9639_v29, %v1972_v48  ;;  %v9907_v26 = vrot.slane %v4943_v9, 4  ;;  %v4953_v45 = vor.u32 %v4952_v46, %v9880_v49  ;;  %v5514_v58 = vrot.slane %v9890_v22, 5  ;;  %v9916_v7 = vpop.f32.mrf.mxu0  ;;  %v1995_v9 = vpop.f32.mrf.mxu1 }
 0x199   : > { %7592 = vmatmul.mubr.bf16.gmra.mxu1 %v9670_v2  ;;  %v9912_v33 = vadd.f32 %v9658_v3, %v1964_v53  ;;  %v2004_v11 = vadd.f32 %v7305_v42, %v10684_v4  ;;  %v4961_v29 = vshrl.u32 %v4639_v5, 16  ;;  %v9919_v48 = vadd.f32 %v9676_v8, %v1975_v52  ;;  %v9928_v3 = vld [vmem:[#allocation2 + $0xc4] sm:$0xf] }
 0x19a   : > { %7595 = vmatprep.mubr.bf16.mxu1 %v9696_v0  ;;  %v9922_v2 = vadd.f32 %v9700_v21, %v1967_v18  ;;  %v9926_v46 = vsel %vm8398_vm13, %v6697_v10, %v5511_v37  ;;  %v9931_v53 = vadd.f32 %v9713_v32, %v1988_v60  ;;  %v9934_v0 = vadd.f32 %v9726_v35, %v1980_v23  ;;  %v9940_v51 = vpop.f32.mrf.mxu0  ;;  %v10685_v18 = vld [vmem:[#allocation34_spill] sm:$0xff]  ;;  %v10686_v32 = vld [vmem:[#allocation36_spill] sm:$0xff]  ;;  %v7306_v35 = vpop.f32.mrf.mxu1  ;;  %v9954_v23 = vld [vmem:[#allocation2 + $0xc8] sm:$0x1] }
 0x19b   : > { %v9937_v8 = vadd.f32 %v9741_v34, %v1991_v55  ;;  %v1996_v21 = vadd.f32 %v1995_v9, %v9489_v25  ;;  %v5518_v52 = vrot.slane %v9928_v3, 5  ;;  %v9944_v20 = vadd.f32 %v10685_v18, %v1983_v12  ;;  %v10688_v12 = vld [vmem:[#allocation37_spill] sm:$0xff] }
 0x19c   : > { %7648 = vmatmul.mubr.bf16.gmra.mxu0 %v6725_v40  ;;  %v5368_v40 = vld [vmem:[#allocation2 + $0xc0] sm:$0xe]  ;;  %v9947_v60 = vadd.f32 %v10686_v32, %v2004_v11  ;;  %v4949_v34 = vsel %vm7950_vm5, %v9907_v26, %v9880_v49  ;;  %v5513_v25 = vrot.slane %v5511_v37, 4  ;;  %v4964_v17 = vshll.u32 %v4639_v5, 16  ;;  %v9957_v62 = vpop.f32.mrf.mxu0  ;;  %v1998_v4 = vpop.f32.mrf.mxu1 }
 0x19d   : > { %7651 = vmatprep.mubr.bf16.mxu0 %v6726_v39  ;;  %v4970_v39 = vshll.u32 %v9895_v30, 16  ;;  %v2007_v55 = vadd.f32 %v7306_v35, %v10687_v27  ;;  %v4954_v10 = vrot.slane %v4953_v45, 4  ;;  %v9959_v50 = vrot.slane %v4961_v29, 4  ;;  %v10689_v26 = vld [vmem:[#allocation24_spill] sm:$0xff] }
 0x19e   : > { %v9962_v42 = vadd.f32 %v10688_v12, %v1996_v21  ;;  %v4974_v11 = vshrl.u32 %v9895_v30, 16  ;;  %v6698_v49 = vrot.slane %v5368_v40, 9  ;;  %v4985_v37 = vshrl.u32 %v4642_v41, 16  ;;  %v9966_v18 = vpop.f32.mrf.mxu0  ;;  %v7309_v29 = vpop.f32.mrf.mxu1  ;;  %v10690_v27 = vld [vmem:[#allocation12_spill] sm:$0xff]  ;;  %v10691_v12 = vld [vmem:[#allocation26_spill] sm:$0xff] }
 0x19f   : > { %v4988_v5 = vshll.u32 %v4642_v41, 16  ;;  %v1999_v9 = vadd.f32 %v1998_v4, %v10689_v26  ;;  %v5520_v32 = vrot.slane %v5518_v52, 4  ;;  %v5521_v35 = vrot.slane %v9954_v23, 5 }
 0x1a0   : > { %v9970_v45 = vadd.f32 %v9794_v44, %v2007_v55  ;;  %v5515_v21 = vsel %vm8398_vm13, %v5513_v25, %v5514_v58  ;;  %v4966_v30 = vrot.slane %v4964_v17, 5  ;;  %v4994_v40 = vshll.u32 %v9928_v3, 16  ;;  %v9979_v26 = vpop.f32.mrf.mxu0  ;;  %v2011_v58 = vpop.f32.mrf.mxu1 }
 0x1a1   : > { %7596 = vmatmul.mubr.bf16.gmra.mxu1 %v10690_v27  ;;  %v4998_v41 = vshrl.u32 %v9928_v3, 16  ;;  %v2020_v4 = vadd.f32 %v7309_v29, %v10691_v12  ;;  %v4959_v44 = vsel %vm7950_vm5, %v4954_v10, %v9900_v43  ;;  %v9984_v55 = vrot.slane %v4970_v39, 5  ;;  %v4646_v29 = vld [vmem:[#allocation2 + $0xd0] sm:$0xf]  ;;  %v10692_v12 = vld [vmem:[#allocation28_spill] sm:$0xff] }
 0x1a2   : > { %7599 = vmatprep.mubr.bf16.mxu1 %v9843_v54  ;;  %v9987_v27 = vadd.f32 %v9808_v24, %v1999_v9  ;;  %v4976_v3 = vrot.slane %v4974_v11, 4  ;;  %v5519_v54 = vsel %vm8398_vm13, %v6698_v49, %v5518_v52  ;;  %v4987_v25 = vrot.slane %v4985_v37, 4  ;;  %v9995_v43 = vpop.f32.mrf.mxu0  ;;  %v7310_v52 = vpop.f32.mrf.mxu1 }
 0x1a3   : > { %v4990_v17 = vrot.slane %v4988_v5, 5  ;;  %v2012_v19 = vadd.f32 %v2011_v58, %v10692_v12  ;;  %v10693_v24 = vcombine.low %v9861_v31, %v9865_v63  ;;  %v5522_v39 = vsel %vm8398_vm13, %v5520_v32, %v5521_v35  ;;  %v10009_v5 = vld [vmem:[#allocation2 + $0xd4] sm:$0x1]  ;;  %v10694_v31 = vld [vmem:[#allocation29_spill] sm:$0xff] }
 0x1a4   : > { %7652 = vmatmul.mubr.bf16.gmra.mxu0 %v6727_v36  ;;  %v5525_v57 = vrot.slane %v4646_v29, 5  ;;  %v10003_v36 = vadd.f32 %v9817_v59, %v2020_v4  ;;  %v6729_v10 = vcombine.low %v9926_v46, %v5515_v21  ;;  %v4980_v11 = vshll.u32 %v9890_v22, 16  ;;  %v10012_v9 = vpop.f32.mrf.mxu0  ;;  %v4645_v58 = vld [vmem:[#allocation2 + $0xcc] sm:$0xf]  ;;  %v2014_v4 = vpop.f32.mrf.mxu1 }
 0x1a5   : > { %7655 = vmatprep.mubr.bf16.mxu0 %v10693_v24  ;;  %v10007_v49 = vrot.slane %v4994_v40, 5  ;;  %v5000_v37 = vrot.slane %v4998_v41, 4  ;;  %v2023_v63 = vadd.f32 %v7310_v52, %v10694_v31  ;;  %v6672_v32 = vcombine.low %v4949_v34, %v4959_v44  ;;  %v10695_v41 = vld [vmem:[#allocation31_spill] sm:$0xff] }
 0x1a6   : > { %v4967_v35 = vor.u32 %v4966_v30, %v9959_v50  ;;  %v10016_v59 = vadd.f32 %v9836_v38, %v2012_v19  ;;  %v4977_v46 = vor.u32 %v4976_v3, %v9984_v55  ;;  %v6730_v22 = vcombine.low %v5519_v54, %v5522_v39  ;;  %v10020_v24 = vpop.f32.mrf.mxu0  ;;  %v10696_v3 = vld [vmem:[#allocation10_spill] sm:$0xff] }
 0x1a7   : > { %v4991_v21 = vor.u32 %v4990_v17, %v4987_v25  ;;  %v6699_v40 = vrot.slane %v5369_v47, 9  ;;  %v2015_v12 = vadd.f32 %v2014_v4, %v10695_v41  ;;  %v5527_v52 = vrot.slane %v5525_v57, 4  ;;  %v7313_v50 = vpop.f32.mrf.mxu1 }
 0x1a8   : > { %v5528_v31 = vrot.slane %v10009_v5, 5  ;;  %v10024_v34 = vadd.f32 %v9869_v61, %v2023_v63  ;;  %v5001_v38 = vor.u32 %v5000_v37, %v10007_v49  ;;  %v5004_v19 = vshll.u32 %v9954_v23, 16  ;;  %v10031_v25 = vpop.f32.mrf.mxu0  ;;  %v10697_v23 = vld [vmem:[#allocation14_spill] sm:$0xff] }
 0x1a9   : > { %7600 = vmatmul.mubr.bf16.gmra.mxu1 %v9847_v13  ;;  %v5009_v30 = vshrl.u32 %v4645_v58, 16  ;;  %v5012_v44 = vshll.u32 %v4645_v58, 16  ;;  %v2036_v54 = vadd.f32 %v7313_v50, %v10696_v3  ;;  %v5018_v17 = vshll.u32 %v4646_v29, 16  ;;  %v2027_v47 = vpop.f32.mrf.mxu1 }
 0x1aa   : > { %7603 = vmatprep.mubr.bf16.mxu1 %v9874_v16  ;;  %v5022_v39 = vshrl.u32 %v4646_v29, 16  ;;  %v10034_v61 = vadd.f32 %v9884_v56, %v2015_v12  ;;  %v4968_v13 = vrot.slane %v4967_v35, 4  ;;  %v4978_v63 = vrot.slane %v4977_v46, 4  ;;  %v10037_v58 = vpop.f32.mrf.mxu0 }
 0x1ab   : > { %v4982_v37 = vrot.slane %v4980_v11, 5  ;;  %v4992_v4 = vrot.slane %v4991_v21, 4  ;;  %v2028_v41 = vadd.f32 %v2027_v47, %v10697_v23  ;;  %v5526_v16 = vsel %vm8398_vm13, %v6699_v40, %v5525_v57  ;;  %v7314_v12 = vpop.f32.mrf.mxu1  ;;  %v10698_v21 = vld [vmem:[#allocation16_spill] sm:$0xff]  ;;  %v10699_v40 = vld [vmem:[#allocation18_spill] sm:$0xff] }
 0x1ac   : > { %7656 = vmatmul.mubr.bf16.gmra.mxu0 %v6729_v10  ;;  %v5529_v29 = vsel %vm8398_vm13, %v5527_v52, %v5528_v31  ;;  %v10044_v56 = vadd.f32 %v9898_v1, %v2036_v54  ;;  %v5002_v10 = vrot.slane %v5001_v38, 4  ;;  %v5006_v35 = vrot.slane %v5004_v19, 5  ;;  %v10047_v3 = vpop.f32.mrf.mxu0 }
 0x1ad   : > { %7659 = vmatprep.mubr.bf16.mxu0 %v6730_v22  ;;  %v5011_v46 = vrot.slane %v5009_v30, 4  ;;  %v5014_v11 = vrot.slane %v5012_v44, 5  ;;  %v2039_v50 = vadd.f32 %v7314_v12, %v10698_v21  ;;  %v5020_v47 = vrot.slane %v5018_v17, 5  ;;  %v2030_v57 = vpop.f32.mrf.mxu1 }
 0x1ae   : > { %v5024_v22 = vrot.slane %v5022_v39, 4  ;;  %v10050_v23 = vadd.f32 %v9916_v7, %v2028_v41  ;;  %v6731_v15 = vcombine.low %v5526_v16, %v5529_v29  ;;  %v2031_v52 = vadd.f32 %v2030_v57, %v10699_v40  ;;  %v10704_v40 = vld [vmem:[#allocation27_spill] sm:$0xff] }
 0x1af   : > { %v4973_v1 = vsel %vm7950_vm5, %v4968_v13, %v9984_v55  ;;  %v7373_v31 = vpop.f32.mrf.mxu0  ;;  %v10057_v38 = vadd.f32 %v9940_v51, %v2039_v50  ;;  %v4983_v30 = vsel %vm7950_vm5, %v4978_v63, %v4982_v37  ;;  %v4997_v7 = vsel %vm7950_vm5, %v4992_v4, %v10007_v49  ;;  %v10700_v55 = vld [vmem:[#allocation20_spill] sm:$0xff]  ;;  %v10701_v63 = vld [vmem:[#allocation21_spill] sm:$0xff] }
 0x1b0   : > { %v7317_v19 = vpop.f32.mrf.mxu1  ;;  %v5007_v44 = vsel %vm7950_vm5, %v5002_v10, %v5006_v35  ;;  %v5028_v54 = vshll.u32 %v10009_v5, 16  ;;  %v5015_v51 = vor.u32 %v5014_v11, %v5011_v46  ;;  %v5025_v39 = vor.u32 %v5024_v22, %v5020_v47  ;;  %v10702_v10 = vld [vmem:[#allocation23_spill] sm:$0xff]  ;;  %v10703_v50 = vld [vmem:[#allocation25_spill] sm:$0xff] }
 0x1b1   : > { %7604 = vmatmul.mubr.bf16.gmra.mxu1 %v9886_v6  ;;  %v2052_v17 = vadd.f32 %v7317_v19, %v10700_v55  ;;  %v2528_v13 = vpop.f32.mrf.mxu0  ;;  %v10070_v6 = vadd.f32 %v9957_v62, %v2031_v52  ;;  %v6673_v29 = vcombine.low %v4973_v1, %v4983_v30  ;;  %v6674_v5 = vcombine.low %v4997_v7, %v5007_v44  ;;  %v10705_v44 = vld [vmem:[#allocation30_spill] sm:$0xff] }
 0x1b2   : > { %7607 = vmatprep.mubr.bf16.mxu1 %v6672_v32  ;;  %v2043_v41 = vpop.f32.mrf.mxu1  ;;  %v5030_v12 = vrot.slane %v5028_v54, 5  ;;  %v5016_v35 = vrot.slane %v5015_v51, 4  ;;  %v5026_v46 = vrot.slane %v5025_v39, 4  ;;  %v10706_v39 = vld [vmem:[#allocation32_spill] sm:$0xff] }
 0x1b3   : > { %v2044_v37 = vadd.f32 %v2043_v41, %v10701_v63  ;;  %v7374_v16 = vpop.f32.mrf.mxu0  ;;  %v10074_v49 = vadd.f32 %v9966_v18, %v2052_v17 }
 0x1b4   : > { %7660 = vmatmul.mubr.bf16.gmra.mxu0 %v6731_v15  ;;  %v7318_v4 = vpop.f32.mrf.mxu1  ;;  %v5021_v1 = vsel %vm7950_vm5, %v5016_v35, %v5020_v47  ;;  %v5031_v19 = vsel %vm7950_vm5, %v5026_v46, %v5030_v12  ;;  %v10708_v12 = vld [vmem:[#allocation33_spill] sm:$0xff]  ;;  %v10709_v46 = vld [vmem:[#allocation7_spill] sm:$0xff] }
 0x1b5   : > { %v2055_v32 = vadd.f32 %v7318_v4, %v10702_v10  ;;  %v2531_v11 = vpop.f32.mrf.mxu0  ;;  %v10078_v62 = vadd.f32 %v9979_v26, %v2044_v37  ;;  %v6675_v51 = vcombine.low %v5021_v1, %v5031_v19  ;;  %v10707_v37 = vld [vmem:[#allocation11_spill] sm:$0xff] }
 0x1b6   : > { %v2046_v21 = vpop.f32.mrf.mxu1  ;;  %v10711_v19 = vld [vmem:[#allocation35_spill] sm:$0xff] }
 0x1b7   : > { %v2047_v22 = vadd.f32 %v2046_v21, %v10703_v50  ;;  %v7441_v57 = vpop.f32.mrf.mxu0  ;;  %v10082_v15 = vadd.f32 %v9995_v43, %v2055_v32 }
 0x1b9   : > { %v7321_v18 = vpop.f32.mrf.mxu1  ;;  %7608 = vmatmul.mubr.bf16.gmra.mxu1 %v6673_v29  ;;  %v3556_v26 = vpop.f32.mrf.mxu0  ;;  %v10090_v30 = vadd.f32 %v10012_v9, %v2047_v22 }
 0x1ba   : > { %v2068_v52 = vadd.f32 %v7321_v18, %v10704_v40  ;;  %7611 = vmatprep.mubr.bf16.mxu1 %v6674_v5  ;;  %v10710_v18 = vld [vmem:[#allocation6_spill] sm:$0xff] }
 0x1bb   : > { %v2059_v7 = vpop.f32.mrf.mxu1  ;;  %v7442_v43 = vpop.f32.mrf.mxu0 }
 0x1bc   : > { %v2060_v54 = vadd.f32 %v2059_v7, %v10705_v44  ;;  %v10094_v55 = vadd.f32 %v10020_v24, %v2068_v52 }
 0x1bd   : > { %v7322_v17 = vpop.f32.mrf.mxu1  ;;  %v3559_v63 = vpop.f32.mrf.mxu0 }
 0x1be   : > { %v2071_v41 = vadd.f32 %v7322_v17, %v10706_v39  ;;  %v10098_v47 = vadd.f32 %v10031_v25, %v2060_v54 }
 0x1bf   : > { %v2062_v28 = vpop.f32.mrf.mxu1  ;;  %v7445_v9 = vpop.f32.mrf.mxu0 }
 0x1c0   : > { %v2063_v4 = vadd.f32 %v2062_v28, %v10707_v37  ;;  %v10102_v29 = vadd.f32 %v10037_v58, %v2071_v41 }
 0x1c1   : > { %v7325_v5 = vpop.f32.mrf.mxu1  ;;  %7612 = vmatmul.mubr.bf16.gmra.mxu1 %v6675_v51  ;;  %v3572_v10 = vpop.f32.mrf.mxu0 }
 0x1c2   : > { %v2084_v24 = vadd.f32 %v7325_v5, %v10708_v12  ;;  %v10106_v32 = vadd.f32 %v10047_v3, %v2063_v4 }
 0x1c3   : > { %v2075_v35 = vpop.f32.mrf.mxu1  ;;  %v7446_v25 = vpop.f32.mrf.mxu0 }
 0x1c4   : > { %v2076_v21 = vadd.f32 %v2075_v35, %v10709_v46  ;;  %v10109_v50 = vadd.f32 %v7373_v31, %v2084_v24 }
 0x1c5   : > { %v7326_v22 = vpop.f32.mrf.mxu1  ;;  %v3575_v52 = vpop.f32.mrf.mxu0 }
 0x1c6   : > { %v2087_v40 = vadd.f32 %v7326_v22, %v10710_v18  ;;  %v10112_v58 = vadd.f32 %v2528_v13, %v2076_v21 }
 0x1c7   : > { %v2078_v1 = vpop.f32.mrf.mxu1  ;;  %v7449_v44 = vpop.f32.mrf.mxu0 }
 0x1c8   : > { %v2079_v7 = vadd.f32 %v2078_v1, %v10711_v19  ;;  %v10115_v54 = vadd.f32 %v7374_v16, %v2087_v40 }
 0x1c9   : > { %v7393_v3 = vpop.f32.mrf.mxu1  ;;  %v3588_v51 = vpop.f32.mrf.mxu0 }
 0x1ca   : > { %v2931_v17 = vadd.f32 %v7393_v3, %v9904_v14  ;;  %v10118_v39 = vadd.f32 %v2531_v11, %v2079_v7 }
 0x1cb   : > { %v2802_v31 = vpop.f32.mrf.mxu1  ;;  %v7450_v28 = vpop.f32.mrf.mxu0 }
 0x1cc   : > { %v2929_v41 = vadd.f32 %v2802_v31, %v9912_v33  ;;  %v10121_v37 = vadd.f32 %v7441_v57, %v2931_v17 }
 0x1cd   : > { %v7394_v13 = vpop.f32.mrf.mxu1  ;;  %v3591_v5 = vpop.f32.mrf.mxu0 }
 0x1ce   : > { %v2932_v4 = vadd.f32 %v7394_v13, %v9919_v48  ;;  %v10124_v12 = vadd.f32 %v3556_v26, %v2929_v41 }
 0x1cf   : > { %v2805_v16 = vpop.f32.mrf.mxu1  ;;  %v7453_v35 = vpop.f32.mrf.mxu0 }
 0x1d0   : > { %v2930_v24 = vadd.f32 %v2805_v16, %v9922_v2  ;;  %v10127_v14 = vadd.f32 %v7442_v43, %v2932_v4 }
 0x1d1   : > { %v7397_v11 = vpop.f32.mrf.mxu1  ;;  %v3604_v21 = vpop.f32.mrf.mxu0 }
 0x1d2   : > { %v2935_v46 = vadd.f32 %v7397_v11, %v9931_v53  ;;  %v10130_v33 = vadd.f32 %v3559_v63, %v2930_v24 }
 0x1d3   : > { %v2818_v57 = vpop.f32.mrf.mxu1  ;;  %v7454_v18 = vpop.f32.mrf.mxu0 }
 0x1d4   : > { %v2933_v22 = vadd.f32 %v2818_v57, %v9934_v0  ;;  %v10133_v48 = vadd.f32 %v7445_v9, %v2935_v46 }
 0x1d5   : > { %v7398_v26 = vpop.f32.mrf.mxu1  ;;  %v3607_v1 = vpop.f32.mrf.mxu0 }
 0x1d6   : > { %v2936_v40 = vadd.f32 %v7398_v26, %v9937_v8  ;;  %v10136_v2 = vadd.f32 %v3572_v10, %v2933_v22 }
 0x1d7   : > { %v2821_v43 = vpop.f32.mrf.mxu1  ;;  %v7457_v7 = vpop.f32.mrf.mxu0 }
 0x1d8   : > { %v2934_v19 = vadd.f32 %v2821_v43, %v9944_v20  ;;  %v10139_v53 = vadd.f32 %v7446_v25, %v2936_v40 }
 0x1d9   : > { %v7401_v63 = vpop.f32.mrf.mxu1  ;;  %v3620_v17 = vpop.f32.mrf.mxu0 }
 0x1da   : > { %v2939_v3 = vadd.f32 %v7401_v63, %v9947_v60  ;;  %v10142_v0 = vadd.f32 %v3575_v52, %v2934_v19 }
 0x1db   : > { %v2834_v9 = vpop.f32.mrf.mxu1  ;;  %v7458_v41 = vpop.f32.mrf.mxu0 }
 0x1dc   : > { %v2937_v31 = vadd.f32 %v2834_v9, %v9962_v42  ;;  %v10145_v8 = vadd.f32 %v7449_v44, %v2939_v3 }
 0x1dd   : > { %v7402_v10 = vpop.f32.mrf.mxu1  ;;  %v3623_v4 = vpop.f32.mrf.mxu0 }
 0x1de   : > { %v2940_v13 = vadd.f32 %v7402_v10, %v9970_v45  ;;  %v10148_v20 = vadd.f32 %v3588_v51, %v2937_v31 }
 0x1df   : > { %v2837_v25 = vpop.f32.mrf.mxu1  ;;  %v7461_v24 = vpop.f32.mrf.mxu0 }
 0x1e0   : > { %v2938_v16 = vadd.f32 %v2837_v25, %v9987_v27  ;;  %v10151_v60 = vadd.f32 %v7450_v28, %v2940_v13 }
 0x1e1   : > { %v7405_v52 = vpop.f32.mrf.mxu1  ;;  %v3636_v46 = vpop.f32.mrf.mxu0 }
 0x1e2   : > { %v2943_v11 = vadd.f32 %v7405_v52, %v10003_v36  ;;  %v10154_v42 = vadd.f32 %v3591_v5, %v2938_v16 }
 0x1e3   : > { %v2850_v44 = vpop.f32.mrf.mxu1  ;;  %v7462_v22 = vpop.f32.mrf.mxu0 }
 0x1e4   : > { %v2941_v57 = vadd.f32 %v2850_v44, %v10016_v59  ;;  %v10157_v45 = vadd.f32 %v7453_v35, %v2943_v11 }
 0x1e5   : > { %v7406_v51 = vpop.f32.mrf.mxu1  ;;  %v3639_v40 = vpop.f32.mrf.mxu0 }
 0x1e6   : > { %v2944_v26 = vadd.f32 %v7406_v51, %v10024_v34  ;;  %v10160_v27 = vadd.f32 %v3604_v21, %v2941_v57 }
 0x1e7   : > { %v2853_v28 = vpop.f32.mrf.mxu1  ;;  %v7465_v19 = vpop.f32.mrf.mxu0 }
 0x1e8   : > { %v2942_v43 = vadd.f32 %v2853_v28, %v10034_v61  ;;  %v10163_v36 = vadd.f32 %v7454_v18, %v2944_v26 }
 0x1e9   : > { %v7409_v5 = vpop.f32.mrf.mxu1  ;;  %v3652_v3 = vpop.f32.mrf.mxu0 }
 0x1ea   : > { %v2947_v63 = vadd.f32 %v7409_v5, %v10044_v56  ;;  %v10166_v59 = vadd.f32 %v3607_v1, %v2942_v43 }
 0x1eb   : > { %v2866_v35 = vpop.f32.mrf.mxu1  ;;  %v7466_v31 = vpop.f32.mrf.mxu0 }
 0x1ec   : > { %v2945_v9 = vadd.f32 %v2866_v35, %v10050_v23  ;;  %v10169_v34 = vadd.f32 %v7457_v7, %v2947_v63 }
 0x1ed   : > { %v7410_v21 = vpop.f32.mrf.mxu1  ;;  %v3655_v13 = vpop.f32.mrf.mxu0 }
 0x1ee   : > { %v2948_v10 = vadd.f32 %v7410_v21, %v10057_v38  ;;  %v10172_v61 = vadd.f32 %v3620_v17, %v2945_v9 }
 0x1ef   : > { %v2869_v18 = vpop.f32.mrf.mxu1 }
 0x1f0   : > { %v2946_v25 = vadd.f32 %v2869_v18, %v10070_v6  ;;  %v10175_v16 = vadd.f32 %v7458_v41, %v2948_v10 }
 0x1f1   : > { %v7413_v56 = vpop.f32.mrf.mxu1  ;;  %v7469_v52 = vpop.f32.mrf.mxu0 }
 0x1f2   : > { %v2951_v1 = vadd.f32 %v7413_v56, %v10074_v49  ;;  %v10178_v11 = vadd.f32 %v3623_v4, %v2946_v25 }
 0x1f3   : > { %v2882_v23 = vpop.f32.mrf.mxu1  ;;  %v3668_v44 = vpop.f32.mrf.mxu0 }
 0x1f4   : > { %v2949_v7 = vadd.f32 %v2882_v23, %v10078_v62  ;;  %v10181_v57 = vadd.f32 %v7461_v24, %v2951_v1 }
 0x1f5   : > { %v7414_v38 = vpop.f32.mrf.mxu1  ;;  %v7470_v51 = vpop.f32.mrf.mxu0 }
 0x1f6   : > { %v2952_v17 = vadd.f32 %v7414_v38, %v10082_v15  ;;  %v10184_v26 = vadd.f32 %v3636_v46, %v2949_v7 }
 0x1f7   : > { %v2885_v6 = vpop.f32.mrf.mxu1  ;;  %v3671_v28 = vpop.f32.mrf.mxu0 }
 0x1f8   : > { %v2950_v41 = vadd.f32 %v2885_v6, %v10090_v30  ;;  %v10187_v49 = vadd.f32 %v7462_v22, %v2952_v17 }
 0x1f9   : > { %v7417_v4 = vpop.f32.mrf.mxu1  ;;  %v7537_v5 = vpop.f32.mrf.mxu0 }
 0x1fa   : > { %v2955_v43 = vadd.f32 %v7417_v4, %v10094_v55  ;;  %v10190_v62 = vadd.f32 %v3639_v40, %v2950_v41 }
 0x1fb   : > { %v2898_v24 = vpop.f32.mrf.mxu1  ;;  %v4441_v35 = vpop.f32.mrf.mxu0 }
 0x1fc   : > { %10712 = vst [vmem:[#allocation8_spill] sm:$0xff] %v10190_v62  ;;  %v2953_v63 = vadd.f32 %v2898_v24, %v10098_v47  ;;  %v10193_v15 = vadd.f32 %v7465_v19, %v2955_v43 }
 0x1fd   : > { %v7418_v46 = vpop.f32.mrf.mxu1  ;;  %v10196_v21 = vpop.f32.mrf.mxu0 }
 0x1fe   : > { %v2956_v9 = vadd.f32 %v7418_v46, %v10102_v29  ;;  %v10198_v30 = vadd.f32 %v3652_v3, %v2953_v63 }
 0x1ff   : > { %v2901_v22 = vpop.f32.mrf.mxu1  ;;  %v10201_v55 = vpop.f32.mrf.mxu0 }
 0x200   : > { %v2954_v10 = vadd.f32 %v2901_v22, %v10106_v32  ;;  %v10203_v40 = vadd.f32 %v7466_v31, %v2956_v9 }
 0x201   : > { %v7421_v18 = vpop.f32.mrf.mxu1  ;;  %v7541_v25 = vpop.f32.mrf.mxu0 }
 0x202   : > { %10713 = vst [vmem:[#allocation9_spill] sm:$0xff] %v10203_v40  ;;  %v2959_v47 = vadd.f32 %v7421_v18, %v10109_v50  ;;  %v10206_v19 = vadd.f32 %v3655_v13, %v2954_v10 }
 0x203   : > { %v2914_v56 = vpop.f32.mrf.mxu1  ;;  %v4457_v1 = vpop.f32.mrf.mxu0 }
 0x204   : > { %10714 = vst [vmem:[#allocation4_spill] sm:$0xff] %v10206_v19  ;;  %v2957_v29 = vadd.f32 %v2914_v56, %v10112_v58  ;;  %v10209_v23 = vadd.f32 %v7469_v52, %v2959_v47 }
 0x205   : > { %v7422_v3 = vpop.f32.mrf.mxu1  ;;  %v10212_v32 = vpop.f32.mrf.mxu0 }
 0x206   : > { %v2960_v7 = vadd.f32 %v7422_v3, %v10115_v54  ;;  %v10214_v38 = vadd.f32 %v3668_v44, %v2957_v29 }
 0x207   : > { %v2917_v31 = vpop.f32.mrf.mxu1  ;;  %v10217_v50 = vpop.f32.mrf.mxu0 }
 0x208   : > { %v2958_v17 = vadd.f32 %v2917_v31, %v10118_v39  ;;  %v10219_v13 = vadd.f32 %v7470_v51, %v2960_v7 }
 0x209   : > { %v7489_v6 = vpop.f32.mrf.mxu1  ;;  %v7545_v4 = vpop.f32.mrf.mxu0 }
 0x20a   : > { %10715 = vst [vmem:[#allocation5_spill] sm:$0xff] %v10219_v13  ;;  %v4183_v58 = vadd.f32 %v7489_v6, %v10121_v37  ;;  %v10222_v41 = vadd.f32 %v3671_v28, %v2958_v17 }
 0x20b   : > { %v4054_v52 = vpop.f32.mrf.mxu1  ;;  %v4473_v24 = vpop.f32.mrf.mxu0 }
 0x20c   : > { %10716 = vst [vmem:[#allocation3_spill] sm:$0xff] %v10222_v41  ;;  %v4181_v54 = vadd.f32 %v4054_v52, %v10124_v12  ;;  %v10225_v43 = vadd.f32 %v7537_v5, %v4183_v58 }
 0x20d   : > { %v10227_v44 = vpop.f32.mrf.mxu1  ;;  %v10233_v51 = vpop.f32.mrf.mxu0 }
 0x20e   : > { %v10229_v63 = vadd.f32 %v4441_v35, %v4181_v54 }
 0x20f   : > { %v10231_v39 = vpop.f32.mrf.mxu1  ;;  %v10235_v9 = vpop.f32.mrf.mxu0 }
 0x211   : > { %v7493_v46 = vpop.f32.mrf.mxu1 }
 0x212   : > { %v4187_v37 = vadd.f32 %v7493_v46, %v10133_v48 }
 0x213   : > { %v4070_v28 = vpop.f32.mrf.mxu1  ;;  %v7549_v22 = vpop.f32.mrf.mxu0 }
 0x214   : > { %v4185_v12 = vadd.f32 %v4070_v28, %v10136_v2  ;;  %v10239_v5 = vadd.f32 %v7541_v25, %v4187_v37 }
 0x215   : > { %v10241_v10 = vpop.f32.mrf.mxu1  ;;  %v4489_v18 = vpop.f32.mrf.mxu0 }
 0x216   : > { %v10243_v35 = vadd.f32 %v4457_v1, %v4185_v12 }
 0x217   : > { %v10245_v47 = vpop.f32.mrf.mxu1  ;;  %v10247_v56 = vpop.f32.mrf.mxu0 }
 0x219   : > { %v7497_v29 = vpop.f32.mrf.mxu1  ;;  %v10249_v3 = vpop.f32.mrf.mxu0 }
 0x21a   : > { %v4191_v48 = vadd.f32 %v7497_v29, %v10145_v8 }
 0x21b   : > { %v4086_v7 = vpop.f32.mrf.mxu1  ;;  %v7553_v31 = vpop.f32.mrf.mxu0 }
 0x21c   : > { %v4189_v2 = vadd.f32 %v4086_v7, %v10148_v20  ;;  %v10253_v25 = vadd.f32 %v7545_v4, %v4191_v48 }
 0x21d   : > { %v10255_v17 = vpop.f32.mrf.mxu1  ;;  %v4505_v6 = vpop.f32.mrf.mxu0 }
 0x21e   : > { %v10257_v1 = vadd.f32 %v4473_v24, %v4189_v2 }
 0x21f   : > { %v10259_v58 = vpop.f32.mrf.mxu1  ;;  %v10261_v52 = vpop.f32.mrf.mxu0 }
 0x221   : > { %v7501_v54 = vpop.f32.mrf.mxu1  ;;  %v10263_v46 = vpop.f32.mrf.mxu0 }
 0x222   : > { %v4195_v8 = vadd.f32 %v7501_v54, %v10157_v45 }
 0x223   : > { %v4102_v37 = vpop.f32.mrf.mxu1  ;;  %v7557_v28 = vpop.f32.mrf.mxu0 }
 0x224   : > { %v4193_v20 = vadd.f32 %v4102_v37, %v10160_v27  ;;  %v10267_v4 = vadd.f32 %v7549_v22, %v4195_v8 }
 0x225   : > { %v10269_v12 = vpop.f32.mrf.mxu1  ;;  %v4521_v29 = vpop.f32.mrf.mxu0 }
 0x226   : > { %v10271_v24 = vadd.f32 %v4489_v18, %v4193_v20 }
 0x227   : > { %v10273_v48 = vpop.f32.mrf.mxu1  ;;  %v10275_v7 = vpop.f32.mrf.mxu0 }
 0x228   : > { %10717 = vst [vmem:[#allocation13_spill] sm:$0xff] %v10275_v7 }
 0x229   : > { %v7505_v2 = vpop.f32.mrf.mxu1  ;;  %v10277_v41 = vpop.f32.mrf.mxu0 }
 0x22a   : > { %10718 = vst [vmem:[#allocation15_spill] sm:$0xff] %v10277_v41  ;;  %v4199_v45 = vadd.f32 %v7505_v2, %v10169_v34 }
 0x22b   : > { %v4118_v54 = vpop.f32.mrf.mxu1  ;;  %v7561_v13 = vpop.f32.mrf.mxu0 }
 0x22c   : > { %v4197_v27 = vadd.f32 %v4118_v54, %v10172_v61  ;;  %v10281_v22 = vadd.f32 %v7553_v31, %v4199_v45 }
 0x22d   : > { %v10283_v8 = vpop.f32.mrf.mxu1  ;;  %v4537_v37 = vpop.f32.mrf.mxu0 }
 0x22e   : > { %10719 = vst [vmem:[#allocation17_spill] sm:$0xff] %v10281_v22  ;;  %v10285_v18 = vadd.f32 %v4505_v6, %v4197_v27 }
 0x22f   : > { %v10287_v20 = vpop.f32.mrf.mxu1  ;;  %v10289_v19 = vpop.f32.mrf.mxu0 }
 0x230   : > { %10720 = vst [vmem:[#allocation19_spill] sm:$0xff] %v10285_v18  ;;  %10721 = vst [vmem:[#allocation34_spill] sm:$0xff] %v10289_v19 }
 0x231   : > { %v7509_v40 = vpop.f32.mrf.mxu1  ;;  %v10291_v7 = vpop.f32.mrf.mxu0 }
 0x232   : > { %10722 = vst [vmem:[#allocation36_spill] sm:$0xff] %v10291_v7  ;;  %v4203_v34 = vadd.f32 %v7509_v40, %v10181_v57 }
 0x233   : > { %v4134_v2 = vpop.f32.mrf.mxu1  ;;  %v7565_v41 = vpop.f32.mrf.mxu0 }
 0x234   : > { %v4201_v61 = vadd.f32 %v4134_v2, %v10184_v26  ;;  %v10295_v31 = vadd.f32 %v7557_v28, %v4203_v34 }
 0x235   : > { %v10297_v45 = vpop.f32.mrf.mxu1  ;;  %v4553_v54 = vpop.f32.mrf.mxu0 }
 0x236   : > { %10723 = vst [vmem:[#allocation22_spill] sm:$0xff] %v10295_v31  ;;  %v10299_v6 = vadd.f32 %v4521_v29, %v4201_v61 }
 0x237   : > { %v10301_v27 = vpop.f32.mrf.mxu1  ;;  %v10303_v18 = vpop.f32.mrf.mxu0 }
 0x238   : > { %10724 = vst [vmem:[#allocation37_spill] sm:$0xff] %v10299_v6  ;;  %10725 = vst [vmem:[#allocation24_spill] sm:$0xff] %v10301_v27 }
 0x239   : > { %10726 = vst [vmem:[#allocation12_spill] sm:$0xff] %v10303_v18  ;;  %v7513_v19 = vpop.f32.mrf.mxu1  ;;  %v10305_v22 = vpop.f32.mrf.mxu0 }
 0x23a   : > { %10727 = vst [vmem:[#allocation26_spill] sm:$0xff] %v10305_v22  ;;  %v4207_v57 = vadd.f32 %v7513_v19, %v10193_v15 }
 0x23b   : > { %v4150_v40 = vpop.f32.mrf.mxu1  ;;  %v7633_v7 = vpop.f32.mrf.mxu0 }
 0x23c   : > { %v4205_v26 = vadd.f32 %v4150_v40, %v10198_v30  ;;  %v10309_v28 = vadd.f32 %v7561_v13, %v4207_v57 }
 0x23d   : > { %v10311_v34 = vpop.f32.mrf.mxu1  ;;  %v5693_v2 = vpop.f32.mrf.mxu0 }
 0x23e   : > { %v10313_v29 = vadd.f32 %v4537_v37, %v4205_v26  ;;  %v4184_v26 = vadd.f32 %v10227_v44, %v10127_v14  ;;  %v10343_v14 = vld [vmem:[%s10541_s4] ss:$0 sm:$0xff] }
 0x23f   : > { %v10315_v61 = vpop.f32.mrf.mxu1  ;;  %v7634_v6 = vpop.f32.mrf.mxu0 }
 0x240   : > { %10728 = vst [vmem:[#allocation28_spill] sm:$0xff] %v10313_v29 }
 0x241   : > { %v7517_v18 = vpop.f32.mrf.mxu1  ;;  %v5696_v31 = vpop.f32.mrf.mxu0 }
 0x242   : > { %v4211_v22 = vadd.f32 %v7517_v18, %v10209_v23 }
 0x243   : > { %v4166_v27 = vpop.f32.mrf.mxu1  ;;  %v7637_v15 = vpop.f32.mrf.mxu0 }
 0x244   : > { %v4209_v19 = vadd.f32 %v4166_v27, %v10214_v38  ;;  %v10319_v62 = vadd.f32 %v7565_v41, %v4211_v22  ;;  %v4182_v38 = vadd.f32 %v10231_v39, %v10130_v33  ;;  %v4188_v39 = vadd.f32 %v10241_v10, %v10139_v53 }
 0x245   : > { %v10321_v30 = vpop.f32.mrf.mxu1  ;;  %v5709_v13 = vpop.f32.mrf.mxu0 }
 0x246   : > { %10729 = vst [vmem:[#allocation29_spill] sm:$0xff] %v10319_v62  ;;  %v10323_v57 = vadd.f32 %v4553_v54, %v4209_v19  ;;  %v4571_v19 = vadd.f32 %v10196_v21, %v4184_v26 }
 0x247   : > { %v10325_v37 = vpop.f32.mrf.mxu1  ;;  %v10327_v40 = vpop.f32.mrf.mxu0 }
 0x248   : > { %10730 = vst [vmem:[#allocation31_spill] sm:$0xff] %v10323_v57 }
 0x249   : > { %v7585_v29 = vpop.f32.mrf.mxu1  ;;  %v10331_v23 = vpop.f32.mrf.mxu0 }
 0x24a   : > { %v5324_v41 = vadd.f32 %v7585_v29, %v10225_v43  ;;  %v4569_v43 = vadd.f32 %v10201_v55, %v4182_v38  ;;  %v4190_v55 = vadd.f32 %v10259_v58, %v10154_v42  ;;  %v4196_v38 = vadd.f32 %v10269_v12, %v10163_v36 }
 0x24b   : > { %v5195_v22 = vpop.f32.mrf.mxu1  ;;  %v10336_v18 = vpop.f32.mrf.mxu0 }
 0x24c   : > { %v5822_v54 = vadd.f32 %v7633_v7, %v5324_v41  ;;  %v5322_v27 = vadd.f32 %v5195_v22, %v10229_v63  ;;  %v4186_v22 = vadd.f32 %v10245_v47, %v10142_v0 }
 0x24d   : > { %v7586_v44 = vpop.f32.mrf.mxu1  ;;  %v10345_v57 = vpop.f32.mrf.mxu0 }
 0x24e   : > { %v5820_v62 = vadd.f32 %v5693_v2, %v5322_v27  ;;  %v5325_v33 = vadd.f32 %v7586_v44, %v4571_v19  ;;  %v5861_v21 = vadd.f32 %v10343_v14, %v5822_v54  ;;  %v4192_v2 = vadd.f32 %v10255_v17, %v10151_v60 }
 0x24f   : > { %v5198_v7 = vpop.f32.mrf.mxu1  ;;  %v10350_v29 = vpop.f32.mrf.mxu0  ;;  %v4194_v54 = vadd.f32 %v10273_v48, %v10166_v59  ;;  %v4575_v17 = vadd.f32 %v10212_v32, %v4188_v39  ;;  %v4573_v12 = vadd.f32 %v10217_v50, %v4186_v22  ;;  %v4577_v48 = vadd.f32 %v10235_v9, %v4190_v55 }
 0x250   : > { %v5859_v63 = vadd.f32 %v10343_v14, %v5820_v62  ;;  %v5823_v26 = vadd.f32 %v7634_v6, %v5325_v33  ;;  %v5323_v41 = vadd.f32 %v5198_v7, %v4569_v43  ;;  %v5893_v58 = vmax.f32 %v5861_v21, 0.0 }
 0x251   : > { %v7589_v53 = vpop.f32.mrf.mxu1  ;;  %v10360_v10 = vpop.f32.mrf.mxu0  ;;  %v4579_v32 = vadd.f32 %v10233_v51, %v4192_v2  ;;  %v10386_v43 = vadd.f32 %v10247_v56, %v4196_v38  ;;  %v4200_v39 = vadd.f32 %v10283_v8, %v10175_v16  ;;  %v10393_v51 = vadd.f32 %v10249_v3, %v4194_v54 }
 0x252   : > { %v5862_v62 = vadd.f32 %v10343_v14, %v5823_v26  ;;  %v5821_v6 = vadd.f32 %v5696_v31, %v5323_v41  ;;  %v5891_v0 = vmax.f32 %v5859_v63, 0.0  ;;  %v5328_v47 = vadd.f32 %v7589_v53, %v10239_v5 }
 0x253   : > { %v5211_v60 = vpop.f32.mrf.mxu1  ;;  %v5963_v56 = vmul.f32 %v5893_v58, %v5893_v58 }
 0x254   : > { %v10369_v42 = vpop.f32.mrf.mxu0  ;;  %v5894_v27 = vmax.f32 %v5862_v62, 0.0  ;;  %v5860_v19 = vadd.f32 %v10343_v14, %v5821_v6  ;;  %v5326_v36 = vadd.f32 %v5211_v60, %v10243_v35  ;;  %v5826_v59 = vadd.f32 %v7637_v15, %v5328_v47 }
 0x255   : > { %v7590_v5 = vpop.f32.mrf.mxu1  ;;  %v5961_v15 = vmul.f32 %v5891_v0, %v5891_v0  ;;  %v4198_v62 = vadd.f32 %v10287_v20, %v10178_v11 }
 0x256   : > { %v10383_v31 = vpop.f32.mrf.mxu0  ;;  %v6913_v44 = vpack.c.bf16 %v5894_v27, %v5893_v58  ;;  %v5892_v33 = vmax.f32 %v5860_v19, 0.0  ;;  %v5824_v35 = vadd.f32 %v5709_v13, %v5326_v36  ;;  %v5329_v7 = vadd.f32 %v7590_v5, %v4575_v17 }
 0x257   : > { %v5214_v21 = vpop.f32.mrf.mxu1  ;;  %v5865_v41 = vadd.f32 %v10343_v14, %v5826_v59  ;;  %v5964_v60 = vmul.f32 %v5894_v27, %v5894_v27 }
 0x258   : > { %v10390_v50 = vpop.f32.mrf.mxu0  ;;  %7000 = vst [vmem:[%s10378_s17 + $0x8] sm:$0xff] %v6913_v44   ;;  %v5923_v9 = vadd.f32 %v5892_v33, %v5891_v0  ;;  %v5962_v63 = vmul.f32 %v5892_v33, %v5892_v33  ;;  %v6908_v26 = vpack.c.bf16 %v5892_v33, %v5891_v0  ;;  %v5863_v13 = vadd.f32 %v10343_v14, %v5824_v35 }
 0x259   : > { %v5827_v16 = vadd.f32 %v10327_v40, %v5329_v7  ;;  %v5327_v8 = vadd.f32 %v5214_v21, %v4573_v12  ;;  %v7593_v22 = vpop.f32.mrf.mxu1  ;;  %v10410_v40 = vadd.f32 %v10261_v52, %v4200_v39  ;;  %v5897_v36 = vmax.f32 %v5865_v41, 0.0 }
 0x25a   : > { %v10399_v2 = vpop.f32.mrf.mxu0  ;;  %v5924_v55 = vadd.f32 %v5923_v9, %v5893_v58  ;;  %v5993_v53 = vadd.f32 %v5962_v63, %v5961_v15  ;;  %6909 = vst [vmem:[%s10378_s17] sm:$0xff] %v6908_v26   ;;  %v5895_v3 = vmax.f32 %v5863_v13, 0.0  ;;  %v5332_v38 = vadd.f32 %v7593_v22, %v10253_v25 }
 0x25b   : > { %v5866_v6 = vadd.f32 %v10343_v14, %v5827_v16  ;;  %v5825_v54 = vadd.f32 %v10331_v23, %v5327_v8  ;;  %v5227_v0 = vpop.f32.mrf.mxu1  ;;  %v10423_v9 = vadd.f32 %v10263_v46, %v4198_v62 }
 0x25c   : > { %v10407_v47 = vpop.f32.mrf.mxu0  ;;  %v5994_v17 = vadd.f32 %v5993_v53, %v5963_v56  ;;  %v5925_v58 = vadd.f32 %v5924_v55, %v5894_v27  ;;  %v5830_v19 = vadd.f32 %v10336_v18, %v5332_v38  ;;  %v5330_v11 = vadd.f32 %v5227_v0, %v10257_v1 }
 0x25d   : > { %v5898_v25 = vmax.f32 %v5866_v6, 0.0  ;;  %v5864_v59 = vadd.f32 %v10343_v14, %v5825_v54  ;;  %v7594_v20 = vpop.f32.mrf.mxu1  ;;  %v5965_v12 = vmul.f32 %v5895_v3, %v5895_v3 }
 0x25e   : > { %v10415_v23 = vpop.f32.mrf.mxu0  ;;  %v5926_v5 = vadd.f32 %v5925_v58, %v5895_v3  ;;  %v5995_v44 = vadd.f32 %v5994_v17, %v5964_v60  ;;  %v5333_v52 = vadd.f32 %v7594_v20, %v4579_v32  ;;  %v5869_v27 = vadd.f32 %v10343_v14, %v5830_v19  ;;  %v10731_v19 = vld [vmem:[#allocation8_spill] sm:$0xff] }
 0x25f   : > { %v6923_v33 = vpack.c.bf16 %v5898_v25, %v5897_v36  ;;  %v5896_v35 = vmax.f32 %v5864_v59, 0.0  ;;  %v5828_v18 = vadd.f32 %v10345_v57, %v5330_v11  ;;  %v5230_v39 = vpop.f32.mrf.mxu1  ;;  %v5967_v57 = vmul.f32 %v5897_v36, %v5897_v36 }
 0x260   : > { %v10419_v15 = vpop.f32.mrf.mxu0  ;;  %v5996_v7 = vadd.f32 %v5995_v44, %v5965_v12  ;;  %v5831_v1 = vadd.f32 %v10350_v29, %v5333_v52  ;;  %v5331_v21 = vadd.f32 %v5230_v39, %v4577_v48  ;;  %v5901_v46 = vmax.f32 %v5869_v27, 0.0 }
 0x261   : > { %7002 = vst [vmem:[%s10378_s17 + $0x18] sm:$0xff] %v6923_v33   ;;  %v5927_v63 = vadd.f32 %v5926_v5, %v5896_v35  ;;  %v5966_v32 = vmul.f32 %v5896_v35, %v5896_v35  ;;  %v6918_v26 = vpack.c.bf16 %v5896_v35, %v5895_v3  ;;  %v5867_v13 = vadd.f32 %v10343_v14, %v5828_v18  ;;  %v7597_v56 = vpop.f32.mrf.mxu1 }
 0x262   : > { %v10427_v41 = vpop.f32.mrf.mxu0  ;;  %v5870_v16 = vadd.f32 %v10343_v14, %v5831_v1  ;;  %v5829_v8 = vadd.f32 %v10360_v10, %v5331_v21  ;;  %v5336_v29 = vadd.f32 %v7597_v56, %v10267_v4  ;;  %v4204_v10 = vadd.f32 %v10297_v45, %v10187_v49 }
 0x263   : > { %v5928_v48 = vadd.f32 %v5927_v63, %v5897_v36  ;;  %v5997_v22 = vadd.f32 %v5996_v7, %v5966_v32  ;;  %7001 = vst [vmem:[%s10378_s17 + $0x10] sm:$0xff] %v6918_v26   ;;  %v5899_v55 = vmax.f32 %v5867_v13, 0.0  ;;  %v5243_v53 = vpop.f32.mrf.mxu1  ;;  %v5968_v4 = vmul.f32 %v5898_v25, %v5898_v25  ;;  %v10732_v36 = vld [vmem:[#allocation24_spill] sm:$0xff]  ;;  %v10733_v63 = vld [vmem:[#allocation17_spill] sm:$0xff] }
 0x264   : > { %v10433_v38 = vpop.f32.mrf.mxu0  ;;  %v5902_v3 = vmax.f32 %v5870_v16, 0.0  ;;  %v5868_v62 = vadd.f32 %v10343_v14, %v5829_v8  ;;  %v5834_v6 = vadd.f32 %v10369_v42, %v5336_v29  ;;  %v5334_v54 = vadd.f32 %v5243_v53, %v10271_v24  ;;  %v10734_v26 = vld [vmem:[#allocation13_spill] sm:$0xff] }
 0x265   : > { %v5998_v0 = vadd.f32 %v5997_v22, %v5967_v57  ;;  %v5929_v60 = vadd.f32 %v5928_v48, %v5898_v25  ;;  %v7598_v17 = vpop.f32.mrf.mxu1  ;;  %v10444_v59 = vadd.f32 %v10732_v36, %v10731_v19  ;;  %v5969_v11 = vmul.f32 %v5899_v55, %v5899_v55  ;;  %v10735_v22 = vld [vmem:[#allocation19_spill] sm:$0xff] }
 0x266   : > { %v10440_v58 = vpop.f32.mrf.mxu0  ;;  %v6933_v20 = vpack.c.bf16 %v5902_v3, %v5901_v46  ;;  %v5900_v5 = vmax.f32 %v5868_v62, 0.0  ;;  %v5832_v24 = vadd.f32 %v10383_v31, %v5334_v54  ;;  %v5337_v49 = vadd.f32 %v7598_v17, %v10386_v43 }
 0x267   : > { %v5930_v42 = vadd.f32 %v5929_v60, %v5899_v55  ;;  %v5999_v12 = vadd.f32 %v5998_v0, %v5968_v4  ;;  %v5246_v45 = vpop.f32.mrf.mxu1  ;;  %v5873_v33 = vadd.f32 %v10343_v14, %v5834_v6  ;;  %v5971_v43 = vmul.f32 %v5901_v46, %v5901_v46 }
 0x268   : > { %v10448_v44 = vpop.f32.mrf.mxu0  ;;  %7004 = vst [vmem:[%s10378_s17 + $0x28] sm:$0xff] %v6933_v20   ;;  %v5970_v25 = vmul.f32 %v5900_v5, %v5900_v5  ;;  %v6928_v52 = vpack.c.bf16 %v5900_v5, %v5899_v55  ;;  %v5335_v35 = vadd.f32 %v5246_v45, %v10393_v51  ;;  %v5871_v39 = vadd.f32 %v10343_v14, %v5832_v24 }
 0x269   : > { %v6000_v27 = vadd.f32 %v5999_v12, %v5969_v11  ;;  %v5931_v18 = vadd.f32 %v5930_v42, %v5900_v5  ;;  %v5835_v7 = vadd.f32 %v10390_v50, %v5337_v49  ;;  %v7601_v31 = vpop.f32.mrf.mxu1  ;;  %v4591_v13 = vadd.f32 %v10734_v26, %v4204_v10 }
 0x26a   : > { %v10455_v1 = vpop.f32.mrf.mxu0  ;;  %7003 = vst [vmem:[%s10378_s17 + $0x20] sm:$0xff] %v6928_v52   ;;  %v5833_v21 = vadd.f32 %v10399_v2, %v5335_v35  ;;  %v5340_v32 = vadd.f32 %v7601_v31, %v10733_v63  ;;  %v5903_v51 = vmax.f32 %v5871_v39, 0.0  ;;  %v5972_v29 = vmul.f32 %v5902_v3, %v5902_v3 }
 0x26b   : > { %v5932_v56 = vadd.f32 %v5931_v18, %v5901_v46  ;;  %v6001_v57 = vadd.f32 %v6000_v27, %v5970_v25  ;;  %v5874_v16 = vadd.f32 %v10343_v14, %v5835_v7  ;;  %v5259_v8 = vpop.f32.mrf.mxu1  ;;  %v5905_v62 = vmax.f32 %v5873_v33, 0.0  ;;  %v10736_v46 = vld [vmem:[#allocation9_spill] sm:$0xff]  ;;  %v10737_v25 = vld [vmem:[#allocation4_spill] sm:$0xff]  ;;  %v10738_v27 = vld [vmem:[#allocation22_spill] sm:$0xff] }
 0x26c   : > { %v5872_v50 = vadd.f32 %v10343_v14, %v5833_v21  ;;  %v5838_v48 = vadd.f32 %v10407_v47, %v5340_v32  ;;  %v5338_v55 = vadd.f32 %v5259_v8, %v10735_v22  ;;  %v10465_v10 = vpop.f32.mrf.mxu0  ;;  %v4208_v4 = vadd.f32 %v10311_v34, %v10736_v46  ;;  %v10739_v32 = vld [vmem:[#allocation37_spill] sm:$0xff]  ;;  %v10741_v22 = vld [vmem:[#allocation34_spill] sm:$0xff] }
 0x26d   : > { %v6002_v53 = vadd.f32 %v6001_v57, %v5971_v43  ;;  %v5933_v2 = vadd.f32 %v5932_v56, %v5902_v3  ;;  %v5906_v6 = vmax.f32 %v5874_v16, 0.0  ;;  %v7602_v54 = vpop.f32.mrf.mxu1  ;;  %v5973_v47 = vmul.f32 %v5903_v51, %v5903_v51 }
 0x26e   : > { %v5904_v0 = vmax.f32 %v5872_v50, 0.0  ;;  %v5836_v60 = vadd.f32 %v10415_v23, %v5338_v55  ;;  %v5341_v17 = vadd.f32 %v7602_v54, %v10410_v40  ;;  %v5877_v42 = vadd.f32 %v10343_v14, %v5838_v48  ;;  %v10476_v45 = vpop.f32.mrf.mxu0 }
 0x26f   : > { %v5934_v19 = vadd.f32 %v5933_v2, %v5903_v51  ;;  %v6003_v36 = vadd.f32 %v6002_v53, %v5972_v29  ;;  %v6943_v11 = vpack.c.bf16 %v5906_v6, %v5905_v62  ;;  %v5262_v20 = vpop.f32.mrf.mxu1  ;;  %v4206_v52 = vadd.f32 %v10315_v61, %v10737_v25 }
 0x270   : > { %v5974_v3 = vmul.f32 %v5904_v0, %v5904_v0  ;;  %v6938_v5 = vpack.c.bf16 %v5904_v0, %v5903_v51  ;;  %v5875_v12 = vadd.f32 %v10343_v14, %v5836_v60  ;;  %v5839_v49 = vadd.f32 %v10419_v15, %v5341_v17  ;;  %v7658_v8 = vpop.f32.mrf.mxu0  ;;  %v10742_v60 = vld [vmem:[#allocation36_spill] sm:$0xff] }
 0x271   : > { %v6004_v24 = vadd.f32 %v6003_v36, %v5973_v47  ;;  %7006 = vst [vmem:[%s10378_s17 + $0x38] sm:$0xff] %v6943_v11   ;;  %v5935_v34 = vadd.f32 %v5934_v19, %v5904_v0  ;;  %v5339_v23 = vadd.f32 %v5262_v20, %v10423_v9  ;;  %v7605_v40 = vpop.f32.mrf.mxu1  ;;  %v5975_v33 = vmul.f32 %v5905_v62, %v5905_v62  ;;  %v10743_v19 = vld [vmem:[#allocation5_spill] sm:$0xff] }
 0x272   : > { %7005 = vst [vmem:[%s10378_s17 + $0x30] sm:$0xff] %v6938_v5   ;;  %v5907_v35 = vmax.f32 %v5875_v12, 0.0  ;;  %v5344_v18 = vadd.f32 %v7605_v40, %v10738_v27  ;;  %v5878_v31 = vadd.f32 %v10343_v14, %v5839_v49  ;;  %v5976_v21 = vmul.f32 %v5906_v6, %v5906_v6  ;;  %v5792_v36 = vpop.f32.mrf.mxu0  ;;  %v10744_v40 = vld [vmem:[#allocation28_spill] sm:$0xff] }
 0x273   : > { %v5936_v39 = vadd.f32 %v5935_v34, %v5905_v62  ;;  %v6005_v7 = vadd.f32 %v6004_v24, %v5974_v3  ;;  %v5837_v43 = vadd.f32 %v10427_v41, %v5339_v23  ;;  %v5275_v15 = vpop.f32.mrf.mxu1  ;;  %v5909_v9 = vmax.f32 %v5877_v42, 0.0  ;;  %v10740_v41 = vld [vmem:[#allocation15_spill] sm:$0xff] }
 0x274   : > { %v5842_v63 = vadd.f32 %v10433_v38, %v5344_v18  ;;  %v5342_v26 = vadd.f32 %v5275_v15, %v10739_v32  ;;  %v5910_v57 = vmax.f32 %v5878_v31, 0.0  ;;  %v4589_v48 = vadd.f32 %v10740_v41, %v10444_v59 }
 0x275   : > { %v6006_v56 = vadd.f32 %v6005_v7, %v5975_v33  ;;  %v5937_v61 = vadd.f32 %v5936_v39, %v5906_v6  ;;  %v5876_v51 = vadd.f32 %v10343_v14, %v5837_v43  ;;  %v7606_v16 = vpop.f32.mrf.mxu1  ;;  %v4595_v55 = vadd.f32 %v10741_v22, %v4208_v4  ;;  %v7661_v39 = vpop.f32.mrf.mxu0 }
 0x276   : > { %v5840_v29 = vadd.f32 %v10440_v58, %v5342_v26  ;;  %v5345_v50 = vadd.f32 %v7606_v16, %v4591_v13  ;;  %v5977_v38 = vmul.f32 %v5907_v35, %v5907_v35  ;;  %v6953_v2 = vpack.c.bf16 %v5910_v57, %v5909_v9 }
 0x277   : > { %v5938_v53 = vadd.f32 %v5937_v61, %v5907_v35  ;;  %v6007_v62 = vadd.f32 %v6006_v56, %v5976_v21  ;;  %v5278_v54 = vpop.f32.mrf.mxu1  ;;  %v5908_v6 = vmax.f32 %v5876_v51, 0.0  ;;  %v4593_v17 = vadd.f32 %v10742_v60, %v4206_v52  ;;  %v10745_v61 = vld [vmem:[#allocation3_spill] sm:$0xff] }
 0x278   : > { %v5879_v46 = vadd.f32 %v10343_v14, %v5840_v29  ;;  %v5843_v0 = vadd.f32 %v10448_v44, %v5345_v50  ;;  %v4212_v58 = vadd.f32 %v10321_v30, %v10743_v19  ;;  %7008 = vst [vmem:[%s10378_s17 + $0x48] sm:$0xff] %v6953_v2   ;;  %v5881_v59 = vadd.f32 %v10343_v14, %v5842_v63  ;;  %v5805_v50 = vpop.f32.mrf.mxu0 }
 0x279   : > { %v6008_v13 = vadd.f32 %v6007_v62, %v5977_v38  ;;  %v5343_v4 = vadd.f32 %v5278_v54, %v4589_v48  ;;  %v7609_v47 = vpop.f32.mrf.mxu1  ;;  %v5979_v11 = vmul.f32 %v5909_v9, %v5909_v9  ;;  %v5939_v20 = vadd.f32 %v5938_v53, %v5908_v6 }
 0x27a   : > { %v5978_v3 = vmul.f32 %v5908_v6, %v5908_v6  ;;  %v6948_v5 = vpack.c.bf16 %v5908_v6, %v5907_v35  ;;  %v5911_v42 = vmax.f32 %v5879_v46, 0.0  ;;  %v5882_v44 = vadd.f32 %v10343_v14, %v5843_v0 }
 0x27b   : > { %v5841_v12 = vadd.f32 %v10455_v1, %v5343_v4  ;;  %v5348_v24 = vadd.f32 %v7609_v47, %v10309_v28  ;;  %v5291_v30 = vpop.f32.mrf.mxu1  ;;  %v5980_v34 = vmul.f32 %v5910_v57, %v5910_v57  ;;  %v5940_v49 = vadd.f32 %v5939_v20, %v5909_v9  ;;  %v7662_v4 = vpop.f32.mrf.mxu0 }
 0x27c   : > { %v6009_v23 = vadd.f32 %v6008_v13, %v5978_v3  ;;  %7007 = vst [vmem:[%s10378_s17 + $0x40] sm:$0xff] %v6948_v5   ;;  %v5346_v25 = vadd.f32 %v5291_v30, %v10744_v40  ;;  %v5913_v52 = vmax.f32 %v5881_v59, 0.0  ;;  %v5914_v33 = vmax.f32 %v5882_v44, 0.0  ;;  %v10748_v13 = vld [vmem:[#allocation31_spill] sm:$0xff] }
 0x27d   : > { %v5880_v27 = vadd.f32 %v10343_v14, %v5841_v12  ;;  %v5846_v35 = vadd.f32 %v10465_v10, %v5348_v24  ;;  %v7610_v18 = vpop.f32.mrf.mxu1  ;;  %v5941_v1 = vadd.f32 %v5940_v49, %v5910_v57  ;;  %v5981_v43 = vmul.f32 %v5911_v42, %v5911_v42 }
 0x27e   : > { %v6010_v7 = vadd.f32 %v6009_v23, %v5979_v11  ;;  %v5844_v28 = vadd.f32 %v10476_v45, %v5346_v25  ;;  %v5349_v31 = vadd.f32 %v7610_v18, %v4595_v55  ;;  %v6963_v15 = vpack.c.bf16 %v5914_v33, %v5913_v52  ;;  %v10746_v55 = vld [vmem:[#allocation12_spill] sm:$0xff] }
 0x27f   : > { %v5912_v21 = vmax.f32 %v5880_v27, 0.0  ;;  %v5885_v9 = vadd.f32 %v10343_v14, %v5846_v35  ;;  %v5294_v63 = vpop.f32.mrf.mxu1  ;;  %v5942_v32 = vadd.f32 %v5941_v1, %v5911_v42  ;;  %v4210_v51 = vadd.f32 %v10325_v37, %v10745_v61  ;;  %v5808_v35 = vpop.f32.mrf.mxu0 }
 0x280   : > { %v6011_v26 = vadd.f32 %v6010_v7, %v5980_v34  ;;  %v5883_v56 = vadd.f32 %v10343_v14, %v5844_v28  ;;  %v5847_v10 = vadd.f32 %v7658_v8, %v5349_v31  ;;  %7010 = vst [vmem:[%s10378_s17 + $0x58] sm:$0xff] %v6963_v15   ;;  %v5347_v45 = vadd.f32 %v5294_v63, %v4593_v17  ;;  %v10747_v8 = vld [vmem:[#allocation29_spill] sm:$0xff] }
 0x281   : > { %v5982_v57 = vmul.f32 %v5912_v21, %v5912_v21  ;;  %v6958_v16 = vpack.c.bf16 %v5912_v21, %v5911_v42  ;;  %v7613_v29 = vpop.f32.mrf.mxu1  ;;  %v5943_v48 = vadd.f32 %v5942_v32, %v5912_v21  ;;  %v4599_v53 = vadd.f32 %v10746_v55, %v4212_v58  ;;  %v10749_v58 = vld [vmem:[#allocation26_spill] sm:$0xff] }
 0x282   : > { %v6012_v41 = vadd.f32 %v6011_v26, %v5981_v43  ;;  %v5886_v22 = vadd.f32 %v10343_v14, %v5847_v10  ;;  %v5983_v38 = vmul.f32 %v5913_v52, %v5913_v52  ;;  %v5917_v62 = vmax.f32 %v5885_v9, 0.0 }
 0x283   : > { %7009 = vst [vmem:[%s10378_s17 + $0x50] sm:$0xff] %v6958_v16   ;;  %v5845_v2 = vadd.f32 %v5792_v36, %v5347_v45  ;;  %v5352_v54 = vadd.f32 %v7613_v29, %v10747_v8  ;;  %v5307_v6 = vpop.f32.mrf.mxu1  ;;  %v5944_v37 = vadd.f32 %v5943_v48, %v5913_v52  ;;  %v5915_v0 = vmax.f32 %v5883_v56, 0.0 }
 0x284   : > { %v6013_v46 = vadd.f32 %v6012_v41, %v5982_v57  ;;  %v5918_v60 = vmax.f32 %v5886_v22, 0.0  ;;  %v5350_v59 = vadd.f32 %v5307_v6, %v10748_v13  ;;  %v4597_v11 = vadd.f32 %v10749_v58, %v4210_v51 }
 0x285   : > { %v5884_v17 = vadd.f32 %v10343_v14, %v5845_v2  ;;  %v5850_v19 = vadd.f32 %v7661_v39, %v5352_v54  ;;  %v7614_v47 = vpop.f32.mrf.mxu1  ;;  %v5984_v20 = vmul.f32 %v5914_v33, %v5914_v33  ;;  %v5945_v36 = vadd.f32 %v5944_v37, %v5914_v33 }
 0x286   : > { %v6014_v3 = vadd.f32 %v6013_v46, %v5983_v38  ;;  %v6973_v5 = vpack.c.bf16 %v5918_v60, %v5917_v62  ;;  %v5848_v44 = vadd.f32 %v5805_v50, %v5350_v59  ;;  %v5353_v12 = vadd.f32 %v7614_v47, %v4599_v53 }
 0x287   : > { %v5916_v42 = vmax.f32 %v5884_v17, 0.0  ;;  %v5310_v24 = vpop.f32.mrf.mxu1  ;;  %v5946_v30 = vadd.f32 %v5945_v36, %v5915_v0  ;;  %v5985_v34 = vmul.f32 %v5915_v0, %v5915_v0  ;;  %v5889_v52 = vadd.f32 %v10343_v14, %v5850_v19 }
 0x288   : > { %v6015_v49 = vadd.f32 %v6014_v3, %v5984_v20  ;;  %7012 = vst [vmem:[%s10378_s17 + $0x68] sm:$0xff] %v6973_v5   ;;  %v5351_v23 = vadd.f32 %v5310_v24, %v4597_v11  ;;  %v5887_v27 = vadd.f32 %v10343_v14, %v5848_v44  ;;  %v5851_v39 = vadd.f32 %v7662_v4, %v5353_v12 }
 0x289   : > { %v5986_v40 = vmul.f32 %v5916_v42, %v5916_v42  ;;  %v6968_v25 = vpack.c.bf16 %v5916_v42, %v5915_v0  ;;  %v5947_v33 = vadd.f32 %v5946_v30, %v5916_v42  ;;  %v5987_v1 = vmul.f32 %v5917_v62, %v5917_v62 }
 0x28a   : > { %v6016_v18 = vadd.f32 %v6015_v49, %v5985_v34  ;;  %v5849_v7 = vadd.f32 %v5808_v35, %v5351_v23  ;;  %v5919_v28 = vmax.f32 %v5887_v27, 0.0  ;;  %v5890_v15 = vadd.f32 %v10343_v14, %v5851_v39 }
 0x28b   : > { %7011 = vst [vmem:[%s10378_s17 + $0x60] sm:$0xff] %v6968_v25   ;;  %v5948_v31 = vadd.f32 %v5947_v33, %v5917_v62  ;;  %v5988_v9 = vmul.f32 %v5918_v60, %v5918_v60  ;;  %v5921_v63 = vmax.f32 %v5889_v52, 0.0 }
 0x28c   : > { %v6017_v43 = vadd.f32 %v6016_v18, %v5986_v40  ;;  %v5888_v21 = vadd.f32 %v10343_v14, %v5849_v7  ;;  %v5922_v56 = vmax.f32 %v5890_v15, 0.0  ;;  %v5989_v51 = vmul.f32 %v5919_v28, %v5919_v28 }
 0x28d   : > { %v5949_v26 = vadd.f32 %v5948_v31, %v5918_v60  ;;  %v5991_v48 = vmul.f32 %v5921_v63, %v5921_v63 }
 0x28e   : > { %v6018_v32 = vadd.f32 %v6017_v43, %v5987_v1  ;;  %v5920_v10 = vmax.f32 %v5888_v21, 0.0  ;;  %v6983_v16 = vpack.c.bf16 %v5922_v56, %v5921_v63  ;;  %v5992_v55 = vmul.f32 %v5922_v56, %v5922_v56 }
 0x28f   : > { %v5950_v61 = vadd.f32 %v5949_v26, %v5919_v28 }
 0x290   : > { %v6019_v57 = vadd.f32 %v6018_v32, %v5988_v9  ;;  %v5990_v45 = vmul.f32 %v5920_v10, %v5920_v10  ;;  %v6978_v29 = vpack.c.bf16 %v5920_v10, %v5919_v28  ;;  %7014 = vst [vmem:[%s10378_s17 + $0x78] sm:$0xff] %v6983_v16  }
 0x291   : > { %v5951_v41 = vadd.f32 %v5950_v61, %v5920_v10 }
 0x292   : > { %v6020_v50 = vadd.f32 %v6019_v57, %v5989_v51  ;;  %7013 = vst [vmem:[%s10378_s17 + $0x70] sm:$0xff] %v6978_v29  }
 0x293   : > { %v5952_v14 = vadd.f32 %v5951_v41, %v5921_v63 }
 0x294   : > { %v6021_v22 = vadd.f32 %v6020_v50, %v5990_v45 }
 0x295   : > { %v5953_v53 = vadd.f32 %v5952_v14, %v5922_v56 }
 0x296   : > { %v6022_v38 = vadd.f32 %v6021_v22, %v5991_v48 }
 0x297   : > { %v5954_v62 = vrot.slane %v5953_v53, 4 }
 0x298   : > { %v6023_v2 = vadd.f32 %v6022_v38, %v5992_v55 }
 0x299   : > { %v5955_v8 = vadd.f32 %v5954_v62, %v5953_v53 }
 0x29a   : > { %v6024_v54 = vrot.slane %v6023_v2, 4 }
 0x29b   : > { %v5956_v6 = vrot.slane %v5955_v8, 2 }
 0x29c   : > { %v6025_v37 = vadd.f32 %v6024_v54, %v6023_v2 }
 0x29d   : > { %v5957_v46 = vadd.f32 %v5956_v6, %v5955_v8 }
 0x29e   : > { %v6026_v0 = vrot.slane %v6025_v37, 2 }
 0x29f   : > { %v5958_v60 = vrot.slane %v5957_v46, 1 }
 0x2a0   : > { %v6027_v17 = vadd.f32 %v6026_v0, %v6025_v37 }
 0x2a1   : > { %v5959_v19 = vadd.f32 %v5958_v60, %v5957_v46 }
 0x2a2   : > { %v6028_v13 = vrot.slane %v6027_v17, 1 }
 0x2a3   : > { %5960 = vst [vmem:[%s306_s20] sm:$0x1] %v5959_v19 }
 0x2a4   : > { %v6029_v59 = vadd.f32 %v6028_v13, %v6027_v17 }
 0x2a6   : > { %6030 = vst [vmem:[%s309_s23] sm:$0x1] %v6029_v59 }
 0x2a7 PF: > { %s18_s24 = sadd.s32 1, %s7841_s24  }
 0x2a8   : > { %p15_p4 = scmp.ge.s32.totalorder %s18_s24, 4  }
 0x2aa   :  { %17 = sbr.rel (!%p15_p4) target bundleno = 1 (0x1), region = 107 }

</bundles_post_ra>
